<compile_context>
chip_gen: v5e
topology: v5e:2x2
jax: 0.10.0
libtpu: 0.0.40
codegen_flags: <defaults>
</compile_context>

<pallas_src>
import functools

import numpy as np
import jax
import jax.numpy as jnp
from jax import lax
from jax.experimental import pallas as pl
from jax.experimental.pallas import tpu as pltpu

OUTPUT_CLASSES = 10
GROWTH_RATE = 32
BN_SIZE = 4
BLOCK_CONFIG = (6, 12, 24, 16)          # densenet121
NUM_INIT_FEATURES = 64
BN_EPS = 1e-5


def _round_up(x, m):
    return (x + m - 1) // m * m


def _pick_tile(dim, cap):
    """Largest tile (multiple of 128, <= cap) that evenly divides round_up(dim, 128)."""
    d = _round_up(dim, 128)
    if d <= cap:
        return d
    t = cap
    while t > 128:
        if d % t == 0:
            return t
        t -= 128
    return 128


# ----------------------------------------------------------------------------
# Tiled matmul kernels (all convolutions go through these via im2col / 1x1 reshape)
# ----------------------------------------------------------------------------
def _matmul_kernel_single_k(a_ref, b_ref, o_ref):
    # One K step: MXU result goes straight to the output tile (no acc / init / copy epilogue).
    o_ref[...] = jnp.dot(a_ref[...], b_ref[...],
                         preferred_element_type=jnp.float32).astype(o_ref.dtype)


def _matmul_kernel(a_ref, b_ref, o_ref, acc_ref):
    @pl.when(pl.program_id(2) == 0)
    def _():
        acc_ref[...] = jnp.zeros_like(acc_ref)

    acc_ref[...] += jnp.dot(a_ref[...], b_ref[...], preferred_element_type=jnp.float32)

    @pl.when(pl.program_id(2) == pl.num_programs(2) - 1)
    def _():
        o_ref[...] = acc_ref[...].astype(o_ref.dtype)


def matmul_pallas(a, b_packed, *, out_dtype=jnp.bfloat16):
    """a: (M, K) float, b_packed: (K128, N) bf16 pre-packed at init.  Returns (M, N) out_dtype."""
    M, K = a.shape
    Kb, N = b_packed.shape
    a = a.astype(jnp.bfloat16)
    if K < Kb:                                    # weight K was zero-padded to a 128 multiple
        a = jnp.pad(a, ((0, 0), (0, Kb - K)))
        K = Kb
    b = b_packed.astype(jnp.bfloat16)

    if M < 128:
        Mp = _round_up(M, 16)                     # sublane floor only; no 128-row padding for tiny M
        TM = Mp
    else:
        TM = _pick_tile(M, 256)                   # TODO(synk): sweep 512-wide tiles on v5e/v6e for big M
        Mp = _round_up(M, TM)
    if N < 128:
        Np, TN = N, N                             # full-extent lane dim (<128) avoids an output slice
    else:
        TN = _pick_tile(N, 256)
        Np = _round_up(N, TN)
    TK = _pick_tile(K, 2048)                      # every densenet conv K fits one MXU step
    Kp = _round_up(K, TK)

    # v7x has 2 TensorCores: ensure at least one "parallel" axis has >= 2 tiles when possible.
    if Mp // TM == 1 and Np // TN == 1:
        if Np >= 256 and (Np // 2) % 128 == 0:
            TN = Np // 2
        elif Mp >= 256 and (Mp // 2) % 128 == 0:
            TM = Mp // 2

    if (Mp, Kp) != (M, K):
        a = jnp.pad(a, ((0, Mp - M), (0, Kp - K)))
    if (Kp, Np) != (K, N):
        b = jnp.pad(b, ((0, Kp - K), (0, Np - N)))

    nk = Kp // TK
    if nk == 1:
        out = pl.pallas_call(
            _matmul_kernel_single_k,
            out_shape=jax.ShapeDtypeStruct((Mp, Np), out_dtype),
            grid=(Mp // TM, Np // TN),
            in_specs=[pl.BlockSpec((TM, TK), lambda i, j: (i, 0)),
                      pl.BlockSpec((TK, TN), lambda i, j: (0, j))],
            out_specs=pl.BlockSpec((TM, TN), lambda i, j: (i, j)),
            compiler_params=pltpu.CompilerParams(
                dimension_semantics=("parallel", "parallel")),
        )(a, b)
    else:
        out = pl.pallas_call(
            _matmul_kernel,
            out_shape=jax.ShapeDtypeStruct((Mp, Np), out_dtype),
            grid=(Mp // TM, Np // TN, nk),
            in_specs=[pl.BlockSpec((TM, TK), lambda i, j, k: (i, k)),
                      pl.BlockSpec((TK, TN), lambda i, j, k: (k, j))],
            out_specs=pl.BlockSpec((TM, TN), lambda i, j, k: (i, j)),
            scratch_shapes=[pltpu.VMEM((TM, TN), jnp.float32)],
            compiler_params=pltpu.CompilerParams(
                dimension_semantics=("parallel", "parallel", "arbitrary")),
        )(a, b)
    if (Mp, Np) != (M, N):
        out = out[:M, :N]
    return out


# ----------------------------------------------------------------------------
# Fused BatchNorm(+ReLU) kernel (training-mode batch statistics, eps=1e-5)
# bf16 in, f32 math, bf16/f32 out; gridded over 256-512 wide channel tiles.
# ----------------------------------------------------------------------------
def _bn_kernel(x_ref, g_ref, b_ref, o_ref, *, apply_relu, rows):
    x = x_ref[...].astype(jnp.float32)
    inv_m = 1.0 / rows
    mean = jnp.sum(x, axis=0, keepdims=True) * inv_m
    xc = x - mean
    var = jnp.sum(xc * xc, axis=0, keepdims=True) * inv_m       # biased var (PyTorch train-mode BN)
    y = xc * lax.rsqrt(var + BN_EPS) * g_ref[...] + b_ref[...]
    if apply_relu:
        y = jnp.maximum(y, 0.0)
    o_ref[...] = y.astype(o_ref.dtype)


def bn_pallas(x2d, gamma, beta, *, apply_relu, out_dtype=jnp.bfloat16):
    M, C = x2d.shape
    Cp = _round_up(C, 128)
    TC = _pick_tile(Cp, 512)
    xp = x2d if Cp == C else jnp.pad(x2d, ((0, 0), (0, Cp - C)))
    gp = jnp.pad(gamma.astype(jnp.float32), (0, Cp - C), constant_values=1.0).reshape(1, Cp)
    bp = jnp.pad(beta.astype(jnp.float32), (0, Cp - C)).reshape(1, Cp)
    out = pl.pallas_call(
        functools.partial(_bn_kernel, apply_relu=apply_relu, rows=M),
        out_shape=jax.ShapeDtypeStruct((M, Cp), out_dtype),
        grid=(Cp // TC,),
        in_specs=[pl.BlockSpec((M, TC), lambda j: (0, j)),
                  pl.BlockSpec((1, TC), lambda j: (0, j)),
                  pl.BlockSpec((1, TC), lambda j: (0, j))],
        out_specs=pl.BlockSpec((M, TC), lambda j: (0, j)),
        compiler_params=pltpu.CompilerParams(dimension_semantics=("parallel",)),
    )(xp, gp, bp)
    if Cp != C:
        out = out[:, :C]
    return out


# ----------------------------------------------------------------------------
# Head kernel: adaptive_avg_pool2d(1,1) + Linear + softmax, fused
# ----------------------------------------------------------------------------
def _head_kernel(f_ref, w_ref, b_ref, o_ref, *, hw):
    f = f_ref[...].astype(jnp.float32)               # (N, HW, C)
    pooled = jnp.sum(f, axis=1) * (1.0 / hw)         # == adaptive_avg_pool2d(1,1) + flatten
    logits = jnp.dot(pooled, w_ref[...], preferred_element_type=jnp.float32) + b_ref[...]
    m = jnp.max(logits, axis=-1, keepdims=True)
    e = jnp.exp(logits - m)
    o_ref[...] = e / jnp.sum(e, axis=-1, keepdims=True)


def head_pallas(feat, fc_w_t, fc_b):
    N, HW, _ = feat.shape
    vmem = pl.BlockSpec(memory_space=pltpu.MemorySpace.VMEM)
    return pl.pallas_call(
        functools.partial(_head_kernel, hw=HW),
        out_shape=jax.ShapeDtypeStruct((N, OUTPUT_CLASSES), jnp.float32),
        in_specs=[vmem, vmem, vmem],
        out_specs=vmem,
    )(feat, fc_w_t, fc_b.reshape(1, OUTPUT_CLASSES))


# ----------------------------------------------------------------------------
# Conv / pooling glue (im2col + reshapes) in plain JAX, all fused under the forward jit
# ----------------------------------------------------------------------------
def _im2col(x, kh, kw, stride, pad):
    # TODO(synk): still materializes kh*kw shifted copies; a tap-indexed K grid would read in place.
    n, h, w, c = x.shape
    if pad:
        x = jnp.pad(x, ((0, 0), (pad, pad), (pad, pad), (0, 0)))
    ho = (h + 2 * pad - kh) // stride + 1
    wo = (w + 2 * pad - kw) // stride + 1
    cols = []
    for i in range(kh):
        for j in range(kw):
            cols.append(x[:, i:i + stride * ho:stride, j:j + stride * wo:stride, :])
    cols = jnp.concatenate(cols, axis=-1)            # (n, ho, wo, kh*kw*c)
    return cols.reshape(n * ho * wo, kh * kw * c), ho, wo


def conv2d(x, w_packed, kh, kw, *, stride=1, pad=0, out_dtype=jnp.bfloat16):
    """x: NHWC; w_packed: (round_up(kh*kw*Cin,128), Cout) bf16 pre-packed at init (no bias)."""
    n = x.shape[0]
    if kh == 1 and kw == 1 and stride == 1 and pad == 0:
        ho, wo = x.shape[1], x.shape[2]
        cols = x.reshape(n * ho * wo, x.shape[3])
    else:
        cols, ho, wo = _im2col(x, kh, kw, stride, pad)
    y = matmul_pallas(cols, w_packed, out_dtype=out_dtype)
    return y.reshape(n, ho, wo, w_packed.shape[1])


def max_pool_3x3_s2_p1(x):
    # TODO(synk): pooling kept as lax.reduce_window glue (negligible next to the conv matmuls).
    return lax.reduce_window(x, jnp.asarray(-jnp.inf, x.dtype), lax.max,
                             window_dimensions=(1, 3, 3, 1),
                             window_strides=(1, 2, 2, 1),
                             padding=((0, 0), (1, 1), (1, 1), (0, 0)))


def avg_pool_2x2(x):
    n, h, w, c = x.shape
    y = x.astype(jnp.float32).reshape(n, h // 2, 2, w // 2, 2, c).mean(axis=(2, 4))
    return y.astype(x.dtype)


# ----------------------------------------------------------------------------
# DenseNet-121 parameters (deterministic init, pre-packed for the kernels)
# ----------------------------------------------------------------------------
def init_params(key):
    # TODO(synk): pretrained=True weights cannot be loaded here; He-style deterministic init instead.
    keys = iter(jax.random.split(key, 512))

    def conv_packed(cout, cin, kh, kw, k_rows):
        fan_in = cin * kh * kw
        w = jax.random.normal(next(keys), (cout, cin, kh, kw), jnp.float32) * np.sqrt(2.0 / fan_in)
        wm = jnp.transpose(w, (2, 3, 1, 0)).reshape(kh * kw * cin, cout)
        if k_rows > wm.shape[0]:
            wm = jnp.pad(wm, ((0, k_rows - wm.shape[0]), (0, 0)))
        return wm.astype(jnp.bfloat16)

    def bn_raw(c):
        return jnp.ones((c,), jnp.float32), jnp.zeros((c,), jnp.float32)

    params = {"conv0": conv_packed(NUM_INIT_FEATURES, 3, 7, 7, _round_up(3 * 7 * 7, 128))}
    g0, b0 = bn_raw(NUM_INIT_FEATURES)
    params["norm0"] = {"gamma": g0, "beta": b0}

    c = NUM_INIT_FEATURES
    blocks = []
    for bi, nlayers in enumerate(BLOCK_CONFIG):
        c_total = c + GROWTH_RATE * nlayers
        layers = []
        for _ in range(nlayers):
            g1, b1 = bn_raw(c)
            g2, b2 = bn_raw(BN_SIZE * GROWTH_RATE)
            # norm1/conv1 act on the block's full-width feature buffer: embed per-layer BN params /
            # weight rows at [:c]; not-yet-written channels get gamma=1, beta=0, w=0 -> contribute 0.
            layers.append({
                "g1": jnp.ones((c_total,), jnp.float32).at[:c].set(g1),
                "b1": jnp.zeros((c_total,), jnp.float32).at[:c].set(b1),
                "w1": conv_packed(BN_SIZE * GROWTH_RATE, c, 1, 1, c_total),
                "g2": g2, "b2": b2,
                "w2": conv_packed(GROWTH_RATE, BN_SIZE * GROWTH_RATE, 3, 3,
                                  9 * BN_SIZE * GROWTH_RATE),
            })
            c += GROWTH_RATE
        block = {"layers": layers}
        if bi != len(BLOCK_CONFIG) - 1:
            tg, tb = bn_raw(c)
            block["tg"], block["tb"] = tg, tb
            block["tconv"] = conv_packed(c // 2, c, 1, 1, c)
            c //= 2
        blocks.append(block)
    params["blocks"] = blocks

    g5, b5 = bn_raw(c)                               # c == 1024 == encoder.norm5.num_features
    params["norm5"] = {"gamma": g5, "beta": b5}
    k1, k2 = jax.random.split(next(keys))
    params["fc_w_t"] = jnp.transpose(
        jax.random.normal(k1, (OUTPUT_CLASSES, c), jnp.float32) / np.sqrt(c))
    params["fc_b"] = jax.random.normal(k2, (OUTPUT_CLASSES,), jnp.float32) * 0.01
    return params


# ----------------------------------------------------------------------------
# Forward pass (single jit: densenet121.features -> avgpool(1,1) -> flatten -> fc -> softmax)
# ----------------------------------------------------------------------------
def _forward_impl(params, x_nchw):
    x = jnp.transpose(x_nchw, (0, 2, 3, 1)).astype(jnp.bfloat16)    # NCHW -> NHWC, bf16 path
    n = x.shape[0]

    # Stem: conv0 7x7/2 -> norm0 -> relu -> maxpool 3x3/2
    x = conv2d(x, params["conv0"], 7, 7, stride=2, pad=3, out_dtype=jnp.bfloat16)
    g0 = params["norm0"]
    x = bn_pallas(x.reshape(-1, x.shape[3]), g0["gamma"], g0["beta"],
                  apply_relu=True, out_dtype=jnp.bfloat16).reshape(x.shape)
    x = max_pool_3x3_s2_p1(x)

    for block in params["blocks"]:
        nlayers = len(block["layers"])
        h, w, c0 = x.shape[1], x.shape[2], x.shape[3]
        c_total = c0 + GROWTH_RATE * nlayers
        M = n * h * w
        # Pre-allocated full-width feature buffer: each layer writes its 32 new channels in place
        # (no O(L^2) concat copies); norm1/conv1 read the whole buffer, dead channels are zero.
        buf = jnp.zeros((n, h, w, c_total), jnp.bfloat16)
        buf = lax.dynamic_update_slice(buf, x, (0, 0, 0, 0))
        c = c0
        for lp in block["layers"]:
            y = bn_pallas(buf.reshape(M, c_total), lp["g1"], lp["b1"],
                          apply_relu=True, out_dtype=jnp.bfloat16)
            y = matmul_pallas(y, lp["w1"], out_dtype=jnp.bfloat16)       # 1x1 bottleneck
            y = bn_pallas(y, lp["g2"], lp["b2"], apply_relu=True, out_dtype=jnp.bfloat16)
            y = conv2d(y.reshape(n, h, w, BN_SIZE * GROWTH_RATE), lp["w2"], 3, 3,
                       stride=1, pad=1, out_dtype=jnp.bfloat16)          # 3x3 growth conv
            buf = lax.dynamic_update_slice(buf, y, (0, 0, 0, c))
            c += GROWTH_RATE
        if "tconv" in block:                                             # transition 1..3
            y = bn_pallas(buf.reshape(M, c_total), block["tg"], block["tb"],
                          apply_relu=True, out_dtype=jnp.bfloat16)
            y = matmul_pallas(y, block["tconv"], out_dtype=jnp.bfloat16)
            x = avg_pool_2x2(y.reshape(n, h, w, c_total // 2))
        else:
            x = buf

    nb, h, w, cf = x.shape
    y = bn_pallas(x.reshape(nb * h * w, cf), params["norm5"]["gamma"], params["norm5"]["beta"],
                  apply_relu=False, out_dtype=jnp.float32)               # features end at norm5 (no relu)
    feat = y.reshape(nb, h * w, cf)
    return head_pallas(feat, params["fc_w_t"], params["fc_b"])


forward = jax.jit(_forward_impl)


if __name__ == "__main__":
    key = jax.random.PRNGKey(0)
    pkey, xkey = jax.random.split(key)
    params = init_params(pkey)
    # batch=2, 3 input channels, 32x32 (smallest spatial size that survives densenet's /32 downsampling)
    x = jax.random.normal(xkey, (2, 3, 32, 32), jnp.float32)
    out = jax.block_until_ready(forward(params, x))
    assert out.shape == (2, OUTPUT_CLASSES)
    assert bool(jnp.all(jnp.isfinite(out)))
    assert bool(jnp.allclose(jnp.sum(out, axis=1), 1.0, atol=1e-4))     # softmax rows sum to 1
    print("KERNEL_OK")
</pallas_src>

<mosaic_0001>
module attributes {stable_mosaic.version = 11 : i64} {
  func.func @_matmul_kernel_single_k(%arg0: i32, %arg1: i32, %arg2: memref<256x256xbf16, #tpu.memory_space<vmem>>, %arg3: memref<256x64xbf16, #tpu.memory_space<vmem>>, %arg4: memref<256x64xbf16, #tpu.memory_space<vmem>>) attributes {dimension_semantics = [#tpu.dimension_semantics<parallel>, #tpu.dimension_semantics<parallel>], iteration_bounds = array<i64: 2, 1>, scalar_prefetch = 0 : i64, scratch_operands = 0 : i64, tpu.core_type = #tpu.core_type<tc>, window_params = [{transform_indices = @transform_0, window_bounds = array<i64: 256, 256>}, {transform_indices = @transform_1, window_bounds = array<i64: 256, 64>}, {transform_indices = @transform_2, window_bounds = array<i64: 256, 64>}]} {
    %c0 = arith.constant 0 : index
    %c0_0 = arith.constant 0 : index
    %0 = vector.load %arg2[%c0, %c0_0] : memref<256x256xbf16, #tpu.memory_space<vmem>>, vector<256x256xbf16>
    %c0_1 = arith.constant 0 : index
    %c0_2 = arith.constant 0 : index
    %1 = vector.load %arg3[%c0_1, %c0_2] : memref<256x64xbf16, #tpu.memory_space<vmem>>, vector<256x64xbf16>
    %cst = arith.constant dense<0.000000e+00> : vector<256x64xf32>
    %2 = tpu.matmul %0, %1, %cst {dimension_numbers = #tpu.dot_dimension_numbers<[1], [0], [0], [1], [0, 0, 1, 1], [], []>} : vector<256x256xbf16>, vector<256x64xbf16>, vector<256x64xf32> -> vector<256x64xf32>
    %3 = arith.truncf %2 : vector<256x64xf32> to vector<256x64xbf16>
    %c0_3 = arith.constant 0 : index
    %c0_4 = arith.constant 0 : index
    %4 = vector.load %arg4[%c0_3, %c0_4] : memref<256x64xbf16, #tpu.memory_space<vmem>>, vector<256x64xbf16>
    tpu.vector_store %arg4[%c0_3, %c0_4], %3 {strides = array<i32>} : memref<256x64xbf16, #tpu.memory_space<vmem>>, vector<256x64xbf16>,
    return
  }
  func.func @transform_0(%arg0: i32, %arg1: i32) -> (i32, i32) {
    %c0_i32 = arith.constant 0 : i32
    %c0_i32_0 = arith.constant 0 : i32
    return %arg0, %c0_i32 : i32, i32
  }
  func.func @transform_1(%arg0: i32, %arg1: i32) -> (i32, i32) {
    %c0_i32 = arith.constant 0 : i32
    %c0_i32_0 = arith.constant 0 : i32
    return %c0_i32, %arg1 : i32, i32
  }
  func.func @transform_2(%arg0: i32, %arg1: i32) -> (i32, i32) {
    %c0_i32 = arith.constant 0 : i32
    return %arg0, %arg1 : i32, i32
  }
}

module attributes {stable_mosaic.version = 11 : i64} {
  func.func @_bn_kernel(%arg0: i32, %arg1: memref<512x128xbf16, #tpu.memory_space<vmem>>, %arg2: memref<1x128xf32, #tpu.memory_space<vmem>>, %arg3: memref<1x128xf32, #tpu.memory_space<vmem>>, %arg4: memref<512x128xbf16, #tpu.memory_space<vmem>>) attributes {dimension_semantics = [#tpu.dimension_semantics<parallel>], iteration_bounds = array<i64: 1>, scalar_prefetch = 0 : i64, scratch_operands = 0 : i64, tpu.core_type = #tpu.core_type<tc>, window_params = [{transform_indices = @transform_0, window_bounds = array<i64: 512, 128>}, {transform_indices = @transform_1, window_bounds = array<i64: 1, 128>}, {transform_indices = @transform_2, window_bounds = array<i64: 1, 128>}, {transform_indices = @transform_3, window_bounds = array<i64: 512, 128>}]} {
    %c0 = arith.constant 0 : index
    %c0_0 = arith.constant 0 : index
    %0 = vector.load %arg1[%c0, %c0_0] : memref<512x128xbf16, #tpu.memory_space<vmem>>, vector<512x128xbf16>
    %1 = arith.extf %0 : vector<512x128xbf16> to vector<512x128xf32>
    %cst = arith.constant dense<0.000000e+00> : vector<128xf32>
    %2 = vector.multi_reduction <add>, %1, %cst [0] : vector<512x128xf32> to vector<128xf32>
    %3 = vector.shape_cast %2 : vector<128xf32> to vector<1x128xf32>
    %cst_1 = arith.constant 0.001953125 : f32
    %4 = vector.broadcast %cst_1 : f32 to vector<1x128xf32>
    %5 = arith.mulf %3, %4 : vector<1x128xf32>
    %6 = vector.broadcast %5 : vector<1x128xf32> to vector<512x128xf32>
    %7 = arith.subf %1, %6 : vector<512x128xf32>
    %8 = arith.mulf %7, %7 : vector<512x128xf32>
    %cst_2 = arith.constant dense<0.000000e+00> : vector<128xf32>
    %9 = vector.multi_reduction <add>, %8, %cst_2 [0] : vector<512x128xf32> to vector<128xf32>
    %10 = vector.shape_cast %9 : vector<128xf32> to vector<1x128xf32>
    %cst_3 = arith.constant 0.001953125 : f32
    %11 = vector.broadcast %cst_3 : f32 to vector<1x128xf32>
    %12 = arith.mulf %10, %11 : vector<1x128xf32>
    %cst_4 = arith.constant 9.99999974E-6 : f32
    %13 = vector.broadcast %cst_4 : f32 to vector<1x128xf32>
    %14 = arith.addf %12, %13 : vector<1x128xf32>
    %15 = math.rsqrt %14 : vector<1x128xf32>
    %16 = vector.broadcast %15 : vector<1x128xf32> to vector<512x128xf32>
    %17 = arith.mulf %7, %16 : vector<512x128xf32>
    %c0_5 = arith.constant 0 : index
    %c0_6 = arith.constant 0 : index
    %18 = vector.load %arg2[%c0_5, %c0_6] : memref<1x128xf32, #tpu.memory_space<vmem>>, vector<1x128xf32>
    %19 = vector.broadcast %18 : vector<1x128xf32> to vector<512x128xf32>
    %20 = arith.mulf %17, %19 : vector<512x128xf32>
    %c0_7 = arith.constant 0 : index
    %c0_8 = arith.constant 0 : index
    %21 = vector.load %arg3[%c0_7, %c0_8] : memref<1x128xf32, #tpu.memory_space<vmem>>, vector<1x128xf32>
    %22 = vector.broadcast %21 : vector<1x128xf32> to vector<512x128xf32>
    %23 = arith.addf %20, %22 : vector<512x128xf32>
    %cst_9 = arith.constant 0.000000e+00 : f32
    %24 = vector.broadcast %cst_9 : f32 to vector<512x128xf32>
    %25 = arith.maximumf %23, %24 : vector<512x128xf32>
    %26 = arith.truncf %25 : vector<512x128xf32> to vector<512x128xbf16>
    %c0_10 = arith.constant 0 : index
    %c0_11 = arith.constant 0 : index
    %27 = vector.load %arg4[%c0_10, %c0_11] : memref<512x128xbf16, #tpu.memory_space<vmem>>, vector<512x128xbf16>
    tpu.vector_store %arg4[%c0_10, %c0_11], %26 {strides = array<i32>} : memref<512x128xbf16, #tpu.memory_space<vmem>>, vector<512x128xbf16>,
    return
  }
  func.func @transform_0(%arg0: i32) -> (i32, i32) {
    %c0_i32 = arith.constant 0 : i32
    %c0_i32_0 = arith.constant 0 : i32
    return %c0_i32, %arg0 : i32, i32
  }
  func.func @transform_1(%arg0: i32) -> (i32, i32) {
    %c0_i32 = arith.constant 0 : i32
    %c0_i32_0 = arith.constant 0 : i32
    return %c0_i32, %arg0 : i32, i32
  }
  func.func @transform_2(%arg0: i32) -> (i32, i32) {
    %c0_i32 = arith.constant 0 : i32
    %c0_i32_0 = arith.constant 0 : i32
    return %c0_i32, %arg0 : i32, i32
  }
  func.func @transform_3(%arg0: i32) -> (i32, i32) {
    %c0_i32 = arith.constant 0 : i32
    %c0_i32_0 = arith.constant 0 : i32
    return %c0_i32, %arg0 : i32, i32
  }
}

module attributes {stable_mosaic.version = 11 : i64} {
  func.func @_bn_kernel(%arg0: i32, %arg1: memref<128x256xbf16, #tpu.memory_space<vmem>>, %arg2: memref<1x256xf32, #tpu.memory_space<vmem>>, %arg3: memref<1x256xf32, #tpu.memory_space<vmem>>, %arg4: memref<128x256xbf16, #tpu.memory_space<vmem>>) attributes {dimension_semantics = [#tpu.dimension_semantics<parallel>], iteration_bounds = array<i64: 1>, scalar_prefetch = 0 : i64, scratch_operands = 0 : i64, tpu.core_type = #tpu.core_type<tc>, window_params = [{transform_indices = @transform_0, window_bounds = array<i64: 128, 256>}, {transform_indices = @transform_1, window_bounds = array<i64: 1, 256>}, {transform_indices = @transform_2, window_bounds = array<i64: 1, 256>}, {transform_indices = @transform_3, window_bounds = array<i64: 128, 256>}]} {
    %c0 = arith.constant 0 : index
    %c0_0 = arith.constant 0 : index
    %0 = vector.load %arg1[%c0, %c0_0] : memref<128x256xbf16, #tpu.memory_space<vmem>>, vector<128x256xbf16>
    %1 = arith.extf %0 : vector<128x256xbf16> to vector<128x256xf32>
    %cst = arith.constant dense<0.000000e+00> : vector<256xf32>
    %2 = vector.multi_reduction <add>, %1, %cst [0] : vector<128x256xf32> to vector<256xf32>
    %3 = vector.shape_cast %2 : vector<256xf32> to vector<1x256xf32>
    %cst_1 = arith.constant 7.812500e-03 : f32
    %4 = vector.broadcast %cst_1 : f32 to vector<1x256xf32>
    %5 = arith.mulf %3, %4 : vector<1x256xf32>
    %6 = vector.broadcast %5 : vector<1x256xf32> to vector<128x256xf32>
    %7 = arith.subf %1, %6 : vector<128x256xf32>
    %8 = arith.mulf %7, %7 : vector<128x256xf32>
    %cst_2 = arith.constant dense<0.000000e+00> : vector<256xf32>
    %9 = vector.multi_reduction <add>, %8, %cst_2 [0] : vector<128x256xf32> to vector<256xf32>
    %10 = vector.shape_cast %9 : vector<256xf32> to vector<1x256xf32>
    %cst_3 = arith.constant 7.812500e-03 : f32
    %11 = vector.broadcast %cst_3 : f32 to vector<1x256xf32>
    %12 = arith.mulf %10, %11 : vector<1x256xf32>
    %cst_4 = arith.constant 9.99999974E-6 : f32
    %13 = vector.broadcast %cst_4 : f32 to vector<1x256xf32>
    %14 = arith.addf %12, %13 : vector<1x256xf32>
    %15 = math.rsqrt %14 : vector<1x256xf32>
    %16 = vector.broadcast %15 : vector<1x256xf32> to vector<128x256xf32>
    %17 = arith.mulf %7, %16 : vector<128x256xf32>
    %c0_5 = arith.constant 0 : index
    %c0_6 = arith.constant 0 : index
    %18 = vector.load %arg2[%c0_5, %c0_6] : memref<1x256xf32, #tpu.memory_space<vmem>>, vector<1x256xf32>
    %19 = vector.broadcast %18 : vector<1x256xf32> to vector<128x256xf32>
    %20 = arith.mulf %17, %19 : vector<128x256xf32>
    %c0_7 = arith.constant 0 : index
    %c0_8 = arith.constant 0 : index
    %21 = vector.load %arg3[%c0_7, %c0_8] : memref<1x256xf32, #tpu.memory_space<vmem>>, vector<1x256xf32>
    %22 = vector.broadcast %21 : vector<1x256xf32> to vector<128x256xf32>
    %23 = arith.addf %20, %22 : vector<128x256xf32>
    %cst_9 = arith.constant 0.000000e+00 : f32
    %24 = vector.broadcast %cst_9 : f32 to vector<128x256xf32>
    %25 = arith.maximumf %23, %24 : vector<128x256xf32>
    %26 = arith.truncf %25 : vector<128x256xf32> to vector<128x256xbf16>
    %c0_10 = arith.constant 0 : index
    %c0_11 = arith.constant 0 : index
    %27 = vector.load %arg4[%c0_10, %c0_11] : memref<128x256xbf16, #tpu.memory_space<vmem>>, vector<128x256xbf16>
    tpu.vector_store %arg4[%c0_10, %c0_11], %26 {strides = array<i32>} : memref<128x256xbf16, #tpu.memory_space<vmem>>, vector<128x256xbf16>,
    return
  }
  func.func @transform_0(%arg0: i32) -> (i32, i32) {
    %c0_i32 = arith.constant 0 : i32
    %c0_i32_0 = arith.constant 0 : i32
    return %c0_i32, %arg0 : i32, i32
  }
  func.func @transform_1(%arg0: i32) -> (i32, i32) {
    %c0_i32 = arith.constant 0 : i32
    %c0_i32_0 = arith.constant 0 : i32
    return %c0_i32, %arg0 : i32, i32
  }
  func.func @transform_2(%arg0: i32) -> (i32, i32) {
    %c0_i32 = arith.constant 0 : i32
    %c0_i32_0 = arith.constant 0 : i32
    return %c0_i32, %arg0 : i32, i32
  }
  func.func @transform_3(%arg0: i32) -> (i32, i32) {
    %c0_i32 = arith.constant 0 : i32
    %c0_i32_0 = arith.constant 0 : i32
    return %c0_i32, %arg0 : i32, i32
  }
}

module attributes {stable_mosaic.version = 11 : i64} {
  func.func @_bn_kernel(%arg0: i32, %arg1: memref<128x128xbf16, #tpu.memory_space<vmem>>, %arg2: memref<1x128xf32, #tpu.memory_space<vmem>>, %arg3: memref<1x128xf32, #tpu.memory_space<vmem>>, %arg4: memref<128x128xbf16, #tpu.memory_space<vmem>>) attributes {dimension_semantics = [#tpu.dimension_semantics<parallel>], iteration_bounds = array<i64: 1>, scalar_prefetch = 0 : i64, scratch_operands = 0 : i64, tpu.core_type = #tpu.core_type<tc>, window_params = [{transform_indices = @transform_0, window_bounds = array<i64: 128, 128>}, {transform_indices = @transform_1, window_bounds = array<i64: 1, 128>}, {transform_indices = @transform_2, window_bounds = array<i64: 1, 128>}, {transform_indices = @transform_3, window_bounds = array<i64: 128, 128>}]} {
    %c0 = arith.constant 0 : index
    %c0_0 = arith.constant 0 : index
    %0 = vector.load %arg1[%c0, %c0_0] : memref<128x128xbf16, #tpu.memory_space<vmem>>, vector<128x128xbf16>
    %1 = arith.extf %0 : vector<128x128xbf16> to vector<128x128xf32>
    %cst = arith.constant dense<0.000000e+00> : vector<128xf32>
    %2 = vector.multi_reduction <add>, %1, %cst [0] : vector<128x128xf32> to vector<128xf32>
    %3 = vector.shape_cast %2 : vector<128xf32> to vector<1x128xf32>
    %cst_1 = arith.constant 7.812500e-03 : f32
    %4 = vector.broadcast %cst_1 : f32 to vector<1x128xf32>
    %5 = arith.mulf %3, %4 : vector<1x128xf32>
    %6 = vector.broadcast %5 : vector<1x128xf32> to vector<128x128xf32>
    %7 = arith.subf %1, %6 : vector<128x128xf32>
    %8 = arith.mulf %7, %7 : vector<128x128xf32>
    %cst_2 = arith.constant dense<0.000000e+00> : vector<128xf32>
    %9 = vector.multi_reduction <add>, %8, %cst_2 [0] : vector<128x128xf32> to vector<128xf32>
    %10 = vector.shape_cast %9 : vector<128xf32> to vector<1x128xf32>
    %cst_3 = arith.constant 7.812500e-03 : f32
    %11 = vector.broadcast %cst_3 : f32 to vector<1x128xf32>
    %12 = arith.mulf %10, %11 : vector<1x128xf32>
    %cst_4 = arith.constant 9.99999974E-6 : f32
    %13 = vector.broadcast %cst_4 : f32 to vector<1x128xf32>
    %14 = arith.addf %12, %13 : vector<1x128xf32>
    %15 = math.rsqrt %14 : vector<1x128xf32>
    %16 = vector.broadcast %15 : vector<1x128xf32> to vector<128x128xf32>
    %17 = arith.mulf %7, %16 : vector<128x128xf32>
    %c0_5 = arith.constant 0 : index
    %c0_6 = arith.constant 0 : index
    %18 = vector.load %arg2[%c0_5, %c0_6] : memref<1x128xf32, #tpu.memory_space<vmem>>, vector<1x128xf32>
    %19 = vector.broadcast %18 : vector<1x128xf32> to vector<128x128xf32>
    %20 = arith.mulf %17, %19 : vector<128x128xf32>
    %c0_7 = arith.constant 0 : index
    %c0_8 = arith.constant 0 : index
    %21 = vector.load %arg3[%c0_7, %c0_8] : memref<1x128xf32, #tpu.memory_space<vmem>>, vector<1x128xf32>
    %22 = vector.broadcast %21 : vector<1x128xf32> to vector<128x128xf32>
    %23 = arith.addf %20, %22 : vector<128x128xf32>
    %cst_9 = arith.constant 0.000000e+00 : f32
    %24 = vector.broadcast %cst_9 : f32 to vector<128x128xf32>
    %25 = arith.maximumf %23, %24 : vector<128x128xf32>
    %26 = arith.truncf %25 : vector<128x128xf32> to vector<128x128xbf16>
    %c0_10 = arith.constant 0 : index
    %c0_11 = arith.constant 0 : index
    %27 = vector.load %arg4[%c0_10, %c0_11] : memref<128x128xbf16, #tpu.memory_space<vmem>>, vector<128x128xbf16>
    tpu.vector_store %arg4[%c0_10, %c0_11], %26 {strides = array<i32>} : memref<128x128xbf16, #tpu.memory_space<vmem>>, vector<128x128xbf16>,
    return
  }
  func.func @transform_0(%arg0: i32) -> (i32, i32) {
    %c0_i32 = arith.constant 0 : i32
    %c0_i32_0 = arith.constant 0 : i32
    return %c0_i32, %arg0 : i32, i32
  }
  func.func @transform_1(%arg0: i32) -> (i32, i32) {
    %c0_i32 = arith.constant 0 : i32
    %c0_i32_0 = arith.constant 0 : i32
    return %c0_i32, %arg0 : i32, i32
  }
  func.func @transform_2(%arg0: i32) -> (i32, i32) {
    %c0_i32 = arith.constant 0 : i32
    %c0_i32_0 = arith.constant 0 : i32
    return %c0_i32, %arg0 : i32, i32
  }
  func.func @transform_3(%arg0: i32) -> (i32, i32) {
    %c0_i32 = arith.constant 0 : i32
    %c0_i32_0 = arith.constant 0 : i32
    return %c0_i32, %arg0 : i32, i32
  }
}

module attributes {stable_mosaic.version = 11 : i64} {
  func.func @_matmul_kernel_single_k(%arg0: i32, %arg1: i32, %arg2: memref<128x256xbf16, #tpu.memory_space<vmem>>, %arg3: memref<256x128xbf16, #tpu.memory_space<vmem>>, %arg4: memref<128x128xbf16, #tpu.memory_space<vmem>>) attributes {dimension_semantics = [#tpu.dimension_semantics<parallel>, #tpu.dimension_semantics<parallel>], iteration_bounds = array<i64: 1, 1>, scalar_prefetch = 0 : i64, scratch_operands = 0 : i64, tpu.core_type = #tpu.core_type<tc>, window_params = [{transform_indices = @transform_0, window_bounds = array<i64: 128, 256>}, {transform_indices = @transform_1, window_bounds = array<i64: 256, 128>}, {transform_indices = @transform_2, window_bounds = array<i64: 128, 128>}]} {
    %c0 = arith.constant 0 : index
    %c0_0 = arith.constant 0 : index
    %0 = vector.load %arg2[%c0, %c0_0] : memref<128x256xbf16, #tpu.memory_space<vmem>>, vector<128x256xbf16>
    %c0_1 = arith.constant 0 : index
    %c0_2 = arith.constant 0 : index
    %1 = vector.load %arg3[%c0_1, %c0_2] : memref<256x128xbf16, #tpu.memory_space<vmem>>, vector<256x128xbf16>
    %cst = arith.constant dense<0.000000e+00> : vector<128x128xf32>
    %2 = tpu.matmul %0, %1, %cst {dimension_numbers = #tpu.dot_dimension_numbers<[1], [0], [0], [1], [0, 0, 1, 1], [], []>} : vector<128x256xbf16>, vector<256x128xbf16>, vector<128x128xf32> -> vector<128x128xf32>
    %3 = arith.truncf %2 : vector<128x128xf32> to vector<128x128xbf16>
    %c0_3 = arith.constant 0 : index
    %c0_4 = arith.constant 0 : index
    %4 = vector.load %arg4[%c0_3, %c0_4] : memref<128x128xbf16, #tpu.memory_space<vmem>>, vector<128x128xbf16>
    tpu.vector_store %arg4[%c0_3, %c0_4], %3 {strides = array<i32>} : memref<128x128xbf16, #tpu.memory_space<vmem>>, vector<128x128xbf16>,
    return
  }
  func.func @transform_0(%arg0: i32, %arg1: i32) -> (i32, i32) {
    %c0_i32 = arith.constant 0 : i32
    %c0_i32_0 = arith.constant 0 : i32
    return %arg0, %c0_i32 : i32, i32
  }
  func.func @transform_1(%arg0: i32, %arg1: i32) -> (i32, i32) {
    %c0_i32 = arith.constant 0 : i32
    %c0_i32_0 = arith.constant 0 : i32
    return %c0_i32, %arg1 : i32, i32
  }
  func.func @transform_2(%arg0: i32, %arg1: i32) -> (i32, i32) {
    %c0_i32 = arith.constant 0 : i32
    return %arg0, %arg1 : i32, i32
  }
}

module attributes {stable_mosaic.version = 11 : i64} {
  func.func @_matmul_kernel_single_k(%arg0: i32, %arg1: i32, %arg2: memref<128x1152xbf16, #tpu.memory_space<vmem>>, %arg3: memref<1152x32xbf16, #tpu.memory_space<vmem>>, %arg4: memref<128x32xbf16, #tpu.memory_space<vmem>>) attributes {dimension_semantics = [#tpu.dimension_semantics<parallel>, #tpu.dimension_semantics<parallel>], iteration_bounds = array<i64: 1, 1>, scalar_prefetch = 0 : i64, scratch_operands = 0 : i64, tpu.core_type = #tpu.core_type<tc>, window_params = [{transform_indices = @transform_0, window_bounds = array<i64: 128, 1152>}, {transform_indices = @transform_1, window_bounds = array<i64: 1152, 32>}, {transform_indices = @transform_2, window_bounds = array<i64: 128, 32>}]} {
    %c0 = arith.constant 0 : index
    %c0_0 = arith.constant 0 : index
    %0 = vector.load %arg2[%c0, %c0_0] : memref<128x1152xbf16, #tpu.memory_space<vmem>>, vector<128x1152xbf16>
    %c0_1 = arith.constant 0 : index
    %c0_2 = arith.constant 0 : index
    %1 = vector.load %arg3[%c0_1, %c0_2] : memref<1152x32xbf16, #tpu.memory_space<vmem>>, vector<1152x32xbf16>
    %cst = arith.constant dense<0.000000e+00> : vector<128x32xf32>
    %2 = tpu.matmul %0, %1, %cst {dimension_numbers = #tpu.dot_dimension_numbers<[1], [0], [0], [1], [0, 0, 1, 1], [], []>} : vector<128x1152xbf16>, vector<1152x32xbf16>, vector<128x32xf32> -> vector<128x32xf32>
    %3 = arith.truncf %2 : vector<128x32xf32> to vector<128x32xbf16>
    %c0_3 = arith.constant 0 : index
    %c0_4 = arith.constant 0 : index
    %4 = vector.load %arg4[%c0_3, %c0_4] : memref<128x32xbf16, #tpu.memory_space<vmem>>, vector<128x32xbf16>
    tpu.vector_store %arg4[%c0_3, %c0_4], %3 {strides = array<i32>} : memref<128x32xbf16, #tpu.memory_space<vmem>>, vector<128x32xbf16>,
    return
  }
  func.func @transform_0(%arg0: i32, %arg1: i32) -> (i32, i32) {
    %c0_i32 = arith.constant 0 : i32
    %c0_i32_0 = arith.constant 0 : i32
    return %arg0, %c0_i32 : i32, i32
  }
  func.func @transform_1(%arg0: i32, %arg1: i32) -> (i32, i32) {
    %c0_i32 = arith.constant 0 : i32
    %c0_i32_0 = arith.constant 0 : i32
    return %c0_i32, %arg1 : i32, i32
  }
  func.func @transform_2(%arg0: i32, %arg1: i32) -> (i32, i32) {
    %c0_i32 = arith.constant 0 : i32
    return %arg0, %arg1 : i32, i32
  }
}

module attributes {stable_mosaic.version = 11 : i64} {
  func.func @_bn_kernel(%arg0: i32, %arg1: memref<32x512xbf16, #tpu.memory_space<vmem>>, %arg2: memref<1x512xf32, #tpu.memory_space<vmem>>, %arg3: memref<1x512xf32, #tpu.memory_space<vmem>>, %arg4: memref<32x512xbf16, #tpu.memory_space<vmem>>) attributes {dimension_semantics = [#tpu.dimension_semantics<parallel>], iteration_bounds = array<i64: 1>, scalar_prefetch = 0 : i64, scratch_operands = 0 : i64, tpu.core_type = #tpu.core_type<tc>, window_params = [{transform_indices = @transform_0, window_bounds = array<i64: 32, 512>}, {transform_indices = @transform_1, window_bounds = array<i64: 1, 512>}, {transform_indices = @transform_2, window_bounds = array<i64: 1, 512>}, {transform_indices = @transform_3, window_bounds = array<i64: 32, 512>}]} {
    %c0 = arith.constant 0 : index
    %c0_0 = arith.constant 0 : index
    %0 = vector.load %arg1[%c0, %c0_0] : memref<32x512xbf16, #tpu.memory_space<vmem>>, vector<32x512xbf16>
    %1 = arith.extf %0 : vector<32x512xbf16> to vector<32x512xf32>
    %cst = arith.constant dense<0.000000e+00> : vector<512xf32>
    %2 = vector.multi_reduction <add>, %1, %cst [0] : vector<32x512xf32> to vector<512xf32>
    %3 = vector.shape_cast %2 : vector<512xf32> to vector<1x512xf32>
    %cst_1 = arith.constant 3.125000e-02 : f32
    %4 = vector.broadcast %cst_1 : f32 to vector<1x512xf32>
    %5 = arith.mulf %3, %4 : vector<1x512xf32>
    %6 = vector.broadcast %5 : vector<1x512xf32> to vector<32x512xf32>
    %7 = arith.subf %1, %6 : vector<32x512xf32>
    %8 = arith.mulf %7, %7 : vector<32x512xf32>
    %cst_2 = arith.constant dense<0.000000e+00> : vector<512xf32>
    %9 = vector.multi_reduction <add>, %8, %cst_2 [0] : vector<32x512xf32> to vector<512xf32>
    %10 = vector.shape_cast %9 : vector<512xf32> to vector<1x512xf32>
    %cst_3 = arith.constant 3.125000e-02 : f32
    %11 = vector.broadcast %cst_3 : f32 to vector<1x512xf32>
    %12 = arith.mulf %10, %11 : vector<1x512xf32>
    %cst_4 = arith.constant 9.99999974E-6 : f32
    %13 = vector.broadcast %cst_4 : f32 to vector<1x512xf32>
    %14 = arith.addf %12, %13 : vector<1x512xf32>
    %15 = math.rsqrt %14 : vector<1x512xf32>
    %16 = vector.broadcast %15 : vector<1x512xf32> to vector<32x512xf32>
    %17 = arith.mulf %7, %16 : vector<32x512xf32>
    %c0_5 = arith.constant 0 : index
    %c0_6 = arith.constant 0 : index
    %18 = vector.load %arg2[%c0_5, %c0_6] : memref<1x512xf32, #tpu.memory_space<vmem>>, vector<1x512xf32>
    %19 = vector.broadcast %18 : vector<1x512xf32> to vector<32x512xf32>
    %20 = arith.mulf %17, %19 : vector<32x512xf32>
    %c0_7 = arith.constant 0 : index
    %c0_8 = arith.constant 0 : index
    %21 = vector.load %arg3[%c0_7, %c0_8] : memref<1x512xf32, #tpu.memory_space<vmem>>, vector<1x512xf32>
    %22 = vector.broadcast %21 : vector<1x512xf32> to vector<32x512xf32>
    %23 = arith.addf %20, %22 : vector<32x512xf32>
    %cst_9 = arith.constant 0.000000e+00 : f32
    %24 = vector.broadcast %cst_9 : f32 to vector<32x512xf32>
    %25 = arith.maximumf %23, %24 : vector<32x512xf32>
    %26 = arith.truncf %25 : vector<32x512xf32> to vector<32x512xbf16>
    %c0_10 = arith.constant 0 : index
    %c0_11 = arith.constant 0 : index
    %27 = vector.load %arg4[%c0_10, %c0_11] : memref<32x512xbf16, #tpu.memory_space<vmem>>, vector<32x512xbf16>
    tpu.vector_store %arg4[%c0_10, %c0_11], %26 {strides = array<i32>} : memref<32x512xbf16, #tpu.memory_space<vmem>>, vector<32x512xbf16>,
    return
  }
  func.func @transform_0(%arg0: i32) -> (i32, i32) {
    %c0_i32 = arith.constant 0 : i32
    %c0_i32_0 = arith.constant 0 : i32
    return %c0_i32, %arg0 : i32, i32
  }
  func.func @transform_1(%arg0: i32) -> (i32, i32) {
    %c0_i32 = arith.constant 0 : i32
    %c0_i32_0 = arith.constant 0 : i32
    return %c0_i32, %arg0 : i32, i32
  }
  func.func @transform_2(%arg0: i32) -> (i32, i32) {
    %c0_i32 = arith.constant 0 : i32
    %c0_i32_0 = arith.constant 0 : i32
    return %c0_i32, %arg0 : i32, i32
  }
  func.func @transform_3(%arg0: i32) -> (i32, i32) {
    %c0_i32 = arith.constant 0 : i32
    %c0_i32_0 = arith.constant 0 : i32
    return %c0_i32, %arg0 : i32, i32
  }
}

module attributes {stable_mosaic.version = 11 : i64} {
  func.func @_matmul_kernel_single_k(%arg0: i32, %arg1: i32, %arg2: memref<32x512xbf16, #tpu.memory_space<vmem>>, %arg3: memref<512x128xbf16, #tpu.memory_space<vmem>>, %arg4: memref<32x128xbf16, #tpu.memory_space<vmem>>) attributes {dimension_semantics = [#tpu.dimension_semantics<parallel>, #tpu.dimension_semantics<parallel>], iteration_bounds = array<i64: 1, 1>, scalar_prefetch = 0 : i64, scratch_operands = 0 : i64, tpu.core_type = #tpu.core_type<tc>, window_params = [{transform_indices = @transform_0, window_bounds = array<i64: 32, 512>}, {transform_indices = @transform_1, window_bounds = array<i64: 512, 128>}, {transform_indices = @transform_2, window_bounds = array<i64: 32, 128>}]} {
    %c0 = arith.constant 0 : index
    %c0_0 = arith.constant 0 : index
    %0 = vector.load %arg2[%c0, %c0_0] : memref<32x512xbf16, #tpu.memory_space<vmem>>, vector<32x512xbf16>
    %c0_1 = arith.constant 0 : index
    %c0_2 = arith.constant 0 : index
    %1 = vector.load %arg3[%c0_1, %c0_2] : memref<512x128xbf16, #tpu.memory_space<vmem>>, vector<512x128xbf16>
    %cst = arith.constant dense<0.000000e+00> : vector<32x128xf32>
    %2 = tpu.matmul %0, %1, %cst {dimension_numbers = #tpu.dot_dimension_numbers<[1], [0], [0], [1], [0, 0, 1, 1], [], []>} : vector<32x512xbf16>, vector<512x128xbf16>, vector<32x128xf32> -> vector<32x128xf32>
    %3 = arith.truncf %2 : vector<32x128xf32> to vector<32x128xbf16>
    %c0_3 = arith.constant 0 : index
    %c0_4 = arith.constant 0 : index
    %4 = vector.load %arg4[%c0_3, %c0_4] : memref<32x128xbf16, #tpu.memory_space<vmem>>, vector<32x128xbf16>
    tpu.vector_store %arg4[%c0_3, %c0_4], %3 {strides = array<i32>} : memref<32x128xbf16, #tpu.memory_space<vmem>>, vector<32x128xbf16>,
    return
  }
  func.func @transform_0(%arg0: i32, %arg1: i32) -> (i32, i32) {
    %c0_i32 = arith.constant 0 : i32
    %c0_i32_0 = arith.constant 0 : i32
    return %arg0, %c0_i32 : i32, i32
  }
  func.func @transform_1(%arg0: i32, %arg1: i32) -> (i32, i32) {
    %c0_i32 = arith.constant 0 : i32
    %c0_i32_0 = arith.constant 0 : i32
    return %c0_i32, %arg1 : i32, i32
  }
  func.func @transform_2(%arg0: i32, %arg1: i32) -> (i32, i32) {
    %c0_i32 = arith.constant 0 : i32
    return %arg0, %arg1 : i32, i32
  }
}

module attributes {stable_mosaic.version = 11 : i64} {
  func.func @_bn_kernel(%arg0: i32, %arg1: memref<32x128xbf16, #tpu.memory_space<vmem>>, %arg2: memref<1x128xf32, #tpu.memory_space<vmem>>, %arg3: memref<1x128xf32, #tpu.memory_space<vmem>>, %arg4: memref<32x128xbf16, #tpu.memory_space<vmem>>) attributes {dimension_semantics = [#tpu.dimension_semantics<parallel>], iteration_bounds = array<i64: 1>, scalar_prefetch = 0 : i64, scratch_operands = 0 : i64, tpu.core_type = #tpu.core_type<tc>, window_params = [{transform_indices = @transform_0, window_bounds = array<i64: 32, 128>}, {transform_indices = @transform_1, window_bounds = array<i64: 1, 128>}, {transform_indices = @transform_2, window_bounds = array<i64: 1, 128>}, {transform_indices = @transform_3, window_bounds = array<i64: 32, 128>}]} {
    %c0 = arith.constant 0 : index
    %c0_0 = arith.constant 0 : index
    %0 = vector.load %arg1[%c0, %c0_0] : memref<32x128xbf16, #tpu.memory_space<vmem>>, vector<32x128xbf16>
    %1 = arith.extf %0 : vector<32x128xbf16> to vector<32x128xf32>
    %cst = arith.constant dense<0.000000e+00> : vector<128xf32>
    %2 = vector.multi_reduction <add>, %1, %cst [0] : vector<32x128xf32> to vector<128xf32>
    %3 = vector.shape_cast %2 : vector<128xf32> to vector<1x128xf32>
    %cst_1 = arith.constant 3.125000e-02 : f32
    %4 = vector.broadcast %cst_1 : f32 to vector<1x128xf32>
    %5 = arith.mulf %3, %4 : vector<1x128xf32>
    %6 = vector.broadcast %5 : vector<1x128xf32> to vector<32x128xf32>
    %7 = arith.subf %1, %6 : vector<32x128xf32>
    %8 = arith.mulf %7, %7 : vector<32x128xf32>
    %cst_2 = arith.constant dense<0.000000e+00> : vector<128xf32>
    %9 = vector.multi_reduction <add>, %8, %cst_2 [0] : vector<32x128xf32> to vector<128xf32>
    %10 = vector.shape_cast %9 : vector<128xf32> to vector<1x128xf32>
    %cst_3 = arith.constant 3.125000e-02 : f32
    %11 = vector.broadcast %cst_3 : f32 to vector<1x128xf32>
    %12 = arith.mulf %10, %11 : vector<1x128xf32>
    %cst_4 = arith.constant 9.99999974E-6 : f32
    %13 = vector.broadcast %cst_4 : f32 to vector<1x128xf32>
    %14 = arith.addf %12, %13 : vector<1x128xf32>
    %15 = math.rsqrt %14 : vector<1x128xf32>
    %16 = vector.broadcast %15 : vector<1x128xf32> to vector<32x128xf32>
    %17 = arith.mulf %7, %16 : vector<32x128xf32>
    %c0_5 = arith.constant 0 : index
    %c0_6 = arith.constant 0 : index
    %18 = vector.load %arg2[%c0_5, %c0_6] : memref<1x128xf32, #tpu.memory_space<vmem>>, vector<1x128xf32>
    %19 = vector.broadcast %18 : vector<1x128xf32> to vector<32x128xf32>
    %20 = arith.mulf %17, %19 : vector<32x128xf32>
    %c0_7 = arith.constant 0 : index
    %c0_8 = arith.constant 0 : index
    %21 = vector.load %arg3[%c0_7, %c0_8] : memref<1x128xf32, #tpu.memory_space<vmem>>, vector<1x128xf32>
    %22 = vector.broadcast %21 : vector<1x128xf32> to vector<32x128xf32>
    %23 = arith.addf %20, %22 : vector<32x128xf32>
    %cst_9 = arith.constant 0.000000e+00 : f32
    %24 = vector.broadcast %cst_9 : f32 to vector<32x128xf32>
    %25 = arith.maximumf %23, %24 : vector<32x128xf32>
    %26 = arith.truncf %25 : vector<32x128xf32> to vector<32x128xbf16>
    %c0_10 = arith.constant 0 : index
    %c0_11 = arith.constant 0 : index
    %27 = vector.load %arg4[%c0_10, %c0_11] : memref<32x128xbf16, #tpu.memory_space<vmem>>, vector<32x128xbf16>
    tpu.vector_store %arg4[%c0_10, %c0_11], %26 {strides = array<i32>} : memref<32x128xbf16, #tpu.memory_space<vmem>>, vector<32x128xbf16>,
    return
  }
  func.func @transform_0(%arg0: i32) -> (i32, i32) {
    %c0_i32 = arith.constant 0 : i32
    %c0_i32_0 = arith.constant 0 : i32
    return %c0_i32, %arg0 : i32, i32
  }
  func.func @transform_1(%arg0: i32) -> (i32, i32) {
    %c0_i32 = arith.constant 0 : i32
    %c0_i32_0 = arith.constant 0 : i32
    return %c0_i32, %arg0 : i32, i32
  }
  func.func @transform_2(%arg0: i32) -> (i32, i32) {
    %c0_i32 = arith.constant 0 : i32
    %c0_i32_0 = arith.constant 0 : i32
    return %c0_i32, %arg0 : i32, i32
  }
  func.func @transform_3(%arg0: i32) -> (i32, i32) {
    %c0_i32 = arith.constant 0 : i32
    %c0_i32_0 = arith.constant 0 : i32
    return %c0_i32, %arg0 : i32, i32
  }
}

module attributes {stable_mosaic.version = 11 : i64} {
  func.func @_matmul_kernel_single_k(%arg0: i32, %arg1: i32, %arg2: memref<32x1152xbf16, #tpu.memory_space<vmem>>, %arg3: memref<1152x32xbf16, #tpu.memory_space<vmem>>, %arg4: memref<32x32xbf16, #tpu.memory_space<vmem>>) attributes {dimension_semantics = [#tpu.dimension_semantics<parallel>, #tpu.dimension_semantics<parallel>], iteration_bounds = array<i64: 1, 1>, scalar_prefetch = 0 : i64, scratch_operands = 0 : i64, tpu.core_type = #tpu.core_type<tc>, window_params = [{transform_indices = @transform_0, window_bounds = array<i64: 32, 1152>}, {transform_indices = @transform_1, window_bounds = array<i64: 1152, 32>}, {transform_indices = @transform_2, window_bounds = array<i64: 32, 32>}]} {
    %c0 = arith.constant 0 : index
    %c0_0 = arith.constant 0 : index
    %0 = vector.load %arg2[%c0, %c0_0] : memref<32x1152xbf16, #tpu.memory_space<vmem>>, vector<32x1152xbf16>
    %c0_1 = arith.constant 0 : index
    %c0_2 = arith.constant 0 : index
    %1 = vector.load %arg3[%c0_1, %c0_2] : memref<1152x32xbf16, #tpu.memory_space<vmem>>, vector<1152x32xbf16>
    %cst = arith.constant dense<0.000000e+00> : vector<32x32xf32>
    %2 = tpu.matmul %0, %1, %cst {dimension_numbers = #tpu.dot_dimension_numbers<[1], [0], [0], [1], [0, 0, 1, 1], [], []>} : vector<32x1152xbf16>, vector<1152x32xbf16>, vector<32x32xf32> -> vector<32x32xf32>
    %3 = arith.truncf %2 : vector<32x32xf32> to vector<32x32xbf16>
    %c0_3 = arith.constant 0 : index
    %c0_4 = arith.constant 0 : index
    %4 = vector.load %arg4[%c0_3, %c0_4] : memref<32x32xbf16, #tpu.memory_space<vmem>>, vector<32x32xbf16>
    tpu.vector_store %arg4[%c0_3, %c0_4], %3 {strides = array<i32>} : memref<32x32xbf16, #tpu.memory_space<vmem>>, vector<32x32xbf16>,
    return
  }
  func.func @transform_0(%arg0: i32, %arg1: i32) -> (i32, i32) {
    %c0_i32 = arith.constant 0 : i32
    %c0_i32_0 = arith.constant 0 : i32
    return %arg0, %c0_i32 : i32, i32
  }
  func.func @transform_1(%arg0: i32, %arg1: i32) -> (i32, i32) {
    %c0_i32 = arith.constant 0 : i32
    %c0_i32_0 = arith.constant 0 : i32
    return %c0_i32, %arg1 : i32, i32
  }
  func.func @transform_2(%arg0: i32, %arg1: i32) -> (i32, i32) {
    %c0_i32 = arith.constant 0 : i32
    return %arg0, %arg1 : i32, i32
  }
}

module attributes {stable_mosaic.version = 11 : i64} {
  func.func @_matmul_kernel_single_k(%arg0: i32, %arg1: i32, %arg2: memref<32x512xbf16, #tpu.memory_space<vmem>>, %arg3: memref<512x128xbf16, #tpu.memory_space<vmem>>, %arg4: memref<32x128xbf16, #tpu.memory_space<vmem>>) attributes {dimension_semantics = [#tpu.dimension_semantics<parallel>, #tpu.dimension_semantics<parallel>], iteration_bounds = array<i64: 1, 2>, scalar_prefetch = 0 : i64, scratch_operands = 0 : i64, tpu.core_type = #tpu.core_type<tc>, window_params = [{transform_indices = @transform_0, window_bounds = array<i64: 32, 512>}, {transform_indices = @transform_1, window_bounds = array<i64: 512, 128>}, {transform_indices = @transform_2, window_bounds = array<i64: 32, 128>}]} {
    %c0 = arith.constant 0 : index
    %c0_0 = arith.constant 0 : index
    %0 = vector.load %arg2[%c0, %c0_0] : memref<32x512xbf16, #tpu.memory_space<vmem>>, vector<32x512xbf16>
    %c0_1 = arith.constant 0 : index
    %c0_2 = arith.constant 0 : index
    %1 = vector.load %arg3[%c0_1, %c0_2] : memref<512x128xbf16, #tpu.memory_space<vmem>>, vector<512x128xbf16>
    %cst = arith.constant dense<0.000000e+00> : vector<32x128xf32>
    %2 = tpu.matmul %0, %1, %cst {dimension_numbers = #tpu.dot_dimension_numbers<[1], [0], [0], [1], [0, 0, 1, 1], [], []>} : vector<32x512xbf16>, vector<512x128xbf16>, vector<32x128xf32> -> vector<32x128xf32>
    %3 = arith.truncf %2 : vector<32x128xf32> to vector<32x128xbf16>
    %c0_3 = arith.constant 0 : index
    %c0_4 = arith.constant 0 : index
    %4 = vector.load %arg4[%c0_3, %c0_4] : memref<32x128xbf16, #tpu.memory_space<vmem>>, vector<32x128xbf16>
    tpu.vector_store %arg4[%c0_3, %c0_4], %3 {strides = array<i32>} : memref<32x128xbf16, #tpu.memory_space<vmem>>, vector<32x128xbf16>,
    return
  }
  func.func @transform_0(%arg0: i32, %arg1: i32) -> (i32, i32) {
    %c0_i32 = arith.constant 0 : i32
    %c0_i32_0 = arith.constant 0 : i32
    return %arg0, %c0_i32 : i32, i32
  }
  func.func @transform_1(%arg0: i32, %arg1: i32) -> (i32, i32) {
    %c0_i32 = arith.constant 0 : i32
    %c0_i32_0 = arith.constant 0 : i32
    return %c0_i32, %arg1 : i32, i32
  }
  func.func @transform_2(%arg0: i32, %arg1: i32) -> (i32, i32) {
    %c0_i32 = arith.constant 0 : i32
    return %arg0, %arg1 : i32, i32
  }
}

module attributes {stable_mosaic.version = 11 : i64} {
  func.func @_bn_kernel(%arg0: i32, %arg1: memref<8x512xbf16, #tpu.memory_space<vmem>>, %arg2: memref<1x512xf32, #tpu.memory_space<vmem>>, %arg3: memref<1x512xf32, #tpu.memory_space<vmem>>, %arg4: memref<8x512xbf16, #tpu.memory_space<vmem>>) attributes {dimension_semantics = [#tpu.dimension_semantics<parallel>], iteration_bounds = array<i64: 2>, scalar_prefetch = 0 : i64, scratch_operands = 0 : i64, tpu.core_type = #tpu.core_type<tc>, window_params = [{transform_indices = @transform_0, window_bounds = array<i64: 8, 512>}, {transform_indices = @transform_1, window_bounds = array<i64: 1, 512>}, {transform_indices = @transform_2, window_bounds = array<i64: 1, 512>}, {transform_indices = @transform_3, window_bounds = array<i64: 8, 512>}]} {
    %c0 = arith.constant 0 : index
    %c0_0 = arith.constant 0 : index
    %0 = vector.load %arg1[%c0, %c0_0] : memref<8x512xbf16, #tpu.memory_space<vmem>>, vector<8x512xbf16>
    %1 = arith.extf %0 : vector<8x512xbf16> to vector<8x512xf32>
    %cst = arith.constant dense<0.000000e+00> : vector<512xf32>
    %2 = vector.multi_reduction <add>, %1, %cst [0] : vector<8x512xf32> to vector<512xf32>
    %3 = vector.shape_cast %2 : vector<512xf32> to vector<1x512xf32>
    %cst_1 = arith.constant 1.250000e-01 : f32
    %4 = vector.broadcast %cst_1 : f32 to vector<1x512xf32>
    %5 = arith.mulf %3, %4 : vector<1x512xf32>
    %6 = vector.broadcast %5 : vector<1x512xf32> to vector<8x512xf32>
    %7 = arith.subf %1, %6 : vector<8x512xf32>
    %8 = arith.mulf %7, %7 : vector<8x512xf32>
    %cst_2 = arith.constant dense<0.000000e+00> : vector<512xf32>
    %9 = vector.multi_reduction <add>, %8, %cst_2 [0] : vector<8x512xf32> to vector<512xf32>
    %10 = vector.shape_cast %9 : vector<512xf32> to vector<1x512xf32>
    %cst_3 = arith.constant 1.250000e-01 : f32
    %11 = vector.broadcast %cst_3 : f32 to vector<1x512xf32>
    %12 = arith.mulf %10, %11 : vector<1x512xf32>
    %cst_4 = arith.constant 9.99999974E-6 : f32
    %13 = vector.broadcast %cst_4 : f32 to vector<1x512xf32>
    %14 = arith.addf %12, %13 : vector<1x512xf32>
    %15 = math.rsqrt %14 : vector<1x512xf32>
    %16 = vector.broadcast %15 : vector<1x512xf32> to vector<8x512xf32>
    %17 = arith.mulf %7, %16 : vector<8x512xf32>
    %c0_5 = arith.constant 0 : index
    %c0_6 = arith.constant 0 : index
    %18 = vector.load %arg2[%c0_5, %c0_6] : memref<1x512xf32, #tpu.memory_space<vmem>>, vector<1x512xf32>
    %19 = vector.broadcast %18 : vector<1x512xf32> to vector<8x512xf32>
    %20 = arith.mulf %17, %19 : vector<8x512xf32>
    %c0_7 = arith.constant 0 : index
    %c0_8 = arith.constant 0 : index
    %21 = vector.load %arg3[%c0_7, %c0_8] : memref<1x512xf32, #tpu.memory_space<vmem>>, vector<1x512xf32>
    %22 = vector.broadcast %21 : vector<1x512xf32> to vector<8x512xf32>
    %23 = arith.addf %20, %22 : vector<8x512xf32>
    %cst_9 = arith.constant 0.000000e+00 : f32
    %24 = vector.broadcast %cst_9 : f32 to vector<8x512xf32>
    %25 = arith.maximumf %23, %24 : vector<8x512xf32>
    %26 = arith.truncf %25 : vector<8x512xf32> to vector<8x512xbf16>
    %c0_10 = arith.constant 0 : index
    %c0_11 = arith.constant 0 : index
    %27 = vector.load %arg4[%c0_10, %c0_11] : memref<8x512xbf16, #tpu.memory_space<vmem>>, vector<8x512xbf16>
    tpu.vector_store %arg4[%c0_10, %c0_11], %26 {strides = array<i32>} : memref<8x512xbf16, #tpu.memory_space<vmem>>, vector<8x512xbf16>,
    return
  }
  func.func @transform_0(%arg0: i32) -> (i32, i32) {
    %c0_i32 = arith.constant 0 : i32
    %c0_i32_0 = arith.constant 0 : i32
    return %c0_i32, %arg0 : i32, i32
  }
  func.func @transform_1(%arg0: i32) -> (i32, i32) {
    %c0_i32 = arith.constant 0 : i32
    %c0_i32_0 = arith.constant 0 : i32
    return %c0_i32, %arg0 : i32, i32
  }
  func.func @transform_2(%arg0: i32) -> (i32, i32) {
    %c0_i32 = arith.constant 0 : i32
    %c0_i32_0 = arith.constant 0 : i32
    return %c0_i32, %arg0 : i32, i32
  }
  func.func @transform_3(%arg0: i32) -> (i32, i32) {
    %c0_i32 = arith.constant 0 : i32
    %c0_i32_0 = arith.constant 0 : i32
    return %c0_i32, %arg0 : i32, i32
  }
}

module attributes {stable_mosaic.version = 11 : i64} {
  func.func @_matmul_kernel_single_k(%arg0: i32, %arg1: i32, %arg2: memref<16x1024xbf16, #tpu.memory_space<vmem>>, %arg3: memref<1024x128xbf16, #tpu.memory_space<vmem>>, %arg4: memref<16x128xbf16, #tpu.memory_space<vmem>>) attributes {dimension_semantics = [#tpu.dimension_semantics<parallel>, #tpu.dimension_semantics<parallel>], iteration_bounds = array<i64: 1, 1>, scalar_prefetch = 0 : i64, scratch_operands = 0 : i64, tpu.core_type = #tpu.core_type<tc>, window_params = [{transform_indices = @transform_0, window_bounds = array<i64: 16, 1024>}, {transform_indices = @transform_1, window_bounds = array<i64: 1024, 128>}, {transform_indices = @transform_2, window_bounds = array<i64: 16, 128>}]} {
    %c0 = arith.constant 0 : index
    %c0_0 = arith.constant 0 : index
    %0 = vector.load %arg2[%c0, %c0_0] : memref<16x1024xbf16, #tpu.memory_space<vmem>>, vector<16x1024xbf16>
    %c0_1 = arith.constant 0 : index
    %c0_2 = arith.constant 0 : index
    %1 = vector.load %arg3[%c0_1, %c0_2] : memref<1024x128xbf16, #tpu.memory_space<vmem>>, vector<1024x128xbf16>
    %cst = arith.constant dense<0.000000e+00> : vector<16x128xf32>
    %2 = tpu.matmul %0, %1, %cst {dimension_numbers = #tpu.dot_dimension_numbers<[1], [0], [0], [1], [0, 0, 1, 1], [], []>} : vector<16x1024xbf16>, vector<1024x128xbf16>, vector<16x128xf32> -> vector<16x128xf32>
    %3 = arith.truncf %2 : vector<16x128xf32> to vector<16x128xbf16>
    %c0_3 = arith.constant 0 : index
    %c0_4 = arith.constant 0 : index
    %4 = vector.load %arg4[%c0_3, %c0_4] : memref<16x128xbf16, #tpu.memory_space<vmem>>, vector<16x128xbf16>
    tpu.vector_store %arg4[%c0_3, %c0_4], %3 {strides = array<i32>} : memref<16x128xbf16, #tpu.memory_space<vmem>>, vector<16x128xbf16>,
    return
  }
  func.func @transform_0(%arg0: i32, %arg1: i32) -> (i32, i32) {
    %c0_i32 = arith.constant 0 : i32
    %c0_i32_0 = arith.constant 0 : i32
    return %arg0, %c0_i32 : i32, i32
  }
  func.func @transform_1(%arg0: i32, %arg1: i32) -> (i32, i32) {
    %c0_i32 = arith.constant 0 : i32
    %c0_i32_0 = arith.constant 0 : i32
    return %c0_i32, %arg1 : i32, i32
  }
  func.func @transform_2(%arg0: i32, %arg1: i32) -> (i32, i32) {
    %c0_i32 = arith.constant 0 : i32
    return %arg0, %arg1 : i32, i32
  }
}

module attributes {stable_mosaic.version = 11 : i64} {
  func.func @_bn_kernel(%arg0: i32, %arg1: memref<8x128xbf16, #tpu.memory_space<vmem>>, %arg2: memref<1x128xf32, #tpu.memory_space<vmem>>, %arg3: memref<1x128xf32, #tpu.memory_space<vmem>>, %arg4: memref<8x128xbf16, #tpu.memory_space<vmem>>) attributes {dimension_semantics = [#tpu.dimension_semantics<parallel>], iteration_bounds = array<i64: 1>, scalar_prefetch = 0 : i64, scratch_operands = 0 : i64, tpu.core_type = #tpu.core_type<tc>, window_params = [{transform_indices = @transform_0, window_bounds = array<i64: 8, 128>}, {transform_indices = @transform_1, window_bounds = array<i64: 1, 128>}, {transform_indices = @transform_2, window_bounds = array<i64: 1, 128>}, {transform_indices = @transform_3, window_bounds = array<i64: 8, 128>}]} {
    %c0 = arith.constant 0 : index
    %c0_0 = arith.constant 0 : index
    %0 = vector.load %arg1[%c0, %c0_0] : memref<8x128xbf16, #tpu.memory_space<vmem>>, vector<8x128xbf16>
    %1 = arith.extf %0 : vector<8x128xbf16> to vector<8x128xf32>
    %cst = arith.constant dense<0.000000e+00> : vector<128xf32>
    %2 = vector.multi_reduction <add>, %1, %cst [0] : vector<8x128xf32> to vector<128xf32>
    %3 = vector.shape_cast %2 : vector<128xf32> to vector<1x128xf32>
    %cst_1 = arith.constant 1.250000e-01 : f32
    %4 = vector.broadcast %cst_1 : f32 to vector<1x128xf32>
    %5 = arith.mulf %3, %4 : vector<1x128xf32>
    %6 = vector.broadcast %5 : vector<1x128xf32> to vector<8x128xf32>
    %7 = arith.subf %1, %6 : vector<8x128xf32>
    %8 = arith.mulf %7, %7 : vector<8x128xf32>
    %cst_2 = arith.constant dense<0.000000e+00> : vector<128xf32>
    %9 = vector.multi_reduction <add>, %8, %cst_2 [0] : vector<8x128xf32> to vector<128xf32>
    %10 = vector.shape_cast %9 : vector<128xf32> to vector<1x128xf32>
    %cst_3 = arith.constant 1.250000e-01 : f32
    %11 = vector.broadcast %cst_3 : f32 to vector<1x128xf32>
    %12 = arith.mulf %10, %11 : vector<1x128xf32>
    %cst_4 = arith.constant 9.99999974E-6 : f32
    %13 = vector.broadcast %cst_4 : f32 to vector<1x128xf32>
    %14 = arith.addf %12, %13 : vector<1x128xf32>
    %15 = math.rsqrt %14 : vector<1x128xf32>
    %16 = vector.broadcast %15 : vector<1x128xf32> to vector<8x128xf32>
    %17 = arith.mulf %7, %16 : vector<8x128xf32>
    %c0_5 = arith.constant 0 : index
    %c0_6 = arith.constant 0 : index
    %18 = vector.load %arg2[%c0_5, %c0_6] : memref<1x128xf32, #tpu.memory_space<vmem>>, vector<1x128xf32>
    %19 = vector.broadcast %18 : vector<1x128xf32> to vector<8x128xf32>
    %20 = arith.mulf %17, %19 : vector<8x128xf32>
    %c0_7 = arith.constant 0 : index
    %c0_8 = arith.constant 0 : index
    %21 = vector.load %arg3[%c0_7, %c0_8] : memref<1x128xf32, #tpu.memory_space<vmem>>, vector<1x128xf32>
    %22 = vector.broadcast %21 : vector<1x128xf32> to vector<8x128xf32>
    %23 = arith.addf %20, %22 : vector<8x128xf32>
    %cst_9 = arith.constant 0.000000e+00 : f32
    %24 = vector.broadcast %cst_9 : f32 to vector<8x128xf32>
    %25 = arith.maximumf %23, %24 : vector<8x128xf32>
    %26 = arith.truncf %25 : vector<8x128xf32> to vector<8x128xbf16>
    %c0_10 = arith.constant 0 : index
    %c0_11 = arith.constant 0 : index
    %27 = vector.load %arg4[%c0_10, %c0_11] : memref<8x128xbf16, #tpu.memory_space<vmem>>, vector<8x128xbf16>
    tpu.vector_store %arg4[%c0_10, %c0_11], %26 {strides = array<i32>} : memref<8x128xbf16, #tpu.memory_space<vmem>>, vector<8x128xbf16>,
    return
  }
  func.func @transform_0(%arg0: i32) -> (i32, i32) {
    %c0_i32 = arith.constant 0 : i32
    %c0_i32_0 = arith.constant 0 : i32
    return %c0_i32, %arg0 : i32, i32
  }
  func.func @transform_1(%arg0: i32) -> (i32, i32) {
    %c0_i32 = arith.constant 0 : i32
    %c0_i32_0 = arith.constant 0 : i32
    return %c0_i32, %arg0 : i32, i32
  }
  func.func @transform_2(%arg0: i32) -> (i32, i32) {
    %c0_i32 = arith.constant 0 : i32
    %c0_i32_0 = arith.constant 0 : i32
    return %c0_i32, %arg0 : i32, i32
  }
  func.func @transform_3(%arg0: i32) -> (i32, i32) {
    %c0_i32 = arith.constant 0 : i32
    %c0_i32_0 = arith.constant 0 : i32
    return %c0_i32, %arg0 : i32, i32
  }
}

module attributes {stable_mosaic.version = 11 : i64} {
  func.func @_matmul_kernel_single_k(%arg0: i32, %arg1: i32, %arg2: memref<16x1152xbf16, #tpu.memory_space<vmem>>, %arg3: memref<1152x32xbf16, #tpu.memory_space<vmem>>, %arg4: memref<16x32xbf16, #tpu.memory_space<vmem>>) attributes {dimension_semantics = [#tpu.dimension_semantics<parallel>, #tpu.dimension_semantics<parallel>], iteration_bounds = array<i64: 1, 1>, scalar_prefetch = 0 : i64, scratch_operands = 0 : i64, tpu.core_type = #tpu.core_type<tc>, window_params = [{transform_indices = @transform_0, window_bounds = array<i64: 16, 1152>}, {transform_indices = @transform_1, window_bounds = array<i64: 1152, 32>}, {transform_indices = @transform_2, window_bounds = array<i64: 16, 32>}]} {
    %c0 = arith.constant 0 : index
    %c0_0 = arith.constant 0 : index
    %0 = vector.load %arg2[%c0, %c0_0] : memref<16x1152xbf16, #tpu.memory_space<vmem>>, vector<16x1152xbf16>
    %c0_1 = arith.constant 0 : index
    %c0_2 = arith.constant 0 : index
    %1 = vector.load %arg3[%c0_1, %c0_2] : memref<1152x32xbf16, #tpu.memory_space<vmem>>, vector<1152x32xbf16>
    %cst = arith.constant dense<0.000000e+00> : vector<16x32xf32>
    %2 = tpu.matmul %0, %1, %cst {dimension_numbers = #tpu.dot_dimension_numbers<[1], [0], [0], [1], [0, 0, 1, 1], [], []>} : vector<16x1152xbf16>, vector<1152x32xbf16>, vector<16x32xf32> -> vector<16x32xf32>
    %3 = arith.truncf %2 : vector<16x32xf32> to vector<16x32xbf16>
    %c0_3 = arith.constant 0 : index
    %c0_4 = arith.constant 0 : index
    %4 = vector.load %arg4[%c0_3, %c0_4] : memref<16x32xbf16, #tpu.memory_space<vmem>>, vector<16x32xbf16>
    tpu.vector_store %arg4[%c0_3, %c0_4], %3 {strides = array<i32>} : memref<16x32xbf16, #tpu.memory_space<vmem>>, vector<16x32xbf16>,
    return
  }
  func.func @transform_0(%arg0: i32, %arg1: i32) -> (i32, i32) {
    %c0_i32 = arith.constant 0 : i32
    %c0_i32_0 = arith.constant 0 : i32
    return %arg0, %c0_i32 : i32, i32
  }
  func.func @transform_1(%arg0: i32, %arg1: i32) -> (i32, i32) {
    %c0_i32 = arith.constant 0 : i32
    %c0_i32_0 = arith.constant 0 : i32
    return %c0_i32, %arg1 : i32, i32
  }
  func.func @transform_2(%arg0: i32, %arg1: i32) -> (i32, i32) {
    %c0_i32 = arith.constant 0 : i32
    return %arg0, %arg1 : i32, i32
  }
}

module attributes {stable_mosaic.version = 11 : i64} {
  func.func @_matmul_kernel_single_k(%arg0: i32, %arg1: i32, %arg2: memref<16x1024xbf16, #tpu.memory_space<vmem>>, %arg3: memref<1024x256xbf16, #tpu.memory_space<vmem>>, %arg4: memref<16x256xbf16, #tpu.memory_space<vmem>>) attributes {dimension_semantics = [#tpu.dimension_semantics<parallel>, #tpu.dimension_semantics<parallel>], iteration_bounds = array<i64: 1, 2>, scalar_prefetch = 0 : i64, scratch_operands = 0 : i64, tpu.core_type = #tpu.core_type<tc>, window_params = [{transform_indices = @transform_0, window_bounds = array<i64: 16, 1024>}, {transform_indices = @transform_1, window_bounds = array<i64: 1024, 256>}, {transform_indices = @transform_2, window_bounds = array<i64: 16, 256>}]} {
    %c0 = arith.constant 0 : index
    %c0_0 = arith.constant 0 : index
    %0 = vector.load %arg2[%c0, %c0_0] : memref<16x1024xbf16, #tpu.memory_space<vmem>>, vector<16x1024xbf16>
    %c0_1 = arith.constant 0 : index
    %c0_2 = arith.constant 0 : index
    %1 = vector.load %arg3[%c0_1, %c0_2] : memref<1024x256xbf16, #tpu.memory_space<vmem>>, vector<1024x256xbf16>
    %cst = arith.constant dense<0.000000e+00> : vector<16x256xf32>
    %2 = tpu.matmul %0, %1, %cst {dimension_numbers = #tpu.dot_dimension_numbers<[1], [0], [0], [1], [0, 0, 1, 1], [], []>} : vector<16x1024xbf16>, vector<1024x256xbf16>, vector<16x256xf32> -> vector<16x256xf32>
    %3 = arith.truncf %2 : vector<16x256xf32> to vector<16x256xbf16>
    %c0_3 = arith.constant 0 : index
    %c0_4 = arith.constant 0 : index
    %4 = vector.load %arg4[%c0_3, %c0_4] : memref<16x256xbf16, #tpu.memory_space<vmem>>, vector<16x256xbf16>
    tpu.vector_store %arg4[%c0_3, %c0_4], %3 {strides = array<i32>} : memref<16x256xbf16, #tpu.memory_space<vmem>>, vector<16x256xbf16>,
    return
  }
  func.func @transform_0(%arg0: i32, %arg1: i32) -> (i32, i32) {
    %c0_i32 = arith.constant 0 : i32
    %c0_i32_0 = arith.constant 0 : i32
    return %arg0, %c0_i32 : i32, i32
  }
  func.func @transform_1(%arg0: i32, %arg1: i32) -> (i32, i32) {
    %c0_i32 = arith.constant 0 : i32
    %c0_i32_0 = arith.constant 0 : i32
    return %c0_i32, %arg1 : i32, i32
  }
  func.func @transform_2(%arg0: i32, %arg1: i32) -> (i32, i32) {
    %c0_i32 = arith.constant 0 : i32
    return %arg0, %arg1 : i32, i32
  }
}

module attributes {stable_mosaic.version = 11 : i64} {
  func.func @_bn_kernel(%arg0: i32, %arg1: memref<2x512xbf16, #tpu.memory_space<vmem>>, %arg2: memref<1x512xf32, #tpu.memory_space<vmem>>, %arg3: memref<1x512xf32, #tpu.memory_space<vmem>>, %arg4: memref<2x512xbf16, #tpu.memory_space<vmem>>) attributes {dimension_semantics = [#tpu.dimension_semantics<parallel>], iteration_bounds = array<i64: 2>, scalar_prefetch = 0 : i64, scratch_operands = 0 : i64, tpu.core_type = #tpu.core_type<tc>, window_params = [{transform_indices = @transform_0, window_bounds = array<i64: 2, 512>}, {transform_indices = @transform_1, window_bounds = array<i64: 1, 512>}, {transform_indices = @transform_2, window_bounds = array<i64: 1, 512>}, {transform_indices = @transform_3, window_bounds = array<i64: 2, 512>}]} {
    %c0 = arith.constant 0 : index
    %c0_0 = arith.constant 0 : index
    %0 = vector.load %arg1[%c0, %c0_0] : memref<2x512xbf16, #tpu.memory_space<vmem>>, vector<2x512xbf16>
    %1 = arith.extf %0 : vector<2x512xbf16> to vector<2x512xf32>
    %cst = arith.constant dense<0.000000e+00> : vector<512xf32>
    %2 = vector.multi_reduction <add>, %1, %cst [0] : vector<2x512xf32> to vector<512xf32>
    %3 = vector.shape_cast %2 : vector<512xf32> to vector<1x512xf32>
    %cst_1 = arith.constant 5.000000e-01 : f32
    %4 = vector.broadcast %cst_1 : f32 to vector<1x512xf32>
    %5 = arith.mulf %3, %4 : vector<1x512xf32>
    %6 = vector.broadcast %5 : vector<1x512xf32> to vector<2x512xf32>
    %7 = arith.subf %1, %6 : vector<2x512xf32>
    %8 = arith.mulf %7, %7 : vector<2x512xf32>
    %cst_2 = arith.constant dense<0.000000e+00> : vector<512xf32>
    %9 = vector.multi_reduction <add>, %8, %cst_2 [0] : vector<2x512xf32> to vector<512xf32>
    %10 = vector.shape_cast %9 : vector<512xf32> to vector<1x512xf32>
    %cst_3 = arith.constant 5.000000e-01 : f32
    %11 = vector.broadcast %cst_3 : f32 to vector<1x512xf32>
    %12 = arith.mulf %10, %11 : vector<1x512xf32>
    %cst_4 = arith.constant 9.99999974E-6 : f32
    %13 = vector.broadcast %cst_4 : f32 to vector<1x512xf32>
    %14 = arith.addf %12, %13 : vector<1x512xf32>
    %15 = math.rsqrt %14 : vector<1x512xf32>
    %16 = vector.broadcast %15 : vector<1x512xf32> to vector<2x512xf32>
    %17 = arith.mulf %7, %16 : vector<2x512xf32>
    %c0_5 = arith.constant 0 : index
    %c0_6 = arith.constant 0 : index
    %18 = vector.load %arg2[%c0_5, %c0_6] : memref<1x512xf32, #tpu.memory_space<vmem>>, vector<1x512xf32>
    %19 = vector.broadcast %18 : vector<1x512xf32> to vector<2x512xf32>
    %20 = arith.mulf %17, %19 : vector<2x512xf32>
    %c0_7 = arith.constant 0 : index
    %c0_8 = arith.constant 0 : index
    %21 = vector.load %arg3[%c0_7, %c0_8] : memref<1x512xf32, #tpu.memory_space<vmem>>, vector<1x512xf32>
    %22 = vector.broadcast %21 : vector<1x512xf32> to vector<2x512xf32>
    %23 = arith.addf %20, %22 : vector<2x512xf32>
    %cst_9 = arith.constant 0.000000e+00 : f32
    %24 = vector.broadcast %cst_9 : f32 to vector<2x512xf32>
    %25 = arith.maximumf %23, %24 : vector<2x512xf32>
    %26 = arith.truncf %25 : vector<2x512xf32> to vector<2x512xbf16>
    %c0_10 = arith.constant 0 : index
    %c0_11 = arith.constant 0 : index
    %27 = vector.load %arg4[%c0_10, %c0_11] : memref<2x512xbf16, #tpu.memory_space<vmem>>, vector<2x512xbf16>
    tpu.vector_store %arg4[%c0_10, %c0_11], %26 {strides = array<i32>} : memref<2x512xbf16, #tpu.memory_space<vmem>>, vector<2x512xbf16>,
    return
  }
  func.func @transform_0(%arg0: i32) -> (i32, i32) {
    %c0_i32 = arith.constant 0 : i32
    %c0_i32_0 = arith.constant 0 : i32
    return %c0_i32, %arg0 : i32, i32
  }
  func.func @transform_1(%arg0: i32) -> (i32, i32) {
    %c0_i32 = arith.constant 0 : i32
    %c0_i32_0 = arith.constant 0 : i32
    return %c0_i32, %arg0 : i32, i32
  }
  func.func @transform_2(%arg0: i32) -> (i32, i32) {
    %c0_i32 = arith.constant 0 : i32
    %c0_i32_0 = arith.constant 0 : i32
    return %c0_i32, %arg0 : i32, i32
  }
  func.func @transform_3(%arg0: i32) -> (i32, i32) {
    %c0_i32 = arith.constant 0 : i32
    %c0_i32_0 = arith.constant 0 : i32
    return %c0_i32, %arg0 : i32, i32
  }
}

module attributes {stable_mosaic.version = 11 : i64} {
  func.func @_bn_kernel(%arg0: i32, %arg1: memref<2x128xbf16, #tpu.memory_space<vmem>>, %arg2: memref<1x128xf32, #tpu.memory_space<vmem>>, %arg3: memref<1x128xf32, #tpu.memory_space<vmem>>, %arg4: memref<2x128xbf16, #tpu.memory_space<vmem>>) attributes {dimension_semantics = [#tpu.dimension_semantics<parallel>], iteration_bounds = array<i64: 1>, scalar_prefetch = 0 : i64, scratch_operands = 0 : i64, tpu.core_type = #tpu.core_type<tc>, window_params = [{transform_indices = @transform_0, window_bounds = array<i64: 2, 128>}, {transform_indices = @transform_1, window_bounds = array<i64: 1, 128>}, {transform_indices = @transform_2, window_bounds = array<i64: 1, 128>}, {transform_indices = @transform_3, window_bounds = array<i64: 2, 128>}]} {
    %c0 = arith.constant 0 : index
    %c0_0 = arith.constant 0 : index
    %0 = vector.load %arg1[%c0, %c0_0] : memref<2x128xbf16, #tpu.memory_space<vmem>>, vector<2x128xbf16>
    %1 = arith.extf %0 : vector<2x128xbf16> to vector<2x128xf32>
    %cst = arith.constant dense<0.000000e+00> : vector<128xf32>
    %2 = vector.multi_reduction <add>, %1, %cst [0] : vector<2x128xf32> to vector<128xf32>
    %3 = vector.shape_cast %2 : vector<128xf32> to vector<1x128xf32>
    %cst_1 = arith.constant 5.000000e-01 : f32
    %4 = vector.broadcast %cst_1 : f32 to vector<1x128xf32>
    %5 = arith.mulf %3, %4 : vector<1x128xf32>
    %6 = vector.broadcast %5 : vector<1x128xf32> to vector<2x128xf32>
    %7 = arith.subf %1, %6 : vector<2x128xf32>
    %8 = arith.mulf %7, %7 : vector<2x128xf32>
    %cst_2 = arith.constant dense<0.000000e+00> : vector<128xf32>
    %9 = vector.multi_reduction <add>, %8, %cst_2 [0] : vector<2x128xf32> to vector<128xf32>
    %10 = vector.shape_cast %9 : vector<128xf32> to vector<1x128xf32>
    %cst_3 = arith.constant 5.000000e-01 : f32
    %11 = vector.broadcast %cst_3 : f32 to vector<1x128xf32>
    %12 = arith.mulf %10, %11 : vector<1x128xf32>
    %cst_4 = arith.constant 9.99999974E-6 : f32
    %13 = vector.broadcast %cst_4 : f32 to vector<1x128xf32>
    %14 = arith.addf %12, %13 : vector<1x128xf32>
    %15 = math.rsqrt %14 : vector<1x128xf32>
    %16 = vector.broadcast %15 : vector<1x128xf32> to vector<2x128xf32>
    %17 = arith.mulf %7, %16 : vector<2x128xf32>
    %c0_5 = arith.constant 0 : index
    %c0_6 = arith.constant 0 : index
    %18 = vector.load %arg2[%c0_5, %c0_6] : memref<1x128xf32, #tpu.memory_space<vmem>>, vector<1x128xf32>
    %19 = vector.broadcast %18 : vector<1x128xf32> to vector<2x128xf32>
    %20 = arith.mulf %17, %19 : vector<2x128xf32>
    %c0_7 = arith.constant 0 : index
    %c0_8 = arith.constant 0 : index
    %21 = vector.load %arg3[%c0_7, %c0_8] : memref<1x128xf32, #tpu.memory_space<vmem>>, vector<1x128xf32>
    %22 = vector.broadcast %21 : vector<1x128xf32> to vector<2x128xf32>
    %23 = arith.addf %20, %22 : vector<2x128xf32>
    %cst_9 = arith.constant 0.000000e+00 : f32
    %24 = vector.broadcast %cst_9 : f32 to vector<2x128xf32>
    %25 = arith.maximumf %23, %24 : vector<2x128xf32>
    %26 = arith.truncf %25 : vector<2x128xf32> to vector<2x128xbf16>
    %c0_10 = arith.constant 0 : index
    %c0_11 = arith.constant 0 : index
    %27 = vector.load %arg4[%c0_10, %c0_11] : memref<2x128xbf16, #tpu.memory_space<vmem>>, vector<2x128xbf16>
    tpu.vector_store %arg4[%c0_10, %c0_11], %26 {strides = array<i32>} : memref<2x128xbf16, #tpu.memory_space<vmem>>, vector<2x128xbf16>,
    return
  }
  func.func @transform_0(%arg0: i32) -> (i32, i32) {
    %c0_i32 = arith.constant 0 : i32
    %c0_i32_0 = arith.constant 0 : i32
    return %c0_i32, %arg0 : i32, i32
  }
  func.func @transform_1(%arg0: i32) -> (i32, i32) {
    %c0_i32 = arith.constant 0 : i32
    %c0_i32_0 = arith.constant 0 : i32
    return %c0_i32, %arg0 : i32, i32
  }
  func.func @transform_2(%arg0: i32) -> (i32, i32) {
    %c0_i32 = arith.constant 0 : i32
    %c0_i32_0 = arith.constant 0 : i32
    return %c0_i32, %arg0 : i32, i32
  }
  func.func @transform_3(%arg0: i32) -> (i32, i32) {
    %c0_i32 = arith.constant 0 : i32
    %c0_i32_0 = arith.constant 0 : i32
    return %c0_i32, %arg0 : i32, i32
  }
}

module attributes {stable_mosaic.version = 11 : i64} {
  func.func @_bn_kernel(%arg0: i32, %arg1: memref<2x512xbf16, #tpu.memory_space<vmem>>, %arg2: memref<1x512xf32, #tpu.memory_space<vmem>>, %arg3: memref<1x512xf32, #tpu.memory_space<vmem>>, %arg4: memref<2x512xf32, #tpu.memory_space<vmem>>) attributes {dimension_semantics = [#tpu.dimension_semantics<parallel>], iteration_bounds = array<i64: 2>, scalar_prefetch = 0 : i64, scratch_operands = 0 : i64, tpu.core_type = #tpu.core_type<tc>, window_params = [{transform_indices = @transform_0, window_bounds = array<i64: 2, 512>}, {transform_indices = @transform_1, window_bounds = array<i64: 1, 512>}, {transform_indices = @transform_2, window_bounds = array<i64: 1, 512>}, {transform_indices = @transform_3, window_bounds = array<i64: 2, 512>}]} {
    %c0 = arith.constant 0 : index
    %c0_0 = arith.constant 0 : index
    %0 = vector.load %arg1[%c0, %c0_0] : memref<2x512xbf16, #tpu.memory_space<vmem>>, vector<2x512xbf16>
    %1 = arith.extf %0 : vector<2x512xbf16> to vector<2x512xf32>
    %cst = arith.constant dense<0.000000e+00> : vector<512xf32>
    %2 = vector.multi_reduction <add>, %1, %cst [0] : vector<2x512xf32> to vector<512xf32>
    %3 = vector.shape_cast %2 : vector<512xf32> to vector<1x512xf32>
    %cst_1 = arith.constant 5.000000e-01 : f32
    %4 = vector.broadcast %cst_1 : f32 to vector<1x512xf32>
    %5 = arith.mulf %3, %4 : vector<1x512xf32>
    %6 = vector.broadcast %5 : vector<1x512xf32> to vector<2x512xf32>
    %7 = arith.subf %1, %6 : vector<2x512xf32>
    %8 = arith.mulf %7, %7 : vector<2x512xf32>
    %cst_2 = arith.constant dense<0.000000e+00> : vector<512xf32>
    %9 = vector.multi_reduction <add>, %8, %cst_2 [0] : vector<2x512xf32> to vector<512xf32>
    %10 = vector.shape_cast %9 : vector<512xf32> to vector<1x512xf32>
    %cst_3 = arith.constant 5.000000e-01 : f32
    %11 = vector.broadcast %cst_3 : f32 to vector<1x512xf32>
    %12 = arith.mulf %10, %11 : vector<1x512xf32>
    %cst_4 = arith.constant 9.99999974E-6 : f32
    %13 = vector.broadcast %cst_4 : f32 to vector<1x512xf32>
    %14 = arith.addf %12, %13 : vector<1x512xf32>
    %15 = math.rsqrt %14 : vector<1x512xf32>
    %16 = vector.broadcast %15 : vector<1x512xf32> to vector<2x512xf32>
    %17 = arith.mulf %7, %16 : vector<2x512xf32>
    %c0_5 = arith.constant 0 : index
    %c0_6 = arith.constant 0 : index
    %18 = vector.load %arg2[%c0_5, %c0_6] : memref<1x512xf32, #tpu.memory_space<vmem>>, vector<1x512xf32>
    %19 = vector.broadcast %18 : vector<1x512xf32> to vector<2x512xf32>
    %20 = arith.mulf %17, %19 : vector<2x512xf32>
    %c0_7 = arith.constant 0 : index
    %c0_8 = arith.constant 0 : index
    %21 = vector.load %arg3[%c0_7, %c0_8] : memref<1x512xf32, #tpu.memory_space<vmem>>, vector<1x512xf32>
    %22 = vector.broadcast %21 : vector<1x512xf32> to vector<2x512xf32>
    %23 = arith.addf %20, %22 : vector<2x512xf32>
    %c0_9 = arith.constant 0 : index
    %c0_10 = arith.constant 0 : index
    %24 = vector.load %arg4[%c0_9, %c0_10] : memref<2x512xf32, #tpu.memory_space<vmem>>, vector<2x512xf32>
    tpu.vector_store %arg4[%c0_9, %c0_10], %23 {strides = array<i32>} : memref<2x512xf32, #tpu.memory_space<vmem>>, vector<2x512xf32>,
    return
  }
  func.func @transform_0(%arg0: i32) -> (i32, i32) {
    %c0_i32 = arith.constant 0 : i32
    %c0_i32_0 = arith.constant 0 : i32
    return %c0_i32, %arg0 : i32, i32
  }
  func.func @transform_1(%arg0: i32) -> (i32, i32) {
    %c0_i32 = arith.constant 0 : i32
    %c0_i32_0 = arith.constant 0 : i32
    return %c0_i32, %arg0 : i32, i32
  }
  func.func @transform_2(%arg0: i32) -> (i32, i32) {
    %c0_i32 = arith.constant 0 : i32
    %c0_i32_0 = arith.constant 0 : i32
    return %c0_i32, %arg0 : i32, i32
  }
  func.func @transform_3(%arg0: i32) -> (i32, i32) {
    %c0_i32 = arith.constant 0 : i32
    %c0_i32_0 = arith.constant 0 : i32
    return %c0_i32, %arg0 : i32, i32
  }
}

module attributes {stable_mosaic.version = 11 : i64} {
  func.func @_head_kernel(%arg0: memref<2x1x1024xf32, #tpu.memory_space<vmem>>, %arg1: memref<1024x10xf32, #tpu.memory_space<vmem>>, %arg2: memref<1x10xf32, #tpu.memory_space<vmem>>, %arg3: memref<2x10xf32, #tpu.memory_space<vmem>>) attributes {dimension_semantics = [], scalar_prefetch = 0 : i64, scratch_operands = 0 : i64, tpu.core_type = #tpu.core_type<tc>} {
    %c0 = arith.constant 0 : index
    %c0_0 = arith.constant 0 : index
    %c0_1 = arith.constant 0 : index
    %0 = vector.load %arg0[%c0, %c0_0, %c0_1] : memref<2x1x1024xf32, #tpu.memory_space<vmem>>, vector<2x1x1024xf32>
    %cst = arith.constant dense<0.000000e+00> : vector<2x1024xf32>
    %1 = vector.multi_reduction <add>, %0, %cst [1] : vector<2x1x1024xf32> to vector<2x1024xf32>
    %cst_2 = arith.constant 1.000000e+00 : f32
    %2 = vector.broadcast %cst_2 : f32 to vector<2x1024xf32>
    %3 = arith.mulf %1, %2 : vector<2x1024xf32>
    %c0_3 = arith.constant 0 : index
    %c0_4 = arith.constant 0 : index
    %4 = vector.load %arg1[%c0_3, %c0_4] : memref<1024x10xf32, #tpu.memory_space<vmem>>, vector<1024x10xf32>
    %cst_5 = arith.constant dense<0.000000e+00> : vector<2x10xf32>
    %5 = tpu.matmul %3, %4, %cst_5 {dimension_numbers = #tpu.dot_dimension_numbers<[1], [0], [0], [1], [0, 0, 1, 1], [], []>} : vector<2x1024xf32>, vector<1024x10xf32>, vector<2x10xf32> -> vector<2x10xf32>
    %c0_6 = arith.constant 0 : index
    %c0_7 = arith.constant 0 : index
    %6 = vector.load %arg2[%c0_6, %c0_7] : memref<1x10xf32, #tpu.memory_space<vmem>>, vector<1x10xf32>
    %7 = vector.broadcast %6 : vector<1x10xf32> to vector<2x10xf32>
    %8 = arith.addf %5, %7 : vector<2x10xf32>
    %cst_8 = arith.constant dense<0xFF800000> : vector<2xf32>
    %9 = vector.multi_reduction <maximumf>, %8, %cst_8 [1] : vector<2x10xf32> to vector<2xf32>
    %10 = vector.shape_cast %9 : vector<2xf32> to vector<2x1xf32>
    %11 = vector.broadcast %10 : vector<2x1xf32> to vector<2x10xf32>
    %12 = arith.subf %8, %11 : vector<2x10xf32>
    %13 = math.exp %12 : vector<2x10xf32>
    %cst_9 = arith.constant dense<0.000000e+00> : vector<2xf32>
    %14 = vector.multi_reduction <add>, %13, %cst_9 [1] : vector<2x10xf32> to vector<2xf32>
    %15 = vector.shape_cast %14 : vector<2xf32> to vector<2x1xf32>
    %16 = vector.broadcast %15 : vector<2x1xf32> to vector<2x10xf32>
    %17 = arith.divf %13, %16 : vector<2x10xf32>
    %c0_10 = arith.constant 0 : index
    %c0_11 = arith.constant 0 : index
    %18 = vector.load %arg3[%c0_10, %c0_11] : memref<2x10xf32, #tpu.memory_space<vmem>>, vector<2x10xf32>
    tpu.vector_store %arg3[%c0_10, %c0_11], %17 {strides = array<i32>} : memref<2x10xf32, #tpu.memory_space<vmem>>, vector<2x10xf32>,
    return
  }
}

</mosaic_0001>

<bundles_post_ra>
// kernel: _forward_impl.243
= control target key start
LH: loop header
LB: loop body
LE: loop exit
PB: predicated region body
PF: predicated region fallthrough
CT: control target
= control target key end

     0   :  { %s2245_s0 = inlined_call_operand.vmem [shape: bf16[512,128], index: 0, kind: input, shape index: {}]   ;;  %s2246_s1 = inlined_call_operand.vmem [shape: f32[1,128], index: 1, kind: input, shape index: {}]   ;;  %s2247_s2 = inlined_call_operand.vmem [shape: f32[1,128], index: 2, kind: input, shape index: {}]   ;;  %s2248_s3 = inlined_call_operand.vmem [shape: bf16[512,128], index: 3, kind: output, shape index: {}]  }
   0x1   :  { %v1194_v0 = vld [vmem:[%s2245_s0] sm:$0xff]   ;;  %v1199_v1 = vld [vmem:[%s2245_s0 + $0x8] sm:$0xff]   ;;  %v1207_v5 = vld [vmem:[%s2245_s0 + $0x10] sm:$0xff]  }
   0x2   :  { %v819_v2 = vunpack.c.l.bf16 %v1194_v0  ;;  %v820_v3 = vunpack.c.h.bf16 %v1194_v0  ;;  %v823_v4 = vunpack.c.l.bf16 %v1199_v1  ;;  %v824_v6 = vunpack.c.h.bf16 %v1199_v1  ;;  %v1220_v10 = vld [vmem:[%s2245_s0 + $0x18] sm:$0xff]   ;;  %v1231_v15 = vld [vmem:[%s2245_s0 + $0x20] sm:$0xff]   ;;  %v1242_v20 = vld [vmem:[%s2245_s0 + $0x28] sm:$0xff]  }
   0x3   :  { %v827_v8 = vunpack.c.l.bf16 %v1207_v5  ;;  %v828_v11 = vunpack.c.h.bf16 %v1207_v5  ;;  %v2287_v13 = vunpack.c.l.bf16 %v1220_v10  ;;  %v2286_v16 = vunpack.c.h.bf16 %v1220_v10  ;;  %v1253_v25 = vld [vmem:[%s2245_s0 + $0x30] sm:$0xff]   ;;  %v1264_v30 = vld [vmem:[%s2245_s0 + $0x38] sm:$0xff]   ;;  %v1275_v35 = vld [vmem:[%s2245_s0 + $0x40] sm:$0xff]  }
   0x4   :  { %v142_v7 = vadd.f32 %v820_v3, %v819_v2  ;;  %v2285_v18 = vunpack.c.l.bf16 %v1231_v15  ;;  %v2284_v21 = vunpack.c.h.bf16 %v1231_v15  ;;  %v2283_v23 = vunpack.c.l.bf16 %v1242_v20  ;;  %v1286_v40 = vld [vmem:[%s2245_s0 + $0x48] sm:$0xff]   ;;  %v1297_v45 = vld [vmem:[%s2245_s0 + $0x50] sm:$0xff]   ;;  %v1308_v50 = vld [vmem:[%s2245_s0 + $0x58] sm:$0xff]  }
   0x5   :  { %v2282_v26 = vunpack.c.h.bf16 %v1242_v20  ;;  %v2281_v28 = vunpack.c.l.bf16 %v1253_v25  ;;  %v2280_v31 = vunpack.c.h.bf16 %v1253_v25  ;;  %v2279_v33 = vunpack.c.l.bf16 %v1264_v30  ;;  %v1319_v55 = vld [vmem:[%s2245_s0 + $0x60] sm:$0xff]   ;;  %v1330_v60 = vld [vmem:[%s2245_s0 + $0x68] sm:$0xff]  }
   0x6   :  { %v143_v9 = vadd.f32 %v823_v4, %v142_v7  ;;  %v2278_v36 = vunpack.c.h.bf16 %v1264_v30  ;;  %v2277_v38 = vunpack.c.l.bf16 %v1275_v35  ;;  %v2276_v41 = vunpack.c.h.bf16 %v1275_v35 }
   0x7   :  { %v2275_v43 = vunpack.c.l.bf16 %v1286_v40  ;;  %v2274_v46 = vunpack.c.h.bf16 %v1286_v40  ;;  %v2273_v48 = vunpack.c.l.bf16 %v1297_v45  ;;  %v2272_v51 = vunpack.c.h.bf16 %v1297_v45 }
   0x8   :  { %v144_v12 = vadd.f32 %v824_v6, %v143_v9  ;;  %v2271_v53 = vunpack.c.l.bf16 %v1308_v50  ;;  %v2270_v56 = vunpack.c.h.bf16 %v1308_v50  ;;  %v2267_v58 = vunpack.c.l.bf16 %v1319_v55  ;;  %v1341_v9 = vld [vmem:[%s2245_s0 + $0x70] sm:$0xff]  }
   0x9   :  { %v2266_v61 = vunpack.c.h.bf16 %v1319_v55  ;;  %v2265_v63 = vunpack.c.l.bf16 %v1330_v60 }
   0xa   :  { %v145_v14 = vadd.f32 %v827_v8, %v144_v12  ;;  %v2264_v12 = vunpack.c.h.bf16 %v1330_v60 }
   0xc   :  { %v146_v17 = vadd.f32 %v828_v11, %v145_v14 }
   0xe   :  { %v147_v19 = vadd.f32 %v2287_v13, %v146_v17  ;;  %v2262_v17 = vunpack.c.l.bf16 %v1341_v9 }
  0x10   :  { %v148_v22 = vadd.f32 %v2286_v16, %v147_v19 }
  0x12   :  { %v149_v24 = vadd.f32 %v2285_v18, %v148_v22  ;;  %v1352_v22 = vld [vmem:[%s2245_s0 + $0x78] sm:$0xff]  }
  0x14   :  { %v150_v27 = vadd.f32 %v2284_v21, %v149_v24  ;;  %v2260_v24 = vunpack.c.h.bf16 %v1341_v9 }
  0x16   :  { %v151_v29 = vadd.f32 %v2283_v23, %v150_v27 }
  0x18   :  { %v152_v32 = vadd.f32 %v2282_v26, %v151_v29  ;;  %v2259_v29 = vunpack.c.l.bf16 %v1352_v22 }
  0x1a   :  { %v153_v34 = vadd.f32 %v2281_v28, %v152_v32 }
  0x1c   :  { %v154_v37 = vadd.f32 %v2280_v31, %v153_v34  ;;  %v1363_v34 = vld [vmem:[%s2245_s0 + $0x80] sm:$0xff]  }
  0x1e   :  { %v155_v39 = vadd.f32 %v2279_v33, %v154_v37  ;;  %v2256_v37 = vunpack.c.h.bf16 %v1352_v22 }
  0x20   :  { %v156_v42 = vadd.f32 %v2278_v36, %v155_v39 }
  0x22   :  { %v157_v44 = vadd.f32 %v2277_v38, %v156_v42  ;;  %v2253_v42 = vunpack.c.l.bf16 %v1363_v34 }
  0x24   :  { %v158_v47 = vadd.f32 %v2276_v41, %v157_v44 }
  0x26   :  { %v159_v49 = vadd.f32 %v2275_v43, %v158_v47  ;;  %v1374_v47 = vld [vmem:[%s2245_s0 + $0x88] sm:$0xff]  }
  0x28   :  { %v160_v52 = vadd.f32 %v2274_v46, %v159_v49  ;;  %v2250_v49 = vunpack.c.h.bf16 %v1363_v34 }
  0x2a   :  { %v161_v54 = vadd.f32 %v2273_v48, %v160_v52 }
  0x2c   :  { %v162_v57 = vadd.f32 %v2272_v51, %v161_v54  ;;  %v2249_v54 = vunpack.c.l.bf16 %v1374_v47 }
  0x2e   :  { %v163_v59 = vadd.f32 %v2271_v53, %v162_v57 }
  0x30   :  { %v164_v62 = vadd.f32 %v2270_v56, %v163_v59  ;;  %v1385_v59 = vld [vmem:[%s2245_s0 + $0x90] sm:$0xff]  }
  0x32   :  { %v165_v7 = vadd.f32 %v2267_v58, %v164_v62  ;;  %v2251_v62 = vunpack.c.h.bf16 %v1374_v47 }
  0x34   :  { %v166_v14 = vadd.f32 %v2266_v61, %v165_v7 }
  0x36   :  { %v167_v19 = vadd.f32 %v2265_v63, %v166_v14  ;;  %v2252_v14 = vunpack.c.l.bf16 %v1385_v59 }
  0x38   :  { %v168_v27 = vadd.f32 %v2264_v12, %v167_v19  ;;  %v1129_v12 = vld [vmem:[%s2245_s0 + $0xc8] sm:$0xff]  }
  0x39   :  { %v919_v58 = vunpack.c.l.bf16 %v1129_v12 }
  0x3a   :  { %v169_v32 = vadd.f32 %v2262_v17, %v168_v27  ;;  %v1396_v27 = vld [vmem:[%s2245_s0 + $0x98] sm:$0xff]  }
  0x3c   :  { %v170_v39 = vadd.f32 %v2260_v24, %v169_v32  ;;  %v2254_v32 = vunpack.c.h.bf16 %v1385_v59 }
  0x3e   :  { %v171_v44 = vadd.f32 %v2259_v29, %v170_v39 }
  0x40   :  { %v172_v52 = vadd.f32 %v2256_v37, %v171_v44  ;;  %v2255_v44 = vunpack.c.l.bf16 %v1396_v27 }
  0x42   :  { %v173_v57 = vadd.f32 %v2253_v42, %v172_v52 }
  0x44   :  { %v174_v7 = vadd.f32 %v2250_v49, %v173_v57  ;;  %v1407_v57 = vld [vmem:[%s2245_s0 + $0xa0] sm:$0xff]  }
  0x45   :  { %v2258_v49 = vunpack.c.l.bf16 %v1407_v57 }
  0x46   :  { %v175_v19 = vadd.f32 %v2249_v54, %v174_v7  ;;  %v2257_v7 = vunpack.c.h.bf16 %v1396_v27 }
  0x48   :  { %v176_v39 = vadd.f32 %v2251_v62, %v175_v19  ;;  %v1418_v62 = vld [vmem:[%s2245_s0 + $0xa8] sm:$0xff]  }
  0x49   :  { %v2263_v42 = vunpack.c.l.bf16 %v1418_v62 }
  0x4a   :  { %v177_v52 = vadd.f32 %v2252_v14, %v176_v39  ;;  %v2261_v39 = vunpack.c.h.bf16 %v1407_v57 }
  0x4c   :  { %v178_v54 = vadd.f32 %v2254_v32, %v177_v52  ;;  %v1429_v32 = vld [vmem:[%s2245_s0 + $0xb0] sm:$0xff]  }
  0x4d   :  { %v2268_v37 = vunpack.c.l.bf16 %v1429_v32 }
  0x4e   :  { %v179_v19 = vadd.f32 %v2255_v44, %v178_v54  ;;  %v2269_v54 = vunpack.c.h.bf16 %v1418_v62 }
  0x50   :  { %v180_v14 = vadd.f32 %v2257_v7, %v179_v19  ;;  %v1127_v7 = vld [vmem:[%s2245_s0 + $0xb8] sm:$0xff]  }
  0x51   :  { %v911_v29 = vunpack.c.l.bf16 %v1127_v7 }
  0x52   :  { %v181_v52 = vadd.f32 %v2258_v49, %v180_v14  ;;  %v908_v14 = vunpack.c.h.bf16 %v1429_v32 }
  0x54   :  { %v182_v44 = vadd.f32 %v2261_v39, %v181_v52  ;;  %v1128_v52 = vld [vmem:[%s2245_s0 + $0xc0] sm:$0xff]   ;;  %v912_v39 = vunpack.c.h.bf16 %v1127_v7 }
  0x55   :  { %v916_v63 = vunpack.c.h.bf16 %v1128_v52 }
  0x56   :  { %v183_v19 = vadd.f32 %v2263_v42, %v182_v44  ;;  %v915_v44 = vunpack.c.l.bf16 %v1128_v52 }
  0x58   :  { %v184_v49 = vadd.f32 %v2269_v54, %v183_v19 }
  0x5a   :  { %v185_v24 = vadd.f32 %v2268_v37, %v184_v49  ;;  %v1130_v49 = vld [vmem:[%s2245_s0 + $0xd0] sm:$0xff]   ;;  %v920_v37 = vunpack.c.h.bf16 %v1129_v12  ;;  %v1133_v12 = vld [vmem:[%s2245_s0 + $0xe8] sm:$0xff]  }
  0x5b   :  { %v923_v56 = vunpack.c.l.bf16 %v1130_v49  ;;  %v935_v41 = vunpack.c.l.bf16 %v1133_v12 }
  0x5c   :  { %v186_v17 = vadd.f32 %v908_v14, %v185_v24  ;;  %v924_v24 = vunpack.c.h.bf16 %v1130_v49  ;;  %v936_v49 = vunpack.c.h.bf16 %v1133_v12 }
  0x5e   :  { %v187_v42 = vadd.f32 %v911_v29, %v186_v17  ;;  %v1131_v17 = vld [vmem:[%s2245_s0 + $0xd8] sm:$0xff]  }
  0x5f   :  { %v927_v51 = vunpack.c.l.bf16 %v1131_v17 }
  0x60   :  { %v188_v61 = vadd.f32 %v912_v39, %v187_v42  ;;  %v928_v42 = vunpack.c.h.bf16 %v1131_v17 }
  0x62   :  { %v189_v19 = vadd.f32 %v915_v44, %v188_v61  ;;  %v1132_v61 = vld [vmem:[%s2245_s0 + $0xe0] sm:$0xff]  }
  0x63   :  { %v931_v46 = vunpack.c.l.bf16 %v1132_v61 }
  0x64   :  { %v190_v54 = vadd.f32 %v916_v63, %v189_v19 }
  0x66   :  { %v191_v53 = vadd.f32 %v919_v58, %v190_v54  ;;  %v932_v54 = vunpack.c.h.bf16 %v1132_v61 }
  0x68   :  { %v192_v7 = vadd.f32 %v920_v37, %v191_v53  ;;  %v1134_v53 = vld [vmem:[%s2245_s0 + $0xf0] sm:$0xff]  }
  0x69   :  { %v939_v36 = vunpack.c.l.bf16 %v1134_v53  ;;  %v940_v17 = vunpack.c.h.bf16 %v1134_v53 }
  0x6a   :  { %v193_v48 = vadd.f32 %v923_v56, %v192_v7 }
  0x6c   :  { %v194_v52 = vadd.f32 %v924_v24, %v193_v48  ;;  %v1135_v48 = vld [vmem:[%s2245_s0 + $0xf8] sm:$0xff]  }
  0x6d   :  { %v943_v31 = vunpack.c.l.bf16 %v1135_v48  ;;  %v944_v61 = vunpack.c.h.bf16 %v1135_v48 }
  0x6e   :  { %v195_v43 = vadd.f32 %v927_v51, %v194_v52 }
  0x70   :  { %v196_v19 = vadd.f32 %v928_v42, %v195_v43 }
  0x72   :  { %v197_v38 = vadd.f32 %v931_v46, %v196_v19 }
  0x74   :  { %v198_v7 = vadd.f32 %v932_v54, %v197_v38 }
  0x76   :  { %v199_v33 = vadd.f32 %v935_v41, %v198_v7 }
  0x78   :  { %v200_v52 = vadd.f32 %v936_v49, %v199_v33 }
  0x7a   :  { %v201_v28 = vadd.f32 %v939_v36, %v200_v52 }
  0x7c   :  { %v202_v43 = vadd.f32 %v940_v17, %v201_v28 }
  0x7e   :  { %v203_v26 = vadd.f32 %v943_v31, %v202_v43 }
  0x80   :  { %v204_v19 = vadd.f32 %v944_v61, %v203_v26 }
  0x82   :  { %v205_v23 = vrot.slane %v204_v19, 4 }
  0x84   :  { %v206_v21 = vadd.f32 %v205_v23, %v204_v19 }
  0x86   :  { %v207_v18 = vrot.slane %v206_v21, 2 }
  0x88   :  { %v208_v16 = vadd.f32 %v207_v18, %v206_v21 }
  0x8a   :  { %v209_v12 = vrot.slane %v208_v16, 1 }
  0x8c   :  { %v210_v38 = vadd.f32 %v209_v12, %v208_v16 }
  0x8e   :  { %v1469_v13 = vmul.f32 0.001953125, %v210_v38  ;;  %v2319_v38 = vunpack.c.h.bf16 %v1231_v15 }
  0x90   :  { %v1472_v7 = vsub.f32 %v908_v14, %v1469_v13  ;;  %v1475_v53 = vsub.f32 %v911_v29, %v1469_v13  ;;  %v1478_v33 = vsub.f32 %v912_v39, %v1469_v13  ;;  %v1481_v28 = vsub.f32 %v915_v44, %v1469_v13 }
  0x91   :  { %v1484_v23 = vsub.f32 %v916_v63, %v1469_v13  ;;  %v1487_v18 = vsub.f32 %v919_v58, %v1469_v13  ;;  %v1490_v16 = vsub.f32 %v920_v37, %v1469_v13  ;;  %v1493_v21 = vsub.f32 %v923_v56, %v1469_v13 }
  0x92   :  { %v1496_v26 = vsub.f32 %v924_v24, %v1469_v13  ;;  %v1499_v29 = vsub.f32 %v927_v51, %v1469_v13  ;;  %v1502_v39 = vsub.f32 %v928_v42, %v1469_v13  ;;  %v1505_v63 = vsub.f32 %v931_v46, %v1469_v13 }
  0x93   :  { %v1508_v58 = vsub.f32 %v932_v54, %v1469_v13  ;;  %v1511_v37 = vsub.f32 %v935_v41, %v1469_v13  ;;  %v1514_v56 = vsub.f32 %v936_v49, %v1469_v13  ;;  %v1517_v14 = vsub.f32 %v939_v36, %v1469_v13 }
  0x94   :  { %2309 = vst [vmem:[#allocation2_spill] sm:$0xff] %v1505_v63  ;;  %v1520_v51 = vsub.f32 %v940_v17, %v1469_v13  ;;  %v1523_v44 = vsub.f32 %v943_v31, %v1469_v13  ;;  %v1526_v46 = vsub.f32 %v944_v61, %v1469_v13  ;;  %v1531_v41 = vsub.f32 %v819_v2, %v1469_v13 }
  0x95   :  { %2310 = vst [vmem:[#allocation3_spill] sm:$0xff] %v1508_v58  ;;  %v1536_v24 = vsub.f32 %v820_v3, %v1469_v13  ;;  %v1541_v36 = vsub.f32 %v823_v4, %v1469_v13  ;;  %v1546_v31 = vsub.f32 %v824_v6, %v1469_v13  ;;  %v1555_v0 = vsub.f32 %v827_v8, %v1469_v13 }
  0x96   :  { %2311 = vst [vmem:[#allocation4_spill] sm:$0xff] %v1511_v37  ;;  %v276_v42 = vmul.f32 %v1531_v41, %v1531_v41  ;;  %v1562_v1 = vsub.f32 %v828_v11, %v1469_v13  ;;  %v2316_v54 = vunpack.c.l.bf16 %v1220_v10  ;;  %v2317_v17 = vunpack.c.h.bf16 %v1220_v10 }
  0x97   :  { %2312 = vst [vmem:[#allocation5_spill] sm:$0xff] %v1514_v56  ;;  %v277_v2 = vmul.f32 %v1536_v24, %v1536_v24  ;;  %v278_v3 = vmul.f32 %v1541_v36, %v1541_v36  ;;  %v279_v4 = vmul.f32 %v1546_v31, %v1546_v31  ;;  %v280_v8 = vmul.f32 %v1555_v0, %v1555_v0 }
  0x98   :  { %2313 = vst [vmem:[#allocation6_spill] sm:$0xff] %v1517_v14  ;;  %v1569_v49 = vsub.f32 %v2316_v54, %v1469_v13  ;;  %v1576_v52 = vsub.f32 %v2317_v17, %v1469_v13  ;;  %v281_v5 = vmul.f32 %v1562_v1, %v1562_v1  ;;  %v2318_v61 = vunpack.c.l.bf16 %v1231_v15 }
  0x99   :  { %2314 = vst [vmem:[#allocation7_spill] sm:$0xff] %v1520_v51  ;;  %v340_v6 = vadd.f32 %v277_v2, %v276_v42  ;;  %v1590_v42 = vsub.f32 %v2319_v38, %v1469_v13 }
  0x9a   :  { %2315 = vst [vmem:[#allocation8_spill] sm:$0xff] %v1523_v44  ;;  %v1583_v43 = vsub.f32 %v2318_v61, %v1469_v13  ;;  %v282_v19 = vmul.f32 %v1569_v49, %v1569_v49  ;;  %v283_v10 = vmul.f32 %v1576_v52, %v1576_v52 }
  0x9b   :  { %v341_v48 = vadd.f32 %v340_v6, %v278_v3  ;;  %v2320_v3 = vunpack.c.l.bf16 %v1242_v20  ;;  %v285_v15 = vmul.f32 %v1590_v42, %v1590_v42 }
  0x9c   :  { %v284_v6 = vmul.f32 %v1583_v43, %v1583_v43 }
  0x9d   :  { %v342_v11 = vadd.f32 %v341_v48, %v279_v4  ;;  %v1597_v4 = vsub.f32 %v2320_v3, %v1469_v13 }
  0x9f   :  { %v343_v12 = vadd.f32 %v342_v11, %v280_v8  ;;  %v2321_v8 = vunpack.c.h.bf16 %v1242_v20  ;;  %v286_v61 = vmul.f32 %v1597_v4, %v1597_v4 }
  0xa1   :  { %v344_v2 = vadd.f32 %v343_v12, %v281_v5  ;;  %v1604_v48 = vsub.f32 %v2321_v8, %v1469_v13  ;;  %v2322_v5 = vunpack.c.l.bf16 %v1253_v25 }
  0xa3   :  { %v345_v54 = vadd.f32 %v344_v2, %v282_v19  ;;  %v1611_v11 = vsub.f32 %v2322_v5, %v1469_v13  ;;  %v2323_v19 = vunpack.c.h.bf16 %v1253_v25  ;;  %v287_v20 = vmul.f32 %v1604_v48, %v1604_v48 }
  0xa5   :  { %v346_v17 = vadd.f32 %v345_v54, %v283_v10  ;;  %v1618_v38 = vsub.f32 %v2323_v19, %v1469_v13  ;;  %v2325_v10 = vunpack.c.l.bf16 %v1264_v30  ;;  %v288_v54 = vmul.f32 %v1611_v11, %v1611_v11 }
  0xa7   :  { %v347_v12 = vadd.f32 %v346_v17, %v284_v6  ;;  %2324 = vst [vmem:[#allocation9_spill] sm:$0xff] %v1618_v38  ;;  %v1625_v3 = vsub.f32 %v2325_v10, %v1469_v13  ;;  %v2326_v6 = vunpack.c.h.bf16 %v1264_v30  ;;  %v289_v25 = vmul.f32 %v1618_v38, %v1618_v38 }
  0xa9   :  { %v348_v2 = vadd.f32 %v347_v12, %v285_v15  ;;  %v1632_v17 = vsub.f32 %v2326_v6, %v1469_v13  ;;  %v2328_v15 = vunpack.c.l.bf16 %v1275_v35  ;;  %v290_v19 = vmul.f32 %v1625_v3, %v1625_v3 }
  0xab   :  { %v349_v8 = vadd.f32 %v348_v2, %v286_v61  ;;  %2327 = vst [vmem:[#allocation10_spill] sm:$0xff] %v1632_v17  ;;  %v1639_v12 = vsub.f32 %v2328_v15, %v1469_v13  ;;  %v2329_v61 = vunpack.c.h.bf16 %v1275_v35  ;;  %v291_v30 = vmul.f32 %v1632_v17, %v1632_v17 }
  0xad   :  { %v350_v5 = vadd.f32 %v349_v8, %v287_v20  ;;  %v1646_v2 = vsub.f32 %v2329_v61, %v1469_v13  ;;  %v2331_v20 = vunpack.c.l.bf16 %v1286_v40  ;;  %v292_v15 = vmul.f32 %v1639_v12, %v1639_v12 }
  0xaf   :  { %v351_v10 = vadd.f32 %v350_v5, %v288_v54  ;;  %2330 = vst [vmem:[#allocation11_spill] sm:$0xff] %v1646_v2  ;;  %v1653_v8 = vsub.f32 %v2331_v20, %v1469_v13  ;;  %v2332_v54 = vunpack.c.h.bf16 %v1286_v40  ;;  %v293_v35 = vmul.f32 %v1646_v2, %v1646_v2 }
  0xb1   :  { %v352_v6 = vadd.f32 %v351_v10, %v289_v25  ;;  %v1660_v5 = vsub.f32 %v2332_v54, %v1469_v13  ;;  %v2334_v25 = vunpack.c.l.bf16 %v1297_v45  ;;  %v294_v20 = vmul.f32 %v1653_v8, %v1653_v8 }
  0xb3   :  { %v353_v38 = vadd.f32 %v352_v6, %v290_v19  ;;  %2333 = vst [vmem:[#allocation12_spill] sm:$0xff] %v1660_v5  ;;  %v1667_v10 = vsub.f32 %v2334_v25, %v1469_v13  ;;  %v2335_v19 = vunpack.c.h.bf16 %v1297_v45  ;;  %v295_v40 = vmul.f32 %v1660_v5, %v1660_v5 }
  0xb5   :  { %v354_v61 = vadd.f32 %v353_v38, %v291_v30  ;;  %v1674_v6 = vsub.f32 %v2335_v19, %v1469_v13  ;;  %v2337_v38 = vunpack.c.l.bf16 %v1308_v50  ;;  %v296_v25 = vmul.f32 %v1667_v10, %v1667_v10 }
  0xb7   :  { %v355_v17 = vadd.f32 %v354_v61, %v292_v15  ;;  %2336 = vst [vmem:[#allocation13_spill] sm:$0xff] %v1674_v6  ;;  %v1681_v30 = vsub.f32 %v2337_v38, %v1469_v13  ;;  %v2338_v15 = vunpack.c.h.bf16 %v1308_v50  ;;  %v297_v45 = vmul.f32 %v1674_v6, %v1674_v6 }
  0xb9   :  { %v356_v54 = vadd.f32 %v355_v17, %v293_v35  ;;  %v1688_v61 = vsub.f32 %v2338_v15, %v1469_v13  ;;  %v2340_v17 = vunpack.c.l.bf16 %v1319_v55  ;;  %v298_v38 = vmul.f32 %v1681_v30, %v1681_v30 }
  0xbb   :  { %v357_v2 = vadd.f32 %v356_v54, %v294_v20  ;;  %2339 = vst [vmem:[#allocation14_spill] sm:$0xff] %v1688_v61  ;;  %v1695_v35 = vsub.f32 %v2340_v17, %v1469_v13  ;;  %v2341_v20 = vunpack.c.h.bf16 %v1319_v55  ;;  %v299_v50 = vmul.f32 %v1688_v61, %v1688_v61 }
  0xbd   :  { %v358_v19 = vadd.f32 %v357_v2, %v295_v40  ;;  %v1702_v54 = vsub.f32 %v2341_v20, %v1469_v13  ;;  %v2343_v2 = vunpack.c.l.bf16 %v1330_v60  ;;  %v300_v17 = vmul.f32 %v1695_v35, %v1695_v35 }
  0xbf   :  { %v359_v5 = vadd.f32 %v358_v19, %v296_v25  ;;  %2342 = vst [vmem:[#allocation15_spill] sm:$0xff] %v1702_v54  ;;  %v1709_v40 = vsub.f32 %v2343_v2, %v1469_v13  ;;  %v2344_v25 = vunpack.c.h.bf16 %v1330_v60  ;;  %v301_v55 = vmul.f32 %v1702_v54, %v1702_v54 }
  0xc1   :  { %v360_v15 = vadd.f32 %v359_v5, %v297_v45  ;;  %v1716_v19 = vsub.f32 %v2344_v25, %v1469_v13  ;;  %v2346_v5 = vunpack.c.l.bf16 %v1341_v9  ;;  %v302_v2 = vmul.f32 %v1709_v40, %v1709_v40 }
  0xc3   :  { %v361_v6 = vadd.f32 %v360_v15, %v298_v38  ;;  %2345 = vst [vmem:[#allocation16_spill] sm:$0xff] %v1716_v19  ;;  %v1723_v45 = vsub.f32 %v2346_v5, %v1469_v13  ;;  %v2347_v38 = vunpack.c.h.bf16 %v1341_v9  ;;  %v303_v60 = vmul.f32 %v1716_v19, %v1716_v19 }
  0xc5   :  { %v362_v20 = vadd.f32 %v361_v6, %v299_v50  ;;  %v1730_v15 = vsub.f32 %v2347_v38, %v1469_v13  ;;  %v2349_v6 = vunpack.c.l.bf16 %v1352_v22  ;;  %v304_v5 = vmul.f32 %v1723_v45, %v1723_v45 }
  0xc7   :  { %v363_v61 = vadd.f32 %v362_v20, %v300_v17  ;;  %2348 = vst [vmem:[#allocation17_spill] sm:$0xff] %v1730_v15  ;;  %v1737_v50 = vsub.f32 %v2349_v6, %v1469_v13  ;;  %v2350_v17 = vunpack.c.h.bf16 %v1352_v22  ;;  %v305_v9 = vmul.f32 %v1730_v15, %v1730_v15 }
  0xc9   :  { %v364_v25 = vadd.f32 %v363_v61, %v301_v55  ;;  %v1744_v20 = vsub.f32 %v2350_v17, %v1469_v13  ;;  %v2352_v61 = vunpack.c.l.bf16 %v1363_v34  ;;  %v306_v6 = vmul.f32 %v1737_v50, %v1737_v50 }
  0xcb   :  { %v365_v54 = vadd.f32 %v364_v25, %v302_v2  ;;  %2351 = vst [vmem:[#allocation18_spill] sm:$0xff] %v1744_v20  ;;  %v1751_v55 = vsub.f32 %v2352_v61, %v1469_v13  ;;  %v2353_v2 = vunpack.c.h.bf16 %v1363_v34  ;;  %v307_v22 = vmul.f32 %v1744_v20, %v1744_v20 }
  0xcd   :  { %v366_v38 = vadd.f32 %v365_v54, %v303_v60  ;;  %v1758_v25 = vsub.f32 %v2353_v2, %v1469_v13  ;;  %v2355_v54 = vunpack.c.l.bf16 %v1374_v47  ;;  %v308_v61 = vmul.f32 %v1751_v55, %v1751_v55 }
  0xcf   :  { %v367_v19 = vadd.f32 %v366_v38, %v304_v5  ;;  %2354 = vst [vmem:[#allocation19_spill] sm:$0xff] %v1758_v25  ;;  %v1765_v60 = vsub.f32 %v2355_v54, %v1469_v13  ;;  %v2356_v5 = vunpack.c.h.bf16 %v1374_v47  ;;  %v309_v34 = vmul.f32 %v1758_v25, %v1758_v25 }
  0xd1   :  { %v368_v17 = vadd.f32 %v367_v19, %v305_v9  ;;  %v1772_v38 = vsub.f32 %v2356_v5, %v1469_v13  ;;  %v2358_v19 = vunpack.c.l.bf16 %v1385_v59  ;;  %v310_v54 = vmul.f32 %v1765_v60, %v1765_v60 }
  0xd3   :  { %v369_v15 = vadd.f32 %v368_v17, %v306_v6  ;;  %2357 = vst [vmem:[#allocation20_spill] sm:$0xff] %v1772_v38  ;;  %v1779_v9 = vsub.f32 %v2358_v19, %v1469_v13  ;;  %v2359_v6 = vunpack.c.h.bf16 %v1385_v59  ;;  %v311_v47 = vmul.f32 %v1772_v38, %v1772_v38 }
  0xd5   :  { %v370_v2 = vadd.f32 %v369_v15, %v307_v22  ;;  %v1786_v17 = vsub.f32 %v2359_v6, %v1469_v13  ;;  %v2361_v15 = vunpack.c.l.bf16 %v1396_v27  ;;  %v312_v19 = vmul.f32 %v1779_v9, %v1779_v9 }
  0xd7   :  { %v371_v20 = vadd.f32 %v370_v2, %v308_v61  ;;  %2360 = vst [vmem:[#allocation21_spill] sm:$0xff] %v1786_v17  ;;  %v1793_v22 = vsub.f32 %v2361_v15, %v1469_v13  ;;  %v2362_v61 = vunpack.c.h.bf16 %v1396_v27  ;;  %v313_v59 = vmul.f32 %v1786_v17, %v1786_v17 }
  0xd9   :  { %v372_v5 = vadd.f32 %v371_v20, %v309_v34  ;;  %v1800_v2 = vsub.f32 %v2362_v61, %v1469_v13  ;;  %v2364_v20 = vunpack.c.l.bf16 %v1407_v57  ;;  %v314_v15 = vmul.f32 %v1793_v22, %v1793_v22 }
  0xdb   :  { %v373_v25 = vadd.f32 %v372_v5, %v310_v54  ;;  %2363 = vst [vmem:[#allocation22_spill] sm:$0xff] %v1800_v2  ;;  %v1807_v34 = vsub.f32 %v2364_v20, %v1469_v13  ;;  %v2365_v54 = vunpack.c.h.bf16 %v1407_v57  ;;  %v315_v27 = vmul.f32 %v1800_v2, %v1800_v2 }
  0xdd   :  { %v374_v6 = vadd.f32 %v373_v25, %v311_v47  ;;  %v1814_v5 = vsub.f32 %v2365_v54, %v1469_v13  ;;  %v2366_v25 = vunpack.c.l.bf16 %v1418_v62  ;;  %v316_v20 = vmul.f32 %v1807_v34, %v1807_v34 }
  0xdf   :  { %v375_v38 = vadd.f32 %v374_v6, %v312_v19  ;;  %v1821_v47 = vsub.f32 %v2366_v25, %v1469_v13  ;;  %v2367_v19 = vunpack.c.h.bf16 %v1418_v62  ;;  %v317_v57 = vmul.f32 %v1814_v5, %v1814_v5 }
  0xe1   :  { %v376_v61 = vadd.f32 %v375_v38, %v313_v59  ;;  %v1828_v6 = vsub.f32 %v2367_v19, %v1469_v13  ;;  %v2368_v38 = vunpack.c.l.bf16 %v1429_v32  ;;  %v318_v25 = vmul.f32 %v1821_v47, %v1821_v47 }
  0xe3   :  { %v377_v17 = vadd.f32 %v376_v61, %v314_v15  ;;  %v1835_v59 = vsub.f32 %v2368_v38, %v1469_v13  ;;  %v319_v15 = vmul.f32 %v1828_v6, %v1828_v6  ;;  %v322_v13 = vmul.f32 %v1475_v53, %v1475_v53 }
  0xe4   :  { %v323_v38 = vmul.f32 %v1478_v33, %v1478_v33 }
  0xe5   :  { %v378_v54 = vadd.f32 %v377_v17, %v315_v27  ;;  %v320_v62 = vmul.f32 %v1835_v59, %v1835_v59  ;;  %v321_v17 = vmul.f32 %v1472_v7, %v1472_v7 }
  0xe7   :  { %v379_v2 = vadd.f32 %v378_v54, %v316_v20  ;;  %v324_v54 = vmul.f32 %v1481_v28, %v1481_v28 }
  0xe9   :  { %v380_v61 = vadd.f32 %v379_v2, %v317_v57  ;;  %v325_v57 = vmul.f32 %v1484_v23, %v1484_v23 }
  0xeb   :  { %v381_v19 = vadd.f32 %v380_v61, %v318_v25  ;;  %v326_v61 = vmul.f32 %v1487_v18, %v1487_v18 }
  0xed   :  { %v382_v27 = vadd.f32 %v381_v19, %v319_v15  ;;  %v327_v19 = vmul.f32 %v1490_v16, %v1490_v16 }
  0xef   :  { %v383_v32 = vadd.f32 %v382_v27, %v320_v62  ;;  %v328_v27 = vmul.f32 %v1493_v21, %v1493_v21 }
  0xf1   :  { %v384_v20 = vadd.f32 %v383_v32, %v321_v17  ;;  %v329_v32 = vmul.f32 %v1496_v26, %v1496_v26 }
  0xf3   :  { %v385_v2 = vadd.f32 %v384_v20, %v322_v13  ;;  %v330_v20 = vmul.f32 %v1499_v29, %v1499_v29 }
  0xf5   :  { %v386_v25 = vadd.f32 %v385_v2, %v323_v38  ;;  %v331_v2 = vmul.f32 %v1502_v39, %v1502_v39 }
  0xf7   :  { %v387_v15 = vadd.f32 %v386_v25, %v324_v54  ;;  %v332_v25 = vmul.f32 %v1505_v63, %v1505_v63 }
  0xf9   :  { %v388_v62 = vadd.f32 %v387_v15, %v325_v57  ;;  %v333_v15 = vmul.f32 %v1508_v58, %v1508_v58 }
  0xfb   :  { %v389_v17 = vadd.f32 %v388_v62, %v326_v61  ;;  %v334_v62 = vmul.f32 %v1511_v37, %v1511_v37 }
  0xfd   :  { %v390_v13 = vadd.f32 %v389_v17, %v327_v19  ;;  %v335_v17 = vmul.f32 %v1514_v56, %v1514_v56 }
  0xff   :  { %v391_v38 = vadd.f32 %v390_v13, %v328_v27  ;;  %v336_v13 = vmul.f32 %v1517_v14, %v1517_v14 }
 0x101   :  { %v392_v54 = vadd.f32 %v391_v38, %v329_v32  ;;  %v337_v38 = vmul.f32 %v1520_v51, %v1520_v51 }
 0x103   :  { %v393_v57 = vadd.f32 %v392_v54, %v330_v20  ;;  %v338_v54 = vmul.f32 %v1523_v44, %v1523_v44 }
 0x105   :  { %v394_v61 = vadd.f32 %v393_v57, %v331_v2  ;;  %v339_v57 = vmul.f32 %v1526_v46, %v1526_v46 }
 0x107   :  { %v395_v19 = vadd.f32 %v394_v61, %v332_v25 }
 0x109   :  { %v396_v27 = vadd.f32 %v395_v19, %v333_v15 }
 0x10b   :  { %v397_v32 = vadd.f32 %v396_v27, %v334_v62 }
 0x10d   :  { %v398_v20 = vadd.f32 %v397_v32, %v335_v17 }
 0x10f   :  { %v399_v2 = vadd.f32 %v398_v20, %v336_v13 }
 0x111   :  { %v400_v25 = vadd.f32 %v399_v2, %v337_v38 }
 0x113   :  { %v401_v61 = vadd.f32 %v400_v25, %v338_v54 }
 0x115   :  { %v402_v37 = vadd.f32 %v401_v61, %v339_v57 }
 0x117   :  { %v403_v56 = vrot.slane %v402_v37, 4 }
 0x119   :  { %v404_v15 = vadd.f32 %v403_v56, %v402_v37  ;;  %v1884_v37 = vld [vmem:[%s2246_s1] ss:$0 sm:$0xff] }
 0x11b   :  { %v405_v19 = vrot.slane %v404_v15, 2 }
 0x11d   :  { %v406_v58 = vadd.f32 %v405_v19, %v404_v15 }
 0x11f   :  { %v407_v14 = vrot.slane %v406_v58, 1 }
 0x121   :  { %v408_v62 = vadd.f32 %v407_v14, %v406_v58 }
 0x123   :  { %v409_v27 = vmul.f32 0.001953125, %v408_v62 }
 0x125   :  { %v410_v63 = vadd.f32 1e-05, %v409_v27 }
 0x127   :  { %1169 = vrsqrt.f32 %v410_v63  ;;  %vm417_vm0 = vweird.f32 %v410_v63 }
 0x12d   :  { %v1170_v17 = vpop.eup %1169 }
 0x12e   :  { %v412_v32 = vmul.f32 %v1170_v17, %v410_v63  ;;  %vm418_vm1 = vweird.f32 %v1170_v17  ;;  %v1895_v63 = vld [vmem:[%s2247_s2] ss:$0 sm:$0xff] }
 0x12f   :  { %vm419_vm2 = vmor %vm417_vm0, %vm418_vm1 }
 0x130   :  { %v413_v51 = vmul.f32 %v1170_v17, %v412_v32 }
 0x132   :  { %v414_v44 = vmul.f32 0.5, %v413_v51 }
 0x134   :  { %v415_v13 = vsub.f32 1.5, %v414_v44 }
 0x136   :  { %v416_v38 = vmul.f32 %v1170_v17, %v415_v13 }
 0x138   :  { %v1886_v56 = vsel %vm419_vm2, %v1170_v17, %v416_v38 }
 0x139   :  { %v421_v58 = vmul.f32 %v1886_v56, %v1531_v41  ;;  %v422_v14 = vmul.f32 %v1886_v56, %v1536_v24  ;;  %v423_v51 = vmul.f32 %v1886_v56, %v1541_v36  ;;  %v424_v44 = vmul.f32 %v1886_v56, %v1546_v31 }
 0x13a   :  { %v425_v20 = vmul.f32 %v1886_v56, %v1555_v0  ;;  %v426_v41 = vmul.f32 %v1886_v56, %v1562_v1  ;;  %v427_v24 = vmul.f32 %v1886_v56, %v1569_v49  ;;  %v428_v54 = vmul.f32 %v1886_v56, %v1576_v52 }
 0x13b   :  { %v489_v2 = vmul.f32 %v1884_v37, %v421_v58  ;;  %v490_v57 = vmul.f32 %v1884_v37, %v422_v14  ;;  %v491_v36 = vmul.f32 %v1884_v37, %v423_v51  ;;  %v492_v31 = vmul.f32 %v1884_v37, %v424_v44 }
 0x13c   :  { %v493_v25 = vmul.f32 %v1884_v37, %v425_v20  ;;  %v494_v0 = vmul.f32 %v1884_v37, %v426_v41  ;;  %v495_v1 = vmul.f32 %v1884_v37, %v427_v24  ;;  %v496_v61 = vmul.f32 %v1884_v37, %v428_v54 }
 0x13d   :  { %v557_v49 = vadd.f32 %v1895_v63, %v489_v2  ;;  %v558_v52 = vadd.f32 %v1895_v63, %v490_v57  ;;  %v559_v15 = vadd.f32 %v1895_v63, %v491_v36  ;;  %v560_v19 = vadd.f32 %v1895_v63, %v492_v31 }
 0x13e   :  { %v561_v62 = vadd.f32 %v1895_v63, %v493_v25  ;;  %v562_v27 = vadd.f32 %v1895_v63, %v494_v0  ;;  %v563_v17 = vadd.f32 %v1895_v63, %v495_v1  ;;  %v564_v32 = vadd.f32 %v1895_v63, %v496_v61 }
 0x13f   :  { %v621_v13 = vmax.f32 %v557_v49, 0.0  ;;  %v622_v38 = vmax.f32 %v558_v52, 0.0  ;;  %v623_v58 = vmax.f32 %v559_v15, 0.0  ;;  %v624_v14 = vmax.f32 %v560_v19, 0.0  ;;  %v2370_v15 = vld [vmem:[#allocation10_spill] sm:$0xff] }
 0x140   :  { %v625_v51 = vmax.f32 %v561_v62, 0.0  ;;  %v626_v44 = vmax.f32 %v562_v27, 0.0  ;;  %v627_v20 = vmax.f32 %v563_v17, 0.0  ;;  %v628_v41 = vmax.f32 %v564_v32, 0.0 }
 0x141   :  { %v948_v24 = vpack.c.bf16 %v622_v38, %v621_v13  ;;  %v953_v54 = vpack.c.bf16 %v624_v14, %v623_v58  ;;  %v429_v2 = vmul.f32 %v1886_v56, %v1583_v43  ;;  %v430_v57 = vmul.f32 %v1886_v56, %v1590_v42  ;;  %v2369_v42 = vld [vmem:[#allocation9_spill] sm:$0xff] }
 0x142   :  { %v958_v36 = vpack.c.bf16 %v626_v44, %v625_v51  ;;  %v963_v31 = vpack.c.bf16 %v628_v41, %v627_v20  ;;  %v431_v25 = vmul.f32 %v1886_v56, %v1597_v4  ;;  %v432_v0 = vmul.f32 %v1886_v56, %v1604_v48 }
 0x143   :  { %949 = vst [vmem:[%s2248_s3] sm:$0xff] %v948_v24   ;;  %v497_v1 = vmul.f32 %v1884_v37, %v429_v2  ;;  %v498_v61 = vmul.f32 %v1884_v37, %v430_v57  ;;  %v433_v43 = vmul.f32 %v1886_v56, %v1611_v11  ;;  %v434_v49 = vmul.f32 %v1886_v56, %v2369_v42 }
 0x144   :  { %1136 = vst [vmem:[%s2248_s3 + $0x8] sm:$0xff] %v953_v54   ;;  %v499_v4 = vmul.f32 %v1884_v37, %v431_v25  ;;  %v500_v48 = vmul.f32 %v1884_v37, %v432_v0  ;;  %v435_v52 = vmul.f32 %v1886_v56, %v1625_v3  ;;  %v436_v19 = vmul.f32 %v1886_v56, %v2370_v15 }
 0x145   :  { %1137 = vst [vmem:[%s2248_s3 + $0x10] sm:$0xff] %v958_v36   ;;  %v565_v11 = vadd.f32 %v1895_v63, %v497_v1  ;;  %v566_v62 = vadd.f32 %v1895_v63, %v498_v61  ;;  %v501_v27 = vmul.f32 %v1884_v37, %v433_v43  ;;  %v502_v17 = vmul.f32 %v1884_v37, %v434_v49  ;;  %v2371_v61 = vld [vmem:[#allocation11_spill] sm:$0xff] }
 0x146   :  { %1138 = vst [vmem:[%s2248_s3 + $0x18] sm:$0xff] %v963_v31   ;;  %v567_v3 = vadd.f32 %v1895_v63, %v499_v4  ;;  %v568_v32 = vadd.f32 %v1895_v63, %v500_v48  ;;  %v503_v13 = vmul.f32 %v1884_v37, %v435_v52  ;;  %v504_v38 = vmul.f32 %v1884_v37, %v436_v19  ;;  %v2372_v48 = vld [vmem:[#allocation12_spill] sm:$0xff] }
 0x147   :  { %v629_v58 = vmax.f32 %v565_v11, 0.0  ;;  %v630_v14 = vmax.f32 %v566_v62, 0.0  ;;  %v569_v51 = vadd.f32 %v1895_v63, %v501_v27  ;;  %v570_v44 = vadd.f32 %v1895_v63, %v502_v17  ;;  %v2373_v11 = vld [vmem:[#allocation13_spill] sm:$0xff] }
 0x148   :  { %v631_v20 = vmax.f32 %v567_v3, 0.0  ;;  %v632_v41 = vmax.f32 %v568_v32, 0.0  ;;  %v571_v24 = vadd.f32 %v1895_v63, %v503_v13  ;;  %v572_v54 = vadd.f32 %v1895_v63, %v504_v38  ;;  %v2374_v38 = vld [vmem:[#allocation14_spill] sm:$0xff] }
 0x149   :  { %v968_v2 = vpack.c.bf16 %v630_v14, %v629_v58  ;;  %v633_v57 = vmax.f32 %v569_v51, 0.0  ;;  %v634_v36 = vmax.f32 %v570_v44, 0.0  ;;  %v437_v31 = vmul.f32 %v1886_v56, %v1639_v12 }
 0x14a   :  { %v973_v25 = vpack.c.bf16 %v632_v41, %v631_v20  ;;  %v635_v0 = vmax.f32 %v571_v24, 0.0  ;;  %v636_v1 = vmax.f32 %v572_v54, 0.0  ;;  %v438_v43 = vmul.f32 %v1886_v56, %v2371_v61 }
 0x14b   :  { %1139 = vst [vmem:[%s2248_s3 + $0x20] sm:$0xff] %v968_v2   ;;  %v978_v42 = vpack.c.bf16 %v634_v36, %v633_v57  ;;  %v505_v49 = vmul.f32 %v1884_v37, %v437_v31  ;;  %v439_v4 = vmul.f32 %v1886_v56, %v1653_v8  ;;  %v440_v52 = vmul.f32 %v1886_v56, %v2372_v48 }
 0x14c   :  { %1140 = vst [vmem:[%s2248_s3 + $0x28] sm:$0xff] %v973_v25   ;;  %v983_v12 = vpack.c.bf16 %v636_v1, %v635_v0  ;;  %v506_v15 = vmul.f32 %v1884_v37, %v438_v43  ;;  %v441_v19 = vmul.f32 %v1886_v56, %v1667_v10  ;;  %v442_v62 = vmul.f32 %v1886_v56, %v2373_v11 }
 0x14d   :  { %1141 = vst [vmem:[%s2248_s3 + $0x30] sm:$0xff] %v978_v42   ;;  %v573_v8 = vadd.f32 %v1895_v63, %v505_v49  ;;  %v507_v27 = vmul.f32 %v1884_v37, %v439_v4  ;;  %v508_v17 = vmul.f32 %v1884_v37, %v440_v52  ;;  %v443_v3 = vmul.f32 %v1886_v56, %v1681_v30  ;;  %v2375_v49 = vld [vmem:[#allocation15_spill] sm:$0xff] }
 0x14e   :  { %1142 = vst [vmem:[%s2248_s3 + $0x38] sm:$0xff] %v983_v12   ;;  %v574_v10 = vadd.f32 %v1895_v63, %v506_v15  ;;  %v509_v32 = vmul.f32 %v1884_v37, %v441_v19  ;;  %v510_v13 = vmul.f32 %v1884_v37, %v442_v62  ;;  %v444_v58 = vmul.f32 %v1886_v56, %v2374_v38  ;;  %v2376_v15 = vld [vmem:[#allocation16_spill] sm:$0xff] }
 0x14f   :  { %v637_v14 = vmax.f32 %v573_v8, 0.0  ;;  %v575_v51 = vadd.f32 %v1895_v63, %v507_v27  ;;  %v576_v44 = vadd.f32 %v1895_v63, %v508_v17  ;;  %v511_v30 = vmul.f32 %v1884_v37, %v443_v3  ;;  %v2377_v27 = vld [vmem:[#allocation17_spill] sm:$0xff] }
 0x150   :  { %v638_v20 = vmax.f32 %v574_v10, 0.0  ;;  %v577_v41 = vadd.f32 %v1895_v63, %v509_v32  ;;  %v578_v24 = vadd.f32 %v1895_v63, %v510_v13  ;;  %v512_v54 = vmul.f32 %v1884_v37, %v444_v58 }
 0x151   :  { %v639_v2 = vmax.f32 %v575_v51, 0.0  ;;  %v640_v57 = vmax.f32 %v576_v44, 0.0  ;;  %v579_v36 = vadd.f32 %v1895_v63, %v511_v30  ;;  %v445_v31 = vmul.f32 %v1886_v56, %v1695_v35  ;;  %v2378_v44 = vld [vmem:[#allocation18_spill] sm:$0xff] }
 0x152   :  { %v988_v25 = vpack.c.bf16 %v638_v20, %v637_v14  ;;  %v641_v0 = vmax.f32 %v577_v41, 0.0  ;;  %v642_v1 = vmax.f32 %v578_v24, 0.0  ;;  %v580_v61 = vadd.f32 %v1895_v63, %v512_v54 }
 0x153   :  { %v993_v43 = vpack.c.bf16 %v640_v57, %v639_v2  ;;  %v643_v42 = vmax.f32 %v579_v36, 0.0  ;;  %v446_v4 = vmul.f32 %v1886_v56, %v2375_v49  ;;  %v513_v48 = vmul.f32 %v1884_v37, %v445_v31 }
 0x154   :  { %1143 = vst [vmem:[%s2248_s3 + $0x40] sm:$0xff] %v988_v25   ;;  %v998_v52 = vpack.c.bf16 %v642_v1, %v641_v0  ;;  %v644_v12 = vmax.f32 %v580_v61, 0.0  ;;  %v447_v35 = vmul.f32 %v1886_v56, %v1709_v40  ;;  %v448_v19 = vmul.f32 %v1886_v56, %v2376_v15  ;;  %v2379_v61 = vld [vmem:[#allocation19_spill] sm:$0xff] }
 0x155   :  { %1144 = vst [vmem:[%s2248_s3 + $0x48] sm:$0xff] %v993_v43   ;;  %v514_v11 = vmul.f32 %v1884_v37, %v446_v4  ;;  %v581_v62 = vadd.f32 %v1895_v63, %v513_v48  ;;  %v449_v8 = vmul.f32 %v1886_v56, %v1723_v45  ;;  %v450_v17 = vmul.f32 %v1886_v56, %v2377_v27 }
 0x156   :  { %1145 = vst [vmem:[%s2248_s3 + $0x50] sm:$0xff] %v998_v52   ;;  %v1003_v40 = vpack.c.bf16 %v644_v12, %v643_v42  ;;  %v515_v3 = vmul.f32 %v1884_v37, %v447_v35  ;;  %v516_v10 = vmul.f32 %v1884_v37, %v448_v19  ;;  %v451_v32 = vmul.f32 %v1886_v56, %v1737_v50  ;;  %v2380_v35 = vld [vmem:[#allocation20_spill] sm:$0xff] }
 0x157   :  { %v582_v13 = vadd.f32 %v1895_v63, %v514_v11  ;;  %v645_v38 = vmax.f32 %v581_v62, 0.0  ;;  %v517_v45 = vmul.f32 %v1884_v37, %v449_v8  ;;  %v518_v58 = vmul.f32 %v1884_v37, %v450_v17  ;;  %v2381_v8 = vld [vmem:[#allocation21_spill] sm:$0xff] }
 0x158   :  { %1146 = vst [vmem:[%s2248_s3 + $0x58] sm:$0xff] %v1003_v40   ;;  %v583_v14 = vadd.f32 %v1895_v63, %v515_v3  ;;  %v584_v51 = vadd.f32 %v1895_v63, %v516_v10  ;;  %v452_v30 = vmul.f32 %v1886_v56, %v2378_v44  ;;  %v519_v50 = vmul.f32 %v1884_v37, %v451_v32 }
 0x159   :  { %v646_v20 = vmax.f32 %v582_v13, 0.0  ;;  %v585_v41 = vadd.f32 %v1895_v63, %v517_v45  ;;  %v586_v24 = vadd.f32 %v1895_v63, %v518_v58  ;;  %v453_v54 = vmul.f32 %v1886_v56, %v1751_v55 }
 0x15a   :  { %v647_v2 = vmax.f32 %v583_v14, 0.0  ;;  %v648_v57 = vmax.f32 %v584_v51, 0.0  ;;  %v520_v36 = vmul.f32 %v1884_v37, %v452_v30  ;;  %v587_v31 = vadd.f32 %v1895_v63, %v519_v50  ;;  %v2382_v14 = vld [vmem:[#allocation22_spill] sm:$0xff] }
 0x15b   :  { %v1008_v25 = vpack.c.bf16 %v646_v20, %v645_v38  ;;  %v649_v0 = vmax.f32 %v585_v41, 0.0  ;;  %v650_v1 = vmax.f32 %v586_v24, 0.0  ;;  %v454_v43 = vmul.f32 %v1886_v56, %v2379_v61 }
 0x15c   :  { %v1013_v42 = vpack.c.bf16 %v648_v57, %v647_v2  ;;  %v588_v49 = vadd.f32 %v1895_v63, %v520_v36  ;;  %v651_v4 = vmax.f32 %v587_v31, 0.0  ;;  %v521_v48 = vmul.f32 %v1884_v37, %v453_v54 }
 0x15d   :  { %1147 = vst [vmem:[%s2248_s3 + $0x60] sm:$0xff] %v1008_v25   ;;  %v1018_v55 = vpack.c.bf16 %v650_v1, %v649_v0  ;;  %v522_v52 = vmul.f32 %v1884_v37, %v454_v43  ;;  %v455_v12 = vmul.f32 %v1886_v56, %v1765_v60  ;;  %v456_v15 = vmul.f32 %v1886_v56, %v2380_v35 }
 0x15e   :  { %1148 = vst [vmem:[%s2248_s3 + $0x68] sm:$0xff] %v1013_v42   ;;  %v652_v19 = vmax.f32 %v588_v49, 0.0  ;;  %v589_v11 = vadd.f32 %v1895_v63, %v521_v48  ;;  %v457_v62 = vmul.f32 %v1886_v56, %v1779_v9  ;;  %v458_v27 = vmul.f32 %v1886_v56, %v2381_v8 }
 0x15f   :  { %1149 = vst [vmem:[%s2248_s3 + $0x70] sm:$0xff] %v1018_v55   ;;  %v590_v60 = vadd.f32 %v1895_v63, %v522_v52  ;;  %v523_v17 = vmul.f32 %v1884_v37, %v455_v12  ;;  %v524_v40 = vmul.f32 %v1884_v37, %v456_v15  ;;  %v459_v3 = vmul.f32 %v1886_v56, %v1793_v22 }
 0x160   :  { %v1023_v10 = vpack.c.bf16 %v652_v19, %v651_v4  ;;  %v653_v32 = vmax.f32 %v589_v11, 0.0  ;;  %v525_v9 = vmul.f32 %v1884_v37, %v457_v62  ;;  %v526_v13 = vmul.f32 %v1884_v37, %v458_v27 }
 0x161   :  { %v654_v38 = vmax.f32 %v590_v60, 0.0  ;;  %v591_v45 = vadd.f32 %v1895_v63, %v523_v17  ;;  %v592_v58 = vadd.f32 %v1895_v63, %v524_v40  ;;  %v460_v51 = vmul.f32 %v1886_v56, %v2382_v14 }
 0x162   :  { %1150 = vst [vmem:[%s2248_s3 + $0x78] sm:$0xff] %v1023_v10   ;;  %v593_v22 = vadd.f32 %v1895_v63, %v525_v9  ;;  %v594_v44 = vadd.f32 %v1895_v63, %v526_v13  ;;  %v527_v30 = vmul.f32 %v1884_v37, %v459_v3  ;;  %v461_v50 = vmul.f32 %v1886_v56, %v1807_v34 }
 0x163   :  { %v1028_v20 = vpack.c.bf16 %v654_v38, %v653_v32  ;;  %v655_v41 = vmax.f32 %v591_v45, 0.0  ;;  %v656_v24 = vmax.f32 %v592_v58, 0.0  ;;  %v528_v54 = vmul.f32 %v1884_v37, %v460_v51 }
 0x164   :  { %v657_v2 = vmax.f32 %v593_v22, 0.0  ;;  %v658_v57 = vmax.f32 %v594_v44, 0.0  ;;  %v595_v36 = vadd.f32 %v1895_v63, %v527_v30  ;;  %v462_v31 = vmul.f32 %v1886_v56, %v1814_v5 }
 0x165   :  { %1151 = vst [vmem:[%s2248_s3 + $0x80] sm:$0xff] %v1028_v20   ;;  %v1033_v25 = vpack.c.bf16 %v656_v24, %v655_v41  ;;  %v596_v0 = vadd.f32 %v1895_v63, %v528_v54  ;;  %v529_v34 = vmul.f32 %v1884_v37, %v461_v50  ;;  %v463_v1 = vmul.f32 %v1886_v56, %v1821_v47 }
 0x166   :  { %v1038_v61 = vpack.c.bf16 %v658_v57, %v657_v2  ;;  %v659_v43 = vmax.f32 %v595_v36, 0.0  ;;  %v530_v42 = vmul.f32 %v1884_v37, %v462_v31  ;;  %v464_v49 = vmul.f32 %v1886_v56, %v1828_v6 }
 0x167   :  { %1152 = vst [vmem:[%s2248_s3 + $0x88] sm:$0xff] %v1033_v25   ;;  %v660_v5 = vmax.f32 %v596_v0, 0.0  ;;  %v597_v4 = vadd.f32 %v1895_v63, %v529_v34  ;;  %v531_v48 = vmul.f32 %v1884_v37, %v463_v1  ;;  %v465_v55 = vmul.f32 %v1886_v56, %v1835_v59 }
 0x168   :  { %1153 = vst [vmem:[%s2248_s3 + $0x90] sm:$0xff] %v1038_v61   ;;  %v598_v47 = vadd.f32 %v1895_v63, %v530_v42  ;;  %v532_v6 = vmul.f32 %v1884_v37, %v464_v49  ;;  %v466_v52 = vmul.f32 %v1886_v56, %v1472_v7  ;;  %v467_v12 = vmul.f32 %v1886_v56, %v1475_v53 }
 0x169   :  { %v1043_v35 = vpack.c.bf16 %v660_v5, %v659_v43  ;;  %v661_v15 = vmax.f32 %v597_v4, 0.0  ;;  %v599_v19 = vadd.f32 %v1895_v63, %v531_v48  ;;  %v533_v59 = vmul.f32 %v1884_v37, %v465_v55  ;;  %v2383_v43 = vld [vmem:[#allocation2_spill] sm:$0xff]  ;;  %v2384_v55 = vld [vmem:[#allocation3_spill] sm:$0xff] }
 0x16a   :  { %v662_v11 = vmax.f32 %v598_v47, 0.0  ;;  %v600_v62 = vadd.f32 %v1895_v63, %v532_v6  ;;  %v534_v8 = vmul.f32 %v1884_v37, %v466_v52  ;;  %v468_v27 = vmul.f32 %v1886_v56, %v1478_v33 }
 0x16b   :  { %1154 = vst [vmem:[%s2248_s3 + $0x98] sm:$0xff] %v1043_v35   ;;  %v663_v7 = vmax.f32 %v599_v19, 0.0  ;;  %v601_v53 = vadd.f32 %v1895_v63, %v533_v59  ;;  %v535_v60 = vmul.f32 %v1884_v37, %v467_v12  ;;  %v469_v17 = vmul.f32 %v1886_v56, %v1481_v28 }
 0x16c   :  { %v1048_v40 = vpack.c.bf16 %v662_v11, %v661_v15  ;;  %v664_v3 = vmax.f32 %v600_v62, 0.0  ;;  %v602_v10 = vadd.f32 %v1895_v63, %v534_v8  ;;  %v536_v32 = vmul.f32 %v1884_v37, %v468_v27  ;;  %v2385_v15 = vld [vmem:[#allocation4_spill] sm:$0xff]  ;;  %v2386_v8 = vld [vmem:[#allocation5_spill] sm:$0xff] }
 0x16d   :  { %v665_v9 = vmax.f32 %v601_v53, 0.0  ;;  %v603_v33 = vadd.f32 %v1895_v63, %v535_v60  ;;  %v470_v13 = vmul.f32 %v1886_v56, %v1484_v23  ;;  %v537_v38 = vmul.f32 %v1884_v37, %v469_v17  ;;  %v2387_v17 = vld [vmem:[#allocation6_spill] sm:$0xff] }
 0x16e   :  { %1155 = vst [vmem:[%s2248_s3 + $0xa0] sm:$0xff] %v1048_v40   ;;  %v1053_v45 = vpack.c.bf16 %v664_v3, %v663_v7  ;;  %v666_v28 = vmax.f32 %v602_v10, 0.0  ;;  %v604_v58 = vadd.f32 %v1895_v63, %v536_v32  ;;  %v471_v14 = vmul.f32 %v1886_v56, %v1487_v18 }
 0x16f   :  { %v667_v51 = vmax.f32 %v603_v33, 0.0  ;;  %v538_v22 = vmul.f32 %v1884_v37, %v470_v13  ;;  %v605_v44 = vadd.f32 %v1895_v63, %v537_v38  ;;  %v472_v23 = vmul.f32 %v1886_v56, %v1490_v16 }
 0x170   :  { %1156 = vst [vmem:[%s2248_s3 + $0xa8] sm:$0xff] %v1053_v45   ;;  %v1058_v30 = vpack.c.bf16 %v666_v28, %v665_v9  ;;  %v668_v50 = vmax.f32 %v604_v58, 0.0  ;;  %v539_v20 = vmul.f32 %v1884_v37, %v471_v14  ;;  %v473_v41 = vmul.f32 %v1886_v56, %v1493_v21  ;;  %v2388_v9 = vld [vmem:[#allocation7_spill] sm:$0xff]  ;;  %v2389_v28 = vld [vmem:[#allocation8_spill] sm:$0xff] }
 0x171   :  { %v606_v18 = vadd.f32 %v1895_v63, %v538_v22  ;;  %v669_v24 = vmax.f32 %v605_v44, 0.0  ;;  %v540_v54 = vmul.f32 %v1884_v37, %v472_v23  ;;  %v474_v2 = vmul.f32 %v1886_v56, %v1496_v26 }
 0x172   :  { %1157 = vst [vmem:[%s2248_s3 + $0xb0] sm:$0xff] %v1058_v30   ;;  %v1063_v16 = vpack.c.bf16 %v668_v50, %v667_v51  ;;  %v607_v57 = vadd.f32 %v1895_v63, %v539_v20  ;;  %v541_v36 = vmul.f32 %v1884_v37, %v473_v41  ;;  %v475_v21 = vmul.f32 %v1886_v56, %v1499_v29 }
 0x173   :  { %v670_v31 = vmax.f32 %v606_v18, 0.0  ;;  %v608_v25 = vadd.f32 %v1895_v63, %v540_v54  ;;  %v542_v0 = vmul.f32 %v1884_v37, %v474_v2  ;;  %v476_v26 = vmul.f32 %v1886_v56, %v1502_v39 }
 0x174   :  { %1158 = vst [vmem:[%s2248_s3 + $0xb8] sm:$0xff] %v1063_v16   ;;  %v671_v34 = vmax.f32 %v607_v57, 0.0  ;;  %v609_v1 = vadd.f32 %v1895_v63, %v541_v36  ;;  %v543_v61 = vmul.f32 %v1884_v37, %v475_v21  ;;  %v477_v29 = vmul.f32 %v1886_v56, %v2383_v43 }
 0x175   :  { %v1068_v42 = vpack.c.bf16 %v670_v31, %v669_v24  ;;  %v672_v49 = vmax.f32 %v608_v25, 0.0  ;;  %v610_v5 = vadd.f32 %v1895_v63, %v542_v0  ;;  %v544_v4 = vmul.f32 %v1884_v37, %v476_v26 }
 0x176   :  { %v673_v48 = vmax.f32 %v609_v1, 0.0  ;;  %v611_v39 = vadd.f32 %v1895_v63, %v543_v61  ;;  %v478_v47 = vmul.f32 %v1886_v56, %v2384_v55  ;;  %v545_v6 = vmul.f32 %v1884_v37, %v477_v29 }
 0x177   :  { %1159 = vst [vmem:[%s2248_s3 + $0xc0] sm:$0xff] %v1068_v42   ;;  %v1073_v52 = vpack.c.bf16 %v672_v49, %v671_v34  ;;  %v674_v12 = vmax.f32 %v610_v5, 0.0  ;;  %v612_v35 = vadd.f32 %v1895_v63, %v544_v4  ;;  %v479_v19 = vmul.f32 %v1886_v56, %v2385_v15 }
 0x178   :  { %v675_v59 = vmax.f32 %v611_v39, 0.0  ;;  %v546_v11 = vmul.f32 %v1884_v37, %v478_v47  ;;  %v613_v62 = vadd.f32 %v1895_v63, %v545_v6  ;;  %v480_v27 = vmul.f32 %v1886_v56, %v2386_v8 }
 0x179   :  { %1160 = vst [vmem:[%s2248_s3 + $0xc8] sm:$0xff] %v1073_v52   ;;  %v1078_v7 = vpack.c.bf16 %v674_v12, %v673_v48  ;;  %v676_v53 = vmax.f32 %v612_v35, 0.0  ;;  %v547_v60 = vmul.f32 %v1884_v37, %v479_v19  ;;  %v481_v40 = vmul.f32 %v1886_v56, %v2387_v17 }
 0x17a   :  { %v614_v3 = vadd.f32 %v1895_v63, %v546_v11  ;;  %v677_v10 = vmax.f32 %v613_v62, 0.0  ;;  %v548_v32 = vmul.f32 %v1884_v37, %v480_v27  ;;  %v482_v33 = vmul.f32 %v1886_v56, %v2388_v9 }
 0x17b   :  { %1161 = vst [vmem:[%s2248_s3 + $0xd0] sm:$0xff] %v1078_v7   ;;  %v1083_v13 = vpack.c.bf16 %v676_v53, %v675_v59  ;;  %v615_v38 = vadd.f32 %v1895_v63, %v547_v60  ;;  %v549_v45 = vmul.f32 %v1884_v37, %v481_v40  ;;  %v483_v58 = vmul.f32 %v1886_v56, %v2389_v28 }
 0x17c   :  { %v678_v14 = vmax.f32 %v614_v3, 0.0  ;;  %v616_v51 = vadd.f32 %v1895_v63, %v548_v32  ;;  %v550_v22 = vmul.f32 %v1884_v37, %v482_v33  ;;  %v484_v44 = vmul.f32 %v1886_v56, %v1526_v46 }
 0x17d   :  { %1162 = vst [vmem:[%s2248_s3 + $0xd8] sm:$0xff] %v1083_v13   ;;  %v679_v23 = vmax.f32 %v615_v38, 0.0  ;;  %v617_v30 = vadd.f32 %v1895_v63, %v549_v45  ;;  %v551_v50 = vmul.f32 %v1884_v37, %v483_v58 }
 0x17e   :  { %v1088_v20 = vpack.c.bf16 %v678_v14, %v677_v10  ;;  %v680_v41 = vmax.f32 %v616_v51, 0.0  ;;  %v618_v18 = vadd.f32 %v1895_v63, %v550_v22  ;;  %v552_v24 = vmul.f32 %v1884_v37, %v484_v44 }
 0x17f   :  { %v681_v54 = vmax.f32 %v617_v30, 0.0  ;;  %v619_v2 = vadd.f32 %v1895_v63, %v551_v50 }
 0x180   :  { %1163 = vst [vmem:[%s2248_s3 + $0xe0] sm:$0xff] %v1088_v20   ;;  %v1093_v46 = vpack.c.bf16 %v680_v41, %v679_v23  ;;  %v682_v56 = vmax.f32 %v618_v18, 0.0  ;;  %v620_v16 = vadd.f32 %v1895_v63, %v552_v24 }
 0x181   :  { %v683_v57 = vmax.f32 %v619_v2, 0.0 }
 0x182   :  { %1164 = vst [vmem:[%s2248_s3 + $0xe8] sm:$0xff] %v1093_v46   ;;  %v1098_v36 = vpack.c.bf16 %v682_v56, %v681_v54  ;;  %v684_v21 = vmax.f32 %v620_v16, 0.0 }
 0x184   :  { %1165 = vst [vmem:[%s2248_s3 + $0xf0] sm:$0xff] %v1098_v36   ;;  %v1103_v37 = vpack.c.bf16 %v684_v21, %v683_v57 }
 0x186   :  { %1166 = vst [vmem:[%s2248_s3 + $0xf8] sm:$0xff] %v1103_v37  }

// kernel: _forward_impl.242
= control target key start
LH: loop header
LB: loop body
LE: loop exit
PB: predicated region body
PF: predicated region fallthrough
CT: control target
= control target key end

     0   :  { %s1173_s9 = smov 0   ;;  %s1175_s10 = smov 0   ;;  %s1393_s0 = inlined_call_operand.vmem [shape: bf16[512,256], index: 0, kind: input, shape index: {}]   ;;  %s1394_s1 = inlined_call_operand.vmem [shape: bf16[256,64], index: 1, kind: input, shape index: {}]   ;;  %s1395_s2 = inlined_call_operand.vmem [shape: bf16[512,64], index: 2, kind: output, shape index: {}]  }
   0x1   :  { %s1177_s11 = smov 0  }
   0x2 LB: > { %s24_s12 = sadd.s32 1, %s1152_s10  ;;  %p845_p0 = scmp.ge.s32.totalorder %s1156_s11, 1  ;;  %s1156_s11 = sphi %s1177_s11, %s12_s11   ;;  %s1152_s10 = sphi %s1175_s10, %s1397_s10   ;;  %s1148_s9 = sphi %s1173_s9, %s1396_s9  }
   0x3   : > { %p26_p1 = scmp.ge.s32.totalorder %s24_s12, 2  ;;  %p137_p2 = scmp.lt.s32.totalorder %s1156_s11, 3 }
   0x5   : > { %s1399_s12 = smov (%p26_p1, %s24_s12), 0  ;;  %p138_p3 = pnand %p845_p0, %p137_p2 }
   0x6   : > { %s846_s25 = sshll.u32 (!%p138_p3), %s1148_s9, 5 }
   0x7   : > { %141 = sbr.rel (%p138_p3) target bundleno = 302 (0x12e), region = 28  ;;  %p168_p4 = scmp.lt.s32.totalorder (!%p138_p3), %s846_s25, 63 }
   0xc   : > { %v1085_v0 = vld [vmem:[%s1394_s1 + $0x38] sm:$0xff]  ;;  %v1084_v2 = vld [vmem:[%s1394_s1 + $0x30] sm:$0xff]  ;;  %v1083_v4 = vld [vmem:[%s1394_s1 + $0x28] sm:$0xff]  ;;  %s1401_s25 = smov (!%p168_p4, %s846_s25), 63  ;;  %vm717_vm0 = vcmask 519168  }
   0xd   : > { %v1093_v1 = vld [vmem:[%s1394_s1 + $0x78] sm:$0xff]  ;;  %507 = vmatpush.bf16.msra.mxu0 %v1085_v0  ;;  %1094 = vmatpush.bf16.msra.mxu2 %v1085_v0  ;;  %v1092_v3 = vld [vmem:[%s1394_s1 + $0x70] sm:$0xff]  ;;  %v1091_v5 = vld [vmem:[%s1394_s1 + $0x68] sm:$0xff]  ;;  %s1045_s13 = sshll.u32 %s1401_s25, 3  ;;  %s850_s26 = sshll.u32 %s1401_s25, 2 }
   0xe   : > { %596 = vmatpush.bf16.msra.mxu1 %v1093_v1  ;;  %1102 = vmatpush.bf16.msra.mxu3 %v1093_v1  ;;  %v1082_v6 = vld [vmem:[%s1394_s1 + $0x20] sm:$0xff]  ;;  %v1081_v8 = vld [vmem:[%s1394_s1 + $0x18] sm:$0xff]  ;;  %v1080_v10 = vld [vmem:[%s1394_s1 + $0x10] sm:$0xff]  ;;  %s1239_s18 = scalar_lea.vmem %s1393_s0, %s1045_s13  ;;  %s1318_s29 = scalar_lea.vmem %s1395_s2, %s850_s26 }
   0xf   : > { %v1090_v7 = vld [vmem:[%s1394_s1 + $0x60] sm:$0xff]  ;;  %v1089_v9 = vld [vmem:[%s1394_s1 + $0x58] sm:$0xff]  ;;  %v1088_v11 = vld [vmem:[%s1394_s1 + $0x50] sm:$0xff] }
  0x10   : > { %v1079_v12 = vld [vmem:[%s1394_s1 + $0x8] sm:$0xff]  ;;  %v1078_v14 = vld [vmem:[%s1394_s1] sm:$0xff]  ;;  %v861_v28 = vld [vmem:[%s1239_s18 + $0x10] sm:$0xf] }
  0x11   : > { %508 = vmatpush.bf16.msra.mxu0 %v1084_v2  ;;  %1095 = vmatpush.bf16.msra.mxu2 %v1084_v2  ;;  %v1087_v13 = vld [vmem:[%s1394_s1 + $0x48] sm:$0xff]  ;;  %v1086_v15 = vld [vmem:[%s1394_s1 + $0x40] sm:$0xff]  ;;  %v1049_v29 = vld [vmem:[%s1239_s18 + $0x14] sm:$0xf0] }
  0x12   : > { %597 = vmatpush.bf16.msra.mxu1 %v1092_v3  ;;  %1103 = vmatpush.bf16.msra.mxu3 %v1092_v3  ;;  %v853_v16 = vld [vmem:[%s1239_s18] sm:$0xf]  ;;  %v1047_v17 = vld [vmem:[%s1239_s18 + $0x4] sm:$0xf0]  ;;  %v1046_v20 = vld [vmem:[%s1239_s18 + $0x4] sm:$0xf]  ;;  %v862_v36 = vor.u32 %v1049_v29, %v861_v28 }
  0x13   : > { %v917_v18 = vld [vmem:[%s1239_s18 + $0x80] sm:$0xf]  ;;  %v1063_v19 = vld [vmem:[%s1239_s18 + $0x84] sm:$0xf0]  ;;  %v855_v21 = vld [vmem:[%s1239_s18 + $0x8] sm:$0xf0]  ;;  %v854_v24 = vor.u32 %v1047_v17, %v853_v16 }
  0x14   : > { %v1062_v22 = vld [vmem:[%s1239_s18 + $0x84] sm:$0xf]  ;;  %v919_v23 = vld [vmem:[%s1239_s18 + $0x88] sm:$0xf0]  ;;  %v918_v25 = vor.u32 %v1063_v19, %v917_v18  ;;  %v858_v26 = vor.u32 %v1046_v20, %v855_v21  ;;  %v925_v30 = vld [vmem:[%s1239_s18 + $0x90] sm:$0xf] }
  0x15   : > { %509 = vmatpush.bf16.msra.mxu0 %v1083_v4  ;;  %1096 = vmatpush.bf16.msra.mxu2 %v1083_v4  ;;  %v922_v27 = vor.u32 %v1062_v22, %v919_v23  ;;  %v1065_v31 = vld [vmem:[%s1239_s18 + $0x94] sm:$0xf0]  ;;  %v1048_v32 = vld [vmem:[%s1239_s18 + $0x14] sm:$0xf]  ;;  %v863_v33 = vld [vmem:[%s1239_s18 + $0x18] sm:$0xf0] }
  0x16   : > { %598 = vmatpush.bf16.msra.mxu1 %v1091_v5  ;;  %1104 = vmatpush.bf16.msra.mxu3 %v1091_v5  ;;  %v1064_v34 = vld [vmem:[%s1239_s18 + $0x94] sm:$0xf]  ;;  %v927_v35 = vld [vmem:[%s1239_s18 + $0x98] sm:$0xf0]  ;;  %v926_v37 = vor.u32 %v1065_v31, %v925_v30  ;;  %v866_v38 = vor.u32 %v1048_v32, %v863_v33  ;;  %v869_v40 = vld [vmem:[%s1239_s18 + $0x20] sm:$0xf] }
  0x17   : > { %v930_v39 = vor.u32 %v1064_v34, %v927_v35  ;;  %v1051_v41 = vld [vmem:[%s1239_s18 + $0x24] sm:$0xf0]  ;;  %v933_v42 = vld [vmem:[%s1239_s18 + $0xa0] sm:$0xf]  ;;  %v1050_v44 = vld [vmem:[%s1239_s18 + $0x24] sm:$0xf] }
  0x18   : > { %v1067_v43 = vld [vmem:[%s1239_s18 + $0xa4] sm:$0xf0]  ;;  %v871_v45 = vld [vmem:[%s1239_s18 + $0x28] sm:$0xf0]  ;;  %v1066_v46 = vld [vmem:[%s1239_s18 + $0xa4] sm:$0xf]  ;;  %v870_v48 = vor.u32 %v1051_v41, %v869_v40 }
  0x19   : > { %510 = vmatpush.bf16.msra.mxu0 %v1082_v6  ;;  %1097 = vmatpush.bf16.msra.mxu2 %v1082_v6  ;;  %v935_v47 = vld [vmem:[%s1239_s18 + $0xa8] sm:$0xf0]  ;;  %v934_v49 = vor.u32 %v1067_v43, %v933_v42  ;;  %v874_v50 = vor.u32 %v1050_v44, %v871_v45  ;;  %v877_v52 = vld [vmem:[%s1239_s18 + $0x30] sm:$0xf]  ;;  %v1053_v53 = vld [vmem:[%s1239_s18 + $0x34] sm:$0xf0] }
  0x1a   : > { %599 = vmatpush.bf16.msra.mxu1 %v1090_v7  ;;  %1105 = vmatpush.bf16.msra.mxu3 %v1090_v7  ;;  %v938_v51 = vor.u32 %v1066_v46, %v935_v47  ;;  %v941_v54 = vld [vmem:[%s1239_s18 + $0xb0] sm:$0xf]  ;;  %v1069_v55 = vld [vmem:[%s1239_s18 + $0xb4] sm:$0xf0]  ;;  %v1052_v56 = vld [vmem:[%s1239_s18 + $0x34] sm:$0xf]  ;;  %v878_v60 = vor.u32 %v1053_v53, %v877_v52 }
  0x1b   : > { %v879_v57 = vld [vmem:[%s1239_s18 + $0x38] sm:$0xf0]  ;;  %v1068_v58 = vld [vmem:[%s1239_s18 + $0xb4] sm:$0xf]  ;;  %v942_v61 = vor.u32 %v1069_v55, %v941_v54  ;;  %v885_v0 = vld [vmem:[%s1239_s18 + $0x40] sm:$0xf] }
  0x1c   : > { %v943_v59 = vld [vmem:[%s1239_s18 + $0xb8] sm:$0xf0]  ;;  %v882_v62 = vor.u32 %v1052_v56, %v879_v57  ;;  %v1055_v1 = vld [vmem:[%s1239_s18 + $0x44] sm:$0xf0]  ;;  %v949_v2 = vld [vmem:[%s1239_s18 + $0xc0] sm:$0xf] }
  0x1d   : > { %511 = vmatpush.bf16.msra.mxu0 %v1081_v8  ;;  %1098 = vmatpush.bf16.msra.mxu2 %v1081_v8  ;;  %v946_v63 = vor.u32 %v1068_v58, %v943_v59  ;;  %v1071_v3 = vld [vmem:[%s1239_s18 + $0xc4] sm:$0xf0]  ;;  %v1054_v4 = vld [vmem:[%s1239_s18 + $0x44] sm:$0xf]  ;;  %v887_v5 = vld [vmem:[%s1239_s18 + $0x48] sm:$0xf0]  ;;  %v886_v8 = vor.u32 %v1055_v1, %v885_v0 }
  0x1e   : > { %600 = vmatpush.bf16.msra.mxu1 %v1089_v9  ;;  %1106 = vmatpush.bf16.msra.mxu3 %v1089_v9  ;;  %v1070_v6 = vld [vmem:[%s1239_s18 + $0xc4] sm:$0xf]  ;;  %v951_v7 = vld [vmem:[%s1239_s18 + $0xc8] sm:$0xf0]  ;;  %v950_v9 = vor.u32 %v1071_v3, %v949_v2  ;;  %v1056_v16 = vld [vmem:[%s1239_s18 + $0x54] sm:$0xf] }
  0x1f   : > { %v895_v17 = vld [vmem:[%s1239_s18 + $0x58] sm:$0xf0]  ;;  %v1072_v18 = vld [vmem:[%s1239_s18 + $0xd4] sm:$0xf]  ;;  %v1058_v28 = vld [vmem:[%s1239_s18 + $0x64] sm:$0xf] }
  0x20   : > { %v959_v19 = vld [vmem:[%s1239_s18 + $0xd8] sm:$0xf0]  ;;  %v898_v22 = vor.u32 %v1056_v16, %v895_v17  ;;  %v903_v29 = vld [vmem:[%s1239_s18 + $0x68] sm:$0xf0]  ;;  %v1074_v30 = vld [vmem:[%s1239_s18 + $0xe4] sm:$0xf] }
  0x21   : > { %512 = vmatpush.bf16.msra.mxu0 %v1080_v10  ;;  %1099 = vmatpush.bf16.msra.mxu2 %v1080_v10  ;;  %v890_v10 = vor.u32 %v1054_v4, %v887_v5  ;;  %v962_v23 = vor.u32 %v1072_v18, %v959_v19  ;;  %v967_v31 = vld [vmem:[%s1239_s18 + $0xe8] sm:$0xf0]  ;;  %v906_v34 = vor.u32 %v1058_v28, %v903_v29  ;;  %v1060_v40 = vld [vmem:[%s1239_s18 + $0x74] sm:$0xf]  ;;  %v911_v41 = vld [vmem:[%s1239_s18 + $0x78] sm:$0xf0] }
  0x22   : > { %601 = vmatpush.bf16.msra.mxu1 %v1088_v11  ;;  %1107 = vmatpush.bf16.msra.mxu3 %v1088_v11  ;;  %v954_v11 = vor.u32 %v1070_v6, %v951_v7  ;;  %v970_v35 = vor.u32 %v1074_v30, %v967_v31  ;;  %v1076_v42 = vld [vmem:[%s1239_s18 + $0xf4] sm:$0xf]  ;;  %v975_v43 = vld [vmem:[%s1239_s18 + $0xf8] sm:$0xf0]  ;;  %v914_v46 = vor.u32 %v1060_v40, %v911_v41 }
  0x23   : > { %v978_v47 = vor.u32 %v1076_v42, %v975_v43 }
  0x25   : > { %513 = vmatpush.bf16.msra.mxu0 %v1079_v12  ;;  %1100 = vmatpush.bf16.msra.mxu2 %v1079_v12  ;;  %v893_v12 = vld [vmem:[%s1239_s18 + $0x50] sm:$0xf] }
  0x26   : > { %602 = vmatpush.bf16.msra.mxu1 %v1087_v13  ;;  %1108 = vmatpush.bf16.msra.mxu3 %v1087_v13  ;;  %v1057_v13 = vld [vmem:[%s1239_s18 + $0x54] sm:$0xf0] }
  0x27   : > { %v894_v20 = vor.u32 %v1057_v13, %v893_v12 }
  0x29   : > { %514 = vmatpush.bf16.msra.mxu0 %v1078_v14  ;;  %1101 = vmatpush.bf16.msra.mxu2 %v1078_v14  ;;  %v957_v14 = vld [vmem:[%s1239_s18 + $0xd0] sm:$0xf] }
  0x2a   : > { %603 = vmatpush.bf16.msra.mxu1 %v1086_v15  ;;  %1109 = vmatpush.bf16.msra.mxu3 %v1086_v15  ;;  %v1073_v15 = vld [vmem:[%s1239_s18 + $0xd4] sm:$0xf0] }
  0x2b   : > { %v958_v21 = vor.u32 %v1073_v15, %v957_v14 }
  0x2c   : > { %515 = vmatmul.bf16.vlgmr.msra.gmra.mxu0 %v854_v24  ;;  %555 = vmatmul.bf16.vlgmr.msra.gmra.mxu2 %v918_v25  ;;  %v901_v24 = vld [vmem:[%s1239_s18 + $0x60] sm:$0xf]  ;;  %v1059_v25 = vld [vmem:[%s1239_s18 + $0x64] sm:$0xf0] }
  0x2d   : > { %604 = vmatmul.bf16.vlgmr.msra.gmra.mxu1 %v858_v26  ;;  %644 = vmatmul.bf16.vlgmr.msra.gmra.mxu3 %v922_v27  ;;  %v965_v26 = vld [vmem:[%s1239_s18 + $0xe0] sm:$0xf]  ;;  %v1075_v27 = vld [vmem:[%s1239_s18 + $0xe4] sm:$0xf0]  ;;  %v902_v32 = vor.u32 %v1059_v25, %v901_v24 }
  0x2e   : > { %v966_v33 = vor.u32 %v1075_v27, %v965_v26 }
  0x3c   : > { %520 = vmatmul.bf16.gmra.mxu0 %v862_v36  ;;  %560 = vmatmul.bf16.gmra.mxu2 %v926_v37  ;;  %v909_v36 = vld [vmem:[%s1239_s18 + $0x70] sm:$0xf]  ;;  %v1061_v37 = vld [vmem:[%s1239_s18 + $0x74] sm:$0xf0] }
  0x3d   : > { %609 = vmatmul.bf16.gmra.mxu1 %v866_v38  ;;  %649 = vmatmul.bf16.gmra.mxu3 %v930_v39  ;;  %v973_v38 = vld [vmem:[%s1239_s18 + $0xf0] sm:$0xf]  ;;  %v1077_v39 = vld [vmem:[%s1239_s18 + $0xf4] sm:$0xf0]  ;;  %v910_v44 = vor.u32 %v1061_v37, %v909_v36 }
  0x3e   : > { %v974_v45 = vor.u32 %v1077_v39, %v973_v38 }
  0x4c   : > { %525 = vmatmul.bf16.gmra.mxu0 %v870_v48  ;;  %565 = vmatmul.bf16.gmra.mxu2 %v934_v49 }
  0x4d   : > { %614 = vmatmul.bf16.gmra.mxu1 %v874_v50  ;;  %654 = vmatmul.bf16.gmra.mxu3 %v938_v51 }
  0x5c   : > { %530 = vmatmul.bf16.gmra.mxu0 %v878_v60  ;;  %570 = vmatmul.bf16.gmra.mxu2 %v942_v61 }
  0x5d   : > { %619 = vmatmul.bf16.gmra.mxu1 %v882_v62  ;;  %659 = vmatmul.bf16.gmra.mxu3 %v946_v63 }
  0x6c   : > { %535 = vmatmul.bf16.gmra.mxu0 %v886_v8  ;;  %575 = vmatmul.bf16.gmra.mxu2 %v950_v9 }
  0x6d   : > { %624 = vmatmul.bf16.gmra.mxu1 %v890_v10  ;;  %664 = vmatmul.bf16.gmra.mxu3 %v954_v11 }
  0x7c   : > { %540 = vmatmul.bf16.gmra.mxu0 %v894_v20  ;;  %580 = vmatmul.bf16.gmra.mxu2 %v958_v21 }
  0x7d   : > { %629 = vmatmul.bf16.gmra.mxu1 %v898_v22  ;;  %669 = vmatmul.bf16.gmra.mxu3 %v962_v23 }
  0x8c   : > { %545 = vmatmul.bf16.gmra.mxu0 %v902_v32  ;;  %585 = vmatmul.bf16.gmra.mxu2 %v966_v33 }
  0x8d   : > { %634 = vmatmul.bf16.gmra.mxu1 %v906_v34  ;;  %674 = vmatmul.bf16.gmra.mxu3 %v970_v35 }
  0x9c   : > { %550 = vmatmul.bf16.gmra.mxu0 %v910_v44  ;;  %590 = vmatmul.bf16.gmra.mxu2 %v974_v45 }
  0x9d   : > { %639 = vmatmul.bf16.gmra.mxu1 %v914_v46  ;;  %679 = vmatmul.bf16.gmra.mxu3 %v978_v47 }
  0xa9   : > { %v516_v48 = vpop.f32.mrf.mxu0 }
  0xaa   : > { %v605_v49 = vpop.f32.mrf.mxu1 }
  0xab   : > { %v606_v50 = vadd.f32 %v605_v49, %v516_v48 }
  0xad   : > { %v685_v51 = vpack.c.bf16 %v606_v50, %v606_v50 }
  0xaf   : > { %718 = vst.msk [vmem:[%s1318_s29] sm:$0xf] %vm717_vm0, %v685_v51  ;;  %v556_v52 = vpop.f32.mrf.mxu2 }
  0xb0   : > { %v645_v53 = vpop.f32.mrf.mxu3 }
  0xb1   : > { %v646_v54 = vadd.f32 %v645_v53, %v556_v52  ;;  %v518_v55 = vpop.f32.mrf.mxu0 }
  0xb2   : > { %v607_v56 = vpop.f32.mrf.mxu1 }
  0xb3   : > { %v701_v57 = vpack.c.bf16 %v646_v54, %v646_v54  ;;  %v608_v58 = vadd.f32 %v607_v56, %v518_v55 }
  0xb5   : > { %734 = vst.msk [vmem:[%s1318_s29 + $0x40] sm:$0xf] %vm717_vm0, %v701_v57  ;;  %v686_v59 = vpack.c.bf16 %v608_v58, %v608_v58 }
  0xb7   : > { %719 = vst.msk [vmem:[%s1318_s29 + $0x4] sm:$0xf] %vm717_vm0, %v686_v59  ;;  %v558_v60 = vpop.f32.mrf.mxu2 }
  0xb8   : > { %v647_v61 = vpop.f32.mrf.mxu3 }
  0xb9   : > { %v648_v62 = vadd.f32 %v647_v61, %v558_v60  ;;  %v521_v63 = vpop.f32.mrf.mxu0 }
  0xba   : > { %v610_v0 = vpop.f32.mrf.mxu1 }
  0xbb   : > { %v702_v1 = vpack.c.bf16 %v648_v62, %v648_v62  ;;  %v611_v2 = vadd.f32 %v610_v0, %v521_v63 }
  0xbd   : > { %735 = vst.msk [vmem:[%s1318_s29 + $0x44] sm:$0xf] %vm717_vm0, %v702_v1  ;;  %v687_v3 = vpack.c.bf16 %v611_v2, %v611_v2 }
  0xbf   : > { %720 = vst.msk [vmem:[%s1318_s29 + $0x8] sm:$0xf] %vm717_vm0, %v687_v3  ;;  %v561_v4 = vpop.f32.mrf.mxu2 }
  0xc0   : > { %v650_v5 = vpop.f32.mrf.mxu3 }
  0xc1   : > { %v651_v6 = vadd.f32 %v650_v5, %v561_v4  ;;  %v523_v7 = vpop.f32.mrf.mxu0 }
  0xc2   : > { %v612_v8 = vpop.f32.mrf.mxu1 }
  0xc3   : > { %v703_v9 = vpack.c.bf16 %v651_v6, %v651_v6  ;;  %v613_v10 = vadd.f32 %v612_v8, %v523_v7 }
  0xc5   : > { %736 = vst.msk [vmem:[%s1318_s29 + $0x48] sm:$0xf] %vm717_vm0, %v703_v9  ;;  %v688_v11 = vpack.c.bf16 %v613_v10, %v613_v10 }
  0xc7   : > { %721 = vst.msk [vmem:[%s1318_s29 + $0xc] sm:$0xf] %vm717_vm0, %v688_v11  ;;  %v563_v12 = vpop.f32.mrf.mxu2 }
  0xc8   : > { %v652_v13 = vpop.f32.mrf.mxu3 }
  0xc9   : > { %v653_v14 = vadd.f32 %v652_v13, %v563_v12  ;;  %v526_v15 = vpop.f32.mrf.mxu0 }
  0xca   : > { %v615_v16 = vpop.f32.mrf.mxu1 }
  0xcb   : > { %v704_v17 = vpack.c.bf16 %v653_v14, %v653_v14  ;;  %v616_v18 = vadd.f32 %v615_v16, %v526_v15 }
  0xcd   : > { %737 = vst.msk [vmem:[%s1318_s29 + $0x4c] sm:$0xf] %vm717_vm0, %v704_v17  ;;  %v689_v19 = vpack.c.bf16 %v616_v18, %v616_v18 }
  0xcf   : > { %722 = vst.msk [vmem:[%s1318_s29 + $0x10] sm:$0xf] %vm717_vm0, %v689_v19  ;;  %v566_v20 = vpop.f32.mrf.mxu2 }
  0xd0   : > { %v655_v21 = vpop.f32.mrf.mxu3 }
  0xd1   : > { %v656_v22 = vadd.f32 %v655_v21, %v566_v20  ;;  %v528_v23 = vpop.f32.mrf.mxu0 }
  0xd2   : > { %v617_v24 = vpop.f32.mrf.mxu1 }
  0xd3   : > { %v705_v25 = vpack.c.bf16 %v656_v22, %v656_v22  ;;  %v618_v26 = vadd.f32 %v617_v24, %v528_v23 }
  0xd5   : > { %738 = vst.msk [vmem:[%s1318_s29 + $0x50] sm:$0xf] %vm717_vm0, %v705_v25  ;;  %v690_v27 = vpack.c.bf16 %v618_v26, %v618_v26 }
  0xd7   : > { %723 = vst.msk [vmem:[%s1318_s29 + $0x14] sm:$0xf] %vm717_vm0, %v690_v27  ;;  %v568_v28 = vpop.f32.mrf.mxu2 }
  0xd8   : > { %v657_v29 = vpop.f32.mrf.mxu3 }
  0xd9   : > { %v658_v30 = vadd.f32 %v657_v29, %v568_v28  ;;  %v531_v31 = vpop.f32.mrf.mxu0 }
  0xda   : > { %v620_v32 = vpop.f32.mrf.mxu1 }
  0xdb   : > { %v706_v33 = vpack.c.bf16 %v658_v30, %v658_v30  ;;  %v621_v34 = vadd.f32 %v620_v32, %v531_v31 }
  0xdd   : > { %739 = vst.msk [vmem:[%s1318_s29 + $0x54] sm:$0xf] %vm717_vm0, %v706_v33  ;;  %v691_v35 = vpack.c.bf16 %v621_v34, %v621_v34 }
  0xdf   : > { %724 = vst.msk [vmem:[%s1318_s29 + $0x18] sm:$0xf] %vm717_vm0, %v691_v35  ;;  %v571_v36 = vpop.f32.mrf.mxu2 }
  0xe0   : > { %v660_v37 = vpop.f32.mrf.mxu3 }
  0xe1   : > { %v661_v38 = vadd.f32 %v660_v37, %v571_v36  ;;  %v533_v39 = vpop.f32.mrf.mxu0 }
  0xe2   : > { %v622_v40 = vpop.f32.mrf.mxu1 }
  0xe3   : > { %v707_v41 = vpack.c.bf16 %v661_v38, %v661_v38  ;;  %v623_v42 = vadd.f32 %v622_v40, %v533_v39 }
  0xe5   : > { %740 = vst.msk [vmem:[%s1318_s29 + $0x58] sm:$0xf] %vm717_vm0, %v707_v41  ;;  %v692_v43 = vpack.c.bf16 %v623_v42, %v623_v42 }
  0xe7   : > { %725 = vst.msk [vmem:[%s1318_s29 + $0x1c] sm:$0xf] %vm717_vm0, %v692_v43  ;;  %v573_v44 = vpop.f32.mrf.mxu2 }
  0xe8   : > { %v662_v45 = vpop.f32.mrf.mxu3 }
  0xe9   : > { %v663_v46 = vadd.f32 %v662_v45, %v573_v44  ;;  %v536_v47 = vpop.f32.mrf.mxu0 }
  0xea   : > { %v625_v48 = vpop.f32.mrf.mxu1 }
  0xeb   : > { %v708_v49 = vpack.c.bf16 %v663_v46, %v663_v46  ;;  %v626_v50 = vadd.f32 %v625_v48, %v536_v47 }
  0xed   : > { %741 = vst.msk [vmem:[%s1318_s29 + $0x5c] sm:$0xf] %vm717_vm0, %v708_v49  ;;  %v693_v51 = vpack.c.bf16 %v626_v50, %v626_v50 }
  0xef   : > { %726 = vst.msk [vmem:[%s1318_s29 + $0x20] sm:$0xf] %vm717_vm0, %v693_v51  ;;  %v576_v52 = vpop.f32.mrf.mxu2 }
  0xf0   : > { %v665_v53 = vpop.f32.mrf.mxu3 }
  0xf1   : > { %v666_v54 = vadd.f32 %v665_v53, %v576_v52  ;;  %v538_v55 = vpop.f32.mrf.mxu0 }
  0xf2   : > { %v627_v56 = vpop.f32.mrf.mxu1 }
  0xf3   : > { %v709_v57 = vpack.c.bf16 %v666_v54, %v666_v54  ;;  %v628_v58 = vadd.f32 %v627_v56, %v538_v55 }
  0xf5   : > { %742 = vst.msk [vmem:[%s1318_s29 + $0x60] sm:$0xf] %vm717_vm0, %v709_v57  ;;  %v694_v59 = vpack.c.bf16 %v628_v58, %v628_v58 }
  0xf7   : > { %727 = vst.msk [vmem:[%s1318_s29 + $0x24] sm:$0xf] %vm717_vm0, %v694_v59  ;;  %v578_v60 = vpop.f32.mrf.mxu2 }
  0xf8   : > { %v667_v61 = vpop.f32.mrf.mxu3 }
  0xf9   : > { %v668_v62 = vadd.f32 %v667_v61, %v578_v60  ;;  %v541_v63 = vpop.f32.mrf.mxu0 }
  0xfa   : > { %v630_v0 = vpop.f32.mrf.mxu1 }
  0xfb   : > { %v710_v1 = vpack.c.bf16 %v668_v62, %v668_v62  ;;  %v631_v2 = vadd.f32 %v630_v0, %v541_v63 }
  0xfd   : > { %743 = vst.msk [vmem:[%s1318_s29 + $0x64] sm:$0xf] %vm717_vm0, %v710_v1  ;;  %v695_v3 = vpack.c.bf16 %v631_v2, %v631_v2 }
  0xff   : > { %728 = vst.msk [vmem:[%s1318_s29 + $0x28] sm:$0xf] %vm717_vm0, %v695_v3  ;;  %v581_v4 = vpop.f32.mrf.mxu2 }
 0x100   : > { %v670_v5 = vpop.f32.mrf.mxu3 }
 0x101   : > { %v671_v6 = vadd.f32 %v670_v5, %v581_v4  ;;  %v543_v7 = vpop.f32.mrf.mxu0 }
 0x102   : > { %v632_v8 = vpop.f32.mrf.mxu1 }
 0x103   : > { %v711_v9 = vpack.c.bf16 %v671_v6, %v671_v6  ;;  %v633_v10 = vadd.f32 %v632_v8, %v543_v7 }
 0x105   : > { %744 = vst.msk [vmem:[%s1318_s29 + $0x68] sm:$0xf] %vm717_vm0, %v711_v9  ;;  %v696_v11 = vpack.c.bf16 %v633_v10, %v633_v10 }
 0x107   : > { %729 = vst.msk [vmem:[%s1318_s29 + $0x2c] sm:$0xf] %vm717_vm0, %v696_v11  ;;  %v583_v12 = vpop.f32.mrf.mxu2 }
 0x108   : > { %v672_v13 = vpop.f32.mrf.mxu3 }
 0x109   : > { %v673_v14 = vadd.f32 %v672_v13, %v583_v12  ;;  %v546_v15 = vpop.f32.mrf.mxu0 }
 0x10a   : > { %v635_v16 = vpop.f32.mrf.mxu1 }
 0x10b   : > { %v712_v17 = vpack.c.bf16 %v673_v14, %v673_v14  ;;  %v636_v18 = vadd.f32 %v635_v16, %v546_v15 }
 0x10d   : > { %745 = vst.msk [vmem:[%s1318_s29 + $0x6c] sm:$0xf] %vm717_vm0, %v712_v17  ;;  %v697_v19 = vpack.c.bf16 %v636_v18, %v636_v18 }
 0x10f   : > { %730 = vst.msk [vmem:[%s1318_s29 + $0x30] sm:$0xf] %vm717_vm0, %v697_v19  ;;  %v586_v20 = vpop.f32.mrf.mxu2 }
 0x110   : > { %v675_v21 = vpop.f32.mrf.mxu3 }
 0x111   : > { %v676_v22 = vadd.f32 %v675_v21, %v586_v20  ;;  %v548_v23 = vpop.f32.mrf.mxu0 }
 0x112   : > { %v637_v24 = vpop.f32.mrf.mxu1 }
 0x113   : > { %v713_v25 = vpack.c.bf16 %v676_v22, %v676_v22  ;;  %v638_v26 = vadd.f32 %v637_v24, %v548_v23 }
 0x115   : > { %746 = vst.msk [vmem:[%s1318_s29 + $0x70] sm:$0xf] %vm717_vm0, %v713_v25  ;;  %v698_v27 = vpack.c.bf16 %v638_v26, %v638_v26 }
 0x117   : > { %731 = vst.msk [vmem:[%s1318_s29 + $0x34] sm:$0xf] %vm717_vm0, %v698_v27  ;;  %v588_v28 = vpop.f32.mrf.mxu2 }
 0x118   : > { %v677_v29 = vpop.f32.mrf.mxu3 }
 0x119   : > { %v678_v30 = vadd.f32 %v677_v29, %v588_v28  ;;  %v551_v31 = vpop.f32.mrf.mxu0 }
 0x11a   : > { %v640_v32 = vpop.f32.mrf.mxu1 }
 0x11b   : > { %v714_v33 = vpack.c.bf16 %v678_v30, %v678_v30  ;;  %v641_v34 = vadd.f32 %v640_v32, %v551_v31 }
 0x11d   : > { %747 = vst.msk [vmem:[%s1318_s29 + $0x74] sm:$0xf] %vm717_vm0, %v714_v33  ;;  %v699_v35 = vpack.c.bf16 %v641_v34, %v641_v34 }
 0x11f   : > { %732 = vst.msk [vmem:[%s1318_s29 + $0x38] sm:$0xf] %vm717_vm0, %v699_v35  ;;  %v591_v36 = vpop.f32.mrf.mxu2 }
 0x120   : > { %v680_v37 = vpop.f32.mrf.mxu3 }
 0x121   : > { %v681_v38 = vadd.f32 %v680_v37, %v591_v36  ;;  %v553_v39 = vpop.f32.mrf.mxu0 }
 0x122   : > { %v642_v40 = vpop.f32.mrf.mxu1 }
 0x123   : > { %v715_v41 = vpack.c.bf16 %v681_v38, %v681_v38  ;;  %v643_v42 = vadd.f32 %v642_v40, %v553_v39 }
 0x125   : > { %748 = vst.msk [vmem:[%s1318_s29 + $0x78] sm:$0xf] %vm717_vm0, %v715_v41  ;;  %v700_v43 = vpack.c.bf16 %v643_v42, %v643_v42 }
 0x127   : > { %733 = vst.msk [vmem:[%s1318_s29 + $0x3c] sm:$0xf] %vm717_vm0, %v700_v43  ;;  %v593_v44 = vpop.f32.mrf.mxu2 }
 0x128   : > { %v682_v45 = vpop.f32.mrf.mxu3 }
 0x129   : > { %v683_v46 = vadd.f32 %v682_v45, %v593_v44 }
 0x12b   : > { %v716_v47 = vpack.c.bf16 %v683_v46, %v683_v46 }
 0x12d   : > { %749 = vst.msk [vmem:[%s1318_s29 + $0x7c] sm:$0xf] %vm717_vm0, %v716_v47 }
 0x12e PF: > { %s12_s11 = sadd.s32 1, %s1156_s11   ;;  %s1396_s9 = smov %s1152_s10 }
 0x12f   : > { %p9_p5 = scmp.ge.s32.totalorder %s12_s11, 4   ;;  %s1397_s10 = smov %s1399_s12 }
 0x131   :  { %11 = sbr.rel (!%p9_p5) target bundleno = 2 (0x2), region = 61 }

// kernel: _forward_impl.244
= control target key start
LH: loop header
LB: loop body
LE: loop exit
PB: predicated region body
PF: predicated region fallthrough
CT: control target
= control target key end

     0   :  { %s1034_s0 = inlined_call_operand.vmem [shape: bf16[128,256], index: 0, kind: input, shape index: {}]   ;;  %s1035_s1 = inlined_call_operand.vmem [shape: f32[1,256], index: 1, kind: input, shape index: {}]   ;;  %s1036_s2 = inlined_call_operand.vmem [shape: f32[1,256], index: 2, kind: input, shape index: {}]   ;;  %s1037_s3 = inlined_call_operand.vmem [shape: bf16[128,256], index: 3, kind: output, shape index: {}]  }
   0x1   :  { %v439_v0 = vld [vmem:[%s1034_s0] sm:$0xff]  ;;  %v444_v1 = vld [vmem:[%s1034_s0 + $0x8] sm:$0xff]  ;;  %v449_v2 = vld [vmem:[%s1034_s0 + $0x10] sm:$0xff] }
   0x2   :  { %v30_v3 = vunpack.c.l.bf16 %v439_v0  ;;  %v31_v4 = vunpack.c.h.bf16 %v439_v0  ;;  %v32_v5 = vunpack.c.l.bf16 %v444_v1  ;;  %v33_v6 = vunpack.c.h.bf16 %v444_v1  ;;  %v458_v7 = vld [vmem:[%s1034_s0 + $0x18] sm:$0xff]  ;;  %v465_v10 = vld [vmem:[%s1034_s0 + $0x20] sm:$0xff]  ;;  %v480_v15 = vld [vmem:[%s1034_s0 + $0x28] sm:$0xff] }
   0x3   :  { %v34_v8 = vunpack.c.l.bf16 %v449_v2  ;;  %v35_v9 = vunpack.c.h.bf16 %v449_v2  ;;  %v36_v11 = vunpack.c.l.bf16 %v458_v7  ;;  %v37_v12 = vunpack.c.h.bf16 %v458_v7  ;;  %v491_v20 = vld [vmem:[%s1034_s0 + $0x30] sm:$0xff]  ;;  %v502_v25 = vld [vmem:[%s1034_s0 + $0x38] sm:$0xff]  ;;  %v513_v30 = vld [vmem:[%s1034_s0 + $0x40] sm:$0xff] }
   0x4   :  { %v62_v13 = vadd.f32 %v32_v5, %v30_v3  ;;  %v83_v14 = vadd.f32 %v33_v6, %v31_v4  ;;  %v38_v16 = vunpack.c.l.bf16 %v465_v10  ;;  %v39_v17 = vunpack.c.h.bf16 %v465_v10  ;;  %v524_v35 = vld [vmem:[%s1034_s0 + $0x48] sm:$0xff]  ;;  %v535_v40 = vld [vmem:[%s1034_s0 + $0x50] sm:$0xff]  ;;  %v546_v45 = vld [vmem:[%s1034_s0 + $0x58] sm:$0xff] }
   0x5   :  { %v40_v21 = vunpack.c.l.bf16 %v480_v15  ;;  %v41_v22 = vunpack.c.h.bf16 %v480_v15  ;;  %v42_v26 = vunpack.c.l.bf16 %v491_v20  ;;  %v43_v27 = vunpack.c.h.bf16 %v491_v20  ;;  %v557_v50 = vld [vmem:[%s1034_s0 + $0x60] sm:$0xff]  ;;  %v568_v55 = vld [vmem:[%s1034_s0 + $0x68] sm:$0xff]  ;;  %v579_v60 = vld [vmem:[%s1034_s0 + $0x70] sm:$0xff] }
   0x6   :  { %v63_v18 = vadd.f32 %v62_v13, %v34_v8  ;;  %v84_v19 = vadd.f32 %v83_v14, %v35_v9  ;;  %v44_v31 = vunpack.c.l.bf16 %v502_v25  ;;  %v45_v32 = vunpack.c.h.bf16 %v502_v25  ;;  %v590_v14 = vld [vmem:[%s1034_s0 + $0x78] sm:$0xff] }
   0x7   :  { %v46_v36 = vunpack.c.l.bf16 %v513_v30  ;;  %v47_v37 = vunpack.c.h.bf16 %v513_v30  ;;  %v48_v41 = vunpack.c.l.bf16 %v524_v35  ;;  %v49_v42 = vunpack.c.h.bf16 %v524_v35 }
   0x8   :  { %v64_v23 = vadd.f32 %v63_v18, %v36_v11  ;;  %v85_v24 = vadd.f32 %v84_v19, %v37_v12  ;;  %v50_v46 = vunpack.c.l.bf16 %v535_v40  ;;  %v51_v47 = vunpack.c.h.bf16 %v535_v40 }
   0x9   :  { %v52_v51 = vunpack.c.l.bf16 %v546_v45  ;;  %v53_v52 = vunpack.c.h.bf16 %v546_v45  ;;  %v54_v56 = vunpack.c.l.bf16 %v557_v50  ;;  %v55_v57 = vunpack.c.h.bf16 %v557_v50 }
   0xa   :  { %v65_v28 = vadd.f32 %v64_v23, %v38_v16  ;;  %v86_v29 = vadd.f32 %v85_v24, %v39_v17  ;;  %v56_v61 = vunpack.c.l.bf16 %v568_v55  ;;  %v1039_v62 = vunpack.c.h.bf16 %v568_v55 }
   0xb   :  { %v1038_v18 = vunpack.c.l.bf16 %v579_v60  ;;  %v59_v19 = vunpack.c.h.bf16 %v579_v60 }
   0xc   :  { %v66_v33 = vadd.f32 %v65_v28, %v40_v21  ;;  %v87_v34 = vadd.f32 %v86_v29, %v41_v22  ;;  %v60_v28 = vunpack.c.l.bf16 %v590_v14  ;;  %v61_v29 = vunpack.c.h.bf16 %v590_v14 }
   0xe   :  { %v67_v38 = vadd.f32 %v66_v33, %v42_v26  ;;  %v88_v39 = vadd.f32 %v87_v34, %v43_v27 }
  0x10   :  { %v68_v43 = vadd.f32 %v67_v38, %v44_v31  ;;  %v89_v44 = vadd.f32 %v88_v39, %v45_v32 }
  0x12   :  { %v69_v48 = vadd.f32 %v68_v43, %v46_v36  ;;  %v90_v49 = vadd.f32 %v89_v44, %v47_v37 }
  0x14   :  { %v70_v53 = vadd.f32 %v69_v48, %v48_v41  ;;  %v91_v54 = vadd.f32 %v90_v49, %v49_v42 }
  0x16   :  { %v71_v58 = vadd.f32 %v70_v53, %v50_v46  ;;  %v92_v59 = vadd.f32 %v91_v54, %v51_v47 }
  0x18   :  { %v72_v63 = vadd.f32 %v71_v58, %v52_v51  ;;  %v93_v13 = vadd.f32 %v92_v59, %v53_v52 }
  0x1a   :  { %v73_v23 = vadd.f32 %v72_v63, %v54_v56  ;;  %v94_v24 = vadd.f32 %v93_v13, %v55_v57 }
  0x1c   :  { %v74_v33 = vadd.f32 %v73_v23, %v56_v61  ;;  %v95_v34 = vadd.f32 %v94_v24, %v1039_v62 }
  0x1e   :  { %v75_v38 = vadd.f32 %v74_v33, %v1038_v18  ;;  %v96_v39 = vadd.f32 %v95_v34, %v59_v19 }
  0x20   :  { %v76_v43 = vadd.f32 %v75_v38, %v60_v28  ;;  %v97_v44 = vadd.f32 %v96_v39, %v61_v29 }
  0x22   :  { %v77_v48 = vrot.slane %v76_v43, 4  ;;  %v98_v49 = vrot.slane %v97_v44, 4 }
  0x24   :  { %v78_v53 = vadd.f32 %v77_v48, %v76_v43  ;;  %v99_v54 = vadd.f32 %v98_v49, %v97_v44 }
  0x26   :  { %v79_v58 = vrot.slane %v78_v53, 2  ;;  %v100_v59 = vrot.slane %v99_v54, 2 }
  0x28   :  { %v80_v63 = vadd.f32 %v79_v58, %v78_v53  ;;  %v101_v13 = vadd.f32 %v100_v59, %v99_v54 }
  0x2a   :  { %v81_v23 = vrot.slane %v80_v63, 1  ;;  %v102_v24 = vrot.slane %v101_v13, 1 }
  0x2c   :  { %v82_v33 = vadd.f32 %v81_v23, %v80_v63  ;;  %v103_v18 = vadd.f32 %v102_v24, %v101_v13 }
  0x2e   :  { %v612_v62 = vmul.f32 0.0078125, %v82_v33  ;;  %v614_v34 = vmul.f32 0.0078125, %v103_v18 }
  0x30   :  { %v619_v38 = vsub.f32 %v30_v3, %v612_v62  ;;  %v624_v39 = vsub.f32 %v31_v4, %v614_v34  ;;  %v629_v43 = vsub.f32 %v32_v5, %v612_v62  ;;  %v634_v18 = vsub.f32 %v33_v6, %v614_v34 }
  0x31   :  { %v639_v3 = vsub.f32 %v34_v8, %v612_v62  ;;  %v644_v0 = vsub.f32 %v35_v9, %v614_v34  ;;  %v649_v4 = vsub.f32 %v36_v11, %v612_v62  ;;  %v654_v1 = vsub.f32 %v37_v12, %v614_v34 }
  0x32   :  { %v138_v5 = vmul.f32 %v619_v38, %v619_v38  ;;  %v139_v6 = vmul.f32 %v624_v39, %v624_v39  ;;  %v140_v2 = vmul.f32 %v629_v43, %v629_v43  ;;  %v141_v8 = vmul.f32 %v634_v18, %v634_v18 }
  0x33   :  { %v667_v9 = vsub.f32 %v38_v16, %v612_v62  ;;  %v672_v7 = vsub.f32 %v39_v17, %v614_v34  ;;  %v142_v11 = vmul.f32 %v639_v3, %v639_v3  ;;  %v143_v12 = vmul.f32 %v644_v0, %v644_v0 }
  0x34   :  { %v681_v44 = vsub.f32 %v40_v21, %v612_v62  ;;  %v686_v16 = vsub.f32 %v41_v22, %v614_v34  ;;  %v144_v10 = vmul.f32 %v649_v4, %v649_v4  ;;  %v145_v17 = vmul.f32 %v654_v1, %v654_v1 }
  0x35   :  { %v170_v48 = vadd.f32 %v140_v2, %v138_v5  ;;  %v191_v49 = vadd.f32 %v141_v8, %v139_v6  ;;  %v695_v53 = vsub.f32 %v42_v26, %v612_v62  ;;  %v700_v21 = vsub.f32 %v43_v27, %v614_v34 }
  0x36   :  { %v146_v15 = vmul.f32 %v667_v9, %v667_v9  ;;  %v147_v22 = vmul.f32 %v672_v7, %v672_v7  ;;  %v709_v59 = vsub.f32 %v44_v31, %v612_v62  ;;  %v714_v26 = vsub.f32 %v45_v32, %v614_v34 }
  0x37   :  { %v171_v54 = vadd.f32 %v170_v48, %v142_v11  ;;  %v192_v58 = vadd.f32 %v191_v49, %v143_v12  ;;  %v148_v20 = vmul.f32 %v681_v44, %v681_v44  ;;  %v149_v27 = vmul.f32 %v686_v16, %v686_v16 }
  0x38   :  { %v723_v23 = vsub.f32 %v46_v36, %v612_v62  ;;  %v728_v31 = vsub.f32 %v47_v37, %v614_v34  ;;  %v150_v25 = vmul.f32 %v695_v53, %v695_v53  ;;  %v151_v32 = vmul.f32 %v700_v21, %v700_v21 }
  0x39   :  { %v172_v63 = vadd.f32 %v171_v54, %v144_v10  ;;  %v193_v13 = vadd.f32 %v192_v58, %v145_v17  ;;  %v737_v5 = vsub.f32 %v48_v41, %v612_v62  ;;  %v742_v36 = vsub.f32 %v49_v42, %v614_v34 }
  0x3a   :  { %v152_v30 = vmul.f32 %v709_v59, %v709_v59  ;;  %v153_v37 = vmul.f32 %v714_v26, %v714_v26  ;;  %v751_v8 = vsub.f32 %v50_v46, %v612_v62  ;;  %v756_v41 = vsub.f32 %v51_v47, %v614_v34 }
  0x3b   :  { %v173_v24 = vadd.f32 %v172_v63, %v146_v15  ;;  %v194_v33 = vadd.f32 %v193_v13, %v147_v22  ;;  %v154_v35 = vmul.f32 %v723_v23, %v723_v23  ;;  %v155_v42 = vmul.f32 %v728_v31, %v728_v31 }
  0x3c   :  { %v765_v10 = vsub.f32 %v52_v51, %v612_v62  ;;  %v770_v46 = vsub.f32 %v53_v52, %v614_v34  ;;  %v156_v40 = vmul.f32 %v737_v5, %v737_v5  ;;  %v157_v47 = vmul.f32 %v742_v36, %v742_v36 }
  0x3d   :  { %v174_v6 = vadd.f32 %v173_v24, %v148_v20  ;;  %v195_v2 = vadd.f32 %v194_v33, %v149_v27  ;;  %v779_v49 = vsub.f32 %v54_v56, %v612_v62  ;;  %v784_v51 = vsub.f32 %v55_v57, %v614_v34 }
  0x3e   :  { %v158_v45 = vmul.f32 %v751_v8, %v751_v8  ;;  %v159_v52 = vmul.f32 %v756_v41, %v756_v41  ;;  %v793_v54 = vsub.f32 %v56_v61, %v612_v62  ;;  %v1040_v56 = vunpack.c.h.bf16 %v568_v55 }
  0x3f   :  { %v175_v11 = vadd.f32 %v174_v6, %v150_v25  ;;  %v196_v12 = vadd.f32 %v195_v2, %v151_v32  ;;  %v160_v50 = vmul.f32 %v765_v10, %v765_v10  ;;  %v161_v57 = vmul.f32 %v770_v46, %v770_v46 }
  0x40   :  { %v798_v58 = vsub.f32 %v1040_v56, %v614_v34  ;;  %v1041_v63 = vunpack.c.l.bf16 %v579_v60  ;;  %v812_v61 = vsub.f32 %v59_v19, %v614_v34  ;;  %v162_v55 = vmul.f32 %v779_v49, %v779_v49 }
  0x41   :  { %v176_v17 = vadd.f32 %v175_v11, %v152_v30  ;;  %v197_v48 = vadd.f32 %v196_v12, %v153_v37  ;;  %v163_v25 = vmul.f32 %v784_v51, %v784_v51  ;;  %v821_v33 = vsub.f32 %v60_v28, %v612_v62 }
  0x42   :  { %v807_v13 = vsub.f32 %v1041_v63, %v612_v62  ;;  %v826_v30 = vsub.f32 %v61_v29, %v614_v34  ;;  %v164_v60 = vmul.f32 %v793_v54, %v793_v54  ;;  %v165_v19 = vmul.f32 %v798_v58, %v798_v58 }
  0x43   :  { %v177_v15 = vadd.f32 %v176_v17, %v154_v35  ;;  %v198_v22 = vadd.f32 %v197_v48, %v155_v42  ;;  %v167_v62 = vmul.f32 %v812_v61, %v812_v61  ;;  %v168_v14 = vmul.f32 %v821_v33, %v821_v33 }
  0x44   :  { %v166_v2 = vmul.f32 %v807_v13, %v807_v13  ;;  %v169_v29 = vmul.f32 %v826_v30, %v826_v30 }
  0x45   :  { %v178_v20 = vadd.f32 %v177_v15, %v156_v40  ;;  %v199_v27 = vadd.f32 %v198_v22, %v157_v47 }
  0x47   :  { %v179_v32 = vadd.f32 %v178_v20, %v158_v45  ;;  %v200_v24 = vadd.f32 %v199_v27, %v159_v52 }
  0x49   :  { %v180_v37 = vadd.f32 %v179_v32, %v160_v50  ;;  %v201_v6 = vadd.f32 %v200_v24, %v161_v57 }
  0x4b   :  { %v181_v28 = vadd.f32 %v180_v37, %v162_v55  ;;  %v202_v35 = vadd.f32 %v201_v6, %v163_v25 }
  0x4d   :  { %v182_v34 = vadd.f32 %v181_v28, %v164_v60  ;;  %v203_v42 = vadd.f32 %v202_v35, %v165_v19 }
  0x4f   :  { %v183_v11 = vadd.f32 %v182_v34, %v166_v2  ;;  %v204_v12 = vadd.f32 %v203_v42, %v167_v62  ;;  %v306_v42 = vld [vmem:[%s1036_s2] sm:$0x3] }
  0x51   :  { %v184_v40 = vadd.f32 %v183_v11, %v168_v14  ;;  %v205_v47 = vadd.f32 %v204_v12, %v169_v29  ;;  %v268_v29 = vld [vmem:[%s1035_s1] sm:$0x3] }
  0x53   :  { %v185_v17 = vrot.slane %v184_v40, 4  ;;  %v206_v48 = vrot.slane %v205_v47, 4 }
  0x55   :  { %v186_v45 = vadd.f32 %v185_v17, %v184_v40  ;;  %v207_v52 = vadd.f32 %v206_v48, %v205_v47  ;;  %v846_v40 = vperm.slane %v268_v29, 0  ;;  %v850_v17 = vperm.slane %v268_v29, 1 }
  0x56   :  { %v852_v48 = vperm.slane %v306_v42, 0 }
  0x57   :  { %v187_v15 = vrot.slane %v186_v45, 2  ;;  %v208_v22 = vrot.slane %v207_v52, 2 }
  0x59   :  { %v188_v56 = vadd.f32 %v187_v15, %v186_v45  ;;  %v209_v50 = vadd.f32 %v208_v22, %v207_v52  ;;  %v854_v45 = vperm.slane %v306_v42, 1 }
  0x5b   :  { %v189_v57 = vrot.slane %v188_v56, 1  ;;  %v210_v20 = vrot.slane %v209_v50, 1 }
  0x5d   :  { %v190_v27 = vadd.f32 %v189_v57, %v188_v56  ;;  %v211_v63 = vadd.f32 %v210_v20, %v209_v50 }
  0x5f   :  { %v212_v55 = vmul.f32 0.0078125, %v190_v27  ;;  %v213_v25 = vmul.f32 0.0078125, %v211_v63 }
  0x61   :  { %v214_v32 = vadd.f32 1e-05, %v212_v55  ;;  %v215_v24 = vadd.f32 1e-05, %v213_v25 }
  0x63   :  { %412 = vrsqrt.f32 %v214_v32  ;;  %vm222_vm0 = vweird.f32 %v214_v32  ;;  %vm232_vm2 = vweird.f32 %v215_v24 }
  0x64   :  { %414 = vrsqrt.f32 %v215_v24 }
  0x69   :  { %v413_v60 = vpop.eup %412 }
  0x6a   :  { %v415_v19 = vpop.eup %414  ;;  %v217_v37 = vmul.f32 %v413_v60, %v214_v32  ;;  %vm223_vm1 = vweird.f32 %v413_v60 }
  0x6b   :  { %v227_v6 = vmul.f32 %v415_v19, %v215_v24  ;;  %vm233_vm3 = vweird.f32 %v415_v19  ;;  %vm224_vm4 = vmor %vm222_vm0, %vm223_vm1 }
  0x6c   :  { %v218_v2 = vmul.f32 %v413_v60, %v217_v37  ;;  %vm234_vm5 = vmor %vm232_vm2, %vm233_vm3 }
  0x6d   :  { %v228_v62 = vmul.f32 %v415_v19, %v227_v6 }
  0x6e   :  { %v219_v28 = vmul.f32 0.5, %v218_v2 }
  0x6f   :  { %v229_v35 = vmul.f32 0.5, %v228_v62 }
  0x70   :  { %v220_v14 = vsub.f32 1.5, %v219_v28 }
  0x71   :  { %v230_v34 = vsub.f32 1.5, %v229_v35 }
  0x72   :  { %v221_v11 = vmul.f32 %v413_v60, %v220_v14 }
  0x73   :  { %v231_v12 = vmul.f32 %v415_v19, %v230_v34 }
  0x74   :  { %v848_v47 = vsel %vm224_vm4, %v413_v60, %v221_v11 }
  0x75   :  { %v856_v52 = vsel %vm234_vm5, %v415_v19, %v231_v12  ;;  %v236_v15 = vmul.f32 %v848_v47, %v619_v38  ;;  %v238_v22 = vmul.f32 %v848_v47, %v629_v43  ;;  %v240_v56 = vmul.f32 %v848_v47, %v639_v3 }
  0x76   :  { %v237_v50 = vmul.f32 %v856_v52, %v624_v39  ;;  %v239_v57 = vmul.f32 %v856_v52, %v634_v18  ;;  %v241_v20 = vmul.f32 %v856_v52, %v644_v0  ;;  %v242_v27 = vmul.f32 %v848_v47, %v649_v4 }
  0x77   :  { %v274_v38 = vmul.f32 %v846_v40, %v236_v15  ;;  %v276_v63 = vmul.f32 %v846_v40, %v238_v22  ;;  %v278_v43 = vmul.f32 %v846_v40, %v240_v56  ;;  %v243_v3 = vmul.f32 %v856_v52, %v654_v1 }
  0x78   :  { %v275_v39 = vmul.f32 %v850_v17, %v237_v50  ;;  %v277_v55 = vmul.f32 %v850_v17, %v239_v57  ;;  %v279_v18 = vmul.f32 %v850_v17, %v241_v20  ;;  %v280_v0 = vmul.f32 %v846_v40, %v242_v27 }
  0x79   :  { %v312_v25 = vadd.f32 %v852_v48, %v274_v38  ;;  %v314_v4 = vadd.f32 %v852_v48, %v276_v63  ;;  %v316_v32 = vadd.f32 %v852_v48, %v278_v43  ;;  %v281_v24 = vmul.f32 %v850_v17, %v243_v3 }
  0x7a   :  { %v313_v60 = vadd.f32 %v854_v45, %v275_v39  ;;  %v315_v1 = vadd.f32 %v854_v45, %v277_v55  ;;  %v317_v19 = vadd.f32 %v854_v45, %v279_v18  ;;  %v318_v37 = vadd.f32 %v852_v48, %v280_v0 }
  0x7b   :  { %v344_v6 = vmax.f32 %v312_v25, 0.0  ;;  %v346_v2 = vmax.f32 %v314_v4, 0.0  ;;  %v348_v62 = vmax.f32 %v316_v32, 0.0  ;;  %v319_v28 = vadd.f32 %v854_v45, %v281_v24 }
  0x7c   :  { %v345_v35 = vmax.f32 %v313_v60, 0.0  ;;  %v347_v14 = vmax.f32 %v315_v1, 0.0  ;;  %v349_v29 = vmax.f32 %v317_v19, 0.0  ;;  %v350_v34 = vmax.f32 %v318_v37, 0.0 }
  0x7d   :  { %v351_v42 = vmax.f32 %v319_v28, 0.0  ;;  %v244_v11 = vmul.f32 %v848_v47, %v667_v9  ;;  %v245_v12 = vmul.f32 %v856_v52, %v672_v7  ;;  %v246_v15 = vmul.f32 %v848_v47, %v681_v44 }
  0x7e   :  { %v376_v22 = vpack.c.bf16 %v345_v35, %v344_v6  ;;  %v377_v56 = vpack.c.bf16 %v347_v14, %v346_v2  ;;  %v378_v50 = vpack.c.bf16 %v349_v29, %v348_v62  ;;  %v247_v57 = vmul.f32 %v856_v52, %v686_v16 }
  0x7f   :  { %v379_v20 = vpack.c.bf16 %v351_v42, %v350_v34  ;;  %v282_v27 = vmul.f32 %v846_v40, %v244_v11  ;;  %v283_v38 = vmul.f32 %v850_v17, %v245_v12  ;;  %v284_v63 = vmul.f32 %v846_v40, %v246_v15 }
  0x80   :  { %392 = vst [vmem:[%s1037_s3] sm:$0xff] %v376_v22  ;;  %v285_v9 = vmul.f32 %v850_v17, %v247_v57  ;;  %v248_v7 = vmul.f32 %v848_v47, %v695_v53  ;;  %v249_v44 = vmul.f32 %v856_v52, %v700_v21  ;;  %v250_v16 = vmul.f32 %v848_v47, %v709_v59 }
  0x81   :  { %393 = vst [vmem:[%s1037_s3 + $0x8] sm:$0xff] %v377_v56  ;;  %v320_v43 = vadd.f32 %v852_v48, %v282_v27  ;;  %v321_v3 = vadd.f32 %v854_v45, %v283_v38  ;;  %v322_v39 = vadd.f32 %v852_v48, %v284_v63  ;;  %v251_v55 = vmul.f32 %v856_v52, %v714_v26 }
  0x82   :  { %394 = vst [vmem:[%s1037_s3 + $0x10] sm:$0xff] %v378_v50  ;;  %v323_v53 = vadd.f32 %v854_v45, %v285_v9  ;;  %v286_v21 = vmul.f32 %v846_v40, %v248_v7  ;;  %v287_v59 = vmul.f32 %v850_v17, %v249_v44  ;;  %v288_v18 = vmul.f32 %v846_v40, %v250_v16 }
  0x83   :  { %395 = vst [vmem:[%s1037_s3 + $0x18] sm:$0xff] %v379_v20  ;;  %v352_v0 = vmax.f32 %v320_v43, 0.0  ;;  %v353_v25 = vmax.f32 %v321_v3, 0.0  ;;  %v354_v4 = vmax.f32 %v322_v39, 0.0  ;;  %v289_v26 = vmul.f32 %v850_v17, %v251_v55 }
  0x84   :  { %v355_v32 = vmax.f32 %v323_v53, 0.0  ;;  %v324_v24 = vadd.f32 %v852_v48, %v286_v21  ;;  %v325_v60 = vadd.f32 %v854_v45, %v287_v59  ;;  %v326_v1 = vadd.f32 %v852_v48, %v288_v18 }
  0x85   :  { %v380_v19 = vpack.c.bf16 %v353_v25, %v352_v0  ;;  %v327_v37 = vadd.f32 %v854_v45, %v289_v26  ;;  %v252_v6 = vmul.f32 %v848_v47, %v723_v23  ;;  %v253_v2 = vmul.f32 %v856_v52, %v728_v31 }
  0x86   :  { %v381_v62 = vpack.c.bf16 %v355_v32, %v354_v4  ;;  %v356_v28 = vmax.f32 %v324_v24, 0.0  ;;  %v357_v35 = vmax.f32 %v325_v60, 0.0  ;;  %v358_v14 = vmax.f32 %v326_v1, 0.0 }
  0x87   :  { %396 = vst [vmem:[%s1037_s3 + $0x20] sm:$0xff] %v380_v19  ;;  %v359_v29 = vmax.f32 %v327_v37, 0.0  ;;  %v290_v34 = vmul.f32 %v846_v40, %v252_v6  ;;  %v291_v42 = vmul.f32 %v850_v17, %v253_v2  ;;  %v254_v11 = vmul.f32 %v848_v47, %v737_v5 }
  0x88   :  { %397 = vst [vmem:[%s1037_s3 + $0x28] sm:$0xff] %v381_v62  ;;  %v382_v23 = vpack.c.bf16 %v357_v35, %v356_v28  ;;  %v255_v31 = vmul.f32 %v856_v52, %v742_v36  ;;  %v256_v12 = vmul.f32 %v848_v47, %v751_v8  ;;  %v257_v15 = vmul.f32 %v856_v52, %v756_v41 }
  0x89   :  { %v383_v22 = vpack.c.bf16 %v359_v29, %v358_v14  ;;  %v328_v56 = vadd.f32 %v852_v48, %v290_v34  ;;  %v329_v50 = vadd.f32 %v854_v45, %v291_v42  ;;  %v292_v5 = vmul.f32 %v846_v40, %v254_v11 }
  0x8a   :  { %398 = vst [vmem:[%s1037_s3 + $0x30] sm:$0xff] %v382_v23  ;;  %v293_v57 = vmul.f32 %v850_v17, %v255_v31  ;;  %v294_v36 = vmul.f32 %v846_v40, %v256_v12  ;;  %v295_v8 = vmul.f32 %v850_v17, %v257_v15  ;;  %v258_v41 = vmul.f32 %v848_v47, %v765_v10 }
  0x8b   :  { %399 = vst [vmem:[%s1037_s3 + $0x38] sm:$0xff] %v383_v22  ;;  %v360_v20 = vmax.f32 %v328_v56, 0.0  ;;  %v361_v27 = vmax.f32 %v329_v50, 0.0  ;;  %v330_v38 = vadd.f32 %v852_v48, %v292_v5  ;;  %v259_v63 = vmul.f32 %v856_v52, %v770_v46 }
  0x8c   :  { %v331_v9 = vadd.f32 %v854_v45, %v293_v57  ;;  %v332_v7 = vadd.f32 %v852_v48, %v294_v36  ;;  %v333_v44 = vadd.f32 %v854_v45, %v295_v8  ;;  %v296_v16 = vmul.f32 %v846_v40, %v258_v41 }
  0x8d   :  { %v384_v10 = vpack.c.bf16 %v361_v27, %v360_v20  ;;  %v362_v43 = vmax.f32 %v330_v38, 0.0  ;;  %v297_v3 = vmul.f32 %v850_v17, %v259_v63  ;;  %v260_v39 = vmul.f32 %v848_v47, %v779_v49 }
  0x8e   :  { %v363_v55 = vmax.f32 %v331_v9, 0.0  ;;  %v364_v53 = vmax.f32 %v332_v7, 0.0  ;;  %v365_v21 = vmax.f32 %v333_v44, 0.0  ;;  %v334_v46 = vadd.f32 %v852_v48, %v296_v16 }
  0x8f   :  { %400 = vst [vmem:[%s1037_s3 + $0x40] sm:$0xff] %v384_v10  ;;  %v335_v59 = vadd.f32 %v854_v45, %v297_v3  ;;  %v261_v18 = vmul.f32 %v856_v52, %v784_v51  ;;  %v298_v0 = vmul.f32 %v846_v40, %v260_v39  ;;  %v262_v25 = vmul.f32 %v848_v47, %v793_v54 }
  0x90   :  { %v385_v49 = vpack.c.bf16 %v363_v55, %v362_v43  ;;  %v386_v4 = vpack.c.bf16 %v365_v21, %v364_v53  ;;  %v366_v26 = vmax.f32 %v334_v46, 0.0  ;;  %v263_v32 = vmul.f32 %v856_v52, %v798_v58 }
  0x91   :  { %v367_v24 = vmax.f32 %v335_v59, 0.0  ;;  %v299_v60 = vmul.f32 %v850_v17, %v261_v18  ;;  %v336_v1 = vadd.f32 %v852_v48, %v298_v0  ;;  %v300_v19 = vmul.f32 %v846_v40, %v262_v25 }
  0x92   :  { %401 = vst [vmem:[%s1037_s3 + $0x48] sm:$0xff] %v385_v49  ;;  %v301_v51 = vmul.f32 %v850_v17, %v263_v32  ;;  %v264_v54 = vmul.f32 %v848_v47, %v807_v13  ;;  %v265_v37 = vmul.f32 %v856_v52, %v812_v61  ;;  %v266_v58 = vmul.f32 %v848_v47, %v821_v33 }
  0x93   :  { %402 = vst [vmem:[%s1037_s3 + $0x50] sm:$0xff] %v386_v4  ;;  %v387_v6 = vpack.c.bf16 %v367_v24, %v366_v26  ;;  %v337_v2 = vadd.f32 %v854_v45, %v299_v60  ;;  %v368_v62 = vmax.f32 %v336_v1, 0.0  ;;  %v338_v28 = vadd.f32 %v852_v48, %v300_v19 }
  0x94   :  { %v339_v35 = vadd.f32 %v854_v45, %v301_v51  ;;  %v302_v13 = vmul.f32 %v846_v40, %v264_v54  ;;  %v303_v14 = vmul.f32 %v850_v17, %v265_v37  ;;  %v267_v61 = vmul.f32 %v856_v52, %v826_v30 }
  0x95   :  { %403 = vst [vmem:[%s1037_s3 + $0x58] sm:$0xff] %v387_v6  ;;  %v369_v33 = vmax.f32 %v337_v2, 0.0  ;;  %v370_v47 = vmax.f32 %v338_v28, 0.0  ;;  %v304_v29 = vmul.f32 %v846_v40, %v266_v58 }
  0x96   :  { %v371_v34 = vmax.f32 %v339_v35, 0.0  ;;  %v340_v42 = vadd.f32 %v852_v48, %v302_v13  ;;  %v341_v11 = vadd.f32 %v854_v45, %v303_v14  ;;  %v305_v23 = vmul.f32 %v850_v17, %v267_v61 }
  0x97   :  { %v388_v31 = vpack.c.bf16 %v369_v33, %v368_v62  ;;  %v342_v12 = vadd.f32 %v852_v48, %v304_v29 }
  0x98   :  { %v389_v15 = vpack.c.bf16 %v371_v34, %v370_v47  ;;  %v372_v30 = vmax.f32 %v340_v42, 0.0  ;;  %v373_v52 = vmax.f32 %v341_v11, 0.0  ;;  %v343_v22 = vadd.f32 %v854_v45, %v305_v23 }
  0x99   :  { %404 = vst [vmem:[%s1037_s3 + $0x60] sm:$0xff] %v388_v31  ;;  %v374_v40 = vmax.f32 %v342_v12, 0.0 }
  0x9a   :  { %405 = vst [vmem:[%s1037_s3 + $0x68] sm:$0xff] %v389_v15  ;;  %v390_v56 = vpack.c.bf16 %v373_v52, %v372_v30  ;;  %v375_v50 = vmax.f32 %v343_v22, 0.0 }
  0x9c   :  { %406 = vst [vmem:[%s1037_s3 + $0x70] sm:$0xff] %v390_v56  ;;  %v391_v17 = vpack.c.bf16 %v375_v50, %v374_v40 }
  0x9e   :  { %407 = vst [vmem:[%s1037_s3 + $0x78] sm:$0xff] %v391_v17 }

// kernel: _forward_impl.246
= control target key start
LH: loop header
LB: loop body
LE: loop exit
PB: predicated region body
PF: predicated region fallthrough
CT: control target
= control target key end

     0   :  { %s516_s0 = inlined_call_operand.vmem [shape: bf16[128,128], index: 0, kind: input, shape index: {}]   ;;  %s517_s1 = inlined_call_operand.vmem [shape: f32[1,128], index: 1, kind: input, shape index: {}]   ;;  %s518_s2 = inlined_call_operand.vmem [shape: f32[1,128], index: 2, kind: input, shape index: {}]   ;;  %s519_s3 = inlined_call_operand.vmem [shape: bf16[128,128], index: 3, kind: output, shape index: {}]  }
   0x1   :  { %v242_v0 = vld [vmem:[%s516_s0] sm:$0xff]   ;;  %v313_v1 = vld [vmem:[%s516_s0 + $0x8] sm:$0xff]   ;;  %v314_v5 = vld [vmem:[%s516_s0 + $0x10] sm:$0xff]  }
   0x2   :  { %v243_v2 = vunpack.c.l.bf16 %v242_v0  ;;  %v244_v3 = vunpack.c.h.bf16 %v242_v0  ;;  %v247_v4 = vunpack.c.l.bf16 %v313_v1  ;;  %v248_v6 = vunpack.c.h.bf16 %v313_v1  ;;  %v315_v10 = vld [vmem:[%s516_s0 + $0x18] sm:$0xff]   ;;  %v316_v15 = vld [vmem:[%s516_s0 + $0x20] sm:$0xff]   ;;  %v317_v20 = vld [vmem:[%s516_s0 + $0x28] sm:$0xff]  }
   0x3   :  { %v251_v8 = vunpack.c.l.bf16 %v314_v5  ;;  %v252_v11 = vunpack.c.h.bf16 %v314_v5  ;;  %v255_v13 = vunpack.c.l.bf16 %v315_v10  ;;  %v256_v16 = vunpack.c.h.bf16 %v315_v10  ;;  %v318_v25 = vld [vmem:[%s516_s0 + $0x30] sm:$0xff]   ;;  %v319_v30 = vld [vmem:[%s516_s0 + $0x38] sm:$0xff]  }
   0x4   :  { %v46_v7 = vadd.f32 %v244_v3, %v243_v2  ;;  %v259_v18 = vunpack.c.l.bf16 %v316_v15  ;;  %v260_v21 = vunpack.c.h.bf16 %v316_v15  ;;  %v263_v23 = vunpack.c.l.bf16 %v317_v20 }
   0x5   :  { %v264_v26 = vunpack.c.h.bf16 %v317_v20  ;;  %v267_v28 = vunpack.c.l.bf16 %v318_v25  ;;  %v268_v31 = vunpack.c.h.bf16 %v318_v25  ;;  %v271_v33 = vunpack.c.l.bf16 %v319_v30 }
   0x6   :  { %v47_v9 = vadd.f32 %v247_v4, %v46_v7  ;;  %v272_v35 = vunpack.c.h.bf16 %v319_v30 }
   0x8   :  { %v48_v12 = vadd.f32 %v248_v6, %v47_v9 }
   0xa   :  { %v49_v14 = vadd.f32 %v251_v8, %v48_v12 }
   0xc   :  { %v50_v17 = vadd.f32 %v252_v11, %v49_v14 }
   0xe   :  { %v51_v19 = vadd.f32 %v255_v13, %v50_v17 }
  0x10   :  { %v52_v22 = vadd.f32 %v256_v16, %v51_v19 }
  0x12   :  { %v53_v24 = vadd.f32 %v259_v18, %v52_v22 }
  0x14   :  { %v54_v27 = vadd.f32 %v260_v21, %v53_v24 }
  0x16   :  { %v55_v29 = vadd.f32 %v263_v23, %v54_v27 }
  0x18   :  { %v56_v32 = vadd.f32 %v264_v26, %v55_v29 }
  0x1a   :  { %v57_v34 = vadd.f32 %v267_v28, %v56_v32 }
  0x1c   :  { %v58_v36 = vadd.f32 %v268_v31, %v57_v34 }
  0x1e   :  { %v59_v37 = vadd.f32 %v271_v33, %v58_v36 }
  0x20   :  { %v60_v38 = vadd.f32 %v272_v35, %v59_v37 }
  0x22   :  { %v61_v39 = vrot.slane %v60_v38, 4 }
  0x24   :  { %v62_v40 = vadd.f32 %v61_v39, %v60_v38 }
  0x26   :  { %v63_v41 = vrot.slane %v62_v40, 2 }
  0x28   :  { %v64_v42 = vadd.f32 %v63_v41, %v62_v40 }
  0x2a   :  { %v65_v43 = vrot.slane %v64_v42, 1 }
  0x2c   :  { %v66_v44 = vadd.f32 %v65_v43, %v64_v42  ;;  %v438_v43 = vld [vmem:[%s517_s1] ss:$0 sm:$0xff] }
  0x2e   :  { %v67_v45 = vmul.f32 0.0078125, %v66_v44 }
  0x30   :  { %v375_v46 = vsub.f32 %v243_v2, %v67_v45  ;;  %v377_v47 = vsub.f32 %v244_v3, %v67_v45  ;;  %v379_v48 = vsub.f32 %v247_v4, %v67_v45  ;;  %v381_v49 = vsub.f32 %v248_v6, %v67_v45 }
  0x31   :  { %v387_v52 = vsub.f32 %v251_v8, %v67_v45  ;;  %v391_v54 = vsub.f32 %v252_v11, %v67_v45  ;;  %v395_v57 = vsub.f32 %v255_v13, %v67_v45  ;;  %v75_v60 = vsub.f32 %v256_v16, %v67_v45 }
  0x32   :  { %v84_v50 = vmul.f32 %v375_v46, %v375_v46  ;;  %v85_v51 = vmul.f32 %v377_v47, %v377_v47  ;;  %v86_v53 = vmul.f32 %v379_v48, %v379_v48  ;;  %v87_v55 = vmul.f32 %v381_v49, %v381_v49 }
  0x33   :  { %v88_v58 = vmul.f32 %v387_v52, %v387_v52  ;;  %v89_v61 = vmul.f32 %v391_v54, %v391_v54  ;;  %v401_v63 = vsub.f32 %v259_v18, %v67_v45  ;;  %v90_v0 = vmul.f32 %v395_v57, %v395_v57 }
  0x34   :  { %v100_v56 = vadd.f32 %v85_v51, %v84_v50  ;;  %v405_v2 = vsub.f32 %v260_v21, %v67_v45  ;;  %v91_v3 = vmul.f32 %v75_v60, %v75_v60  ;;  %v407_v5 = vsub.f32 %v263_v23, %v67_v45  ;;  %v445_v51 = vld [vmem:[%s518_s2] ss:$0 sm:$0xff] }
  0x35   :  { %v92_v6 = vmul.f32 %v401_v63, %v401_v63  ;;  %v411_v8 = vsub.f32 %v264_v26, %v67_v45  ;;  %v415_v11 = vsub.f32 %v267_v28, %v67_v45  ;;  %v419_v14 = vsub.f32 %v268_v31, %v67_v45 }
  0x36   :  { %v101_v59 = vadd.f32 %v100_v56, %v86_v53  ;;  %v93_v9 = vmul.f32 %v405_v2, %v405_v2  ;;  %v94_v12 = vmul.f32 %v407_v5, %v407_v5  ;;  %v423_v17 = vsub.f32 %v271_v33, %v67_v45 }
  0x37   :  { %v95_v15 = vmul.f32 %v411_v8, %v411_v8  ;;  %v96_v18 = vmul.f32 %v415_v11, %v415_v11  ;;  %v427_v20 = vsub.f32 %v272_v35, %v67_v45  ;;  %v97_v21 = vmul.f32 %v419_v14, %v419_v14 }
  0x38   :  { %v102_v62 = vadd.f32 %v101_v59, %v87_v55  ;;  %v98_v23 = vmul.f32 %v423_v17, %v423_v17 }
  0x39   :  { %v99_v25 = vmul.f32 %v427_v20, %v427_v20 }
  0x3a   :  { %v103_v1 = vadd.f32 %v102_v62, %v88_v58 }
  0x3c   :  { %v104_v4 = vadd.f32 %v103_v1, %v89_v61 }
  0x3e   :  { %v105_v7 = vadd.f32 %v104_v4, %v90_v0 }
  0x40   :  { %v106_v10 = vadd.f32 %v105_v7, %v91_v3 }
  0x42   :  { %v107_v13 = vadd.f32 %v106_v10, %v92_v6 }
  0x44   :  { %v108_v16 = vadd.f32 %v107_v13, %v93_v9 }
  0x46   :  { %v109_v19 = vadd.f32 %v108_v16, %v94_v12 }
  0x48   :  { %v110_v22 = vadd.f32 %v109_v19, %v95_v15 }
  0x4a   :  { %v111_v24 = vadd.f32 %v110_v22, %v96_v18 }
  0x4c   :  { %v112_v26 = vadd.f32 %v111_v24, %v97_v21 }
  0x4e   :  { %v113_v27 = vadd.f32 %v112_v26, %v98_v23 }
  0x50   :  { %v114_v28 = vadd.f32 %v113_v27, %v99_v25 }
  0x52   :  { %v115_v29 = vrot.slane %v114_v28, 4 }
  0x54   :  { %v116_v30 = vadd.f32 %v115_v29, %v114_v28 }
  0x56   :  { %v117_v31 = vrot.slane %v116_v30, 2 }
  0x58   :  { %v118_v32 = vadd.f32 %v117_v31, %v116_v30 }
  0x5a   :  { %v119_v33 = vrot.slane %v118_v32, 1 }
  0x5c   :  { %v120_v34 = vadd.f32 %v119_v33, %v118_v32 }
  0x5e   :  { %v121_v35 = vmul.f32 0.0078125, %v120_v34 }
  0x60   :  { %v122_v36 = vadd.f32 1e-05, %v121_v35 }
  0x62   :  { %329 = vrsqrt.f32 %v122_v36  ;;  %vm129_vm0 = vweird.f32 %v122_v36 }
  0x68   :  { %v330_v37 = vpop.eup %329 }
  0x69   :  { %v124_v38 = vmul.f32 %v330_v37, %v122_v36  ;;  %vm130_vm1 = vweird.f32 %v330_v37 }
  0x6a   :  { %vm131_vm2 = vmor %vm129_vm0, %vm130_vm1 }
  0x6b   :  { %v125_v39 = vmul.f32 %v330_v37, %v124_v38 }
  0x6d   :  { %v126_v40 = vmul.f32 0.5, %v125_v39 }
  0x6f   :  { %v127_v41 = vsub.f32 1.5, %v126_v40 }
  0x71   :  { %v128_v42 = vmul.f32 %v330_v37, %v127_v41 }
  0x73   :  { %v132_v44 = vsel %vm131_vm2, %v330_v37, %v128_v42 }
  0x74   :  { %v133_v45 = vmul.f32 %v132_v44, %v375_v46  ;;  %v134_v50 = vmul.f32 %v132_v44, %v377_v47  ;;  %v135_v53 = vmul.f32 %v132_v44, %v379_v48  ;;  %v136_v55 = vmul.f32 %v132_v44, %v381_v49 }
  0x75   :  { %v137_v56 = vmul.f32 %v132_v44, %v387_v52  ;;  %v138_v58 = vmul.f32 %v132_v44, %v391_v54  ;;  %v139_v59 = vmul.f32 %v132_v44, %v395_v57  ;;  %v140_v61 = vmul.f32 %v132_v44, %v75_v60 }
  0x76   :  { %v153_v46 = vmul.f32 %v438_v43, %v133_v45  ;;  %v154_v47 = vmul.f32 %v438_v43, %v134_v50  ;;  %v155_v62 = vmul.f32 %v438_v43, %v135_v53  ;;  %v156_v0 = vmul.f32 %v438_v43, %v136_v55 }
  0x77   :  { %v157_v1 = vmul.f32 %v438_v43, %v137_v56  ;;  %v158_v48 = vmul.f32 %v438_v43, %v138_v58  ;;  %v159_v49 = vmul.f32 %v438_v43, %v139_v59  ;;  %v160_v52 = vmul.f32 %v438_v43, %v140_v61 }
  0x78   :  { %v173_v54 = vadd.f32 %v445_v51, %v153_v46  ;;  %v174_v57 = vadd.f32 %v445_v51, %v154_v47  ;;  %v175_v60 = vadd.f32 %v445_v51, %v155_v62  ;;  %v176_v3 = vadd.f32 %v445_v51, %v156_v0 }
  0x79   :  { %v177_v4 = vadd.f32 %v445_v51, %v157_v1  ;;  %v178_v6 = vadd.f32 %v445_v51, %v158_v48  ;;  %v179_v7 = vadd.f32 %v445_v51, %v159_v49  ;;  %v180_v9 = vadd.f32 %v445_v51, %v160_v52 }
  0x7a   :  { %v189_v10 = vmax.f32 %v173_v54, 0.0  ;;  %v190_v12 = vmax.f32 %v174_v57, 0.0  ;;  %v191_v13 = vmax.f32 %v175_v60, 0.0  ;;  %v192_v15 = vmax.f32 %v176_v3, 0.0 }
  0x7b   :  { %v193_v16 = vmax.f32 %v177_v4, 0.0  ;;  %v194_v18 = vmax.f32 %v178_v6, 0.0  ;;  %v195_v19 = vmax.f32 %v179_v7, 0.0  ;;  %v196_v21 = vmax.f32 %v180_v9, 0.0 }
  0x7c   :  { %v276_v22 = vpack.c.bf16 %v190_v12, %v189_v10  ;;  %v281_v23 = vpack.c.bf16 %v192_v15, %v191_v13  ;;  %v141_v24 = vmul.f32 %v132_v44, %v401_v63  ;;  %v142_v25 = vmul.f32 %v132_v44, %v405_v2 }
  0x7d   :  { %v286_v26 = vpack.c.bf16 %v194_v18, %v193_v16  ;;  %v291_v27 = vpack.c.bf16 %v196_v21, %v195_v19  ;;  %v143_v28 = vmul.f32 %v132_v44, %v407_v5  ;;  %v144_v29 = vmul.f32 %v132_v44, %v411_v8 }
  0x7e   :  { %277 = vst [vmem:[%s519_s3] sm:$0xff] %v276_v22   ;;  %v161_v30 = vmul.f32 %v438_v43, %v141_v24  ;;  %v162_v31 = vmul.f32 %v438_v43, %v142_v25  ;;  %v145_v32 = vmul.f32 %v132_v44, %v415_v11  ;;  %v146_v63 = vmul.f32 %v132_v44, %v419_v14 }
  0x7f   :  { %320 = vst [vmem:[%s519_s3 + $0x8] sm:$0xff] %v281_v23   ;;  %v163_v2 = vmul.f32 %v438_v43, %v143_v28  ;;  %v164_v5 = vmul.f32 %v438_v43, %v144_v29  ;;  %v147_v8 = vmul.f32 %v132_v44, %v423_v17  ;;  %v148_v33 = vmul.f32 %v132_v44, %v427_v20 }
  0x80   :  { %321 = vst [vmem:[%s519_s3 + $0x10] sm:$0xff] %v286_v26   ;;  %v181_v11 = vadd.f32 %v445_v51, %v161_v30  ;;  %v182_v14 = vadd.f32 %v445_v51, %v162_v31  ;;  %v165_v34 = vmul.f32 %v438_v43, %v145_v32  ;;  %v166_v35 = vmul.f32 %v438_v43, %v146_v63 }
  0x81   :  { %322 = vst [vmem:[%s519_s3 + $0x18] sm:$0xff] %v291_v27   ;;  %v183_v17 = vadd.f32 %v445_v51, %v163_v2  ;;  %v184_v20 = vadd.f32 %v445_v51, %v164_v5  ;;  %v167_v36 = vmul.f32 %v438_v43, %v147_v8  ;;  %v168_v37 = vmul.f32 %v438_v43, %v148_v33 }
  0x82   :  { %v197_v38 = vmax.f32 %v181_v11, 0.0  ;;  %v198_v39 = vmax.f32 %v182_v14, 0.0  ;;  %v185_v40 = vadd.f32 %v445_v51, %v165_v34  ;;  %v186_v41 = vadd.f32 %v445_v51, %v166_v35 }
  0x83   :  { %v199_v42 = vmax.f32 %v183_v17, 0.0  ;;  %v200_v44 = vmax.f32 %v184_v20, 0.0  ;;  %v187_v45 = vadd.f32 %v445_v51, %v167_v36  ;;  %v188_v50 = vadd.f32 %v445_v51, %v168_v37 }
  0x84   :  { %v296_v53 = vpack.c.bf16 %v198_v39, %v197_v38  ;;  %v201_v55 = vmax.f32 %v185_v40, 0.0  ;;  %v202_v56 = vmax.f32 %v186_v41, 0.0 }
  0x85   :  { %v301_v58 = vpack.c.bf16 %v200_v44, %v199_v42  ;;  %v203_v59 = vmax.f32 %v187_v45, 0.0  ;;  %v204_v61 = vmax.f32 %v188_v50, 0.0 }
  0x86   :  { %323 = vst [vmem:[%s519_s3 + $0x20] sm:$0xff] %v296_v53   ;;  %v306_v43 = vpack.c.bf16 %v202_v56, %v201_v55 }
  0x87   :  { %324 = vst [vmem:[%s519_s3 + $0x28] sm:$0xff] %v301_v58   ;;  %v311_v46 = vpack.c.bf16 %v204_v61, %v203_v59 }
  0x88   :  { %325 = vst [vmem:[%s519_s3 + $0x30] sm:$0xff] %v306_v43  }
  0x89   :  { %326 = vst [vmem:[%s519_s3 + $0x38] sm:$0xff] %v311_v46  }

// kernel: _forward_impl.245
= control target key start
LH: loop header
LB: loop body
LE: loop exit
PB: predicated region body
PF: predicated region fallthrough
CT: control target
= control target key end

     0   :  { %s775_s1 = inlined_call_operand.vmem [shape: bf16[256,128], index: 1, kind: input, shape index: {}]   ;;  %s776_s0 = inlined_call_operand.vmem [shape: bf16[128,256], index: 0, kind: input, shape index: {}]   ;;  %s777_s2 = inlined_call_operand.vmem [shape: bf16[128,128], index: 2, kind: output, shape index: {}]  }
   0x1   :  { %v520_v0 = vld [vmem:[%s775_s1 + $0x38] sm:$0xff]  ;;  %v519_v2 = vld [vmem:[%s775_s1 + $0x30] sm:$0xff]  ;;  %v518_v4 = vld [vmem:[%s775_s1 + $0x28] sm:$0xff] }
   0x2   :  { %v528_v1 = vld [vmem:[%s775_s1 + $0x78] sm:$0xff]  ;;  %235 = vmatpush.bf16.msra.mxu0 %v520_v0  ;;  %576 = vmatpush.bf16.msra.mxu2 %v520_v0  ;;  %v527_v3 = vld [vmem:[%s775_s1 + $0x70] sm:$0xff]  ;;  %v526_v5 = vld [vmem:[%s775_s1 + $0x68] sm:$0xff] }
   0x3   :  { %284 = vmatpush.bf16.msra.mxu1 %v528_v1  ;;  %584 = vmatpush.bf16.msra.mxu3 %v528_v1  ;;  %v517_v6 = vld [vmem:[%s775_s1 + $0x20] sm:$0xff]  ;;  %v516_v8 = vld [vmem:[%s775_s1 + $0x18] sm:$0xff]  ;;  %v515_v10 = vld [vmem:[%s775_s1 + $0x10] sm:$0xff] }
   0x4   :  { %v525_v7 = vld [vmem:[%s775_s1 + $0x60] sm:$0xff]  ;;  %v524_v9 = vld [vmem:[%s775_s1 + $0x58] sm:$0xff]  ;;  %v523_v11 = vld [vmem:[%s775_s1 + $0x50] sm:$0xff] }
   0x5   :  { %v514_v12 = vld [vmem:[%s775_s1 + $0x8] sm:$0xff]  ;;  %v513_v14 = vld [vmem:[%s775_s1] sm:$0xff]  ;;  %v379_v28 = vld [vmem:[%s776_s0 + $0x10] sm:$0xf] }
   0x6   :  { %236 = vmatpush.bf16.msra.mxu0 %v519_v2  ;;  %577 = vmatpush.bf16.msra.mxu2 %v519_v2  ;;  %v522_v13 = vld [vmem:[%s775_s1 + $0x48] sm:$0xff]  ;;  %v521_v15 = vld [vmem:[%s775_s1 + $0x40] sm:$0xff]  ;;  %v500_v29 = vld [vmem:[%s776_s0 + $0x14] sm:$0xf0] }
   0x7   :  { %285 = vmatpush.bf16.msra.mxu1 %v527_v3  ;;  %585 = vmatpush.bf16.msra.mxu3 %v527_v3  ;;  %v371_v16 = vld [vmem:[%s776_s0] sm:$0xf]  ;;  %v498_v17 = vld [vmem:[%s776_s0 + $0x4] sm:$0xf0]  ;;  %v497_v20 = vld [vmem:[%s776_s0 + $0x4] sm:$0xf]  ;;  %v380_v36 = vor.u32 %v500_v29, %v379_v28 }
   0x8   :  { %v403_v18 = vld [vmem:[%s776_s0 + $0x40] sm:$0xf]  ;;  %v506_v19 = vld [vmem:[%s776_s0 + $0x44] sm:$0xf0]  ;;  %v373_v21 = vld [vmem:[%s776_s0 + $0x8] sm:$0xf0]  ;;  %v372_v24 = vor.u32 %v498_v17, %v371_v16 }
   0x9   :  { %v505_v22 = vld [vmem:[%s776_s0 + $0x44] sm:$0xf]  ;;  %v405_v23 = vld [vmem:[%s776_s0 + $0x48] sm:$0xf0]  ;;  %v404_v25 = vor.u32 %v506_v19, %v403_v18  ;;  %v376_v26 = vor.u32 %v497_v20, %v373_v21  ;;  %v411_v30 = vld [vmem:[%s776_s0 + $0x50] sm:$0xf] }
   0xa   :  { %237 = vmatpush.bf16.msra.mxu0 %v518_v4  ;;  %578 = vmatpush.bf16.msra.mxu2 %v518_v4  ;;  %v408_v27 = vor.u32 %v505_v22, %v405_v23  ;;  %v508_v31 = vld [vmem:[%s776_s0 + $0x54] sm:$0xf0]  ;;  %v499_v32 = vld [vmem:[%s776_s0 + $0x14] sm:$0xf]  ;;  %v381_v33 = vld [vmem:[%s776_s0 + $0x18] sm:$0xf0] }
   0xb   :  { %286 = vmatpush.bf16.msra.mxu1 %v526_v5  ;;  %586 = vmatpush.bf16.msra.mxu3 %v526_v5  ;;  %v507_v34 = vld [vmem:[%s776_s0 + $0x54] sm:$0xf]  ;;  %v413_v35 = vld [vmem:[%s776_s0 + $0x58] sm:$0xf0]  ;;  %v412_v37 = vor.u32 %v508_v31, %v411_v30  ;;  %v384_v38 = vor.u32 %v499_v32, %v381_v33  ;;  %v387_v40 = vld [vmem:[%s776_s0 + $0x20] sm:$0xf] }
   0xc   :  { %v416_v39 = vor.u32 %v507_v34, %v413_v35  ;;  %v502_v41 = vld [vmem:[%s776_s0 + $0x24] sm:$0xf0]  ;;  %v419_v42 = vld [vmem:[%s776_s0 + $0x60] sm:$0xf]  ;;  %v501_v44 = vld [vmem:[%s776_s0 + $0x24] sm:$0xf] }
   0xd   :  { %v510_v43 = vld [vmem:[%s776_s0 + $0x64] sm:$0xf0]  ;;  %v389_v45 = vld [vmem:[%s776_s0 + $0x28] sm:$0xf0]  ;;  %v509_v46 = vld [vmem:[%s776_s0 + $0x64] sm:$0xf]  ;;  %v388_v48 = vor.u32 %v502_v41, %v387_v40 }
   0xe   :  { %238 = vmatpush.bf16.msra.mxu0 %v517_v6  ;;  %579 = vmatpush.bf16.msra.mxu2 %v517_v6  ;;  %v421_v47 = vld [vmem:[%s776_s0 + $0x68] sm:$0xf0]  ;;  %v420_v49 = vor.u32 %v510_v43, %v419_v42  ;;  %v392_v50 = vor.u32 %v501_v44, %v389_v45  ;;  %v395_v52 = vld [vmem:[%s776_s0 + $0x30] sm:$0xf]  ;;  %v504_v53 = vld [vmem:[%s776_s0 + $0x34] sm:$0xf0] }
   0xf   :  { %287 = vmatpush.bf16.msra.mxu1 %v525_v7  ;;  %587 = vmatpush.bf16.msra.mxu3 %v525_v7  ;;  %v424_v51 = vor.u32 %v509_v46, %v421_v47  ;;  %v427_v54 = vld [vmem:[%s776_s0 + $0x70] sm:$0xf]  ;;  %v512_v55 = vld [vmem:[%s776_s0 + $0x74] sm:$0xf0]  ;;  %v503_v56 = vld [vmem:[%s776_s0 + $0x34] sm:$0xf]  ;;  %v396_v60 = vor.u32 %v504_v53, %v395_v52 }
  0x10   :  { %v397_v57 = vld [vmem:[%s776_s0 + $0x38] sm:$0xf0]  ;;  %v511_v58 = vld [vmem:[%s776_s0 + $0x74] sm:$0xf]  ;;  %v428_v61 = vor.u32 %v512_v55, %v427_v54 }
  0x11   :  { %v429_v59 = vld [vmem:[%s776_s0 + $0x78] sm:$0xf0]  ;;  %v400_v62 = vor.u32 %v503_v56, %v397_v57 }
  0x12   :  { %239 = vmatpush.bf16.msra.mxu0 %v516_v8  ;;  %580 = vmatpush.bf16.msra.mxu2 %v516_v8  ;;  %v432_v63 = vor.u32 %v511_v58, %v429_v59 }
  0x13   :  { %288 = vmatpush.bf16.msra.mxu1 %v524_v9  ;;  %588 = vmatpush.bf16.msra.mxu3 %v524_v9 }
  0x16   :  { %240 = vmatpush.bf16.msra.mxu0 %v515_v10  ;;  %581 = vmatpush.bf16.msra.mxu2 %v515_v10 }
  0x17   :  { %289 = vmatpush.bf16.msra.mxu1 %v523_v11  ;;  %589 = vmatpush.bf16.msra.mxu3 %v523_v11 }
  0x1a   :  { %241 = vmatpush.bf16.msra.mxu0 %v514_v12  ;;  %582 = vmatpush.bf16.msra.mxu2 %v514_v12 }
  0x1b   :  { %290 = vmatpush.bf16.msra.mxu1 %v522_v13  ;;  %590 = vmatpush.bf16.msra.mxu3 %v522_v13 }
  0x1e   :  { %242 = vmatpush.bf16.msra.mxu0 %v513_v14  ;;  %583 = vmatpush.bf16.msra.mxu2 %v513_v14 }
  0x1f   :  { %291 = vmatpush.bf16.msra.mxu1 %v521_v15  ;;  %591 = vmatpush.bf16.msra.mxu3 %v521_v15 }
  0x21   :  { %243 = vmatmul.bf16.vlgmr.msra.gmra.mxu0 %v372_v24  ;;  %263 = vmatmul.bf16.vlgmr.msra.gmra.mxu2 %v404_v25 }
  0x22   :  { %292 = vmatmul.bf16.vlgmr.msra.gmra.mxu1 %v376_v26  ;;  %312 = vmatmul.bf16.vlgmr.msra.gmra.mxu3 %v408_v27 }
  0x31   :  { %248 = vmatmul.bf16.gmra.mxu0 %v380_v36  ;;  %268 = vmatmul.bf16.gmra.mxu2 %v412_v37 }
  0x32   :  { %297 = vmatmul.bf16.gmra.mxu1 %v384_v38  ;;  %317 = vmatmul.bf16.gmra.mxu3 %v416_v39 }
  0x41   :  { %253 = vmatmul.bf16.gmra.mxu0 %v388_v48  ;;  %273 = vmatmul.bf16.gmra.mxu2 %v420_v49 }
  0x42   :  { %302 = vmatmul.bf16.gmra.mxu1 %v392_v50  ;;  %322 = vmatmul.bf16.gmra.mxu3 %v424_v51 }
  0x51   :  { %258 = vmatmul.bf16.gmra.mxu0 %v396_v60  ;;  %278 = vmatmul.bf16.gmra.mxu2 %v428_v61 }
  0x52   :  { %307 = vmatmul.bf16.gmra.mxu1 %v400_v62  ;;  %327 = vmatmul.bf16.gmra.mxu3 %v432_v63 }
  0x9e   :  { %v244_v0 = vpop.f32.mrf.mxu0 }
  0x9f   :  { %v293_v1 = vpop.f32.mrf.mxu1 }
  0xa0   :  { %v294_v6 = vadd.f32 %v293_v1, %v244_v0 }
  0xa4   :  { %v264_v2 = vpop.f32.mrf.mxu2 }
  0xa5   :  { %v313_v3 = vpop.f32.mrf.mxu3 }
  0xa6   :  { %v246_v4 = vpop.f32.mrf.mxu0  ;;  %v314_v11 = vadd.f32 %v313_v3, %v264_v2 }
  0xa7   :  { %v295_v5 = vpop.f32.mrf.mxu1 }
  0xa8   :  { %v296_v7 = vadd.f32 %v295_v5, %v246_v4 }
  0xaa   :  { %v532_v8 = vpack.c.bf16 %v296_v7, %v294_v6 }
  0xac   :  { %533 = vst [vmem:[%s777_s2] sm:$0xff] %v532_v8   ;;  %v266_v9 = vpop.f32.mrf.mxu2 }
  0xad   :  { %v315_v10 = vpop.f32.mrf.mxu3 }
  0xae   :  { %v316_v12 = vadd.f32 %v315_v10, %v266_v9  ;;  %v249_v13 = vpop.f32.mrf.mxu0 }
  0xaf   :  { %v298_v14 = vpop.f32.mrf.mxu1 }
  0xb0   :  { %v552_v15 = vpack.c.bf16 %v316_v12, %v314_v11  ;;  %v299_v20 = vadd.f32 %v298_v14, %v249_v13 }
  0xb2   :  { %572 = vst [vmem:[%s777_s2 + $0x20] sm:$0xff] %v552_v15  }
  0xb4   :  { %v269_v16 = vpop.f32.mrf.mxu2 }
  0xb5   :  { %v318_v17 = vpop.f32.mrf.mxu3 }
  0xb6   :  { %v251_v18 = vpop.f32.mrf.mxu0  ;;  %v319_v25 = vadd.f32 %v318_v17, %v269_v16 }
  0xb7   :  { %v300_v19 = vpop.f32.mrf.mxu1 }
  0xb8   :  { %v301_v21 = vadd.f32 %v300_v19, %v251_v18 }
  0xba   :  { %v537_v22 = vpack.c.bf16 %v301_v21, %v299_v20 }
  0xbc   :  { %569 = vst [vmem:[%s777_s2 + $0x8] sm:$0xff] %v537_v22   ;;  %v271_v23 = vpop.f32.mrf.mxu2 }
  0xbd   :  { %v320_v24 = vpop.f32.mrf.mxu3 }
  0xbe   :  { %v321_v26 = vadd.f32 %v320_v24, %v271_v23  ;;  %v254_v27 = vpop.f32.mrf.mxu0 }
  0xbf   :  { %v303_v28 = vpop.f32.mrf.mxu1 }
  0xc0   :  { %v557_v29 = vpack.c.bf16 %v321_v26, %v319_v25  ;;  %v304_v34 = vadd.f32 %v303_v28, %v254_v27 }
  0xc2   :  { %573 = vst [vmem:[%s777_s2 + $0x28] sm:$0xff] %v557_v29  }
  0xc4   :  { %v274_v30 = vpop.f32.mrf.mxu2 }
  0xc5   :  { %v323_v31 = vpop.f32.mrf.mxu3 }
  0xc6   :  { %v256_v32 = vpop.f32.mrf.mxu0  ;;  %v324_v39 = vadd.f32 %v323_v31, %v274_v30 }
  0xc7   :  { %v305_v33 = vpop.f32.mrf.mxu1 }
  0xc8   :  { %v306_v35 = vadd.f32 %v305_v33, %v256_v32 }
  0xca   :  { %v542_v36 = vpack.c.bf16 %v306_v35, %v304_v34 }
  0xcc   :  { %570 = vst [vmem:[%s777_s2 + $0x10] sm:$0xff] %v542_v36   ;;  %v276_v37 = vpop.f32.mrf.mxu2 }
  0xcd   :  { %v325_v38 = vpop.f32.mrf.mxu3 }
  0xce   :  { %v326_v40 = vadd.f32 %v325_v38, %v276_v37  ;;  %v259_v41 = vpop.f32.mrf.mxu0 }
  0xcf   :  { %v308_v42 = vpop.f32.mrf.mxu1 }
  0xd0   :  { %v562_v43 = vpack.c.bf16 %v326_v40, %v324_v39  ;;  %v309_v48 = vadd.f32 %v308_v42, %v259_v41 }
  0xd2   :  { %574 = vst [vmem:[%s777_s2 + $0x30] sm:$0xff] %v562_v43  }
  0xd4   :  { %v279_v44 = vpop.f32.mrf.mxu2 }
  0xd5   :  { %v328_v45 = vpop.f32.mrf.mxu3 }
  0xd6   :  { %v261_v46 = vpop.f32.mrf.mxu0  ;;  %v329_v53 = vadd.f32 %v328_v45, %v279_v44 }
  0xd7   :  { %v310_v47 = vpop.f32.mrf.mxu1 }
  0xd8   :  { %v311_v49 = vadd.f32 %v310_v47, %v261_v46 }
  0xda   :  { %v547_v50 = vpack.c.bf16 %v311_v49, %v309_v48 }
  0xdc   :  { %571 = vst [vmem:[%s777_s2 + $0x18] sm:$0xff] %v547_v50   ;;  %v281_v51 = vpop.f32.mrf.mxu2 }
  0xdd   :  { %v330_v52 = vpop.f32.mrf.mxu3 }
  0xde   :  { %v331_v54 = vadd.f32 %v330_v52, %v281_v51 }
  0xe0   :  { %v567_v55 = vpack.c.bf16 %v331_v54, %v329_v53 }
  0xe2   :  { %575 = vst [vmem:[%s777_s2 + $0x38] sm:$0xff] %v567_v55  }

// kernel: _forward_impl.247
= control target key start
LH: loop header
LB: loop body
LE: loop exit
PB: predicated region body
PF: predicated region fallthrough
CT: control target
= control target key end

     0   :  { %7 = vsyncpa [#allocation3], 0  ;;  %s2303_s12 = smov [#allocation2]   ;;  %s2304_s14 = smov 576   ;;  %s2688_s0 = inlined_call_operand.hbm [shape: bf16[128,1152], index: 0, kind: input, shape index: {}]   ;;  %s2689_s1 = inlined_call_operand.vmem [shape: bf16[1152,32], index: 1, kind: input, shape index: {}]   ;;  %s2690_s2 = inlined_call_operand.vmem [shape: bf16[128,32], index: 2, kind: output, shape index: {}]  }
   0x1   :  { %s12_s11 = sshll.u32 %s2688_s0, 4  ;;  %s14_s13 = sshll.u32 %s2303_s12, 4  ;;  %s13_s11 = int_to_ptr.hbm [resolvable:$true] %s12_s11  ;;  %s15_s13 = int_to_ptr.vmem [resolvable:$true] %s14_s13 }
   0x2   :  { %s2305_s15 = smov 36  }
   0x3   :  { %20 = dma.hbm_to_vmem [thread:$0]  %s13_s11, 9216, %s15_s13, [#allocation3], %s2304_s14, %s2304_s14, %s2305_s15  }
   0x4   :  { %2301 = dma.done.wait [#allocation3], 9216  }
   0x5   :  { %2302 = vsyncadd [#allocation3], 4294958080  ;;  %v2185_v0 = vld [vmem:[%s2689_s1 + $0x38] sm:$0xff]  ;;  %v2184_v1 = vld [vmem:[%s2689_s1 + $0x30] sm:$0xff]  ;;  %vm1508_vm0 = vcmask 257024  }
   0x6   :  { %2250 = vmatpush.bf16.msra.mxu1 %v2185_v0  ;;  %2251 = vmatpush.bf16.msra.mxu2 %v2185_v0  ;;  %v2183_v2 = vld [vmem:[%s2689_s1 + $0x28] sm:$0xff]  ;;  %v2182_v3 = vld [vmem:[%s2689_s1 + $0x20] sm:$0xff]  ;;  %v2181_v4 = vld [vmem:[%s2689_s1 + $0x18] sm:$0xff] }
   0x7   :  { %2252 = vmatpush.bf16.msra.mxu3 %v2185_v0  ;;  %1051 = vmatpush.bf16.msra.mxu0 %v2185_v0  ;;  %v2180_v5 = vld [vmem:[%s2689_s1 + $0x10] sm:$0xff]  ;;  %v2179_v6 = vld [vmem:[%s2689_s1 + $0x8] sm:$0xff]  ;;  %v2178_v7 = vld [vmem:[%s2689_s1] sm:$0xff] }
   0x8   :  { %v1604_v8 = vld [vmem:[#allocation2 + $0x90] sm:$0xf]  ;;  %v2128_v9 = vld [vmem:[#allocation2 + $0xb0] sm:$0xf0]  ;;  %v1676_v10 = vld [vmem:[#allocation2 + $0x120] sm:$0xf] }
   0x9   :  { %v2146_v11 = vld [vmem:[#allocation2 + $0x140] sm:$0xf0]  ;;  %v1748_v12 = vld [vmem:[#allocation2 + $0x1b0] sm:$0xf]  ;;  %v2164_v13 = vld [vmem:[#allocation2 + $0x1d0] sm:$0xf0]  ;;  %v1605_v18 = vor.u32 %v2128_v9, %v1604_v8 }
   0xa   :  { %2253 = vmatpush.bf16.msra.mxu1 %v2184_v1  ;;  %2254 = vmatpush.bf16.msra.mxu2 %v2184_v1  ;;  %v1532_v14 = vld [vmem:[#allocation2] sm:$0xf]  ;;  %v2110_v15 = vld [vmem:[#allocation2 + $0x20] sm:$0xf0]  ;;  %v2201_v16 = vld [vmem:[%s2689_s1 + $0xb8] sm:$0xff]  ;;  %v1677_v19 = vor.u32 %v2146_v11, %v1676_v10  ;;  %v1749_v20 = vor.u32 %v2164_v13, %v1748_v12 }
   0xb   :  { %2255 = vmatpush.bf16.msra.mxu3 %v2184_v1  ;;  %1052 = vmatpush.bf16.msra.mxu0 %v2184_v1  ;;  %v2193_v17 = vld [vmem:[%s2689_s1 + $0x78] sm:$0xff]  ;;  %v1533_v21 = vor.u32 %v2110_v15, %v1532_v14  ;;  %v2200_v24 = vld [vmem:[%s2689_s1 + $0xb0] sm:$0xff]  ;;  %v2199_v28 = vld [vmem:[%s2689_s1 + $0xa8] sm:$0xff] }
   0xc   :  { %v2209_v22 = vld [vmem:[%s2689_s1 + $0xf8] sm:$0xff]  ;;  %v2192_v25 = vld [vmem:[%s2689_s1 + $0x70] sm:$0xff]  ;;  %v2191_v29 = vld [vmem:[%s2689_s1 + $0x68] sm:$0xff] }
   0xd   :  { %v2217_v23 = vld [vmem:[%s2689_s1 + $0x138] sm:$0xff]  ;;  %v2208_v26 = vld [vmem:[%s2689_s1 + $0xf0] sm:$0xff]  ;;  %v2207_v30 = vld [vmem:[%s2689_s1 + $0xe8] sm:$0xff] }
   0xe   :  { %2256 = vmatpush.bf16.msra.mxu1 %v2183_v2  ;;  %2257 = vmatpush.bf16.msra.mxu2 %v2183_v2  ;;  %v2216_v27 = vld [vmem:[%s2689_s1 + $0x130] sm:$0xff]  ;;  %v2215_v31 = vld [vmem:[%s2689_s1 + $0x128] sm:$0xff]  ;;  %v2198_v32 = vld [vmem:[%s2689_s1 + $0xa0] sm:$0xff] }
   0xf   :  { %2258 = vmatpush.bf16.msra.mxu3 %v2183_v2  ;;  %1053 = vmatpush.bf16.msra.mxu0 %v2183_v2  ;;  %v2190_v33 = vld [vmem:[%s2689_s1 + $0x60] sm:$0xff]  ;;  %v1640_v36 = vld [vmem:[#allocation2 + $0xd8] sm:$0xf]  ;;  %v2137_v37 = vld [vmem:[#allocation2 + $0xf8] sm:$0xf0] }
  0x10   :  { %v2206_v34 = vld [vmem:[%s2689_s1 + $0xe0] sm:$0xff]  ;;  %v1712_v38 = vld [vmem:[#allocation2 + $0x168] sm:$0xf]  ;;  %v2155_v39 = vld [vmem:[#allocation2 + $0x188] sm:$0xf0]  ;;  %v1641_v46 = vor.u32 %v2137_v37, %v1640_v36 }
  0x11   :  { %v2214_v35 = vld [vmem:[%s2689_s1 + $0x120] sm:$0xff]  ;;  %v1784_v40 = vld [vmem:[#allocation2 + $0x1f8] sm:$0xf]  ;;  %v2173_v41 = vld [vmem:[#allocation2 + $0x218] sm:$0xf0]  ;;  %v1713_v47 = vor.u32 %v2155_v39, %v1712_v38 }
  0x12   :  { %2259 = vmatpush.bf16.msra.mxu1 %v2182_v3  ;;  %2260 = vmatpush.bf16.msra.mxu2 %v2182_v3  ;;  %v1568_v42 = vld [vmem:[#allocation2 + $0x48] sm:$0xf]  ;;  %v2119_v43 = vld [vmem:[#allocation2 + $0x68] sm:$0xf0]  ;;  %v2197_v44 = vld [vmem:[%s2689_s1 + $0x98] sm:$0xff]  ;;  %v1785_v48 = vor.u32 %v2173_v41, %v1784_v40 }
  0x13   :  { %2261 = vmatpush.bf16.msra.mxu3 %v2182_v3  ;;  %1054 = vmatpush.bf16.msra.mxu0 %v2182_v3  ;;  %v2189_v45 = vld [vmem:[%s2689_s1 + $0x58] sm:$0xff]  ;;  %v1569_v49 = vor.u32 %v2119_v43, %v1568_v42  ;;  %v2196_v52 = vld [vmem:[%s2689_s1 + $0x90] sm:$0xff]  ;;  %v2195_v56 = vld [vmem:[%s2689_s1 + $0x88] sm:$0xff] }
  0x14   :  { %v2205_v50 = vld [vmem:[%s2689_s1 + $0xd8] sm:$0xff]  ;;  %v2188_v53 = vld [vmem:[%s2689_s1 + $0x50] sm:$0xff]  ;;  %v2187_v57 = vld [vmem:[%s2689_s1 + $0x48] sm:$0xff] }
  0x15   :  { %v2213_v51 = vld [vmem:[%s2689_s1 + $0x118] sm:$0xff]  ;;  %v2204_v54 = vld [vmem:[%s2689_s1 + $0xd0] sm:$0xff]  ;;  %v2203_v58 = vld [vmem:[%s2689_s1 + $0xc8] sm:$0xff] }
  0x16   :  { %2262 = vmatpush.bf16.msra.mxu1 %v2181_v4  ;;  %2263 = vmatpush.bf16.msra.mxu2 %v2181_v4  ;;  %v2212_v55 = vld [vmem:[%s2689_s1 + $0x110] sm:$0xff]  ;;  %v2211_v59 = vld [vmem:[%s2689_s1 + $0x108] sm:$0xff]  ;;  %v2194_v60 = vld [vmem:[%s2689_s1 + $0x80] sm:$0xff] }
  0x17   :  { %2264 = vmatpush.bf16.msra.mxu3 %v2181_v4  ;;  %1055 = vmatpush.bf16.msra.mxu0 %v2181_v4  ;;  %v2186_v61 = vld [vmem:[%s2689_s1 + $0x40] sm:$0xff]  ;;  %v1534_v1 = vld [vmem:[#allocation2 + $0x24] sm:$0xf0]  ;;  %v2233_v2 = vld [vmem:[%s2689_s1 + $0x1b8] sm:$0xff] }
  0x18   :  { %v2106_v62 = vld [vmem:[#allocation2 + $0x4] sm:$0xf]  ;;  %v2225_v3 = vld [vmem:[%s2689_s1 + $0x178] sm:$0xff]  ;;  %v1540_v4 = vld [vmem:[#allocation2 + $0x8] sm:$0xf] }
  0x19   :  { %v2202_v63 = vld [vmem:[%s2689_s1 + $0xc0] sm:$0xff]  ;;  %v1548_v8 = vld [vmem:[#allocation2 + $0x10] sm:$0xf]  ;;  %v2112_v9 = vld [vmem:[#allocation2 + $0x30] sm:$0xf0]  ;;  %v1537_v12 = vor.u32 %v2106_v62, %v1534_v1 }
  0x1a   :  { %2265 = vmatpush.bf16.msra.mxu1 %v2180_v5  ;;  %2266 = vmatpush.bf16.msra.mxu2 %v2180_v5  ;;  %v2210_v0 = vld [vmem:[%s2689_s1 + $0x100] sm:$0xff]  ;;  %v2241_v10 = vld [vmem:[%s2689_s1 + $0x1f8] sm:$0xff]  ;;  %v1549_v15 = vor.u32 %v2112_v9, %v1548_v8  ;;  %v2124_v40 = vld [vmem:[#allocation2 + $0x94] sm:$0xf] }
  0x1b   :  { %2267 = vmatpush.bf16.msra.mxu3 %v2180_v5  ;;  %1056 = vmatpush.bf16.msra.mxu0 %v2180_v5  ;;  %v2111_v5 = vld [vmem:[#allocation2 + $0x28] sm:$0xf0]  ;;  %v2249_v11 = vld [vmem:[%s2689_s1 + $0x238] sm:$0xff]  ;;  %v2230_v36 = vld [vmem:[%s2689_s1 + $0x1a0] sm:$0xff] }
  0x1c   :  { %v1541_v13 = vor.u32 %v2111_v5, %v1540_v4  ;;  %v2238_v37 = vld [vmem:[%s2689_s1 + $0x1e0] sm:$0xff]  ;;  %v1606_v41 = vld [vmem:[#allocation2 + $0xb4] sm:$0xf0]  ;;  %v2129_v43 = vld [vmem:[#allocation2 + $0xb8] sm:$0xf0] }
  0x1d   :  { %v2222_v38 = vld [vmem:[%s2689_s1 + $0x160] sm:$0xff]  ;;  %v1612_v42 = vld [vmem:[#allocation2 + $0x98] sm:$0xf]  ;;  %v1656_v62 = vld [vmem:[#allocation2 + $0xe8] sm:$0xf] }
  0x1e   :  { %2268 = vmatpush.bf16.msra.mxu1 %v2179_v6  ;;  %2269 = vmatpush.bf16.msra.mxu2 %v2179_v6  ;;  %v2246_v39 = vld [vmem:[%s2689_s1 + $0x220] sm:$0xff]  ;;  %v2228_v4 = vld [vmem:[%s2689_s1 + $0x190] sm:$0xff]  ;;  %v1678_v9 = vld [vmem:[#allocation2 + $0x144] sm:$0xf0] }
  0x1f   :  { %2270 = vmatpush.bf16.msra.mxu3 %v2179_v6  ;;  %1057 = vmatpush.bf16.msra.mxu0 %v2179_v6  ;;  %v2107_v6 = vld [vmem:[#allocation2 + $0xc] sm:$0xf]  ;;  %v2236_v5 = vld [vmem:[%s2689_s1 + $0x1d0] sm:$0xff]  ;;  %v2142_v8 = vld [vmem:[#allocation2 + $0x124] sm:$0xf] }
  0x22   :  { %2271 = vmatpush.bf16.msra.mxu1 %v2178_v7  ;;  %2272 = vmatpush.bf16.msra.mxu2 %v2178_v7 }
  0x23   :  { %2273 = vmatpush.bf16.msra.mxu3 %v2178_v7  ;;  %1058 = vmatpush.bf16.msra.mxu0 %v2178_v7  ;;  %v1542_v7 = vld [vmem:[#allocation2 + $0x2c] sm:$0xf0] }
  0x24   :  { %v1545_v14 = vor.u32 %v2107_v6, %v1542_v7  ;;  %v2220_v6 = vld [vmem:[%s2689_s1 + $0x150] sm:$0xff] }
  0x25   :  { %1069 = vmatmul.bf16.vlgmr.msra.gmra.mxu1 %v1605_v18  ;;  %1079 = vmatmul.bf16.vlgmr.msra.gmra.mxu2 %v1677_v19  ;;  %v2240_v18 = vld [vmem:[%s2689_s1 + $0x1f0] sm:$0xff] }
  0x26   :  { %1149 = vmatpush.bf16.msrb.mxu2 %v2201_v16  ;;  %1100 = vmatpush.bf16.msrb.mxu1 %v2193_v17  ;;  %v2232_v16 = vld [vmem:[%s2689_s1 + $0x1b0] sm:$0xff] }
  0x27   :  { %1089 = vmatmul.bf16.vlgmr.msra.gmra.mxu3 %v1749_v20  ;;  %1059 = vmatmul.bf16.vlgmr.msra.gmra.mxu0 %v1533_v21  ;;  %v2224_v17 = vld [vmem:[%s2689_s1 + $0x170] sm:$0xff]  ;;  %v2231_v20 = vld [vmem:[%s2689_s1 + $0x1a8] sm:$0xff] }
  0x28   :  { %1198 = vmatpush.bf16.msrb.mxu3 %v2209_v22  ;;  %1247 = vmatpush.bf16.msrb.mxu0 %v2217_v23  ;;  %v2248_v19 = vld [vmem:[%s2689_s1 + $0x230] sm:$0xff]  ;;  %v2223_v21 = vld [vmem:[%s2689_s1 + $0x168] sm:$0xff] }
  0x29   :  { %v2239_v22 = vld [vmem:[%s2689_s1 + $0x1e8] sm:$0xff]  ;;  %v2244_v7 = vld [vmem:[%s2689_s1 + $0x210] sm:$0xff] }
  0x2a   :  { %1150 = vmatpush.bf16.msrb.mxu2 %v2200_v24  ;;  %1101 = vmatpush.bf16.msrb.mxu1 %v2192_v25  ;;  %v2247_v23 = vld [vmem:[%s2689_s1 + $0x228] sm:$0xff]  ;;  %v1570_v25 = vld [vmem:[#allocation2 + $0x6c] sm:$0xf0] }
  0x2b   :  { %v2115_v24 = vld [vmem:[#allocation2 + $0x4c] sm:$0xf] }
  0x2c   :  { %1199 = vmatpush.bf16.msrb.mxu3 %v2208_v26  ;;  %1248 = vmatpush.bf16.msrb.mxu0 %v2216_v27  ;;  %v1576_v26 = vld [vmem:[#allocation2 + $0x50] sm:$0xf]  ;;  %v2120_v27 = vld [vmem:[#allocation2 + $0x70] sm:$0xf0] }
  0x2e   :  { %1151 = vmatpush.bf16.msrb.mxu2 %v2199_v28  ;;  %1102 = vmatpush.bf16.msrb.mxu1 %v2191_v29  ;;  %v2116_v28 = vld [vmem:[#allocation2 + $0x54] sm:$0xf]  ;;  %v1578_v29 = vld [vmem:[#allocation2 + $0x74] sm:$0xf0] }
  0x30   :  { %1200 = vmatpush.bf16.msrb.mxu3 %v2207_v30  ;;  %1249 = vmatpush.bf16.msrb.mxu0 %v2215_v31  ;;  %v1584_v30 = vld [vmem:[#allocation2 + $0x58] sm:$0xf]  ;;  %v2121_v31 = vld [vmem:[#allocation2 + $0x78] sm:$0xf0] }
  0x32   :  { %1152 = vmatpush.bf16.msrb.mxu2 %v2198_v32  ;;  %1103 = vmatpush.bf16.msrb.mxu1 %v2190_v33  ;;  %v1573_v32 = vor.u32 %v2115_v24, %v1570_v25  ;;  %v1577_v33 = vor.u32 %v2120_v27, %v1576_v26  ;;  %v2151_v24 = vld [vmem:[#allocation2 + $0x16c] sm:$0xf]  ;;  %v1714_v25 = vld [vmem:[#allocation2 + $0x18c] sm:$0xf0]  ;;  %v2156_v27 = vld [vmem:[#allocation2 + $0x190] sm:$0xf0] }
  0x33   :  { %v1720_v26 = vld [vmem:[#allocation2 + $0x170] sm:$0xf] }
  0x34   :  { %1201 = vmatpush.bf16.msrb.mxu3 %v2206_v34  ;;  %1250 = vmatpush.bf16.msrb.mxu0 %v2214_v35  ;;  %v1581_v34 = vor.u32 %v2116_v28, %v1578_v29  ;;  %v1585_v35 = vor.u32 %v2121_v31, %v1584_v30  ;;  %v2152_v28 = vld [vmem:[#allocation2 + $0x174] sm:$0xf]  ;;  %v1722_v29 = vld [vmem:[#allocation2 + $0x194] sm:$0xf0]  ;;  %v2157_v31 = vld [vmem:[#allocation2 + $0x198] sm:$0xf0] }
  0x35   :  { %1074 = vmatmul.bf16.gmra.mxu1 %v1641_v46  ;;  %1084 = vmatmul.bf16.gmra.mxu2 %v1713_v47  ;;  %v1620_v46 = vld [vmem:[#allocation2 + $0xa0] sm:$0xf]  ;;  %v2130_v47 = vld [vmem:[#allocation2 + $0xc0] sm:$0xf0]  ;;  %v1728_v30 = vld [vmem:[#allocation2 + $0x178] sm:$0xf] }
  0x36   :  { %1153 = vmatpush.bf16.msrb.mxu2 %v2197_v44  ;;  %1104 = vmatpush.bf16.msrb.mxu1 %v2189_v45  ;;  %v2125_v44 = vld [vmem:[#allocation2 + $0x9c] sm:$0xf]  ;;  %v1614_v45 = vld [vmem:[#allocation2 + $0xbc] sm:$0xf0] }
  0x37   :  { %1094 = vmatmul.bf16.gmra.mxu3 %v1785_v48  ;;  %1064 = vmatmul.bf16.gmra.mxu0 %v1569_v49  ;;  %v1609_v48 = vor.u32 %v2124_v40, %v1606_v41  ;;  %v1613_v49 = vor.u32 %v2129_v43, %v1612_v42  ;;  %v2160_v40 = vld [vmem:[#allocation2 + $0x1b4] sm:$0xf]  ;;  %v1750_v41 = vld [vmem:[#allocation2 + $0x1d4] sm:$0xf0]  ;;  %v2165_v43 = vld [vmem:[#allocation2 + $0x1d8] sm:$0xf0] }
  0x38   :  { %1202 = vmatpush.bf16.msrb.mxu3 %v2205_v50  ;;  %1251 = vmatpush.bf16.msrb.mxu0 %v2213_v51  ;;  %v1617_v50 = vor.u32 %v2125_v44, %v1614_v45  ;;  %v1621_v51 = vor.u32 %v2130_v47, %v1620_v46  ;;  %v1756_v42 = vld [vmem:[#allocation2 + $0x1b8] sm:$0xf]  ;;  %v2161_v44 = vld [vmem:[#allocation2 + $0x1bc] sm:$0xf]  ;;  %v1758_v45 = vld [vmem:[#allocation2 + $0x1dc] sm:$0xf0] }
  0x39   :  { %v1764_v46 = vld [vmem:[#allocation2 + $0x1c0] sm:$0xf]  ;;  %v2166_v47 = vld [vmem:[#allocation2 + $0x1e0] sm:$0xf0] }
  0x3a   :  { %1154 = vmatpush.bf16.msrb.mxu2 %v2196_v52  ;;  %1105 = vmatpush.bf16.msrb.mxu1 %v2188_v53  ;;  %v2229_v52 = vld [vmem:[%s2689_s1 + $0x198] sm:$0xff] }
  0x3b   :  { %v2237_v53 = vld [vmem:[%s2689_s1 + $0x1d8] sm:$0xff] }
  0x3c   :  { %1203 = vmatpush.bf16.msrb.mxu3 %v2204_v54  ;;  %1252 = vmatpush.bf16.msrb.mxu0 %v2212_v55  ;;  %v2221_v54 = vld [vmem:[%s2689_s1 + $0x158] sm:$0xff] }
  0x3d   :  { %v2245_v55 = vld [vmem:[%s2689_s1 + $0x218] sm:$0xff] }
  0x3e   :  { %1155 = vmatpush.bf16.msrb.mxu2 %v2195_v56  ;;  %1106 = vmatpush.bf16.msrb.mxu1 %v2187_v57  ;;  %v2133_v56 = vld [vmem:[#allocation2 + $0xdc] sm:$0xf]  ;;  %v1642_v57 = vld [vmem:[#allocation2 + $0xfc] sm:$0xf0] }
  0x40   :  { %1204 = vmatpush.bf16.msrb.mxu3 %v2203_v58  ;;  %1253 = vmatpush.bf16.msrb.mxu0 %v2211_v59  ;;  %v1648_v58 = vld [vmem:[#allocation2 + $0xe0] sm:$0xf]  ;;  %v2138_v59 = vld [vmem:[#allocation2 + $0x100] sm:$0xf0] }
  0x41   :  { %v1649_v1 = vor.u32 %v2138_v59, %v1648_v58  ;;  %v2169_v58 = vld [vmem:[#allocation2 + $0x1fc] sm:$0xf]  ;;  %v1786_v59 = vld [vmem:[#allocation2 + $0x21c] sm:$0xf0] }
  0x42   :  { %1156 = vmatpush.bf16.msrb.mxu2 %v2194_v60  ;;  %1107 = vmatpush.bf16.msrb.mxu1 %v2186_v61  ;;  %v2134_v60 = vld [vmem:[#allocation2 + $0xe4] sm:$0xf]  ;;  %v1650_v61 = vld [vmem:[#allocation2 + $0x104] sm:$0xf0] }
  0x44   :  { %1205 = vmatpush.bf16.msrb.mxu3 %v2202_v63  ;;  %1254 = vmatpush.bf16.msrb.mxu0 %v2210_v0  ;;  %v2139_v63 = vld [vmem:[#allocation2 + $0x108] sm:$0xf0]  ;;  %v1645_v0 = vor.u32 %v2133_v56, %v1642_v57 }
  0x45   :  { %1108 = vmatmul.bf16.vlgmr.msrb.gmra.mxu1 %v1537_v12  ;;  %1157 = vmatmul.bf16.vlgmr.msrb.gmra.mxu2 %v1541_v13  ;;  %v2143_v12 = vld [vmem:[#allocation2 + $0x12c] sm:$0xf]  ;;  %v1686_v13 = vld [vmem:[#allocation2 + $0x14c] sm:$0xf0] }
  0x46   :  { %1345 = vmatpush.bf16.msra.mxu2 %v2233_v2  ;;  %1296 = vmatpush.bf16.msra.mxu1 %v2225_v3  ;;  %v1653_v2 = vor.u32 %v2134_v60, %v1650_v61  ;;  %v1657_v3 = vor.u32 %v2139_v63, %v1656_v62  ;;  %v1792_v60 = vld [vmem:[#allocation2 + $0x200] sm:$0xf]  ;;  %v2174_v61 = vld [vmem:[#allocation2 + $0x220] sm:$0xf0]  ;;  %v1794_v63 = vld [vmem:[#allocation2 + $0x224] sm:$0xf0] }
  0x47   :  { %1206 = vmatmul.bf16.vlgmr.msrb.gmra.mxu3 %v1545_v14  ;;  %1255 = vmatmul.bf16.vlgmr.msrb.gmra.mxu0 %v1549_v15  ;;  %v1692_v14 = vld [vmem:[#allocation2 + $0x130] sm:$0xf]  ;;  %v2148_v15 = vld [vmem:[#allocation2 + $0x150] sm:$0xf0]  ;;  %v2170_v62 = vld [vmem:[#allocation2 + $0x204] sm:$0xf] }
  0x48   :  { %1394 = vmatpush.bf16.msra.mxu3 %v2241_v10  ;;  %1443 = vmatpush.bf16.msra.mxu0 %v2249_v11  ;;  %v1684_v10 = vld [vmem:[#allocation2 + $0x128] sm:$0xf]  ;;  %v2147_v11 = vld [vmem:[#allocation2 + $0x148] sm:$0xf0] }
  0x4a   :  { %1346 = vmatpush.bf16.msra.mxu2 %v2232_v16  ;;  %1297 = vmatpush.bf16.msra.mxu1 %v2224_v17  ;;  %v1681_v16 = vor.u32 %v2142_v8, %v1678_v9  ;;  %v1685_v17 = vor.u32 %v2147_v11, %v1684_v10 }
  0x4c   :  { %1395 = vmatpush.bf16.msra.mxu3 %v2240_v18  ;;  %1444 = vmatpush.bf16.msra.mxu0 %v2248_v19  ;;  %v1689_v18 = vor.u32 %v2143_v12, %v1686_v13  ;;  %v1693_v19 = vor.u32 %v2148_v15, %v1692_v14  ;;  %v2108_v14 = vld [vmem:[#allocation2 + $0x14] sm:$0xf]  ;;  %v1550_v15 = vld [vmem:[#allocation2 + $0x34] sm:$0xf0] }
  0x4e   :  { %1347 = vmatpush.bf16.msra.mxu2 %v2231_v20  ;;  %1298 = vmatpush.bf16.msra.mxu1 %v2223_v21  ;;  %v2227_v20 = vld [vmem:[%s2689_s1 + $0x188] sm:$0xff] }
  0x4f   :  { %v2235_v21 = vld [vmem:[%s2689_s1 + $0x1c8] sm:$0xff] }
  0x50   :  { %1396 = vmatpush.bf16.msra.mxu3 %v2239_v22  ;;  %1445 = vmatpush.bf16.msra.mxu0 %v2247_v23  ;;  %v2219_v22 = vld [vmem:[%s2689_s1 + $0x148] sm:$0xff] }
  0x51   :  { %v2243_v23 = vld [vmem:[%s2689_s1 + $0x208] sm:$0xff] }
  0x52   :  { %1348 = vmatpush.bf16.msra.mxu2 %v2230_v36  ;;  %1299 = vmatpush.bf16.msra.mxu1 %v2222_v38  ;;  %v2226_v36 = vld [vmem:[%s2689_s1 + $0x180] sm:$0xff] }
  0x53   :  { %v2218_v38 = vld [vmem:[%s2689_s1 + $0x140] sm:$0xff] }
  0x54   :  { %1397 = vmatpush.bf16.msra.mxu3 %v2238_v37  ;;  %1446 = vmatpush.bf16.msra.mxu0 %v2246_v39  ;;  %v2234_v37 = vld [vmem:[%s2689_s1 + $0x1c0] sm:$0xff] }
  0x55   :  { %1113 = vmatmul.bf16.gmra.mxu1 %v1573_v32  ;;  %1162 = vmatmul.bf16.gmra.mxu2 %v1577_v33  ;;  %v1717_v32 = vor.u32 %v2151_v24, %v1714_v25  ;;  %v1721_v33 = vor.u32 %v2156_v27, %v1720_v26  ;;  %v2242_v39 = vld [vmem:[%s2689_s1 + $0x200] sm:$0xff]  ;;  %v1553_v24 = vor.u32 %v2108_v14, %v1550_v15  ;;  %v1622_v15 = vld [vmem:[#allocation2 + $0xc4] sm:$0xf0] }
  0x56   :  { %1349 = vmatpush.bf16.msra.mxu2 %v2229_v52  ;;  %1300 = vmatpush.bf16.msra.mxu1 %v2221_v54  ;;  %v1765_v52 = vor.u32 %v2166_v47, %v1764_v46  ;;  %v2123_v46 = vld [vmem:[#allocation2 + $0x88] sm:$0xf0]  ;;  %v2126_v14 = vld [vmem:[#allocation2 + $0xa4] sm:$0xf] }
  0x57   :  { %1211 = vmatmul.bf16.gmra.mxu3 %v1581_v34  ;;  %1260 = vmatmul.bf16.gmra.mxu0 %v1585_v35  ;;  %v1725_v34 = vor.u32 %v2152_v28, %v1722_v29  ;;  %v1729_v35 = vor.u32 %v2157_v31, %v1728_v30 }
  0x58   :  { %1398 = vmatpush.bf16.msra.mxu3 %v2237_v53  ;;  %1447 = vmatpush.bf16.msra.mxu0 %v2245_v55 }
  0x5a   :  { %1350 = vmatpush.bf16.msra.mxu2 %v2228_v4  ;;  %1301 = vmatpush.bf16.msra.mxu1 %v2220_v6  ;;  %v1789_v4 = vor.u32 %v2169_v58, %v1786_v59 }
  0x5c   :  { %1399 = vmatpush.bf16.msra.mxu3 %v2236_v5  ;;  %1448 = vmatpush.bf16.msra.mxu0 %v2244_v7  ;;  %v1793_v5 = vor.u32 %v2174_v61, %v1792_v60  ;;  %v1797_v7 = vor.u32 %v2170_v62, %v1794_v63 }
  0x5e   :  { %1351 = vmatpush.bf16.msra.mxu2 %v2227_v20  ;;  %1302 = vmatpush.bf16.msra.mxu1 %v2219_v22  ;;  %v1564_v20 = vld [vmem:[#allocation2 + $0x20] sm:$0xf] }
  0x60   :  { %1400 = vmatpush.bf16.msra.mxu3 %v2235_v21  ;;  %1449 = vmatpush.bf16.msra.mxu0 %v2243_v23  ;;  %v2114_v21 = vld [vmem:[#allocation2 + $0x40] sm:$0xf0] }
  0x61   :  { %v1565_v28 = vor.u32 %v2114_v21, %v1564_v20  ;;  %v1636_v20 = vld [vmem:[#allocation2 + $0xb0] sm:$0xf]  ;;  %v2132_v21 = vld [vmem:[#allocation2 + $0xd0] sm:$0xf0] }
  0x62   :  { %1352 = vmatpush.bf16.msra.mxu2 %v2226_v36  ;;  %1303 = vmatpush.bf16.msra.mxu1 %v2218_v38  ;;  %v2117_v38 = vld [vmem:[#allocation2 + $0x5c] sm:$0xf] }
  0x64   :  { %1401 = vmatpush.bf16.msra.mxu3 %v2234_v37  ;;  %1450 = vmatpush.bf16.msra.mxu0 %v2242_v39  ;;  %v1586_v39 = vld [vmem:[#allocation2 + $0x7c] sm:$0xf0] }
  0x65   :  { %1118 = vmatmul.bf16.gmra.mxu1 %v1609_v48  ;;  %1167 = vmatmul.bf16.gmra.mxu2 %v1613_v49  ;;  %v1753_v48 = vor.u32 %v2160_v40, %v1750_v41  ;;  %v1757_v49 = vor.u32 %v2165_v43, %v1756_v42  ;;  %v1592_v41 = vld [vmem:[#allocation2 + $0x60] sm:$0xf]  ;;  %v2122_v42 = vld [vmem:[#allocation2 + $0x80] sm:$0xf0] }
  0x66   :  { %v2118_v43 = vld [vmem:[#allocation2 + $0x64] sm:$0xf] }
  0x67   :  { %1216 = vmatmul.bf16.gmra.mxu3 %v1617_v50  ;;  %1265 = vmatmul.bf16.gmra.mxu0 %v1621_v51  ;;  %v1761_v51 = vor.u32 %v2161_v44, %v1758_v45  ;;  %v1594_v44 = vld [vmem:[#allocation2 + $0x84] sm:$0xf0] }
  0x68   :  { %v1600_v45 = vld [vmem:[#allocation2 + $0x68] sm:$0xf]  ;;  %v1597_v58 = vor.u32 %v2118_v43, %v1594_v44  ;;  %v2135_v43 = vld [vmem:[#allocation2 + $0xec] sm:$0xf]  ;;  %v1658_v44 = vld [vmem:[#allocation2 + $0x10c] sm:$0xf0] }
  0x69   :  { %v1601_v59 = vor.u32 %v2123_v46, %v1600_v45  ;;  %v2140_v46 = vld [vmem:[#allocation2 + $0x110] sm:$0xf0] }
  0x75   :  { %1123 = vmatmul.bf16.gmra.mxu1 %v1645_v0  ;;  %1172 = vmatmul.bf16.gmra.mxu2 %v1649_v1  ;;  %v1800_v0 = vld [vmem:[#allocation2 + $0x208] sm:$0xf]  ;;  %v2175_v1 = vld [vmem:[#allocation2 + $0x228] sm:$0xf0] }
  0x76   :  { %v1801_v8 = vor.u32 %v2175_v1, %v1800_v0 }
  0x77   :  { %1221 = vmatmul.bf16.gmra.mxu3 %v1653_v2  ;;  %1270 = vmatmul.bf16.gmra.mxu0 %v1657_v3 }
  0x85   :  { %1128 = vmatmul.bf16.gmra.mxu1 %v1681_v16  ;;  %1177 = vmatmul.bf16.gmra.mxu2 %v1685_v17  ;;  %v1556_v16 = vld [vmem:[#allocation2 + $0x18] sm:$0xf]  ;;  %v2113_v17 = vld [vmem:[#allocation2 + $0x38] sm:$0xf0] }
  0x86   :  { %v1557_v25 = vor.u32 %v2113_v17, %v1556_v16  ;;  %v1628_v17 = vld [vmem:[#allocation2 + $0xa8] sm:$0xf] }
  0x87   :  { %1226 = vmatmul.bf16.gmra.mxu3 %v1689_v18  ;;  %1275 = vmatmul.bf16.gmra.mxu0 %v1693_v19  ;;  %v2109_v18 = vld [vmem:[#allocation2 + $0x1c] sm:$0xf]  ;;  %v1558_v19 = vld [vmem:[#allocation2 + $0x3c] sm:$0xf0] }
  0x88   :  { %v1561_v27 = vor.u32 %v2109_v18, %v1558_v19  ;;  %v2127_v18 = vld [vmem:[#allocation2 + $0xac] sm:$0xf]  ;;  %v1630_v19 = vld [vmem:[#allocation2 + $0xcc] sm:$0xf0] }
  0x95   :  { %1133 = vmatmul.bf16.gmra.mxu1 %v1717_v32  ;;  %1182 = vmatmul.bf16.gmra.mxu2 %v1721_v33 }
  0x97   :  { %1231 = vmatmul.bf16.gmra.mxu3 %v1725_v34  ;;  %1280 = vmatmul.bf16.gmra.mxu0 %v1729_v35 }
  0xa2   :  { %v2540_v50 = vpop.f32.mrf.mxu1 }
  0xa4   :  { %v1060_v53 = vpop.f32.mrf.mxu0 }
  0xa5   :  { %1138 = vmatmul.bf16.gmra.mxu1 %v1753_v48  ;;  %1187 = vmatmul.bf16.gmra.mxu2 %v1757_v49 }
  0xa7   :  { %1236 = vmatmul.bf16.gmra.mxu3 %v1761_v51  ;;  %1285 = vmatmul.bf16.gmra.mxu0 %v1765_v52  ;;  %v1589_v51 = vor.u32 %v2117_v38, %v1586_v39  ;;  %v1593_v52 = vor.u32 %v2122_v42, %v1592_v41 }
  0xa8   :  { %v2542_v54 = vpop.f32.mrf.mxu2 }
  0xaa   :  { %v2544_v55 = vpop.f32.mrf.mxu3  ;;  %v2546_v56 = vpop.f32.mrf.mxu1 }
  0xac   :  { %v1062_v57 = vpop.f32.mrf.mxu0 }
  0xb0   :  { %v2548_v2 = vpop.f32.mrf.mxu2 }
  0xb2   :  { %v2550_v3 = vpop.f32.mrf.mxu3  ;;  %v2552_v6 = vpop.f32.mrf.mxu1 }
  0xb4   :  { %v1065_v9 = vpop.f32.mrf.mxu0 }
  0xb5   :  { %1143 = vmatmul.bf16.gmra.mxu1 %v1789_v4  ;;  %1192 = vmatmul.bf16.gmra.mxu2 %v1793_v5 }
  0xb7   :  { %1241 = vmatmul.bf16.gmra.mxu3 %v1797_v7  ;;  %1290 = vmatmul.bf16.gmra.mxu0 %v1801_v8 }
  0xb8   :  { %v2554_v10 = vpop.f32.mrf.mxu2 }
  0xba   :  { %v2556_v11 = vpop.f32.mrf.mxu3  ;;  %v2558_v12 = vpop.f32.mrf.mxu1 }
  0xbc   :  { %v1067_v13 = vpop.f32.mrf.mxu0 }
  0xc0   :  { %v2560_v22 = vpop.f32.mrf.mxu2 }
  0xc2   :  { %v2562_v23 = vpop.f32.mrf.mxu3  ;;  %v1109_v26 = vpop.f32.mrf.mxu1 }
  0xc3   :  { %v1110_v29 = vadd.f32 %v1109_v26, %v1060_v53 }
  0xc4   :  { %v1256_v30 = vpop.f32.mrf.mxu0 }
  0xc5   :  { %1304 = vmatmul.bf16.vlgmr.msra.gmra.mxu1 %v1553_v24  ;;  %1353 = vmatmul.bf16.vlgmr.msra.gmra.mxu2 %v1557_v25 }
  0xc7   :  { %1402 = vmatmul.bf16.vlgmr.msra.gmra.mxu3 %v1561_v27  ;;  %1451 = vmatmul.bf16.vlgmr.msra.gmra.mxu0 %v1565_v28  ;;  %v1625_v27 = vor.u32 %v2126_v14, %v1622_v15 }
  0xc8   :  { %v1158_v31 = vpop.f32.mrf.mxu2 }
  0xc9   :  { %v1159_v32 = vadd.f32 %v1158_v31, %v1110_v29  ;;  %v1637_v31 = vor.u32 %v2132_v21, %v1636_v20  ;;  %v2149_v21 = vld [vmem:[#allocation2 + $0x158] sm:$0xf0] }
  0xca   :  { %v1207_v33 = vpop.f32.mrf.mxu3  ;;  %v1111_v34 = vpop.f32.mrf.mxu1 }
  0xcb   :  { %v1208_v35 = vadd.f32 %v1207_v33, %v1159_v32  ;;  %v1112_v36 = vadd.f32 %v1111_v34, %v1062_v57 }
  0xcc   :  { %v1258_v37 = vpop.f32.mrf.mxu0 }
  0xcd   :  { %v2564_v40 = vadd.f32 %v1256_v30, %v1208_v35  ;;  %v1633_v30 = vor.u32 %v2127_v18, %v1630_v19  ;;  %v2144_v18 = vld [vmem:[#allocation2 + $0x134] sm:$0xf]  ;;  %v1694_v19 = vld [vmem:[#allocation2 + $0x154] sm:$0xf0] }
  0xd0   :  { %v1160_v47 = vpop.f32.mrf.mxu2 }
  0xd1   :  { %v1161_v48 = vadd.f32 %v1160_v47, %v1112_v36  ;;  %v2136_v47 = vld [vmem:[#allocation2 + $0xf4] sm:$0xf] }
  0xd2   :  { %v1209_v49 = vpop.f32.mrf.mxu3  ;;  %v1114_v53 = vpop.f32.mrf.mxu1 }
  0xd3   :  { %v1210_v57 = vadd.f32 %v1209_v49, %v1161_v48  ;;  %v1115_v60 = vadd.f32 %v1114_v53, %v1065_v9  ;;  %v2131_v9 = vld [vmem:[#allocation2 + $0xc8] sm:$0xf0]  ;;  %v1666_v48 = vld [vmem:[#allocation2 + $0x114] sm:$0xf0] }
  0xd4   :  { %v1261_v61 = vpop.f32.mrf.mxu0  ;;  %v1629_v28 = vor.u32 %v2131_v9, %v1628_v17  ;;  %v1672_v49 = vld [vmem:[#allocation2 + $0xf8] sm:$0xf] }
  0xd5   :  { %1309 = vmatmul.bf16.gmra.mxu1 %v1589_v51  ;;  %1358 = vmatmul.bf16.gmra.mxu2 %v1593_v52  ;;  %v2566_v62 = vadd.f32 %v1258_v37, %v1210_v57  ;;  %v2141_v51 = vld [vmem:[#allocation2 + $0x118] sm:$0xf0] }
  0xd7   :  { %1407 = vmatmul.bf16.gmra.mxu3 %v1597_v58  ;;  %1456 = vmatmul.bf16.gmra.mxu0 %v1601_v59  ;;  %v1661_v59 = vor.u32 %v2135_v43, %v1658_v44 }
  0xd8   :  { %v1163_v63 = vpop.f32.mrf.mxu2 }
  0xd9   :  { %v1164_v0 = vadd.f32 %v1163_v63, %v1115_v60  ;;  %v1673_v63 = vor.u32 %v2141_v51, %v1672_v49  ;;  %v1736_v49 = vld [vmem:[#allocation2 + $0x180] sm:$0xf]  ;;  %v2158_v51 = vld [vmem:[#allocation2 + $0x1a0] sm:$0xf0] }
  0xda   :  { %v1212_v1 = vpop.f32.mrf.mxu3  ;;  %v1116_v4 = vpop.f32.mrf.mxu1 }
  0xdb   :  { %v1213_v5 = vadd.f32 %v1212_v1, %v1164_v0  ;;  %v1117_v7 = vadd.f32 %v1116_v4, %v1067_v13 }
  0xdc   :  { %v1263_v8 = vpop.f32.mrf.mxu0 }
  0xdd   :  { %v2568_v16 = vadd.f32 %v1261_v61, %v1213_v5  ;;  %v1669_v61 = vor.u32 %v2136_v47, %v1666_v48  ;;  %v1730_v47 = vld [vmem:[#allocation2 + $0x19c] sm:$0xf0] }
  0xe0   :  { %v1165_v24 = vpop.f32.mrf.mxu2 }
  0xe1   :  { %v1166_v25 = vadd.f32 %v1165_v24, %v1117_v7  ;;  %v2145_v24 = vld [vmem:[#allocation2 + $0x13c] sm:$0xf] }
  0xe2   :  { %v1214_v26 = vpop.f32.mrf.mxu3  ;;  %v1119_v29 = vpop.f32.mrf.mxu1 }
  0xe3   :  { %v1215_v13 = vadd.f32 %v1214_v26, %v1166_v25  ;;  %v1120_v32 = vadd.f32 %v1119_v29, %v2540_v50  ;;  %v1664_v50 = vld [vmem:[#allocation2 + $0xf0] sm:$0xf]  ;;  %v1702_v25 = vld [vmem:[#allocation2 + $0x15c] sm:$0xf0] }
  0xe4   :  { %v1266_v33 = vpop.f32.mrf.mxu0  ;;  %v1665_v57 = vor.u32 %v2140_v46, %v1664_v50  ;;  %v1708_v26 = vld [vmem:[#allocation2 + $0x140] sm:$0xf]  ;;  %v2153_v46 = vld [vmem:[#allocation2 + $0x17c] sm:$0xf] }
  0xe5   :  { %1314 = vmatmul.bf16.gmra.mxu1 %v1625_v27  ;;  %1363 = vmatmul.bf16.gmra.mxu2 %v1629_v28  ;;  %v2571_v34 = vadd.f32 %v1263_v8, %v1215_v13  ;;  %v2150_v27 = vld [vmem:[#allocation2 + $0x160] sm:$0xf0] }
  0xe7   :  { %1412 = vmatmul.bf16.gmra.mxu3 %v1633_v30  ;;  %1461 = vmatmul.bf16.gmra.mxu0 %v1637_v31  ;;  %v1697_v31 = vor.u32 %v2144_v18, %v1694_v19 }
  0xe8   :  { %v1168_v35 = vpop.f32.mrf.mxu2 }
  0xe9   :  { %v1169_v36 = vadd.f32 %v1168_v35, %v1120_v32  ;;  %v1709_v35 = vor.u32 %v2150_v27, %v1708_v26  ;;  %v1772_v26 = vld [vmem:[#allocation2 + $0x1c8] sm:$0xf]  ;;  %v2167_v27 = vld [vmem:[#allocation2 + $0x1e8] sm:$0xf0] }
  0xea   :  { %v1217_v37 = vpop.f32.mrf.mxu3  ;;  %v1121_v38 = vpop.f32.mrf.mxu1 }
  0xeb   :  { %v1218_v39 = vadd.f32 %v1217_v37, %v1169_v36  ;;  %v1122_v41 = vadd.f32 %v1121_v38, %v2546_v56 }
  0xec   :  { %v1268_v42 = vpop.f32.mrf.mxu0 }
  0xed   :  { %v2574_v45 = vadd.f32 %v1266_v33, %v1218_v39  ;;  %v1705_v33 = vor.u32 %v2145_v24, %v1702_v25  ;;  %v1766_v24 = vld [vmem:[#allocation2 + $0x1e4] sm:$0xf0] }
  0xf0   :  { %v1170_v52 = vpop.f32.mrf.mxu2 }
  0xf1   :  { %v1171_v53 = vadd.f32 %v1170_v52, %v1122_v41  ;;  %v2154_v52 = vld [vmem:[#allocation2 + $0x184] sm:$0xf] }
  0xf2   :  { %v1219_v58 = vpop.f32.mrf.mxu3  ;;  %v1124_v60 = vpop.f32.mrf.mxu1 }
  0xf3   :  { %v1220_v56 = vadd.f32 %v1219_v58, %v1171_v53  ;;  %v1125_v0 = vadd.f32 %v1124_v60, %v2552_v6  ;;  %v1700_v6 = vld [vmem:[#allocation2 + $0x138] sm:$0xf]  ;;  %v1738_v58 = vld [vmem:[#allocation2 + $0x1a4] sm:$0xf0] }
  0xf4   :  { %v1271_v1 = vpop.f32.mrf.mxu0  ;;  %v1701_v13 = vor.u32 %v2149_v21, %v1700_v6  ;;  %v2162_v21 = vld [vmem:[#allocation2 + $0x1c4] sm:$0xf] }
  0xf5   :  { %1319 = vmatmul.bf16.gmra.mxu1 %v1661_v59  ;;  %1368 = vmatmul.bf16.gmra.mxu2 %v1665_v57  ;;  %v2577_v4 = vadd.f32 %v1268_v42, %v1220_v56  ;;  %v1744_v59 = vld [vmem:[#allocation2 + $0x188] sm:$0xf]  ;;  %v2159_v57 = vld [vmem:[#allocation2 + $0x1a8] sm:$0xf0]  ;;  %v1737_v56 = vor.u32 %v2158_v51, %v1736_v49 }
  0xf7   :  { %1417 = vmatmul.bf16.gmra.mxu3 %v1669_v61  ;;  %1466 = vmatmul.bf16.gmra.mxu0 %v1673_v63  ;;  %v1733_v63 = vor.u32 %v2153_v46, %v1730_v47 }
  0xf8   :  { %v1173_v5 = vpop.f32.mrf.mxu2 }
  0xf9   :  { %v1174_v7 = vadd.f32 %v1173_v5, %v1125_v0  ;;  %v1745_v5 = vor.u32 %v2159_v57, %v1744_v59  ;;  %v1808_v59 = vld [vmem:[#allocation2 + $0x210] sm:$0xf]  ;;  %v2176_v57 = vld [vmem:[#allocation2 + $0x230] sm:$0xf0] }
  0xfa   :  { %v1222_v8 = vpop.f32.mrf.mxu3  ;;  %v1126_v14 = vpop.f32.mrf.mxu1 }
  0xfb   :  { %v1223_v15 = vadd.f32 %v1222_v8, %v1174_v7  ;;  %v1127_v17 = vadd.f32 %v1126_v14, %v2558_v12 }
  0xfc   :  { %v1273_v9 = vpop.f32.mrf.mxu0 }
  0xfd   :  { %v2580_v20 = vadd.f32 %v1271_v1, %v1223_v15  ;;  %v1741_v1 = vor.u32 %v2154_v52, %v1738_v58  ;;  %v2171_v52 = vld [vmem:[#allocation2 + $0x20c] sm:$0xf] }
 0x100   :  { %v1175_v28 = vpop.f32.mrf.mxu2 }
 0x101   :  { %v1176_v29 = vadd.f32 %v1175_v28, %v1127_v17  ;;  %v2163_v28 = vld [vmem:[#allocation2 + $0x1cc] sm:$0xf] }
 0x102   :  { %v1224_v30 = vpop.f32.mrf.mxu3  ;;  %v1129_v32 = vpop.f32.mrf.mxu1 }
 0x103   :  { %v1225_v12 = vadd.f32 %v1224_v30, %v1176_v29  ;;  %v1130_v38 = vadd.f32 %v1129_v32, %v2542_v54  ;;  %v1774_v30 = vld [vmem:[#allocation2 + $0x1ec] sm:$0xf0] }
 0x104   :  { %v1276_v36 = vpop.f32.mrf.mxu0 }
 0x105   :  { %1324 = vmatmul.bf16.gmra.mxu1 %v1697_v31  ;;  %1373 = vmatmul.bf16.gmra.mxu2 %v1701_v13  ;;  %v2582_v37 = vadd.f32 %v1273_v9, %v1225_v12  ;;  %v1780_v31 = vld [vmem:[#allocation2 + $0x1d0] sm:$0xf]  ;;  %v2168_v13 = vld [vmem:[#allocation2 + $0x1f0] sm:$0xf0]  ;;  %v1773_v12 = vor.u32 %v2167_v27, %v1772_v26 }
 0x107   :  { %1422 = vmatmul.bf16.gmra.mxu3 %v1705_v33  ;;  %1471 = vmatmul.bf16.gmra.mxu0 %v1709_v35  ;;  %v1769_v35 = vor.u32 %v2162_v21, %v1766_v24 }
 0x108   :  { %v1178_v39 = vpop.f32.mrf.mxu2 }
 0x109   :  { %v1179_v41 = vadd.f32 %v1178_v39, %v1130_v38  ;;  %v1777_v38 = vor.u32 %v2163_v28, %v1774_v30  ;;  %v1781_v39 = vor.u32 %v2168_v13, %v1780_v31 }
 0x10a   :  { %v1227_v42 = vpop.f32.mrf.mxu3  ;;  %v1131_v43 = vpop.f32.mrf.mxu1 }
 0x10b   :  { %v1228_v44 = vadd.f32 %v1227_v42, %v1179_v41  ;;  %v1132_v53 = vadd.f32 %v1131_v43, %v2548_v2 }
 0x10c   :  { %v1278_v50 = vpop.f32.mrf.mxu0 }
 0x10d   :  { %v2585_v48 = vadd.f32 %v1276_v36, %v1228_v44 }
 0x110   :  { %v1180_v60 = vpop.f32.mrf.mxu2 }
 0x111   :  { %v1181_v54 = vadd.f32 %v1180_v60, %v1132_v53  ;;  %v1802_v53 = vld [vmem:[#allocation2 + $0x22c] sm:$0xf0]  ;;  %v2172_v60 = vld [vmem:[#allocation2 + $0x214] sm:$0xf] }
 0x112   :  { %v1229_v61 = vpop.f32.mrf.mxu3  ;;  %v1134_v0 = vpop.f32.mrf.mxu1 }
 0x113   :  { %v1230_v7 = vadd.f32 %v1229_v61, %v1181_v54  ;;  %v1135_v2 = vadd.f32 %v1134_v0, %v2554_v10  ;;  %v1810_v61 = vld [vmem:[#allocation2 + $0x234] sm:$0xf0] }
 0x114   :  { %v1281_v8 = vpop.f32.mrf.mxu0 }
 0x115   :  { %1329 = vmatmul.bf16.gmra.mxu1 %v1733_v63  ;;  %1378 = vmatmul.bf16.gmra.mxu2 %v1737_v56  ;;  %v2588_v14 = vadd.f32 %v1278_v50, %v1230_v7  ;;  %v1816_v63 = vld [vmem:[#allocation2 + $0x218] sm:$0xf]  ;;  %v2177_v56 = vld [vmem:[#allocation2 + $0x238] sm:$0xf0]  ;;  %v1809_v7 = vor.u32 %v2176_v57, %v1808_v59 }
 0x117   :  { %1427 = vmatmul.bf16.gmra.mxu3 %v1741_v1  ;;  %1476 = vmatmul.bf16.gmra.mxu0 %v1745_v5  ;;  %v1805_v5 = vor.u32 %v2171_v52, %v1802_v53 }
 0x118   :  { %v1183_v15 = vpop.f32.mrf.mxu2 }
 0x119   :  { %v1184_v17 = vadd.f32 %v1183_v15, %v1135_v2  ;;  %v1813_v2 = vor.u32 %v2172_v60, %v1810_v61  ;;  %v1817_v15 = vor.u32 %v2177_v56, %v1816_v63 }
 0x11a   :  { %v1232_v9 = vpop.f32.mrf.mxu3  ;;  %v1136_v18 = vpop.f32.mrf.mxu1 }
 0x11b   :  { %v1233_v19 = vadd.f32 %v1232_v9, %v1184_v17  ;;  %v1137_v29 = vadd.f32 %v1136_v18, %v2560_v22 }
 0x11c   :  { %v1283_v6 = vpop.f32.mrf.mxu0 }
 0x11d   :  { %v2591_v25 = vadd.f32 %v1281_v8, %v1233_v19 }
 0x120   :  { %v1185_v32 = vpop.f32.mrf.mxu2 }
 0x121   :  { %v1186_v10 = vadd.f32 %v1185_v32, %v1137_v29 }
 0x122   :  { %v1234_v33 = vpop.f32.mrf.mxu3  ;;  %v1139_v36 = vpop.f32.mrf.mxu1 }
 0x123   :  { %v1235_v41 = vadd.f32 %v1234_v33, %v1186_v10  ;;  %v1140_v22 = vadd.f32 %v1139_v36, %v2544_v55 }
 0x124   :  { %v1286_v42 = vpop.f32.mrf.mxu0 }
 0x125   :  { %1334 = vmatmul.bf16.gmra.mxu1 %v1769_v35  ;;  %1383 = vmatmul.bf16.gmra.mxu2 %v1773_v12  ;;  %v2594_v43 = vadd.f32 %v1283_v6, %v1235_v41 }
 0x127   :  { %1432 = vmatmul.bf16.gmra.mxu3 %v1777_v38  ;;  %1481 = vmatmul.bf16.gmra.mxu0 %v1781_v39 }
 0x128   :  { %v1188_v44 = vpop.f32.mrf.mxu2 }
 0x129   :  { %v1189_v50 = vadd.f32 %v1188_v44, %v1140_v22 }
 0x12a   :  { %v1237_v46 = vpop.f32.mrf.mxu3  ;;  %v1141_v47 = vpop.f32.mrf.mxu1 }
 0x12b   :  { %v1238_v49 = vadd.f32 %v1237_v46, %v1189_v50  ;;  %v1142_v54 = vadd.f32 %v1141_v47, %v2550_v3 }
 0x12c   :  { %v1288_v51 = vpop.f32.mrf.mxu0 }
 0x12d   :  { %v2597_v58 = vadd.f32 %v1286_v42, %v1238_v49 }
 0x130   :  { %v1190_v0 = vpop.f32.mrf.mxu2 }
 0x131   :  { %v1191_v55 = vadd.f32 %v1190_v0, %v1142_v54 }
 0x132   :  { %v1239_v1 = vpop.f32.mrf.mxu3  ;;  %v1144_v8 = vpop.f32.mrf.mxu1 }
 0x133   :  { %v1240_v17 = vadd.f32 %v1239_v1, %v1191_v55  ;;  %v1145_v3 = vadd.f32 %v1144_v8, %v2556_v11 }
 0x134   :  { %v1291_v9 = vpop.f32.mrf.mxu0 }
 0x135   :  { %1339 = vmatmul.bf16.gmra.mxu1 %v1805_v5  ;;  %1388 = vmatmul.bf16.gmra.mxu2 %v1809_v7  ;;  %v2600_v18 = vadd.f32 %v1288_v51, %v1240_v17 }
 0x137   :  { %1437 = vmatmul.bf16.gmra.mxu3 %v1813_v2  ;;  %1486 = vmatmul.bf16.gmra.mxu0 %v1817_v15 }
 0x138   :  { %v1193_v19 = vpop.f32.mrf.mxu2 }
 0x139   :  { %v1194_v6 = vadd.f32 %v1193_v19, %v1145_v3 }
 0x13a   :  { %v1242_v21 = vpop.f32.mrf.mxu3  ;;  %v1146_v24 = vpop.f32.mrf.mxu1 }
 0x13b   :  { %v1243_v26 = vadd.f32 %v1242_v21, %v1194_v6  ;;  %v1147_v29 = vadd.f32 %v1146_v24, %v2562_v23 }
 0x13c   :  { %v1293_v27 = vpop.f32.mrf.mxu0 }
 0x13d   :  { %v2603_v28 = vadd.f32 %v1291_v9, %v1243_v26 }
 0x140   :  { %v1195_v30 = vpop.f32.mrf.mxu2 }
 0x141   :  { %v1196_v31 = vadd.f32 %v1195_v30, %v1147_v29 }
 0x142   :  { %v1244_v13 = vpop.f32.mrf.mxu3  ;;  %v1305_v32 = vpop.f32.mrf.mxu1 }
 0x143   :  { %v1245_v10 = vadd.f32 %v1244_v13, %v1196_v31  ;;  %v1306_v11 = vadd.f32 %v1305_v32, %v2564_v40 }
 0x144   :  { %v1452_v33 = vpop.f32.mrf.mxu0 }
 0x145   :  { %v2606_v35 = vadd.f32 %v1293_v27, %v1245_v10 }
 0x148   :  { %v1354_v12 = vpop.f32.mrf.mxu2 }
 0x149   :  { %v1355_v36 = vadd.f32 %v1354_v12, %v1306_v11 }
 0x14a   :  { %v1403_v38 = vpop.f32.mrf.mxu3  ;;  %v1307_v39 = vpop.f32.mrf.mxu1 }
 0x14b   :  { %v1404_v41 = vadd.f32 %v1403_v38, %v1355_v36  ;;  %v1308_v23 = vadd.f32 %v1307_v39, %v2566_v62 }
 0x14c   :  { %v1454_v42 = vpop.f32.mrf.mxu0 }
 0x14d   :  { %v1453_v22 = vadd.f32 %v1452_v33, %v1404_v41 }
 0x14f   :  { %v1492_v44 = vpack.c.bf16 %v1453_v22, %v1453_v22 }
 0x150   :  { %v1356_v50 = vpop.f32.mrf.mxu2 }
 0x151   :  { %1509 = vst.msk [vmem:[%s2690_s2] sm:$0xf] %vm1508_vm0, %v1492_v44  ;;  %v1357_v46 = vadd.f32 %v1356_v50, %v1308_v23 }
 0x152   :  { %v1405_v47 = vpop.f32.mrf.mxu3  ;;  %v1310_v40 = vpop.f32.mrf.mxu1 }
 0x153   :  { %v1406_v49 = vadd.f32 %v1405_v47, %v1357_v46  ;;  %v1311_v59 = vadd.f32 %v1310_v40, %v2568_v16 }
 0x154   :  { %v1457_v51 = vpop.f32.mrf.mxu0 }
 0x155   :  { %v1455_v52 = vadd.f32 %v1454_v42, %v1406_v49 }
 0x157   :  { %v1493_v53 = vpack.c.bf16 %v1455_v52, %v1455_v52 }
 0x158   :  { %v1359_v57 = vpop.f32.mrf.mxu2 }
 0x159   :  { %1510 = vst.msk [vmem:[%s2690_s2 + $0x4] sm:$0xf] %vm1508_vm0, %v1493_v53  ;;  %v1360_v62 = vadd.f32 %v1359_v57, %v1311_v59 }
 0x15a   :  { %v1408_v60 = vpop.f32.mrf.mxu3  ;;  %v1312_v54 = vpop.f32.mrf.mxu1 }
 0x15b   :  { %v1409_v61 = vadd.f32 %v1408_v60, %v1360_v62  ;;  %v1313_v55 = vadd.f32 %v1312_v54, %v2571_v34 }
 0x15c   :  { %v1459_v63 = vpop.f32.mrf.mxu0 }
 0x15d   :  { %v1458_v56 = vadd.f32 %v1457_v51, %v1409_v61 }
 0x15f   :  { %v1494_v0 = vpack.c.bf16 %v1458_v56, %v1458_v56 }
 0x160   :  { %v1361_v1 = vpop.f32.mrf.mxu2 }
 0x161   :  { %1511 = vst.msk [vmem:[%s2690_s2 + $0x8] sm:$0xf] %vm1508_vm0, %v1494_v0  ;;  %v1362_v16 = vadd.f32 %v1361_v1, %v1313_v55 }
 0x162   :  { %v1410_v5 = vpop.f32.mrf.mxu3  ;;  %v1315_v7 = vpop.f32.mrf.mxu1 }
 0x163   :  { %v1411_v8 = vadd.f32 %v1410_v5, %v1362_v16  ;;  %v1316_v9 = vadd.f32 %v1315_v7, %v2574_v45 }
 0x164   :  { %v1462_v2 = vpop.f32.mrf.mxu0 }
 0x165   :  { %v1460_v15 = vadd.f32 %v1459_v63, %v1411_v8 }
 0x167   :  { %v1495_v17 = vpack.c.bf16 %v1460_v15, %v1460_v15 }
 0x168   :  { %v1364_v3 = vpop.f32.mrf.mxu2 }
 0x169   :  { %1512 = vst.msk [vmem:[%s2690_s2 + $0xc] sm:$0xf] %vm1508_vm0, %v1495_v17  ;;  %v1365_v34 = vadd.f32 %v1364_v3, %v1316_v9 }
 0x16a   :  { %v1413_v19 = vpop.f32.mrf.mxu3  ;;  %v1317_v6 = vpop.f32.mrf.mxu1 }
 0x16b   :  { %v1414_v21 = vadd.f32 %v1413_v19, %v1365_v34  ;;  %v1318_v29 = vadd.f32 %v1317_v6, %v2577_v4 }
 0x16c   :  { %v1464_v24 = vpop.f32.mrf.mxu0 }
 0x16d   :  { %v1463_v26 = vadd.f32 %v1462_v2, %v1414_v21 }
 0x16f   :  { %v1496_v27 = vpack.c.bf16 %v1463_v26, %v1463_v26 }
 0x170   :  { %v1366_v30 = vpop.f32.mrf.mxu2 }
 0x171   :  { %1513 = vst.msk [vmem:[%s2690_s2 + $0x10] sm:$0xf] %vm1508_vm0, %v1496_v27  ;;  %v1367_v45 = vadd.f32 %v1366_v30, %v1318_v29 }
 0x172   :  { %v1415_v31 = vpop.f32.mrf.mxu3  ;;  %v1320_v13 = vpop.f32.mrf.mxu1 }
 0x173   :  { %v1416_v32 = vadd.f32 %v1415_v31, %v1367_v45  ;;  %v1321_v12 = vadd.f32 %v1320_v13, %v2580_v20 }
 0x174   :  { %v1467_v10 = vpop.f32.mrf.mxu0 }
 0x175   :  { %v1465_v33 = vadd.f32 %v1464_v24, %v1416_v32 }
 0x177   :  { %v1497_v11 = vpack.c.bf16 %v1465_v33, %v1465_v33 }
 0x178   :  { %v1369_v36 = vpop.f32.mrf.mxu2 }
 0x179   :  { %1514 = vst.msk [vmem:[%s2690_s2 + $0x14] sm:$0xf] %vm1508_vm0, %v1497_v11  ;;  %v1370_v4 = vadd.f32 %v1369_v36, %v1321_v12 }
 0x17a   :  { %v1418_v38 = vpop.f32.mrf.mxu3  ;;  %v1322_v39 = vpop.f32.mrf.mxu1 }
 0x17b   :  { %v1419_v41 = vadd.f32 %v1418_v38, %v1370_v4  ;;  %v1323_v23 = vadd.f32 %v1322_v39, %v2582_v37 }
 0x17c   :  { %v1469_v42 = vpop.f32.mrf.mxu0 }
 0x17d   :  { %v1468_v22 = vadd.f32 %v1467_v10, %v1419_v41 }
 0x17f   :  { %v1498_v44 = vpack.c.bf16 %v1468_v22, %v1468_v22 }
 0x180   :  { %v1371_v50 = vpop.f32.mrf.mxu2 }
 0x181   :  { %1515 = vst.msk [vmem:[%s2690_s2 + $0x18] sm:$0xf] %vm1508_vm0, %v1498_v44  ;;  %v1372_v20 = vadd.f32 %v1371_v50, %v1323_v23 }
 0x182   :  { %v1420_v46 = vpop.f32.mrf.mxu3  ;;  %v1325_v47 = vpop.f32.mrf.mxu1 }
 0x183   :  { %v1421_v40 = vadd.f32 %v1420_v46, %v1372_v20  ;;  %v1326_v53 = vadd.f32 %v1325_v47, %v2585_v48 }
 0x184   :  { %v1472_v49 = vpop.f32.mrf.mxu0 }
 0x185   :  { %v1470_v51 = vadd.f32 %v1469_v42, %v1421_v40 }
 0x187   :  { %v1499_v52 = vpack.c.bf16 %v1470_v51, %v1470_v51 }
 0x188   :  { %v1374_v59 = vpop.f32.mrf.mxu2 }
 0x189   :  { %1516 = vst.msk [vmem:[%s2690_s2 + $0x1c] sm:$0xf] %vm1508_vm0, %v1499_v52  ;;  %v1375_v37 = vadd.f32 %v1374_v59, %v1326_v53 }
 0x18a   :  { %v1423_v57 = vpop.f32.mrf.mxu3  ;;  %v1327_v62 = vpop.f32.mrf.mxu1 }
 0x18b   :  { %v1424_v60 = vadd.f32 %v1423_v57, %v1375_v37  ;;  %v1328_v56 = vadd.f32 %v1327_v62, %v2588_v14 }
 0x18c   :  { %v1474_v54 = vpop.f32.mrf.mxu0 }
 0x18d   :  { %v1473_v61 = vadd.f32 %v1472_v49, %v1424_v60 }
 0x18f   :  { %v1500_v63 = vpack.c.bf16 %v1473_v61, %v1473_v61 }
 0x190   :  { %v1376_v0 = vpop.f32.mrf.mxu2 }
 0x191   :  { %1517 = vst.msk [vmem:[%s2690_s2 + $0x20] sm:$0xf] %vm1508_vm0, %v1500_v63  ;;  %v1377_v48 = vadd.f32 %v1376_v0, %v1328_v56 }
 0x192   :  { %v1425_v55 = vpop.f32.mrf.mxu3  ;;  %v1330_v1 = vpop.f32.mrf.mxu1 }
 0x193   :  { %v1426_v16 = vadd.f32 %v1425_v55, %v1377_v48  ;;  %v1331_v2 = vadd.f32 %v1330_v1, %v2591_v25 }
 0x194   :  { %v1477_v5 = vpop.f32.mrf.mxu0 }
 0x195   :  { %v1475_v7 = vadd.f32 %v1474_v54, %v1426_v16 }
 0x197   :  { %v1501_v8 = vpack.c.bf16 %v1475_v7, %v1475_v7 }
 0x198   :  { %v1379_v15 = vpop.f32.mrf.mxu2 }
 0x199   :  { %1518 = vst.msk [vmem:[%s2690_s2 + $0x24] sm:$0xf] %vm1508_vm0, %v1501_v8  ;;  %v1380_v14 = vadd.f32 %v1379_v15, %v1331_v2 }
 0x19a   :  { %v1428_v17 = vpop.f32.mrf.mxu3  ;;  %v1332_v9 = vpop.f32.mrf.mxu1 }
 0x19b   :  { %v1429_v3 = vadd.f32 %v1428_v17, %v1380_v14  ;;  %v1333_v21 = vadd.f32 %v1332_v9, %v2594_v43 }
 0x19c   :  { %v1479_v34 = vpop.f32.mrf.mxu0 }
 0x19d   :  { %v1478_v19 = vadd.f32 %v1477_v5, %v1429_v3 }
 0x19f   :  { %v1502_v6 = vpack.c.bf16 %v1478_v19, %v1478_v19 }
 0x1a0   :  { %v1381_v24 = vpop.f32.mrf.mxu2 }
 0x1a1   :  { %1519 = vst.msk [vmem:[%s2690_s2 + $0x28] sm:$0xf] %vm1508_vm0, %v1502_v6  ;;  %v1382_v25 = vadd.f32 %v1381_v24, %v1333_v21 }
 0x1a2   :  { %v1430_v26 = vpop.f32.mrf.mxu3  ;;  %v1335_v27 = vpop.f32.mrf.mxu1 }
 0x1a3   :  { %v1431_v29 = vadd.f32 %v1430_v26, %v1382_v25  ;;  %v1336_v13 = vadd.f32 %v1335_v27, %v2597_v58 }
 0x1a4   :  { %v1482_v45 = vpop.f32.mrf.mxu0 }
 0x1a5   :  { %v1480_v30 = vadd.f32 %v1479_v34, %v1431_v29 }
 0x1a7   :  { %v1503_v31 = vpack.c.bf16 %v1480_v30, %v1480_v30 }
 0x1a8   :  { %v1384_v32 = vpop.f32.mrf.mxu2 }
 0x1a9   :  { %1520 = vst.msk [vmem:[%s2690_s2 + $0x2c] sm:$0xf] %vm1508_vm0, %v1503_v31  ;;  %v1385_v43 = vadd.f32 %v1384_v32, %v1336_v13 }
 0x1aa   :  { %v1433_v10 = vpop.f32.mrf.mxu3  ;;  %v1337_v33 = vpop.f32.mrf.mxu1 }
 0x1ab   :  { %v1434_v11 = vadd.f32 %v1433_v10, %v1385_v43  ;;  %v1338_v4 = vadd.f32 %v1337_v33, %v2600_v18 }
 0x1ac   :  { %v1484_v38 = vpop.f32.mrf.mxu0 }
 0x1ad   :  { %v1483_v12 = vadd.f32 %v1482_v45, %v1434_v11 }
 0x1af   :  { %v1504_v36 = vpack.c.bf16 %v1483_v12, %v1483_v12 }
 0x1b0   :  { %v1386_v39 = vpop.f32.mrf.mxu2 }
 0x1b1   :  { %1521 = vst.msk [vmem:[%s2690_s2 + $0x30] sm:$0xf] %vm1508_vm0, %v1504_v36  ;;  %v1387_v58 = vadd.f32 %v1386_v39, %v1338_v4 }
 0x1b2   :  { %v1435_v41 = vpop.f32.mrf.mxu3  ;;  %v1340_v42 = vpop.f32.mrf.mxu1 }
 0x1b3   :  { %v1436_v22 = vadd.f32 %v1435_v41, %v1387_v58  ;;  %v1341_v50 = vadd.f32 %v1340_v42, %v2603_v28 }
 0x1b4   :  { %v1487_v47 = vpop.f32.mrf.mxu0 }
 0x1b5   :  { %v1485_v44 = vadd.f32 %v1484_v38, %v1436_v22 }
 0x1b7   :  { %v1505_v23 = vpack.c.bf16 %v1485_v44, %v1485_v44 }
 0x1b8   :  { %v1389_v20 = vpop.f32.mrf.mxu2 }
 0x1b9   :  { %1522 = vst.msk [vmem:[%s2690_s2 + $0x34] sm:$0xf] %vm1508_vm0, %v1505_v23  ;;  %v1390_v18 = vadd.f32 %v1389_v20, %v1341_v50 }
 0x1ba   :  { %v1438_v46 = vpop.f32.mrf.mxu3  ;;  %v1342_v49 = vpop.f32.mrf.mxu1 }
 0x1bb   :  { %v1439_v40 = vadd.f32 %v1438_v46, %v1390_v18  ;;  %v1343_v53 = vadd.f32 %v1342_v49, %v2606_v35 }
 0x1bc   :  { %v1489_v62 = vpop.f32.mrf.mxu0 }
 0x1bd   :  { %v1488_v51 = vadd.f32 %v1487_v47, %v1439_v40 }
 0x1bf   :  { %v1506_v52 = vpack.c.bf16 %v1488_v51, %v1488_v51 }
 0x1c0   :  { %v1391_v59 = vpop.f32.mrf.mxu2 }
 0x1c1   :  { %1523 = vst.msk [vmem:[%s2690_s2 + $0x38] sm:$0xf] %vm1508_vm0, %v1506_v52  ;;  %v1392_v28 = vadd.f32 %v1391_v59, %v1343_v53 }
 0x1c2   :  { %v1440_v37 = vpop.f32.mrf.mxu3 }
 0x1c3   :  { %v1441_v57 = vadd.f32 %v1440_v37, %v1392_v28 }
 0x1c5   :  { %v1490_v60 = vadd.f32 %v1489_v62, %v1441_v57 }
 0x1c7   :  { %v1507_v54 = vpack.c.bf16 %v1490_v60, %v1490_v60 }
 0x1c9   :  { %1524 = vst.msk [vmem:[%s2690_s2 + $0x3c] sm:$0xf] %vm1508_vm0, %v1507_v54 }
 0x1ca   :  { %1529 = vsyncpa [#allocation3], 1 }

// kernel: _forward_impl.272
= control target key start
LH: loop header
LB: loop body
LE: loop exit
PB: predicated region body
PF: predicated region fallthrough
CT: control target
= control target key end

     0   :  { %s159_s0 = inlined_call_operand.vmem [shape: bf16[32,128], index: 0, kind: input, shape index: {}]   ;;  %s160_s1 = inlined_call_operand.vmem [shape: f32[1,128], index: 1, kind: input, shape index: {}]   ;;  %s161_s2 = inlined_call_operand.vmem [shape: f32[1,128], index: 2, kind: input, shape index: {}]   ;;  %s162_s3 = inlined_call_operand.vmem [shape: bf16[32,128], index: 3, kind: output, shape index: {}]  }
   0x1   :  { %v98_v0 = vld [vmem:[%s159_s0] sm:$0xff]   ;;  %v115_v1 = vld [vmem:[%s159_s0 + $0x8] sm:$0xff]  }
   0x2   :  { %v99_v2 = vunpack.c.l.bf16 %v98_v0  ;;  %v100_v3 = vunpack.c.h.bf16 %v98_v0  ;;  %v103_v4 = vunpack.c.l.bf16 %v115_v1  ;;  %v104_v5 = vunpack.c.h.bf16 %v115_v1  ;;  %v117_v41 = vld [vmem:[%s160_s1] ss:$0 sm:$0xff] }
   0x3   :  { %v118_v45 = vld [vmem:[%s161_s2] ss:$0 sm:$0xff] }
   0x4   :  { %v22_v6 = vadd.f32 %v100_v3, %v99_v2 }
   0x6   :  { %v23_v7 = vadd.f32 %v103_v4, %v22_v6 }
   0x8   :  { %v24_v8 = vadd.f32 %v104_v5, %v23_v7 }
   0xa   :  { %v25_v9 = vrot.slane %v24_v8, 4 }
   0xc   :  { %v26_v10 = vadd.f32 %v25_v9, %v24_v8 }
   0xe   :  { %v27_v11 = vrot.slane %v26_v10, 2 }
  0x10   :  { %v28_v12 = vadd.f32 %v27_v11, %v26_v10 }
  0x12   :  { %v29_v13 = vrot.slane %v28_v12, 1 }
  0x14   :  { %v30_v14 = vadd.f32 %v29_v13, %v28_v12 }
  0x16   :  { %v31_v15 = vmul.f32 0.03125, %v30_v14 }
  0x18   :  { %v32_v16 = vsub.f32 %v99_v2, %v31_v15  ;;  %v33_v17 = vsub.f32 %v100_v3, %v31_v15  ;;  %v34_v18 = vsub.f32 %v103_v4, %v31_v15  ;;  %v35_v19 = vsub.f32 %v104_v5, %v31_v15 }
  0x1a   :  { %v36_v20 = vmul.f32 %v32_v16, %v32_v16  ;;  %v37_v21 = vmul.f32 %v33_v17, %v33_v17  ;;  %v38_v22 = vmul.f32 %v34_v18, %v34_v18  ;;  %v39_v23 = vmul.f32 %v35_v19, %v35_v19 }
  0x1c   :  { %v40_v24 = vadd.f32 %v37_v21, %v36_v20 }
  0x1e   :  { %v41_v25 = vadd.f32 %v40_v24, %v38_v22 }
  0x20   :  { %v42_v26 = vadd.f32 %v41_v25, %v39_v23 }
  0x22   :  { %v43_v27 = vrot.slane %v42_v26, 4 }
  0x24   :  { %v44_v28 = vadd.f32 %v43_v27, %v42_v26 }
  0x26   :  { %v45_v29 = vrot.slane %v44_v28, 2 }
  0x28   :  { %v46_v30 = vadd.f32 %v45_v29, %v44_v28 }
  0x2a   :  { %v47_v31 = vrot.slane %v46_v30, 1 }
  0x2c   :  { %v48_v32 = vadd.f32 %v47_v31, %v46_v30 }
  0x2e   :  { %v49_v33 = vmul.f32 0.03125, %v48_v32 }
  0x30   :  { %v50_v34 = vadd.f32 1e-05, %v49_v33 }
  0x32   :  { %119 = vrsqrt.f32 %v50_v34  ;;  %vm57_vm0 = vweird.f32 %v50_v34 }
  0x38   :  { %v120_v35 = vpop.eup %119 }
  0x39   :  { %v52_v36 = vmul.f32 %v120_v35, %v50_v34  ;;  %vm58_vm1 = vweird.f32 %v120_v35 }
  0x3a   :  { %vm59_vm2 = vmor %vm57_vm0, %vm58_vm1 }
  0x3b   :  { %v53_v37 = vmul.f32 %v120_v35, %v52_v36 }
  0x3d   :  { %v54_v38 = vmul.f32 0.5, %v53_v37 }
  0x3f   :  { %v55_v39 = vsub.f32 1.5, %v54_v38 }
  0x41   :  { %v56_v40 = vmul.f32 %v120_v35, %v55_v39 }
  0x43   :  { %v60_v42 = vsel %vm59_vm2, %v120_v35, %v56_v40 }
  0x44   :  { %v61_v43 = vmul.f32 %v60_v42, %v32_v16  ;;  %v62_v44 = vmul.f32 %v60_v42, %v33_v17  ;;  %v63_v46 = vmul.f32 %v60_v42, %v34_v18  ;;  %v64_v47 = vmul.f32 %v60_v42, %v35_v19 }
  0x46   :  { %v69_v48 = vmul.f32 %v117_v41, %v61_v43  ;;  %v70_v49 = vmul.f32 %v117_v41, %v62_v44  ;;  %v71_v50 = vmul.f32 %v117_v41, %v63_v46  ;;  %v72_v51 = vmul.f32 %v117_v41, %v64_v47 }
  0x48   :  { %v77_v52 = vadd.f32 %v118_v45, %v69_v48  ;;  %v78_v53 = vadd.f32 %v118_v45, %v70_v49  ;;  %v79_v54 = vadd.f32 %v118_v45, %v71_v50  ;;  %v80_v55 = vadd.f32 %v118_v45, %v72_v51 }
  0x4a   :  { %v81_v56 = vmax.f32 %v77_v52, 0.0  ;;  %v82_v57 = vmax.f32 %v78_v53, 0.0  ;;  %v83_v58 = vmax.f32 %v79_v54, 0.0  ;;  %v84_v59 = vmax.f32 %v80_v55, 0.0 }
  0x4c   :  { %v108_v60 = vpack.c.bf16 %v82_v57, %v81_v56  ;;  %v113_v61 = vpack.c.bf16 %v84_v59, %v83_v58 }
  0x4e   :  { %109 = vst [vmem:[%s162_s3] sm:$0xff] %v108_v60  }
  0x4f   :  { %116 = vst [vmem:[%s162_s3 + $0x8] sm:$0xff] %v113_v61  }

// kernel: _forward_impl.270
= control target key start
LH: loop header
LB: loop body
LE: loop exit
PB: predicated region body
PF: predicated region fallthrough
CT: control target
= control target key end

     0   :  { %s583_s0 = inlined_call_operand.vmem [shape: bf16[32,512], index: 0, kind: input, shape index: {}]   ;;  %s584_s1 = inlined_call_operand.vmem [shape: f32[1,512], index: 1, kind: input, shape index: {}]   ;;  %s585_s2 = inlined_call_operand.vmem [shape: f32[1,512], index: 2, kind: input, shape index: {}]   ;;  %s586_s3 = inlined_call_operand.vmem [shape: bf16[32,512], index: 3, kind: output, shape index: {}]  }
   0x1   :  { %v329_v0 = vld [vmem:[%s583_s0] sm:$0xff]  ;;  %v334_v1 = vld [vmem:[%s583_s0 + $0x10] sm:$0xff]  ;;  %v353_v8 = vld [vmem:[%s583_s0 + $0x8] sm:$0xff] }
   0x2   :  { %v339_v2 = vld [vmem:[%s583_s0 + $0x20] sm:$0xff]  ;;  %v344_v3 = vld [vmem:[%s583_s0 + $0x30] sm:$0xff]  ;;  %v22_v4 = vunpack.c.l.bf16 %v329_v0  ;;  %v23_v5 = vunpack.c.h.bf16 %v329_v0  ;;  %v26_v6 = vunpack.c.l.bf16 %v334_v1  ;;  %v27_v7 = vunpack.c.h.bf16 %v334_v1  ;;  %v358_v9 = vld [vmem:[%s583_s0 + $0x18] sm:$0xff] }
   0x3   :  { %v30_v10 = vunpack.c.l.bf16 %v339_v2  ;;  %v31_v11 = vunpack.c.h.bf16 %v339_v2  ;;  %v34_v12 = vunpack.c.l.bf16 %v344_v3  ;;  %v35_v13 = vunpack.c.h.bf16 %v344_v3  ;;  %v367_v14 = vld [vmem:[%s583_s0 + $0x28] sm:$0xff]  ;;  %v372_v17 = vld [vmem:[%s583_s0 + $0x38] sm:$0xff] }
   0x4   :  { %v38_v15 = vadd.f32 %v26_v6, %v22_v4  ;;  %v47_v16 = vadd.f32 %v27_v7, %v23_v5  ;;  %v24_v18 = vunpack.c.l.bf16 %v353_v8  ;;  %v25_v19 = vunpack.c.h.bf16 %v353_v8 }
   0x5   :  { %v28_v20 = vunpack.c.l.bf16 %v358_v9  ;;  %v29_v21 = vunpack.c.h.bf16 %v358_v9  ;;  %v32_v22 = vunpack.c.l.bf16 %v367_v14  ;;  %v33_v23 = vunpack.c.h.bf16 %v367_v14 }
   0x6   :  { %v39_v24 = vadd.f32 %v38_v15, %v30_v10  ;;  %v48_v25 = vadd.f32 %v47_v16, %v31_v11  ;;  %v36_v26 = vunpack.c.l.bf16 %v372_v17  ;;  %v37_v27 = vunpack.c.h.bf16 %v372_v17 }
   0x7   :  { %v56_v28 = vadd.f32 %v28_v20, %v24_v18  ;;  %v65_v29 = vadd.f32 %v29_v21, %v25_v19 }
   0x8   :  { %v40_v30 = vadd.f32 %v39_v24, %v34_v12  ;;  %v49_v31 = vadd.f32 %v48_v25, %v35_v13 }
   0x9   :  { %v57_v32 = vadd.f32 %v56_v28, %v32_v22  ;;  %v66_v33 = vadd.f32 %v65_v29, %v33_v23 }
   0xa   :  { %v41_v34 = vrot.slane %v40_v30, 4  ;;  %v50_v35 = vrot.slane %v49_v31, 4 }
   0xb   :  { %v58_v36 = vadd.f32 %v57_v32, %v36_v26  ;;  %v67_v37 = vadd.f32 %v66_v33, %v37_v27 }
   0xc   :  { %v42_v38 = vadd.f32 %v41_v34, %v40_v30  ;;  %v51_v39 = vadd.f32 %v50_v35, %v49_v31 }
   0xd   :  { %v59_v40 = vrot.slane %v58_v36, 4  ;;  %v68_v41 = vrot.slane %v67_v37, 4 }
   0xe   :  { %v43_v42 = vrot.slane %v42_v38, 2  ;;  %v52_v43 = vrot.slane %v51_v39, 2 }
   0xf   :  { %v60_v44 = vadd.f32 %v59_v40, %v58_v36  ;;  %v69_v45 = vadd.f32 %v68_v41, %v67_v37 }
  0x10   :  { %v44_v46 = vadd.f32 %v43_v42, %v42_v38  ;;  %v53_v47 = vadd.f32 %v52_v43, %v51_v39 }
  0x11   :  { %v61_v48 = vrot.slane %v60_v44, 2  ;;  %v70_v49 = vrot.slane %v69_v45, 2 }
  0x12   :  { %v45_v50 = vrot.slane %v44_v46, 1  ;;  %v54_v51 = vrot.slane %v53_v47, 1 }
  0x13   :  { %v62_v52 = vadd.f32 %v61_v48, %v60_v44  ;;  %v71_v53 = vadd.f32 %v70_v49, %v69_v45 }
  0x14   :  { %v46_v54 = vadd.f32 %v45_v50, %v44_v46  ;;  %v55_v55 = vadd.f32 %v54_v51, %v53_v47 }
  0x15   :  { %v63_v56 = vrot.slane %v62_v52, 1  ;;  %v72_v57 = vrot.slane %v71_v53, 1 }
  0x16   :  { %v74_v58 = vmul.f32 0.03125, %v46_v54  ;;  %v75_v59 = vmul.f32 0.03125, %v55_v55 }
  0x17   :  { %v64_v60 = vadd.f32 %v63_v56, %v62_v52  ;;  %v73_v61 = vadd.f32 %v72_v57, %v71_v53 }
  0x18   :  { %v398_v62 = vsub.f32 %v22_v4, %v74_v58  ;;  %v400_v63 = vsub.f32 %v23_v5, %v75_v59  ;;  %v402_v0 = vsub.f32 %v26_v6, %v74_v58  ;;  %v404_v1 = vsub.f32 %v27_v7, %v75_v59 }
  0x19   :  { %v406_v2 = vsub.f32 %v30_v10, %v74_v58  ;;  %v408_v3 = vsub.f32 %v31_v11, %v75_v59  ;;  %v410_v15 = vsub.f32 %v34_v12, %v74_v58  ;;  %v412_v16 = vsub.f32 %v35_v13, %v75_v59 }
  0x1a   :  { %v94_v24 = vmul.f32 %v398_v62, %v398_v62  ;;  %v95_v4 = vmul.f32 %v400_v63, %v400_v63  ;;  %v98_v5 = vmul.f32 %v402_v0, %v402_v0  ;;  %v99_v6 = vmul.f32 %v404_v1, %v404_v1 }
  0x1b   :  { %v102_v7 = vmul.f32 %v406_v2, %v406_v2  ;;  %v103_v10 = vmul.f32 %v408_v3, %v408_v3  ;;  %v106_v11 = vmul.f32 %v410_v15, %v410_v15  ;;  %v107_v12 = vmul.f32 %v412_v16, %v412_v16 }
  0x1c   :  { %v110_v13 = vadd.f32 %v98_v5, %v94_v24  ;;  %v119_v25 = vadd.f32 %v99_v6, %v95_v4  ;;  %v76_v28 = vmul.f32 0.03125, %v64_v60  ;;  %v77_v29 = vmul.f32 0.03125, %v73_v61 }
  0x1e   :  { %v111_v30 = vadd.f32 %v110_v13, %v102_v7  ;;  %v120_v31 = vadd.f32 %v119_v25, %v103_v10  ;;  %v432_v32 = vsub.f32 %v24_v18, %v76_v28  ;;  %v436_v33 = vsub.f32 %v25_v19, %v77_v29 }
  0x1f   :  { %v440_v34 = vsub.f32 %v28_v20, %v76_v28  ;;  %v444_v35 = vsub.f32 %v29_v21, %v77_v29  ;;  %v448_v36 = vsub.f32 %v32_v22, %v76_v28  ;;  %v452_v18 = vsub.f32 %v33_v23, %v77_v29 }
  0x20   :  { %v112_v37 = vadd.f32 %v111_v30, %v106_v11  ;;  %v121_v8 = vadd.f32 %v120_v31, %v107_v12  ;;  %v456_v19 = vsub.f32 %v36_v26, %v76_v28  ;;  %v460_v20 = vsub.f32 %v37_v27, %v77_v29 }
  0x21   :  { %v96_v9 = vmul.f32 %v432_v32, %v432_v32  ;;  %v97_v21 = vmul.f32 %v436_v33, %v436_v33  ;;  %v100_v14 = vmul.f32 %v440_v34, %v440_v34  ;;  %v101_v22 = vmul.f32 %v444_v35, %v444_v35 }
  0x22   :  { %v113_v23 = vrot.slane %v112_v37, 4  ;;  %v122_v38 = vrot.slane %v121_v8, 4  ;;  %v104_v26 = vmul.f32 %v448_v36, %v448_v36  ;;  %v105_v17 = vmul.f32 %v452_v18, %v452_v18 }
  0x23   :  { %v108_v27 = vmul.f32 %v456_v19, %v456_v19  ;;  %v109_v39 = vmul.f32 %v460_v20, %v460_v20  ;;  %v128_v40 = vadd.f32 %v100_v14, %v96_v9  ;;  %v137_v41 = vadd.f32 %v101_v22, %v97_v21  ;;  %v210_v22 = vld [vmem:[%s584_s1] sm:$0xf] }
  0x24   :  { %v114_v42 = vadd.f32 %v113_v23, %v112_v37  ;;  %v123_v43 = vadd.f32 %v122_v38, %v121_v8  ;;  %v236_v38 = vld [vmem:[%s585_s2] sm:$0xf] }
  0x25   :  { %v129_v44 = vadd.f32 %v128_v40, %v104_v26  ;;  %v138_v45 = vadd.f32 %v137_v41, %v105_v17  ;;  %v489_v41 = vperm.slane %v210_v22, 1 }
  0x26   :  { %v115_v46 = vrot.slane %v114_v42, 2  ;;  %v124_v47 = vrot.slane %v123_v43, 2 }
  0x27   :  { %v130_v48 = vadd.f32 %v129_v44, %v108_v27  ;;  %v139_v49 = vadd.f32 %v138_v45, %v109_v39  ;;  %v487_v27 = vperm.slane %v210_v22, 0 }
  0x28   :  { %v116_v50 = vadd.f32 %v115_v46, %v114_v42  ;;  %v125_v51 = vadd.f32 %v124_v47, %v123_v43  ;;  %v491_v42 = vperm.slane %v236_v38, 0  ;;  %v493_v43 = vperm.slane %v236_v38, 1 }
  0x29   :  { %v131_v52 = vrot.slane %v130_v48, 4  ;;  %v140_v53 = vrot.slane %v139_v49, 4  ;;  %v495_v47 = vperm.slane %v210_v22, 2 }
  0x2a   :  { %v117_v54 = vrot.slane %v116_v50, 1  ;;  %v126_v55 = vrot.slane %v125_v51, 1 }
  0x2b   :  { %v132_v56 = vadd.f32 %v131_v52, %v130_v48  ;;  %v141_v57 = vadd.f32 %v140_v53, %v139_v49  ;;  %v497_v48 = vperm.slane %v210_v22, 3  ;;  %v503_v52 = vperm.slane %v236_v38, 3 }
  0x2c   :  { %v118_v58 = vadd.f32 %v117_v54, %v116_v50  ;;  %v127_v59 = vadd.f32 %v126_v55, %v125_v51  ;;  %v501_v51 = vperm.slane %v236_v38, 2 }
  0x2d   :  { %v133_v60 = vrot.slane %v132_v56, 2  ;;  %v142_v61 = vrot.slane %v141_v57, 2 }
  0x2e   :  { %v146_v24 = vmul.f32 0.03125, %v118_v58  ;;  %v147_v4 = vmul.f32 0.03125, %v127_v59 }
  0x2f   :  { %v134_v5 = vadd.f32 %v133_v60, %v132_v56  ;;  %v143_v6 = vadd.f32 %v142_v61, %v141_v57 }
  0x30   :  { %v150_v7 = vadd.f32 1e-05, %v146_v24  ;;  %v151_v10 = vadd.f32 1e-05, %v147_v4 }
  0x31   :  { %v135_v11 = vrot.slane %v134_v5, 1  ;;  %v144_v12 = vrot.slane %v143_v6, 1 }
  0x32   :  { %298 = vrsqrt.f32 %v150_v7  ;;  %vm160_vm0 = vweird.f32 %v150_v7  ;;  %vm170_vm2 = vweird.f32 %v151_v10 }
  0x33   :  { %300 = vrsqrt.f32 %v151_v10  ;;  %v136_v13 = vadd.f32 %v135_v11, %v134_v5  ;;  %v145_v25 = vadd.f32 %v144_v12, %v143_v6 }
  0x35   :  { %v148_v28 = vmul.f32 0.03125, %v136_v13  ;;  %v149_v29 = vmul.f32 0.03125, %v145_v25 }
  0x37   :  { %v152_v30 = vadd.f32 1e-05, %v148_v28  ;;  %v478_v31 = vadd.f32 1e-05, %v149_v29 }
  0x38   :  { %v299_v37 = vpop.eup %298 }
  0x39   :  { %v301_v8 = vpop.eup %300  ;;  %v155_v9 = vmul.f32 %v299_v37, %v150_v7  ;;  %302 = vrsqrt.f32 %v152_v30  ;;  %vm161_vm1 = vweird.f32 %v299_v37  ;;  %vm180_vm6 = vweird.f32 %v152_v30 }
  0x3a   :  { %v165_v21 = vmul.f32 %v301_v8, %v151_v10  ;;  %304 = vrsqrt.f32 %v478_v31  ;;  %vm171_vm3 = vweird.f32 %v301_v8  ;;  %vm162_vm4 = vmor %vm160_vm0, %vm161_vm1  ;;  %vm190_vm7 = vweird.f32 %v478_v31 }
  0x3b   :  { %v156_v14 = vmul.f32 %v299_v37, %v155_v9  ;;  %vm172_vm5 = vmor %vm170_vm2, %vm171_vm3 }
  0x3c   :  { %v166_v23 = vmul.f32 %v301_v8, %v165_v21 }
  0x3d   :  { %v157_v26 = vmul.f32 0.5, %v156_v14 }
  0x3e   :  { %v167_v17 = vmul.f32 0.5, %v166_v23 }
  0x3f   :  { %v303_v39 = vpop.eup %302  ;;  %v158_v40 = vsub.f32 1.5, %v157_v26 }
  0x40   :  { %v305_v44 = vpop.eup %304  ;;  %v168_v45 = vsub.f32 1.5, %v167_v17  ;;  %v175_v46 = vmul.f32 %v303_v39, %v152_v30  ;;  %vm181_vm8 = vweird.f32 %v303_v39 }
  0x41   :  { %v159_v49 = vmul.f32 %v299_v37, %v158_v40  ;;  %v185_v50 = vmul.f32 %v305_v44, %v478_v31  ;;  %vm191_vm9 = vweird.f32 %v305_v44  ;;  %vm182_vm10 = vmor %vm180_vm6, %vm181_vm8 }
  0x42   :  { %v169_v53 = vmul.f32 %v301_v8, %v168_v45  ;;  %v176_v54 = vmul.f32 %v303_v39, %v175_v46  ;;  %vm192_vm11 = vmor %vm190_vm7, %vm191_vm9 }
  0x43   :  { %v163_v55 = vsel %vm162_vm4, %v299_v37, %v159_v49  ;;  %v186_v56 = vmul.f32 %v305_v44, %v185_v50 }
  0x44   :  { %v173_v57 = vsel %vm172_vm5, %v301_v8, %v169_v53  ;;  %v194_v58 = vmul.f32 %v163_v55, %v398_v62  ;;  %v177_v59 = vmul.f32 0.5, %v176_v54  ;;  %v198_v60 = vmul.f32 %v163_v55, %v402_v0 }
  0x45   :  { %v195_v61 = vmul.f32 %v173_v57, %v400_v63  ;;  %v187_v24 = vmul.f32 0.5, %v186_v56  ;;  %v199_v4 = vmul.f32 %v173_v57, %v404_v1  ;;  %v202_v5 = vmul.f32 %v163_v55, %v406_v2 }
  0x46   :  { %v220_v6 = vmul.f32 %v487_v27, %v194_v58  ;;  %v178_v7 = vsub.f32 1.5, %v177_v59  ;;  %v224_v10 = vmul.f32 %v487_v27, %v198_v60  ;;  %v203_v11 = vmul.f32 %v173_v57, %v408_v3 }
  0x47   :  { %v221_v12 = vmul.f32 %v489_v41, %v195_v61  ;;  %v188_v62 = vsub.f32 1.5, %v187_v24  ;;  %v225_v63 = vmul.f32 %v489_v41, %v199_v4  ;;  %v228_v0 = vmul.f32 %v487_v27, %v202_v5 }
  0x48   :  { %v246_v1 = vadd.f32 %v491_v42, %v220_v6  ;;  %v179_v2 = vmul.f32 %v303_v39, %v178_v7  ;;  %v250_v13 = vadd.f32 %v491_v42, %v224_v10  ;;  %v229_v3 = vmul.f32 %v489_v41, %v203_v11 }
  0x49   :  { %v247_v25 = vadd.f32 %v493_v43, %v221_v12  ;;  %v189_v28 = vmul.f32 %v305_v44, %v188_v62  ;;  %v251_v29 = vadd.f32 %v493_v43, %v225_v63  ;;  %v254_v30 = vadd.f32 %v491_v42, %v228_v0 }
  0x4a   :  { %v262_v37 = vmax.f32 %v246_v1, 0.0  ;;  %v183_v8 = vsel %vm182_vm10, %v303_v39, %v179_v2  ;;  %v266_v9 = vmax.f32 %v250_v13, 0.0  ;;  %v255_v21 = vadd.f32 %v493_v43, %v229_v3 }
  0x4b   :  { %v263_v14 = vmax.f32 %v247_v25, 0.0  ;;  %v193_v22 = vsel %vm192_vm11, %v305_v44, %v189_v28  ;;  %v196_v31 = vmul.f32 %v183_v8, %v432_v32  ;;  %v267_v23 = vmax.f32 %v251_v29, 0.0 }
  0x4c   :  { %v197_v38 = vmul.f32 %v193_v22, %v436_v33  ;;  %v200_v26 = vmul.f32 %v183_v8, %v440_v34  ;;  %v201_v17 = vmul.f32 %v193_v22, %v444_v35  ;;  %v270_v40 = vmax.f32 %v254_v30, 0.0 }
  0x4d   :  { %v278_v45 = vpack.c.bf16 %v263_v14, %v262_v37  ;;  %v222_v46 = vmul.f32 %v495_v47, %v196_v31  ;;  %v280_v49 = vpack.c.bf16 %v267_v23, %v266_v9  ;;  %v271_v39 = vmax.f32 %v255_v21, 0.0 }
  0x4e   :  { %v223_v50 = vmul.f32 %v497_v48, %v197_v38  ;;  %v226_v53 = vmul.f32 %v495_v47, %v200_v26  ;;  %v227_v44 = vmul.f32 %v497_v48, %v201_v17  ;;  %v204_v32 = vmul.f32 %v183_v8, %v448_v36 }
  0x4f   :  { %286 = vst [vmem:[%s586_s3] sm:$0xff] %v278_v45  ;;  %v248_v33 = vadd.f32 %v501_v51, %v222_v46  ;;  %v282_v34 = vpack.c.bf16 %v271_v39, %v270_v40  ;;  %v205_v35 = vmul.f32 %v193_v22, %v452_v18  ;;  %v206_v54 = vmul.f32 %v163_v55, %v410_v15 }
  0x50   :  { %v249_v56 = vadd.f32 %v503_v52, %v223_v50  ;;  %288 = vst [vmem:[%s586_s3 + $0x10] sm:$0xff] %v280_v49  ;;  %v252_v58 = vadd.f32 %v501_v51, %v226_v53  ;;  %v253_v36 = vadd.f32 %v503_v52, %v227_v44  ;;  %v230_v59 = vmul.f32 %v495_v47, %v204_v32 }
  0x51   :  { %v264_v60 = vmax.f32 %v248_v33, 0.0  ;;  %290 = vst [vmem:[%s586_s3 + $0x20] sm:$0xff] %v282_v34  ;;  %v231_v18 = vmul.f32 %v497_v48, %v205_v35  ;;  %v207_v15 = vmul.f32 %v173_v57, %v412_v16  ;;  %v232_v55 = vmul.f32 %v487_v27, %v206_v54 }
  0x52   :  { %v265_v61 = vmax.f32 %v249_v56, 0.0  ;;  %v268_v24 = vmax.f32 %v252_v58, 0.0  ;;  %v269_v4 = vmax.f32 %v253_v36, 0.0  ;;  %v256_v5 = vadd.f32 %v501_v51, %v230_v59 }
  0x53   :  { %v257_v6 = vadd.f32 %v503_v52, %v231_v18  ;;  %v233_v7 = vmul.f32 %v489_v41, %v207_v15  ;;  %v258_v10 = vadd.f32 %v491_v42, %v232_v55  ;;  %v208_v11 = vmul.f32 %v183_v8, %v456_v19 }
  0x54   :  { %v279_v12 = vpack.c.bf16 %v265_v61, %v264_v60  ;;  %v281_v62 = vpack.c.bf16 %v269_v4, %v268_v24  ;;  %v272_v63 = vmax.f32 %v256_v5, 0.0  ;;  %v209_v16 = vmul.f32 %v193_v22, %v460_v20 }
  0x55   :  { %v273_v57 = vmax.f32 %v257_v6, 0.0  ;;  %v259_v27 = vadd.f32 %v493_v43, %v233_v7  ;;  %v274_v0 = vmax.f32 %v258_v10, 0.0  ;;  %v234_v1 = vmul.f32 %v495_v47, %v208_v11 }
  0x56   :  { %287 = vst [vmem:[%s586_s3 + $0x8] sm:$0xff] %v279_v12  ;;  %v235_v41 = vmul.f32 %v497_v48, %v209_v16 }
  0x57   :  { %289 = vst [vmem:[%s586_s3 + $0x18] sm:$0xff] %v281_v62  ;;  %v283_v19 = vpack.c.bf16 %v273_v57, %v272_v63  ;;  %v275_v42 = vmax.f32 %v259_v27, 0.0  ;;  %v260_v20 = vadd.f32 %v501_v51, %v234_v1 }
  0x58   :  { %v261_v2 = vadd.f32 %v503_v52, %v235_v41 }
  0x59   :  { %291 = vst [vmem:[%s586_s3 + $0x28] sm:$0xff] %v283_v19  ;;  %v284_v43 = vpack.c.bf16 %v275_v42, %v274_v0  ;;  %v276_v47 = vmax.f32 %v260_v20, 0.0 }
  0x5a   :  { %v277_v13 = vmax.f32 %v261_v2, 0.0 }
  0x5b   :  { %292 = vst [vmem:[%s586_s3 + $0x30] sm:$0xff] %v284_v43 }
  0x5c   :  { %v285_v48 = vpack.c.bf16 %v277_v13, %v276_v47 }
  0x5e   :  { %293 = vst [vmem:[%s586_s3 + $0x38] sm:$0xff] %v285_v48 }

// kernel: _forward_impl.271
= control target key start
LH: loop header
LB: loop body
LE: loop exit
PB: predicated region body
PF: predicated region fallthrough
CT: control target
= control target key end

     0   :  { %s779_s1 = inlined_call_operand.vmem [shape: bf16[512,128], index: 1, kind: input, shape index: {}]   ;;  %s780_s0 = inlined_call_operand.vmem [shape: bf16[32,512], index: 0, kind: input, shape index: {}]   ;;  %s781_s2 = inlined_call_operand.vmem [shape: bf16[32,128], index: 2, kind: output, shape index: {}]  }
   0x1   :  { %v578_v0 = vld [vmem:[%s779_s1 + $0x38] sm:$0xff]  ;;  %v577_v4 = vld [vmem:[%s779_s1 + $0x30] sm:$0xff]  ;;  %v576_v8 = vld [vmem:[%s779_s1 + $0x28] sm:$0xff] }
   0x2   :  { %v586_v1 = vld [vmem:[%s779_s1 + $0x78] sm:$0xff]  ;;  %315 = vmatpush.bf16.msra.mxu0 %v578_v0  ;;  %v585_v5 = vld [vmem:[%s779_s1 + $0x70] sm:$0xff]  ;;  %v584_v9 = vld [vmem:[%s779_s1 + $0x68] sm:$0xff] }
   0x3   :  { %v594_v2 = vld [vmem:[%s779_s1 + $0xb8] sm:$0xff]  ;;  %334 = vmatpush.bf16.msra.mxu1 %v586_v1  ;;  %v593_v6 = vld [vmem:[%s779_s1 + $0xb0] sm:$0xff]  ;;  %v592_v10 = vld [vmem:[%s779_s1 + $0xa8] sm:$0xff] }
   0x4   :  { %v602_v3 = vld [vmem:[%s779_s1 + $0xf8] sm:$0xff]  ;;  %353 = vmatpush.bf16.msra.mxu2 %v594_v2  ;;  %v601_v7 = vld [vmem:[%s779_s1 + $0xf0] sm:$0xff]  ;;  %v600_v11 = vld [vmem:[%s779_s1 + $0xe8] sm:$0xff] }
   0x5   :  { %372 = vmatpush.bf16.msra.mxu3 %v602_v3  ;;  %v575_v12 = vld [vmem:[%s779_s1 + $0x20] sm:$0xff]  ;;  %v574_v16 = vld [vmem:[%s779_s1 + $0x18] sm:$0xff]  ;;  %v573_v20 = vld [vmem:[%s779_s1 + $0x10] sm:$0xff] }
   0x6   :  { %316 = vmatpush.bf16.msra.mxu0 %v577_v4  ;;  %v583_v13 = vld [vmem:[%s779_s1 + $0x60] sm:$0xff]  ;;  %v582_v17 = vld [vmem:[%s779_s1 + $0x58] sm:$0xff]  ;;  %v581_v21 = vld [vmem:[%s779_s1 + $0x50] sm:$0xff] }
   0x7   :  { %335 = vmatpush.bf16.msra.mxu1 %v585_v5  ;;  %v591_v14 = vld [vmem:[%s779_s1 + $0xa0] sm:$0xff]  ;;  %v590_v18 = vld [vmem:[%s779_s1 + $0x98] sm:$0xff]  ;;  %v589_v22 = vld [vmem:[%s779_s1 + $0x90] sm:$0xff] }
   0x8   :  { %354 = vmatpush.bf16.msra.mxu2 %v593_v6  ;;  %v599_v15 = vld [vmem:[%s779_s1 + $0xe0] sm:$0xff]  ;;  %v598_v19 = vld [vmem:[%s779_s1 + $0xd8] sm:$0xff]  ;;  %v597_v23 = vld [vmem:[%s779_s1 + $0xd0] sm:$0xff] }
   0x9   :  { %373 = vmatpush.bf16.msra.mxu3 %v601_v7  ;;  %v572_v24 = vld [vmem:[%s779_s1 + $0x8] sm:$0xff]  ;;  %v571_v28 = vld [vmem:[%s779_s1] sm:$0xff]  ;;  %v565_v33 = vld [vmem:[%s780_s0 + $0xc] sm:$0xf0] }
   0xa   :  { %317 = vmatpush.bf16.msra.mxu0 %v576_v8  ;;  %v580_v25 = vld [vmem:[%s779_s1 + $0x48] sm:$0xff]  ;;  %v579_v29 = vld [vmem:[%s779_s1 + $0x40] sm:$0xff]  ;;  %v407_v35 = vld [vmem:[%s780_s0 + $0x10] sm:$0xf0] }
   0xb   :  { %336 = vmatpush.bf16.msra.mxu1 %v584_v9  ;;  %v588_v26 = vld [vmem:[%s779_s1 + $0x88] sm:$0xff]  ;;  %v587_v30 = vld [vmem:[%s779_s1 + $0x80] sm:$0xff]  ;;  %v566_v37 = vld [vmem:[%s780_s0 + $0x14] sm:$0xf0] }
   0xc   :  { %355 = vmatpush.bf16.msra.mxu2 %v592_v10  ;;  %v596_v27 = vld [vmem:[%s779_s1 + $0xc8] sm:$0xff]  ;;  %v595_v31 = vld [vmem:[%s779_s1 + $0xc0] sm:$0xff]  ;;  %v415_v39 = vld [vmem:[%s780_s0 + $0x18] sm:$0xf0] }
   0xd   :  { %374 = vmatpush.bf16.msra.mxu3 %v600_v11  ;;  %v405_v32 = vld [vmem:[%s780_s0] sm:$0xf]  ;;  %v563_v34 = vld [vmem:[%s780_s0 + $0x4] sm:$0xf]  ;;  %v413_v36 = vld [vmem:[%s780_s0 + $0x8] sm:$0xf] }
   0xe   :  { %318 = vmatpush.bf16.msra.mxu0 %v575_v12  ;;  %v564_v38 = vld [vmem:[%s780_s0 + $0xc] sm:$0xf]  ;;  %v406_v40 = vor.u32 %v565_v33, %v405_v32  ;;  %v410_v41 = vor.u32 %v563_v34, %v407_v35  ;;  %v414_v42 = vor.u32 %v566_v37, %v413_v36  ;;  %v421_v44 = vld [vmem:[%s780_s0 + $0x20] sm:$0xf]  ;;  %v569_v45 = vld [vmem:[%s780_s0 + $0x2c] sm:$0xf0] }
   0xf   :  { %337 = vmatpush.bf16.msra.mxu1 %v583_v13  ;;  %v418_v43 = vor.u32 %v564_v38, %v415_v39  ;;  %v567_v46 = vld [vmem:[%s780_s0 + $0x24] sm:$0xf]  ;;  %v423_v47 = vld [vmem:[%s780_s0 + $0x30] sm:$0xf0]  ;;  %v429_v48 = vld [vmem:[%s780_s0 + $0x28] sm:$0xf]  ;;  %v422_v52 = vor.u32 %v569_v45, %v421_v44 }
  0x10   :  { %356 = vmatpush.bf16.msra.mxu2 %v591_v14  ;;  %v570_v49 = vld [vmem:[%s780_s0 + $0x34] sm:$0xf0]  ;;  %v568_v50 = vld [vmem:[%s780_s0 + $0x2c] sm:$0xf]  ;;  %v431_v51 = vld [vmem:[%s780_s0 + $0x38] sm:$0xf0]  ;;  %v426_v53 = vor.u32 %v567_v46, %v423_v47 }
  0x11   :  { %375 = vmatpush.bf16.msra.mxu3 %v599_v15  ;;  %v430_v54 = vor.u32 %v570_v49, %v429_v48  ;;  %v434_v55 = vor.u32 %v568_v50, %v431_v51 }
  0x12   :  { %319 = vmatpush.bf16.msra.mxu0 %v574_v16 }
  0x13   :  { %338 = vmatpush.bf16.msra.mxu1 %v582_v17 }
  0x14   :  { %357 = vmatpush.bf16.msra.mxu2 %v590_v18 }
  0x15   :  { %376 = vmatpush.bf16.msra.mxu3 %v598_v19 }
  0x16   :  { %320 = vmatpush.bf16.msra.mxu0 %v573_v20 }
  0x17   :  { %339 = vmatpush.bf16.msra.mxu1 %v581_v21 }
  0x18   :  { %358 = vmatpush.bf16.msra.mxu2 %v589_v22 }
  0x19   :  { %377 = vmatpush.bf16.msra.mxu3 %v597_v23 }
  0x1a   :  { %321 = vmatpush.bf16.msra.mxu0 %v572_v24 }
  0x1b   :  { %340 = vmatpush.bf16.msra.mxu1 %v580_v25 }
  0x1c   :  { %359 = vmatpush.bf16.msra.mxu2 %v588_v26 }
  0x1d   :  { %378 = vmatpush.bf16.msra.mxu3 %v596_v27 }
  0x1e   :  { %322 = vmatpush.bf16.msra.mxu0 %v571_v28 }
  0x1f   :  { %341 = vmatpush.bf16.msra.mxu1 %v579_v29 }
  0x20   :  { %360 = vmatpush.bf16.msra.mxu2 %v587_v30 }
  0x21   :  { %379 = vmatpush.bf16.msra.mxu3 %v595_v31  ;;  %323 = vmatmul.bf16.vlgmr.msra.gmra.mxu0 %v406_v40 }
  0x22   :  { %342 = vmatmul.bf16.vlgmr.msra.gmra.mxu1 %v410_v41 }
  0x23   :  { %361 = vmatmul.bf16.vlgmr.msra.gmra.mxu2 %v414_v42 }
  0x24   :  { %380 = vmatmul.bf16.vlgmr.msra.gmra.mxu3 %v418_v43 }
  0x31   :  { %328 = vmatmul.bf16.gmra.mxu0 %v422_v52 }
  0x32   :  { %347 = vmatmul.bf16.gmra.mxu1 %v426_v53 }
  0x33   :  { %366 = vmatmul.bf16.gmra.mxu2 %v430_v54 }
  0x34   :  { %385 = vmatmul.bf16.gmra.mxu3 %v434_v55 }
  0x9e   :  { %v324_v56 = vpop.f32.mrf.mxu0 }
  0x9f   :  { %v343_v57 = vpop.f32.mrf.mxu1 }
  0xa0   :  { %v344_v62 = vadd.f32 %v343_v57, %v324_v56 }
  0xa6   :  { %v362_v58 = vpop.f32.mrf.mxu2  ;;  %v326_v60 = vpop.f32.mrf.mxu0 }
  0xa7   :  { %v381_v59 = vpop.f32.mrf.mxu3  ;;  %v345_v61 = vpop.f32.mrf.mxu1  ;;  %v363_v63 = vadd.f32 %v362_v58, %v344_v62 }
  0xa8   :  { %v346_v0 = vadd.f32 %v345_v61, %v326_v60 }
  0xa9   :  { %v382_v6 = vadd.f32 %v381_v59, %v363_v63 }
  0xae   :  { %v364_v1 = vpop.f32.mrf.mxu2  ;;  %v329_v4 = vpop.f32.mrf.mxu0 }
  0xaf   :  { %v383_v2 = vpop.f32.mrf.mxu3  ;;  %v365_v3 = vadd.f32 %v364_v1, %v346_v0  ;;  %v348_v5 = vpop.f32.mrf.mxu1 }
  0xb0   :  { %v349_v11 = vadd.f32 %v348_v5, %v329_v4 }
  0xb1   :  { %v384_v7 = vadd.f32 %v383_v2, %v365_v3 }
  0xb3   :  { %v606_v8 = vpack.c.bf16 %v384_v7, %v382_v6 }
  0xb5   :  { %607 = vst [vmem:[%s781_s2] sm:$0xff] %v606_v8  }
  0xb6   :  { %v367_v9 = vpop.f32.mrf.mxu2  ;;  %v331_v12 = vpop.f32.mrf.mxu0 }
  0xb7   :  { %v386_v10 = vpop.f32.mrf.mxu3  ;;  %v350_v13 = vpop.f32.mrf.mxu1  ;;  %v368_v14 = vadd.f32 %v367_v9, %v349_v11 }
  0xb8   :  { %v351_v15 = vadd.f32 %v350_v13, %v331_v12 }
  0xb9   :  { %v387_v19 = vadd.f32 %v386_v10, %v368_v14 }
  0xbe   :  { %v369_v16 = vpop.f32.mrf.mxu2 }
  0xbf   :  { %v370_v17 = vadd.f32 %v369_v16, %v351_v15  ;;  %v388_v18 = vpop.f32.mrf.mxu3 }
  0xc1   :  { %v389_v20 = vadd.f32 %v388_v18, %v370_v17 }
  0xc3   :  { %v611_v21 = vpack.c.bf16 %v389_v20, %v387_v19 }
  0xc5   :  { %613 = vst [vmem:[%s781_s2 + $0x8] sm:$0xff] %v611_v21  }

// kernel: _forward_impl.273
= control target key start
LH: loop header
LB: loop body
LE: loop exit
PB: predicated region body
PF: predicated region fallthrough
CT: control target
= control target key end

     0   :  { %7 = vsyncpa [#allocation3], 0  ;;  %s1387_s12 = smov [#allocation2]   ;;  %s1388_s14 = smov 576   ;;  %s1640_s0 = inlined_call_operand.hbm [shape: bf16[32,1152], index: 0, kind: input, shape index: {}]   ;;  %s1641_s1 = inlined_call_operand.vmem [shape: bf16[1152,32], index: 1, kind: input, shape index: {}]   ;;  %s1642_s2 = inlined_call_operand.vmem [shape: bf16[32,32], index: 2, kind: output, shape index: {}]  }
   0x1   :  { %s12_s11 = sshll.u32 %s1640_s0, 4  ;;  %s14_s13 = sshll.u32 %s1387_s12, 4  ;;  %s13_s11 = int_to_ptr.hbm [resolvable:$true] %s12_s11  ;;  %s15_s13 = int_to_ptr.vmem [resolvable:$true] %s14_s13 }
   0x2   :  { %s1389_s15 = smov 36  }
   0x3   :  { %20 = dma.hbm_to_vmem [thread:$0]  %s13_s11, 2304, %s15_s13, [#allocation3], %s1388_s14, %s1388_s14, %s1389_s15  }
   0x4   :  { %1385 = dma.done.wait [#allocation3], 2304  }
   0x5   :  { %1386 = vsyncadd [#allocation3], 4294964992  ;;  %v1285_v0 = vld [vmem:[%s1641_s1 + $0x38] sm:$0xff]  ;;  %v1284_v4 = vld [vmem:[%s1641_s1 + $0x30] sm:$0xff]  ;;  %vm890_vm0 = vcmask 257024  }
   0x6   :  { %v1293_v1 = vld [vmem:[%s1641_s1 + $0x78] sm:$0xff]  ;;  %715 = vmatpush.bf16.msra.mxu0 %v1285_v0  ;;  %v1292_v5 = vld [vmem:[%s1641_s1 + $0x70] sm:$0xff]  ;;  %v1283_v8 = vld [vmem:[%s1641_s1 + $0x28] sm:$0xff] }
   0x7   :  { %v1301_v2 = vld [vmem:[%s1641_s1 + $0xb8] sm:$0xff]  ;;  %734 = vmatpush.bf16.msra.mxu1 %v1293_v1  ;;  %v1300_v6 = vld [vmem:[%s1641_s1 + $0xb0] sm:$0xff]  ;;  %v1291_v9 = vld [vmem:[%s1641_s1 + $0x68] sm:$0xff] }
   0x8   :  { %v1309_v3 = vld [vmem:[%s1641_s1 + $0xf8] sm:$0xff]  ;;  %753 = vmatpush.bf16.msra.mxu2 %v1301_v2  ;;  %v1308_v7 = vld [vmem:[%s1641_s1 + $0xf0] sm:$0xff]  ;;  %v1299_v10 = vld [vmem:[%s1641_s1 + $0xa8] sm:$0xff] }
   0x9   :  { %772 = vmatpush.bf16.msra.mxu3 %v1309_v3  ;;  %v1307_v11 = vld [vmem:[%s1641_s1 + $0xe8] sm:$0xff]  ;;  %v1282_v12 = vld [vmem:[%s1641_s1 + $0x20] sm:$0xff]  ;;  %v1281_v16 = vld [vmem:[%s1641_s1 + $0x18] sm:$0xff] }
   0xa   :  { %716 = vmatpush.bf16.msra.mxu0 %v1284_v4  ;;  %v1290_v13 = vld [vmem:[%s1641_s1 + $0x60] sm:$0xff]  ;;  %v1289_v17 = vld [vmem:[%s1641_s1 + $0x58] sm:$0xff]  ;;  %v1280_v20 = vld [vmem:[%s1641_s1 + $0x10] sm:$0xff] }
   0xb   :  { %735 = vmatpush.bf16.msra.mxu1 %v1292_v5  ;;  %v1298_v14 = vld [vmem:[%s1641_s1 + $0xa0] sm:$0xff]  ;;  %v1297_v18 = vld [vmem:[%s1641_s1 + $0x98] sm:$0xff]  ;;  %v1288_v21 = vld [vmem:[%s1641_s1 + $0x50] sm:$0xff] }
   0xc   :  { %754 = vmatpush.bf16.msra.mxu2 %v1300_v6  ;;  %v1306_v15 = vld [vmem:[%s1641_s1 + $0xe0] sm:$0xff]  ;;  %v1305_v19 = vld [vmem:[%s1641_s1 + $0xd8] sm:$0xff]  ;;  %v1296_v22 = vld [vmem:[%s1641_s1 + $0x90] sm:$0xff] }
   0xd   :  { %773 = vmatpush.bf16.msra.mxu3 %v1308_v7  ;;  %v1304_v23 = vld [vmem:[%s1641_s1 + $0xd0] sm:$0xff]  ;;  %v1279_v24 = vld [vmem:[%s1641_s1 + $0x8] sm:$0xff]  ;;  %v1278_v28 = vld [vmem:[%s1641_s1] sm:$0xff] }
   0xe   :  { %717 = vmatpush.bf16.msra.mxu0 %v1283_v8  ;;  %v1287_v25 = vld [vmem:[%s1641_s1 + $0x48] sm:$0xff]  ;;  %v1286_v29 = vld [vmem:[%s1641_s1 + $0x40] sm:$0xff]  ;;  %v912_v39 = vld [vmem:[#allocation2 + $0x2c] sm:$0xf0] }
   0xf   :  { %736 = vmatpush.bf16.msra.mxu1 %v1291_v9  ;;  %v1295_v26 = vld [vmem:[%s1641_s1 + $0x88] sm:$0xff]  ;;  %v1294_v30 = vld [vmem:[%s1641_s1 + $0x80] sm:$0xff]  ;;  %v1317_v40 = vld [vmem:[%s1641_s1 + $0x138] sm:$0xff] }
  0x10   :  { %755 = vmatpush.bf16.msra.mxu2 %v1299_v10  ;;  %v1303_v27 = vld [vmem:[%s1641_s1 + $0xc8] sm:$0xff]  ;;  %v1302_v31 = vld [vmem:[%s1641_s1 + $0xc0] sm:$0xff]  ;;  %v1325_v41 = vld [vmem:[%s1641_s1 + $0x178] sm:$0xff] }
  0x11   :  { %774 = vmatpush.bf16.msra.mxu3 %v1307_v11  ;;  %v902_v32 = vld [vmem:[#allocation2] sm:$0xf]  ;;  %v1264_v33 = vld [vmem:[#allocation2 + $0x20] sm:$0xf0]  ;;  %v904_v35 = vld [vmem:[#allocation2 + $0x24] sm:$0xf0] }
  0x12   :  { %718 = vmatpush.bf16.msra.mxu0 %v1282_v12  ;;  %v1260_v34 = vld [vmem:[#allocation2 + $0x4] sm:$0xf]  ;;  %v910_v36 = vld [vmem:[#allocation2 + $0x8] sm:$0xf]  ;;  %v1265_v37 = vld [vmem:[#allocation2 + $0x28] sm:$0xf0]  ;;  %v903_v42 = vor.u32 %v1264_v33, %v902_v32 }
  0x13   :  { %737 = vmatpush.bf16.msra.mxu1 %v1290_v13  ;;  %v1261_v38 = vld [vmem:[#allocation2 + $0xc] sm:$0xf]  ;;  %v907_v43 = vor.u32 %v1260_v34, %v904_v35  ;;  %v911_v44 = vor.u32 %v1265_v37, %v910_v36  ;;  %v1333_v46 = vld [vmem:[%s1641_s1 + $0x1b8] sm:$0xff]  ;;  %v1316_v48 = vld [vmem:[%s1641_s1 + $0x130] sm:$0xff] }
  0x14   :  { %756 = vmatpush.bf16.msra.mxu2 %v1298_v14  ;;  %v915_v45 = vor.u32 %v1261_v38, %v912_v39  ;;  %v1341_v47 = vld [vmem:[%s1641_s1 + $0x1f8] sm:$0xff]  ;;  %v1324_v49 = vld [vmem:[%s1641_s1 + $0x170] sm:$0xff]  ;;  %v1315_v52 = vld [vmem:[%s1641_s1 + $0x128] sm:$0xff] }
  0x15   :  { %775 = vmatpush.bf16.msra.mxu3 %v1306_v15  ;;  %v1332_v50 = vld [vmem:[%s1641_s1 + $0x1b0] sm:$0xff]  ;;  %v1323_v53 = vld [vmem:[%s1641_s1 + $0x168] sm:$0xff]  ;;  %v1314_v56 = vld [vmem:[%s1641_s1 + $0x120] sm:$0xff] }
  0x16   :  { %719 = vmatpush.bf16.msra.mxu0 %v1281_v16  ;;  %v1340_v51 = vld [vmem:[%s1641_s1 + $0x1f0] sm:$0xff]  ;;  %v1331_v54 = vld [vmem:[%s1641_s1 + $0x1a8] sm:$0xff]  ;;  %v1322_v57 = vld [vmem:[%s1641_s1 + $0x160] sm:$0xff] }
  0x17   :  { %738 = vmatpush.bf16.msra.mxu1 %v1289_v17  ;;  %v1339_v55 = vld [vmem:[%s1641_s1 + $0x1e8] sm:$0xff]  ;;  %v1330_v58 = vld [vmem:[%s1641_s1 + $0x1a0] sm:$0xff]  ;;  %v940_v63 = vld [vmem:[#allocation2 + $0x6c] sm:$0xf0] }
  0x18   :  { %757 = vmatpush.bf16.msra.mxu2 %v1297_v18  ;;  %v1338_v59 = vld [vmem:[%s1641_s1 + $0x1e0] sm:$0xff]  ;;  %v938_v60 = vld [vmem:[#allocation2 + $0x48] sm:$0xf]  ;;  %v1273_v61 = vld [vmem:[#allocation2 + $0x68] sm:$0xf0] }
  0x19   :  { %776 = vmatpush.bf16.msra.mxu3 %v1305_v19  ;;  %v1269_v62 = vld [vmem:[#allocation2 + $0x4c] sm:$0xf]  ;;  %v946_v0 = vld [vmem:[#allocation2 + $0x50] sm:$0xf]  ;;  %v1274_v1 = vld [vmem:[#allocation2 + $0x70] sm:$0xf0]  ;;  %v939_v6 = vor.u32 %v1273_v61, %v938_v60 }
  0x1a   :  { %720 = vmatpush.bf16.msra.mxu0 %v1280_v20  ;;  %v1270_v2 = vld [vmem:[#allocation2 + $0x54] sm:$0xf]  ;;  %v948_v3 = vld [vmem:[#allocation2 + $0x74] sm:$0xf0]  ;;  %v943_v7 = vor.u32 %v1269_v62, %v940_v63  ;;  %v947_v8 = vor.u32 %v1274_v1, %v946_v0  ;;  %v1311_v16 = vld [vmem:[%s1641_s1 + $0x108] sm:$0xff] }
  0x1b   :  { %739 = vmatpush.bf16.msra.mxu1 %v1288_v21  ;;  %v1313_v4 = vld [vmem:[%s1641_s1 + $0x118] sm:$0xff]  ;;  %v951_v9 = vor.u32 %v1270_v2, %v948_v3  ;;  %v1312_v12 = vld [vmem:[%s1641_s1 + $0x110] sm:$0xff]  ;;  %v1319_v17 = vld [vmem:[%s1641_s1 + $0x148] sm:$0xff] }
  0x1c   :  { %758 = vmatpush.bf16.msra.mxu2 %v1296_v22  ;;  %v1321_v5 = vld [vmem:[%s1641_s1 + $0x158] sm:$0xff]  ;;  %v1320_v13 = vld [vmem:[%s1641_s1 + $0x150] sm:$0xff]  ;;  %v1327_v18 = vld [vmem:[%s1641_s1 + $0x188] sm:$0xff] }
  0x1d   :  { %777 = vmatpush.bf16.msra.mxu3 %v1304_v23  ;;  %v1329_v10 = vld [vmem:[%s1641_s1 + $0x198] sm:$0xff]  ;;  %v1328_v14 = vld [vmem:[%s1641_s1 + $0x190] sm:$0xff]  ;;  %v1335_v19 = vld [vmem:[%s1641_s1 + $0x1c8] sm:$0xff] }
  0x1e   :  { %721 = vmatpush.bf16.msra.mxu0 %v1279_v24  ;;  %v1337_v11 = vld [vmem:[%s1641_s1 + $0x1d8] sm:$0xff]  ;;  %v1336_v15 = vld [vmem:[%s1641_s1 + $0x1d0] sm:$0xff]  ;;  %v1310_v20 = vld [vmem:[%s1641_s1 + $0x100] sm:$0xff] }
  0x1f   :  { %740 = vmatpush.bf16.msra.mxu1 %v1287_v25  ;;  %v1318_v21 = vld [vmem:[%s1641_s1 + $0x140] sm:$0xff]  ;;  %v918_v24 = vld [vmem:[#allocation2 + $0x10] sm:$0xf]  ;;  %v1266_v25 = vld [vmem:[#allocation2 + $0x30] sm:$0xf0] }
  0x20   :  { %759 = vmatpush.bf16.msra.mxu2 %v1295_v26  ;;  %v1326_v22 = vld [vmem:[%s1641_s1 + $0x180] sm:$0xff]  ;;  %v1349_v26 = vld [vmem:[%s1641_s1 + $0x238] sm:$0xff]  ;;  %v919_v33 = vor.u32 %v1266_v25, %v918_v24  ;;  %v1348_v37 = vld [vmem:[%s1641_s1 + $0x230] sm:$0xff] }
  0x21   :  { %778 = vmatpush.bf16.msra.mxu3 %v1303_v27  ;;  %v1334_v23 = vld [vmem:[%s1641_s1 + $0x1c0] sm:$0xff]  ;;  %v1262_v27 = vld [vmem:[#allocation2 + $0x14] sm:$0xf]  ;;  %v1347_v38 = vld [vmem:[%s1641_s1 + $0x228] sm:$0xff] }
  0x22   :  { %722 = vmatpush.bf16.msra.mxu0 %v1278_v28  ;;  %v920_v28 = vld [vmem:[#allocation2 + $0x34] sm:$0xf0]  ;;  %v928_v32 = vld [vmem:[#allocation2 + $0x3c] sm:$0xf0] }
  0x23   :  { %741 = vmatpush.bf16.msra.mxu1 %v1286_v29  ;;  %v926_v29 = vld [vmem:[#allocation2 + $0x18] sm:$0xf]  ;;  %v923_v34 = vor.u32 %v1262_v27, %v920_v28  ;;  %v1346_v39 = vld [vmem:[%s1641_s1 + $0x220] sm:$0xff] }
  0x24   :  { %760 = vmatpush.bf16.msra.mxu2 %v1294_v30  ;;  %v1267_v30 = vld [vmem:[#allocation2 + $0x38] sm:$0xf0] }
  0x25   :  { %779 = vmatpush.bf16.msra.mxu3 %v1302_v31  ;;  %723 = vmatmul.bf16.vlgmr.msra.gmra.mxu0 %v903_v42  ;;  %v1263_v31 = vld [vmem:[#allocation2 + $0x1c] sm:$0xf]  ;;  %v927_v35 = vor.u32 %v1267_v30, %v926_v29 }
  0x26   :  { %791 = vmatpush.bf16.msrb.mxu0 %v1317_v40  ;;  %742 = vmatmul.bf16.vlgmr.msra.gmra.mxu1 %v907_v43  ;;  %v931_v36 = vor.u32 %v1263_v31, %v928_v32  ;;  %v954_v40 = vld [vmem:[#allocation2 + $0x58] sm:$0xf]  ;;  %v1271_v42 = vld [vmem:[#allocation2 + $0x5c] sm:$0xf]  ;;  %v956_v43 = vld [vmem:[#allocation2 + $0x7c] sm:$0xf0] }
  0x27   :  { %810 = vmatpush.bf16.msrb.mxu1 %v1325_v41  ;;  %761 = vmatmul.bf16.vlgmr.msra.gmra.mxu2 %v911_v44  ;;  %v1275_v41 = vld [vmem:[#allocation2 + $0x78] sm:$0xf0]  ;;  %v962_v44 = vld [vmem:[#allocation2 + $0x60] sm:$0xf] }
  0x28   :  { %780 = vmatmul.bf16.vlgmr.msra.gmra.mxu3 %v915_v45  ;;  %829 = vmatpush.bf16.msrb.mxu2 %v1333_v46  ;;  %v1276_v45 = vld [vmem:[#allocation2 + $0x80] sm:$0xf0] }
  0x29   :  { %848 = vmatpush.bf16.msrb.mxu3 %v1341_v47  ;;  %v1272_v46 = vld [vmem:[#allocation2 + $0x64] sm:$0xf]  ;;  %v964_v47 = vld [vmem:[#allocation2 + $0x84] sm:$0xf0] }
  0x2a   :  { %792 = vmatpush.bf16.msrb.mxu0 %v1316_v48  ;;  %v1345_v48 = vld [vmem:[%s1641_s1 + $0x218] sm:$0xff] }
  0x2b   :  { %811 = vmatpush.bf16.msrb.mxu1 %v1324_v49  ;;  %v955_v49 = vor.u32 %v1275_v41, %v954_v40 }
  0x2c   :  { %830 = vmatpush.bf16.msrb.mxu2 %v1332_v50  ;;  %v959_v50 = vor.u32 %v1271_v42, %v956_v43 }
  0x2d   :  { %849 = vmatpush.bf16.msrb.mxu3 %v1340_v51  ;;  %v963_v51 = vor.u32 %v1276_v45, %v962_v44 }
  0x2e   :  { %793 = vmatpush.bf16.msrb.mxu0 %v1315_v52  ;;  %v967_v52 = vor.u32 %v1272_v46, %v964_v47 }
  0x2f   :  { %812 = vmatpush.bf16.msrb.mxu1 %v1323_v53  ;;  %v1344_v53 = vld [vmem:[%s1641_s1 + $0x210] sm:$0xff] }
  0x30   :  { %831 = vmatpush.bf16.msrb.mxu2 %v1331_v54  ;;  %v1343_v54 = vld [vmem:[%s1641_s1 + $0x208] sm:$0xff] }
  0x31   :  { %850 = vmatpush.bf16.msrb.mxu3 %v1339_v55  ;;  %v1342_v55 = vld [vmem:[%s1641_s1 + $0x200] sm:$0xff] }
  0x32   :  { %794 = vmatpush.bf16.msrb.mxu0 %v1314_v56  ;;  %v934_v56 = vld [vmem:[#allocation2 + $0x20] sm:$0xf] }
  0x33   :  { %813 = vmatpush.bf16.msrb.mxu1 %v1322_v57  ;;  %v1268_v57 = vld [vmem:[#allocation2 + $0x40] sm:$0xf0] }
  0x34   :  { %832 = vmatpush.bf16.msrb.mxu2 %v1330_v58  ;;  %v970_v58 = vld [vmem:[#allocation2 + $0x68] sm:$0xf]  ;;  %v935_v60 = vor.u32 %v1268_v57, %v934_v56 }
  0x35   :  { %851 = vmatpush.bf16.msrb.mxu3 %v1338_v59  ;;  %728 = vmatmul.bf16.gmra.mxu0 %v939_v6  ;;  %v1277_v59 = vld [vmem:[#allocation2 + $0x88] sm:$0xf0] }
  0x36   :  { %795 = vmatpush.bf16.msrb.mxu0 %v1313_v4  ;;  %747 = vmatmul.bf16.gmra.mxu1 %v943_v7  ;;  %v971_v61 = vor.u32 %v1277_v59, %v970_v58 }
  0x37   :  { %814 = vmatpush.bf16.msrb.mxu1 %v1321_v5  ;;  %766 = vmatmul.bf16.gmra.mxu2 %v947_v8 }
  0x38   :  { %785 = vmatmul.bf16.gmra.mxu3 %v951_v9  ;;  %833 = vmatpush.bf16.msrb.mxu2 %v1329_v10 }
  0x39   :  { %852 = vmatpush.bf16.msrb.mxu3 %v1337_v11 }
  0x3a   :  { %796 = vmatpush.bf16.msrb.mxu0 %v1312_v12 }
  0x3b   :  { %815 = vmatpush.bf16.msrb.mxu1 %v1320_v13 }
  0x3c   :  { %834 = vmatpush.bf16.msrb.mxu2 %v1328_v14 }
  0x3d   :  { %853 = vmatpush.bf16.msrb.mxu3 %v1336_v15 }
  0x3e   :  { %797 = vmatpush.bf16.msrb.mxu0 %v1311_v16 }
  0x3f   :  { %816 = vmatpush.bf16.msrb.mxu1 %v1319_v17 }
  0x40   :  { %835 = vmatpush.bf16.msrb.mxu2 %v1327_v18 }
  0x41   :  { %854 = vmatpush.bf16.msrb.mxu3 %v1335_v19 }
  0x42   :  { %798 = vmatpush.bf16.msrb.mxu0 %v1310_v20 }
  0x43   :  { %817 = vmatpush.bf16.msrb.mxu1 %v1318_v21 }
  0x44   :  { %836 = vmatpush.bf16.msrb.mxu2 %v1326_v22 }
  0x45   :  { %855 = vmatpush.bf16.msrb.mxu3 %v1334_v23  ;;  %799 = vmatmul.bf16.vlgmr.msrb.gmra.mxu0 %v919_v33 }
  0x46   :  { %867 = vmatpush.bf16.msra.mxu0 %v1349_v26  ;;  %818 = vmatmul.bf16.vlgmr.msrb.gmra.mxu1 %v923_v34 }
  0x47   :  { %1350 = vmatpush.bf16.msra.mxu1 %v1349_v26  ;;  %837 = vmatmul.bf16.vlgmr.msrb.gmra.mxu2 %v927_v35 }
  0x48   :  { %856 = vmatmul.bf16.vlgmr.msrb.gmra.mxu3 %v931_v36 }
  0x4a   :  { %868 = vmatpush.bf16.msra.mxu0 %v1348_v37 }
  0x4b   :  { %1351 = vmatpush.bf16.msra.mxu1 %v1348_v37 }
  0x4e   :  { %869 = vmatpush.bf16.msra.mxu0 %v1347_v38 }
  0x4f   :  { %1352 = vmatpush.bf16.msra.mxu1 %v1347_v38 }
  0x52   :  { %870 = vmatpush.bf16.msra.mxu0 %v1346_v39 }
  0x53   :  { %1353 = vmatpush.bf16.msra.mxu1 %v1346_v39 }
  0x55   :  { %804 = vmatmul.bf16.gmra.mxu0 %v955_v49 }
  0x56   :  { %871 = vmatpush.bf16.msra.mxu0 %v1345_v48  ;;  %823 = vmatmul.bf16.gmra.mxu1 %v959_v50 }
  0x57   :  { %1354 = vmatpush.bf16.msra.mxu1 %v1345_v48  ;;  %842 = vmatmul.bf16.gmra.mxu2 %v963_v51 }
  0x58   :  { %861 = vmatmul.bf16.gmra.mxu3 %v967_v52 }
  0x5a   :  { %872 = vmatpush.bf16.msra.mxu0 %v1344_v53 }
  0x5b   :  { %1355 = vmatpush.bf16.msra.mxu1 %v1344_v53 }
  0x5e   :  { %873 = vmatpush.bf16.msra.mxu0 %v1343_v54 }
  0x5f   :  { %1356 = vmatpush.bf16.msra.mxu1 %v1343_v54 }
  0x62   :  { %874 = vmatpush.bf16.msra.mxu0 %v1342_v55 }
  0x63   :  { %1357 = vmatpush.bf16.msra.mxu1 %v1342_v55 }
  0x65   :  { %875 = vmatmul.bf16.vlgmr.msra.gmra.mxu0 %v935_v60 }
  0x66   :  { %880 = vmatmul.bf16.vlgmr.msra.gmra.mxu1 %v971_v61 }
  0xa2   :  { %v724_v62 = vpop.f32.mrf.mxu0 }
  0xa3   :  { %v743_v63 = vpop.f32.mrf.mxu1 }
  0xa4   :  { %v744_v20 = vadd.f32 %v743_v63, %v724_v62 }
  0xaa   :  { %v762_v0 = vpop.f32.mrf.mxu2  ;;  %v726_v2 = vpop.f32.mrf.mxu0 }
  0xab   :  { %v781_v1 = vpop.f32.mrf.mxu3  ;;  %v745_v3 = vpop.f32.mrf.mxu1  ;;  %v763_v22 = vadd.f32 %v762_v0, %v744_v20 }
  0xac   :  { %v746_v30 = vadd.f32 %v745_v3, %v726_v2 }
  0xad   :  { %v782_v28 = vadd.f32 %v781_v1, %v763_v22 }
  0xb2   :  { %v764_v4 = vpop.f32.mrf.mxu2  ;;  %v729_v6 = vpop.f32.mrf.mxu0 }
  0xb3   :  { %v783_v5 = vpop.f32.mrf.mxu3  ;;  %v748_v7 = vpop.f32.mrf.mxu1  ;;  %v765_v34 = vadd.f32 %v764_v4, %v746_v30 }
  0xb4   :  { %v749_v21 = vadd.f32 %v748_v7, %v729_v6 }
  0xb5   :  { %v784_v41 = vadd.f32 %v783_v5, %v765_v34 }
  0xba   :  { %v767_v8 = vpop.f32.mrf.mxu2  ;;  %v731_v10 = vpop.f32.mrf.mxu0 }
  0xbb   :  { %v786_v9 = vpop.f32.mrf.mxu3  ;;  %v750_v11 = vpop.f32.mrf.mxu1  ;;  %v768_v23 = vadd.f32 %v767_v8, %v749_v21 }
  0xbc   :  { %v751_v31 = vadd.f32 %v750_v11, %v731_v10 }
  0xbd   :  { %v787_v29 = vadd.f32 %v786_v9, %v768_v23 }
  0xc2   :  { %v769_v12 = vpop.f32.mrf.mxu2  ;;  %v800_v14 = vpop.f32.mrf.mxu0 }
  0xc3   :  { %v788_v13 = vpop.f32.mrf.mxu3  ;;  %v819_v15 = vpop.f32.mrf.mxu1  ;;  %v801_v32 = vadd.f32 %v800_v14, %v782_v28  ;;  %v770_v35 = vadd.f32 %v769_v12, %v751_v31 }
  0xc5   :  { %v820_v39 = vadd.f32 %v819_v15, %v801_v32  ;;  %v789_v42 = vadd.f32 %v788_v13, %v770_v35 }
  0xca   :  { %v838_v16 = vpop.f32.mrf.mxu2  ;;  %v802_v18 = vpop.f32.mrf.mxu0 }
  0xcb   :  { %v857_v17 = vpop.f32.mrf.mxu3  ;;  %v821_v19 = vpop.f32.mrf.mxu1  ;;  %v839_v43 = vadd.f32 %v838_v16, %v820_v39  ;;  %v803_v46 = vadd.f32 %v802_v18, %v784_v41 }
  0xcd   :  { %v858_v48 = vadd.f32 %v857_v17, %v839_v43  ;;  %v822_v53 = vadd.f32 %v821_v19, %v803_v46 }
  0xd2   :  { %v840_v24 = vpop.f32.mrf.mxu2  ;;  %v805_v25 = vpop.f32.mrf.mxu0 }
  0xd3   :  { %v824_v26 = vpop.f32.mrf.mxu1  ;;  %v859_v27 = vpop.f32.mrf.mxu3  ;;  %v806_v33 = vadd.f32 %v805_v25, %v787_v29  ;;  %v841_v57 = vadd.f32 %v840_v24, %v822_v53 }
  0xd5   :  { %v825_v40 = vadd.f32 %v824_v26, %v806_v33  ;;  %v860_v62 = vadd.f32 %v859_v27, %v841_v57 }
  0xda   :  { %v843_v36 = vpop.f32.mrf.mxu2  ;;  %v807_v37 = vpop.f32.mrf.mxu0 }
  0xdb   :  { %v826_v38 = vpop.f32.mrf.mxu1  ;;  %v844_v44 = vadd.f32 %v843_v36, %v825_v40  ;;  %v862_v45 = vpop.f32.mrf.mxu3  ;;  %v808_v47 = vadd.f32 %v807_v37, %v789_v42 }
  0xdd   :  { %v863_v49 = vadd.f32 %v862_v45, %v844_v44  ;;  %v827_v54 = vadd.f32 %v826_v38, %v808_v47 }
  0xe2   :  { %v845_v50 = vpop.f32.mrf.mxu2  ;;  %v876_v51 = vpop.f32.mrf.mxu0 }
  0xe3   :  { %v881_v52 = vpop.f32.mrf.mxu1  ;;  %v877_v55 = vadd.f32 %v876_v51, %v858_v48  ;;  %v846_v58 = vadd.f32 %v845_v50, %v827_v54  ;;  %v864_v61 = vpop.f32.mrf.mxu3 }
  0xe4   :  { %v882_v56 = vadd.f32 %v881_v52, %v863_v49 }
  0xe5   :  { %v886_v59 = vpack.c.bf16 %v877_v55, %v877_v55  ;;  %v865_v63 = vadd.f32 %v864_v61, %v846_v58 }
  0xe6   :  { %v888_v60 = vpack.c.bf16 %v882_v56, %v882_v56 }
  0xe7   :  { %891 = vst.msk [vmem:[%s1642_s2] sm:$0xf] %vm890_vm0, %v886_v59 }
  0xe8   :  { %893 = vst.msk [vmem:[%s1642_s2 + $0x8] sm:$0xf] %vm890_vm0, %v888_v60 }
  0xea   :  { %v878_v0 = vpop.f32.mrf.mxu0 }
  0xeb   :  { %v883_v1 = vpop.f32.mrf.mxu1  ;;  %v879_v2 = vadd.f32 %v878_v0, %v860_v62 }
  0xec   :  { %v884_v3 = vadd.f32 %v883_v1, %v865_v63 }
  0xed   :  { %v887_v4 = vpack.c.bf16 %v879_v2, %v879_v2 }
  0xee   :  { %v889_v5 = vpack.c.bf16 %v884_v3, %v884_v3 }
  0xef   :  { %892 = vst.msk [vmem:[%s1642_s2 + $0x4] sm:$0xf] %vm890_vm0, %v887_v4 }
  0xf0   :  { %894 = vst.msk [vmem:[%s1642_s2 + $0xc] sm:$0xf] %vm890_vm0, %v889_v5 }
  0xf1   :  { %899 = vsyncpa [#allocation3], 1 }

// kernel: _forward_impl.319
= control target key start
LH: loop header
LB: loop body
LE: loop exit
PB: predicated region body
PF: predicated region fallthrough
CT: control target
= control target key end

     0   :  { %s1328_s9 = smov 0   ;;  %s1330_s10 = smov 0   ;;  %s1618_s0 = inlined_call_operand.vmem [shape: bf16[32,512], index: 0, kind: input, shape index: {}]   ;;  %s1619_s1 = inlined_call_operand.vmem [shape: bf16[512,256], index: 1, kind: input, shape index: {}]   ;;  %s1620_s2 = inlined_call_operand.vmem [shape: bf16[32,256], index: 2, kind: output, shape index: {}]  }
   0x1   :  { %s1332_s11 = smov 0   ;;  %s1334_s12 = smov 0  }
   0x2   :  { %s1336_s13 = smov 0  }
   0x3 LB: > { %s21_s14 = sadd.s32 1, %s1307_s12  ;;  %s1008_s15 = sadd.s32 4294967295, %s1311_s13   ;;  %s1311_s13 = sphi %s1336_s13, %s12_s13   ;;  %s1307_s12 = sphi %s1334_s12, %s1625_s12   ;;  %s1303_s11 = sphi %s1332_s11, %s1624_s11   ;;  %s1299_s10 = sphi %s1330_s10, %s1623_s10   ;;  %s1295_s9 = sphi %s1328_s9, %s1622_s9  }
   0x4   : > { %p22_p0 = scmp.ge.s32.totalorder %s21_s14, 2  ;;  %p64_p1 = scmp.ne.s32.totalorder %s1299_s10, %s1295_s9 }
   0x5   : > { %p65_p2 = scmp.eq.s32.totalorder %s1311_s13, 0  ;;  %p96_p4 = scmp.eq.s32.totalorder %s1008_s15, 1 }
   0x6   : > { %s1627_s14 = smov (%p22_p0, %s21_s14), 0  ;;  %s57_s17 = sadd.s32 1, %s1299_s10 }
   0x7   : > { %p66_p3 = por %p65_p2, %p64_p1  ;;  %s54_s16 = ssub.s32 %s1307_s12, %s1627_s14 }
   0x8   : > { %p55_p5 = scmp.eq.s32.totalorder %s54_s16, 0  ;;  %p1363_p6 = por %p96_p4, %p64_p1 }
   0x9   : > { %p1012_p7 = scmp.ge.s32.totalorder %s1311_s13, 2 }
   0xa   : > { %s1368_s19 = scalar_select %p55_p5, %s1299_s10, %s57_s17  }
   0xb   : > { %128 = sbr.rel (%p1012_p7) target bundleno = 84 (0x54), region = 20 }
  0x10   : > { %131 = sbr.rel (!%p66_p3) target bundleno = 84 (0x54), region = 24  ;;  %s133_s20 = sand.u32 (%p66_p3), 1, %s1299_s10  }
  0x11   : > { %s1014_s21 = sshll.u32 (%p66_p3), %s1307_s12, 2  ;;  %s1013_s22 = sshll.u32 (%p66_p3), %s133_s20, 8 }
  0x12   : > { %s1376_s25 = scalar_lea.vmem (%p66_p3), %s1619_s1, %s1014_s21  ;;  %s1380_s26 = scalar_lea.vmem (%p66_p3), [#allocation2], %s1013_s22 }
  0x13   : > { %v154_v0 = vld [vmem:[%s1376_s25] sm:$0xf] (%p66_p3)  ;;  %v156_v1 = vld [vmem:[%s1376_s25 + $0x8] sm:$0xf] (%p66_p3)  ;;  %v158_v2 = vld [vmem:[%s1376_s25 + $0x10] sm:$0xf] (%p66_p3) }
  0x14   : > { %155 = vst [vmem:[%s1380_s26] sm:$0xf] (%p66_p3), %v154_v0  ;;  %v160_v3 = vld [vmem:[%s1376_s25 + $0x18] sm:$0xf] (%p66_p3)  ;;  %v162_v4 = vld [vmem:[%s1376_s25 + $0x20] sm:$0xf] (%p66_p3) }
  0x15   : > { %157 = vst [vmem:[%s1380_s26 + $0x4] sm:$0xf] %v156_v1  ;;  %v164_v5 = vld [vmem:[%s1376_s25 + $0x28] sm:$0xf]  ;;  %v166_v6 = vld [vmem:[%s1376_s25 + $0x30] sm:$0xf] }
  0x16   : > { %159 = vst [vmem:[%s1380_s26 + $0x8] sm:$0xf] %v158_v2  ;;  %v168_v7 = vld [vmem:[%s1376_s25 + $0x38] sm:$0xf]  ;;  %v170_v8 = vld [vmem:[%s1376_s25 + $0x40] sm:$0xf] }
  0x17   : > { %161 = vst [vmem:[%s1380_s26 + $0xc] sm:$0xf] %v160_v3  ;;  %v172_v9 = vld [vmem:[%s1376_s25 + $0x48] sm:$0xf]  ;;  %v174_v10 = vld [vmem:[%s1376_s25 + $0x50] sm:$0xf] }
  0x18   : > { %163 = vst [vmem:[%s1380_s26 + $0x10] sm:$0xf] %v162_v4  ;;  %v176_v11 = vld [vmem:[%s1376_s25 + $0x58] sm:$0xf]  ;;  %v178_v12 = vld [vmem:[%s1376_s25 + $0x60] sm:$0xf] }
  0x19   : > { %165 = vst [vmem:[%s1380_s26 + $0x14] sm:$0xf] %v164_v5  ;;  %v180_v13 = vld [vmem:[%s1376_s25 + $0x68] sm:$0xf]  ;;  %v182_v14 = vld [vmem:[%s1376_s25 + $0x70] sm:$0xf] }
  0x1a   : > { %167 = vst [vmem:[%s1380_s26 + $0x18] sm:$0xf] %v166_v6  ;;  %v184_v15 = vld [vmem:[%s1376_s25 + $0x78] sm:$0xf]  ;;  %v186_v16 = vld [vmem:[%s1376_s25 + $0x80] sm:$0xf] }
  0x1b   : > { %169 = vst [vmem:[%s1380_s26 + $0x1c] sm:$0xf] %v168_v7  ;;  %v188_v17 = vld [vmem:[%s1376_s25 + $0x88] sm:$0xf]  ;;  %v190_v18 = vld [vmem:[%s1376_s25 + $0x90] sm:$0xf] }
  0x1c   : > { %171 = vst [vmem:[%s1380_s26 + $0x20] sm:$0xf] %v170_v8  ;;  %v192_v19 = vld [vmem:[%s1376_s25 + $0x98] sm:$0xf]  ;;  %v194_v20 = vld [vmem:[%s1376_s25 + $0xa0] sm:$0xf] }
  0x1d   : > { %173 = vst [vmem:[%s1380_s26 + $0x24] sm:$0xf] %v172_v9  ;;  %v196_v21 = vld [vmem:[%s1376_s25 + $0xa8] sm:$0xf]  ;;  %v198_v22 = vld [vmem:[%s1376_s25 + $0xb0] sm:$0xf] }
  0x1e   : > { %175 = vst [vmem:[%s1380_s26 + $0x28] sm:$0xf] %v174_v10  ;;  %v200_v23 = vld [vmem:[%s1376_s25 + $0xb8] sm:$0xf]  ;;  %v202_v24 = vld [vmem:[%s1376_s25 + $0xc0] sm:$0xf] }
  0x1f   : > { %177 = vst [vmem:[%s1380_s26 + $0x2c] sm:$0xf] %v176_v11  ;;  %v204_v25 = vld [vmem:[%s1376_s25 + $0xc8] sm:$0xf]  ;;  %v206_v26 = vld [vmem:[%s1376_s25 + $0xd0] sm:$0xf] }
  0x20   : > { %179 = vst [vmem:[%s1380_s26 + $0x30] sm:$0xf] %v178_v12  ;;  %v208_v27 = vld [vmem:[%s1376_s25 + $0xd8] sm:$0xf]  ;;  %v210_v28 = vld [vmem:[%s1376_s25 + $0xe0] sm:$0xf] }
  0x21   : > { %181 = vst [vmem:[%s1380_s26 + $0x34] sm:$0xf] %v180_v13  ;;  %v212_v29 = vld [vmem:[%s1376_s25 + $0xe8] sm:$0xf]  ;;  %v214_v30 = vld [vmem:[%s1376_s25 + $0xf0] sm:$0xf] }
  0x22   : > { %183 = vst [vmem:[%s1380_s26 + $0x38] sm:$0xf] %v182_v14  ;;  %v216_v31 = vld [vmem:[%s1376_s25 + $0xf8] sm:$0xf]  ;;  %v218_v32 = vld [vmem:[%s1376_s25 + $0x100] sm:$0xf] }
  0x23   : > { %185 = vst [vmem:[%s1380_s26 + $0x3c] sm:$0xf] %v184_v15  ;;  %v220_v33 = vld [vmem:[%s1376_s25 + $0x108] sm:$0xf]  ;;  %v222_v34 = vld [vmem:[%s1376_s25 + $0x110] sm:$0xf] }
  0x24   : > { %187 = vst [vmem:[%s1380_s26 + $0x40] sm:$0xf] %v186_v16  ;;  %v224_v35 = vld [vmem:[%s1376_s25 + $0x118] sm:$0xf]  ;;  %v226_v36 = vld [vmem:[%s1376_s25 + $0x120] sm:$0xf] }
  0x25   : > { %189 = vst [vmem:[%s1380_s26 + $0x44] sm:$0xf] %v188_v17  ;;  %v228_v37 = vld [vmem:[%s1376_s25 + $0x128] sm:$0xf]  ;;  %v230_v38 = vld [vmem:[%s1376_s25 + $0x130] sm:$0xf] }
  0x26   : > { %191 = vst [vmem:[%s1380_s26 + $0x48] sm:$0xf] %v190_v18  ;;  %v232_v39 = vld [vmem:[%s1376_s25 + $0x138] sm:$0xf]  ;;  %v234_v40 = vld [vmem:[%s1376_s25 + $0x140] sm:$0xf] }
  0x27   : > { %193 = vst [vmem:[%s1380_s26 + $0x4c] sm:$0xf] %v192_v19  ;;  %v236_v41 = vld [vmem:[%s1376_s25 + $0x148] sm:$0xf]  ;;  %v238_v42 = vld [vmem:[%s1376_s25 + $0x150] sm:$0xf] }
  0x28   : > { %195 = vst [vmem:[%s1380_s26 + $0x50] sm:$0xf] %v194_v20  ;;  %v240_v43 = vld [vmem:[%s1376_s25 + $0x158] sm:$0xf]  ;;  %v242_v44 = vld [vmem:[%s1376_s25 + $0x160] sm:$0xf] }
  0x29   : > { %197 = vst [vmem:[%s1380_s26 + $0x54] sm:$0xf] %v196_v21  ;;  %v244_v45 = vld [vmem:[%s1376_s25 + $0x168] sm:$0xf]  ;;  %v246_v46 = vld [vmem:[%s1376_s25 + $0x170] sm:$0xf] }
  0x2a   : > { %199 = vst [vmem:[%s1380_s26 + $0x58] sm:$0xf] %v198_v22  ;;  %v248_v47 = vld [vmem:[%s1376_s25 + $0x178] sm:$0xf]  ;;  %v250_v48 = vld [vmem:[%s1376_s25 + $0x180] sm:$0xf] }
  0x2b   : > { %201 = vst [vmem:[%s1380_s26 + $0x5c] sm:$0xf] %v200_v23  ;;  %v252_v49 = vld [vmem:[%s1376_s25 + $0x188] sm:$0xf]  ;;  %v254_v50 = vld [vmem:[%s1376_s25 + $0x190] sm:$0xf] }
  0x2c   : > { %203 = vst [vmem:[%s1380_s26 + $0x60] sm:$0xf] %v202_v24  ;;  %v256_v51 = vld [vmem:[%s1376_s25 + $0x198] sm:$0xf]  ;;  %v258_v52 = vld [vmem:[%s1376_s25 + $0x1a0] sm:$0xf] }
  0x2d   : > { %205 = vst [vmem:[%s1380_s26 + $0x64] sm:$0xf] %v204_v25  ;;  %v260_v53 = vld [vmem:[%s1376_s25 + $0x1a8] sm:$0xf]  ;;  %v262_v54 = vld [vmem:[%s1376_s25 + $0x1b0] sm:$0xf] }
  0x2e   : > { %207 = vst [vmem:[%s1380_s26 + $0x68] sm:$0xf] %v206_v26  ;;  %v264_v55 = vld [vmem:[%s1376_s25 + $0x1b8] sm:$0xf]  ;;  %v266_v56 = vld [vmem:[%s1376_s25 + $0x1c0] sm:$0xf] }
  0x2f   : > { %209 = vst [vmem:[%s1380_s26 + $0x6c] sm:$0xf] %v208_v27  ;;  %v268_v57 = vld [vmem:[%s1376_s25 + $0x1c8] sm:$0xf]  ;;  %v270_v58 = vld [vmem:[%s1376_s25 + $0x1d0] sm:$0xf] }
  0x30   : > { %211 = vst [vmem:[%s1380_s26 + $0x70] sm:$0xf] %v210_v28  ;;  %v272_v59 = vld [vmem:[%s1376_s25 + $0x1d8] sm:$0xf]  ;;  %v274_v60 = vld [vmem:[%s1376_s25 + $0x1e0] sm:$0xf] }
  0x31   : > { %213 = vst [vmem:[%s1380_s26 + $0x74] sm:$0xf] %v212_v29  ;;  %v276_v61 = vld [vmem:[%s1376_s25 + $0x1e8] sm:$0xf]  ;;  %v278_v62 = vld [vmem:[%s1376_s25 + $0x1f0] sm:$0xf] }
  0x32   : > { %215 = vst [vmem:[%s1380_s26 + $0x78] sm:$0xf] %v214_v30  ;;  %v280_v63 = vld [vmem:[%s1376_s25 + $0x1f8] sm:$0xf] }
  0x33   : > { %217 = vst [vmem:[%s1380_s26 + $0x7c] sm:$0xf] %v216_v31 }
  0x34   : > { %219 = vst [vmem:[%s1380_s26 + $0x80] sm:$0xf] %v218_v32 }
  0x35   : > { %221 = vst [vmem:[%s1380_s26 + $0x84] sm:$0xf] %v220_v33 }
  0x36   : > { %223 = vst [vmem:[%s1380_s26 + $0x88] sm:$0xf] %v222_v34 }
  0x37   : > { %225 = vst [vmem:[%s1380_s26 + $0x8c] sm:$0xf] %v224_v35 }
  0x38   : > { %227 = vst [vmem:[%s1380_s26 + $0x90] sm:$0xf] %v226_v36 }
  0x39   : > { %229 = vst [vmem:[%s1380_s26 + $0x94] sm:$0xf] %v228_v37 }
  0x3a   : > { %231 = vst [vmem:[%s1380_s26 + $0x98] sm:$0xf] %v230_v38 }
  0x3b   : > { %233 = vst [vmem:[%s1380_s26 + $0x9c] sm:$0xf] %v232_v39 }
  0x3c   : > { %235 = vst [vmem:[%s1380_s26 + $0xa0] sm:$0xf] %v234_v40 }
  0x3d   : > { %237 = vst [vmem:[%s1380_s26 + $0xa4] sm:$0xf] %v236_v41 }
  0x3e   : > { %239 = vst [vmem:[%s1380_s26 + $0xa8] sm:$0xf] %v238_v42 }
  0x3f   : > { %241 = vst [vmem:[%s1380_s26 + $0xac] sm:$0xf] %v240_v43 }
  0x40   : > { %243 = vst [vmem:[%s1380_s26 + $0xb0] sm:$0xf] %v242_v44 }
  0x41   : > { %245 = vst [vmem:[%s1380_s26 + $0xb4] sm:$0xf] %v244_v45 }
  0x42   : > { %247 = vst [vmem:[%s1380_s26 + $0xb8] sm:$0xf] %v246_v46 }
  0x43   : > { %249 = vst [vmem:[%s1380_s26 + $0xbc] sm:$0xf] %v248_v47 }
  0x44   : > { %251 = vst [vmem:[%s1380_s26 + $0xc0] sm:$0xf] %v250_v48 }
  0x45   : > { %253 = vst [vmem:[%s1380_s26 + $0xc4] sm:$0xf] %v252_v49 }
  0x46   : > { %255 = vst [vmem:[%s1380_s26 + $0xc8] sm:$0xf] %v254_v50 }
  0x47   : > { %257 = vst [vmem:[%s1380_s26 + $0xcc] sm:$0xf] %v256_v51 }
  0x48   : > { %259 = vst [vmem:[%s1380_s26 + $0xd0] sm:$0xf] %v258_v52 }
  0x49   : > { %261 = vst [vmem:[%s1380_s26 + $0xd4] sm:$0xf] %v260_v53 }
  0x4a   : > { %263 = vst [vmem:[%s1380_s26 + $0xd8] sm:$0xf] %v262_v54 }
  0x4b   : > { %265 = vst [vmem:[%s1380_s26 + $0xdc] sm:$0xf] %v264_v55 }
  0x4c   : > { %267 = vst [vmem:[%s1380_s26 + $0xe0] sm:$0xf] %v266_v56 }
  0x4d   : > { %269 = vst [vmem:[%s1380_s26 + $0xe4] sm:$0xf] %v268_v57 }
  0x4e   : > { %271 = vst [vmem:[%s1380_s26 + $0xe8] sm:$0xf] %v270_v58 }
  0x4f   : > { %273 = vst [vmem:[%s1380_s26 + $0xec] sm:$0xf] %v272_v59 }
  0x50   : > { %275 = vst [vmem:[%s1380_s26 + $0xf0] sm:$0xf] %v274_v60 }
  0x51   : > { %277 = vst [vmem:[%s1380_s26 + $0xf4] sm:$0xf] %v276_v61 }
  0x52   : > { %279 = vst [vmem:[%s1380_s26 + $0xf8] sm:$0xf] %v278_v62 }
  0x53   : > { %281 = vst [vmem:[%s1380_s26 + $0xfc] sm:$0xf] %v280_v63 }
  0x54 PF: > { %p1015_p8 = scmp.ge.s32.totalorder %s1311_s13, 1  ;;  %p432_p9 = scmp.lt.s32.totalorder %s1311_s13, 3 }
  0x56   : > { %p433_p10 = pnand %p1015_p8, %p432_p9 }
  0x57   : > { %s439_s27 = sand.u32 (!%p433_p10), 1, %s1295_s9  }
  0x58   : > { %436 = sbr.rel (%p433_p10) target bundleno = 299 (0x12b), region = 65  ;;  %s1016_s28 = sshll.u32 (!%p433_p10), %s439_s27, 8 }
  0x59   : > { %s1513_s29 = scalar_lea.vmem (!%p433_p10), [#allocation2], %s1016_s28  ;;  %s1017_s23 = sshll.u32 (!%p433_p10), %s439_s27, 4 }
  0x5a   : > { %s464_s24 = scalar_lea.vmem (!%p433_p10), [#allocation3], %s1017_s23 }
  0x5d   : > { %v1197_v0 = vld [vmem:[%s1513_s29 + $0x38] sm:$0xff]  ;;  %v1196_v4 = vld [vmem:[%s1513_s29 + $0x30] sm:$0xff]  ;;  %v1195_v8 = vld [vmem:[%s1513_s29 + $0x28] sm:$0xff]  ;;  %s1179_s9 = sshll.u32 (%p1363_p6), %s1303_s11, 2 }
  0x5e   : > { %v1205_v1 = vld [vmem:[%s1513_s29 + $0x78] sm:$0xff]  ;;  %777 = vmatpush.bf16.msra.mxu0 %v1197_v0  ;;  %v1204_v5 = vld [vmem:[%s1513_s29 + $0x70] sm:$0xff]  ;;  %v1203_v9 = vld [vmem:[%s1513_s29 + $0x68] sm:$0xff]  ;;  %s872_s26 = scalar_lea.vmem (%p1363_p6), %s1620_s2, %s1179_s9 }
  0x5f   : > { %v1213_v2 = vld [vmem:[%s1513_s29 + $0xb8] sm:$0xff]  ;;  %796 = vmatpush.bf16.msra.mxu1 %v1205_v1  ;;  %v1212_v6 = vld [vmem:[%s1513_s29 + $0xb0] sm:$0xff]  ;;  %v1211_v10 = vld [vmem:[%s1513_s29 + $0xa8] sm:$0xff] }
  0x60   : > { %v1221_v3 = vld [vmem:[%s1513_s29 + $0xf8] sm:$0xff]  ;;  %815 = vmatpush.bf16.msra.mxu2 %v1213_v2  ;;  %v1220_v7 = vld [vmem:[%s1513_s29 + $0xf0] sm:$0xff]  ;;  %v1219_v11 = vld [vmem:[%s1513_s29 + $0xe8] sm:$0xff] }
  0x61   : > { %834 = vmatpush.bf16.msra.mxu3 %v1221_v3  ;;  %v1194_v12 = vld [vmem:[%s1513_s29 + $0x20] sm:$0xff]  ;;  %v1193_v16 = vld [vmem:[%s1513_s29 + $0x18] sm:$0xff]  ;;  %v1192_v20 = vld [vmem:[%s1513_s29 + $0x10] sm:$0xff] }
  0x62   : > { %778 = vmatpush.bf16.msra.mxu0 %v1196_v4  ;;  %v1202_v13 = vld [vmem:[%s1513_s29 + $0x60] sm:$0xff]  ;;  %v1201_v17 = vld [vmem:[%s1513_s29 + $0x58] sm:$0xff]  ;;  %v1200_v21 = vld [vmem:[%s1513_s29 + $0x50] sm:$0xff] }
  0x63   : > { %797 = vmatpush.bf16.msra.mxu1 %v1204_v5  ;;  %v1210_v14 = vld [vmem:[%s1513_s29 + $0xa0] sm:$0xff]  ;;  %v1209_v18 = vld [vmem:[%s1513_s29 + $0x98] sm:$0xff]  ;;  %v1208_v22 = vld [vmem:[%s1513_s29 + $0x90] sm:$0xff] }
  0x64   : > { %816 = vmatpush.bf16.msra.mxu2 %v1212_v6  ;;  %v1218_v15 = vld [vmem:[%s1513_s29 + $0xe0] sm:$0xff]  ;;  %v1217_v19 = vld [vmem:[%s1513_s29 + $0xd8] sm:$0xff]  ;;  %v1216_v23 = vld [vmem:[%s1513_s29 + $0xd0] sm:$0xff] }
  0x65   : > { %835 = vmatpush.bf16.msra.mxu3 %v1220_v7  ;;  %v1191_v24 = vld [vmem:[%s1513_s29 + $0x8] sm:$0xff]  ;;  %v1190_v28 = vld [vmem:[%s1513_s29] sm:$0xff]  ;;  %v1184_v30 = vld [vmem:[%s1618_s0 + $0xc] sm:$0xf0] }
  0x66   : > { %779 = vmatpush.bf16.msra.mxu0 %v1195_v8  ;;  %v1199_v25 = vld [vmem:[%s1513_s29 + $0x48] sm:$0xff]  ;;  %v1020_v29 = vld [vmem:[%s1618_s0] sm:$0xf]  ;;  %v1182_v34 = vld [vmem:[%s1618_s0 + $0x4] sm:$0xf] }
  0x67   : > { %798 = vmatpush.bf16.msra.mxu1 %v1203_v9  ;;  %v1207_v26 = vld [vmem:[%s1513_s29 + $0x88] sm:$0xff]  ;;  %v1198_v31 = vld [vmem:[%s1513_s29 + $0x40] sm:$0xff]  ;;  %v1022_v35 = vld [vmem:[%s1618_s0 + $0x10] sm:$0xf0]  ;;  %v1021_v40 = vor.u32 %v1184_v30, %v1020_v29 }
  0x68   : > { %817 = vmatpush.bf16.msra.mxu2 %v1211_v10  ;;  %v1215_v27 = vld [vmem:[%s1513_s29 + $0xc8] sm:$0xff]  ;;  %v1206_v32 = vld [vmem:[%s1513_s29 + $0x80] sm:$0xff]  ;;  %v1185_v37 = vld [vmem:[%s1618_s0 + $0x14] sm:$0xf0]  ;;  %v1025_v41 = vor.u32 %v1182_v34, %v1022_v35 }
  0x69   : > { %836 = vmatpush.bf16.msra.mxu3 %v1219_v11  ;;  %v1214_v33 = vld [vmem:[%s1513_s29 + $0xc0] sm:$0xff]  ;;  %v1028_v36 = vld [vmem:[%s1618_s0 + $0x8] sm:$0xf]  ;;  %v1183_v38 = vld [vmem:[%s1618_s0 + $0xc] sm:$0xf] }
  0x6a   : > { %780 = vmatpush.bf16.msra.mxu0 %v1194_v12  ;;  %v1030_v39 = vld [vmem:[%s1618_s0 + $0x18] sm:$0xf0]  ;;  %v1029_v42 = vor.u32 %v1185_v37, %v1028_v36  ;;  %v1036_v44 = vld [vmem:[%s1618_s0 + $0x20] sm:$0xf]  ;;  %v1188_v45 = vld [vmem:[%s1618_s0 + $0x2c] sm:$0xf0] }
  0x6b   : > { %799 = vmatpush.bf16.msra.mxu1 %v1202_v13  ;;  %v1033_v43 = vor.u32 %v1183_v38, %v1030_v39  ;;  %v1186_v46 = vld [vmem:[%s1618_s0 + $0x24] sm:$0xf]  ;;  %v1038_v47 = vld [vmem:[%s1618_s0 + $0x30] sm:$0xf0]  ;;  %v1044_v48 = vld [vmem:[%s1618_s0 + $0x28] sm:$0xf]  ;;  %v1037_v52 = vor.u32 %v1188_v45, %v1036_v44 }
  0x6c   : > { %818 = vmatpush.bf16.msra.mxu2 %v1210_v14  ;;  %v1189_v49 = vld [vmem:[%s1618_s0 + $0x34] sm:$0xf0]  ;;  %v1187_v50 = vld [vmem:[%s1618_s0 + $0x2c] sm:$0xf]  ;;  %v1046_v51 = vld [vmem:[%s1618_s0 + $0x38] sm:$0xf0]  ;;  %v1041_v53 = vor.u32 %v1186_v46, %v1038_v47 }
  0x6d   : > { %837 = vmatpush.bf16.msra.mxu3 %v1218_v15  ;;  %v1045_v54 = vor.u32 %v1189_v49, %v1044_v48  ;;  %v1049_v55 = vor.u32 %v1187_v50, %v1046_v51 }
  0x6e   : > { %781 = vmatpush.bf16.msra.mxu0 %v1193_v16 }
  0x6f   : > { %800 = vmatpush.bf16.msra.mxu1 %v1201_v17 }
  0x70   : > { %819 = vmatpush.bf16.msra.mxu2 %v1209_v18 }
  0x71   : > { %838 = vmatpush.bf16.msra.mxu3 %v1217_v19 }
  0x72   : > { %782 = vmatpush.bf16.msra.mxu0 %v1192_v20 }
  0x73   : > { %801 = vmatpush.bf16.msra.mxu1 %v1200_v21 }
  0x74   : > { %820 = vmatpush.bf16.msra.mxu2 %v1208_v22 }
  0x75   : > { %839 = vmatpush.bf16.msra.mxu3 %v1216_v23 }
  0x76   : > { %783 = vmatpush.bf16.msra.mxu0 %v1191_v24 }
  0x77   : > { %802 = vmatpush.bf16.msra.mxu1 %v1199_v25 }
  0x78   : > { %821 = vmatpush.bf16.msra.mxu2 %v1207_v26 }
  0x79   : > { %840 = vmatpush.bf16.msra.mxu3 %v1215_v27 }
  0x7a   : > { %784 = vmatpush.bf16.msra.mxu0 %v1190_v28 }
  0x7b   : > { %803 = vmatpush.bf16.msra.mxu1 %v1198_v31 }
  0x7c   : > { %822 = vmatpush.bf16.msra.mxu2 %v1206_v32 }
  0x7d   : > { %841 = vmatpush.bf16.msra.mxu3 %v1214_v33  ;;  %785 = vmatmul.bf16.vlgmr.msra.gmra.mxu0 %v1021_v40 }
  0x7e   : > { %804 = vmatmul.bf16.vlgmr.msra.gmra.mxu1 %v1025_v41 }
  0x7f   : > { %823 = vmatmul.bf16.vlgmr.msra.gmra.mxu2 %v1029_v42 }
  0x80   : > { %842 = vmatmul.bf16.vlgmr.msra.gmra.mxu3 %v1033_v43 }
  0x8d   : > { %790 = vmatmul.bf16.gmra.mxu0 %v1037_v52 }
  0x8e   : > { %809 = vmatmul.bf16.gmra.mxu1 %v1041_v53 }
  0x8f   : > { %828 = vmatmul.bf16.gmra.mxu2 %v1045_v54 }
  0x90   : > { %847 = vmatmul.bf16.gmra.mxu3 %v1049_v55 }
  0xfa   : > { %v786_v56 = vpop.f32.mrf.mxu0 }
  0xfb   : > { %v805_v57 = vpop.f32.mrf.mxu1 }
  0xfc   : > { %v806_v62 = vadd.f32 %v805_v57, %v786_v56 }
 0x102   : > { %v824_v58 = vpop.f32.mrf.mxu2  ;;  %v788_v60 = vpop.f32.mrf.mxu0 }
 0x103   : > { %v843_v59 = vpop.f32.mrf.mxu3  ;;  %v807_v61 = vpop.f32.mrf.mxu1  ;;  %v825_v63 = vadd.f32 %v824_v58, %v806_v62 }
 0x104   : > { %v808_v0 = vadd.f32 %v807_v61, %v788_v60 }
 0x105   : > { %v844_v6 = vadd.f32 %v843_v59, %v825_v63 }
 0x10a   : > { %v826_v1 = vpop.f32.mrf.mxu2  ;;  %v791_v4 = vpop.f32.mrf.mxu0 }
 0x10b   : > { %v845_v2 = vpop.f32.mrf.mxu3  ;;  %v827_v3 = vadd.f32 %v826_v1, %v808_v0  ;;  %v810_v5 = vpop.f32.mrf.mxu1 }
 0x10c   : > { %v811_v11 = vadd.f32 %v810_v5, %v791_v4 }
 0x10d   : > { %v846_v7 = vadd.f32 %v845_v2, %v827_v3 }
 0x10f   : > { %v1225_v8 = vpack.c.bf16 %v846_v7, %v844_v6 }
 0x111   : > { %1226 = vst [vmem:[%s464_s24] sm:$0xff] %v1225_v8  }
 0x112   : > { %v829_v9 = vpop.f32.mrf.mxu2  ;;  %v793_v12 = vpop.f32.mrf.mxu0 }
 0x113   : > { %v848_v10 = vpop.f32.mrf.mxu3  ;;  %v812_v13 = vpop.f32.mrf.mxu1  ;;  %v830_v14 = vadd.f32 %v829_v9, %v811_v11 }
 0x114   : > { %v813_v15 = vadd.f32 %v812_v13, %v793_v12 }
 0x115   : > { %v849_v19 = vadd.f32 %v848_v10, %v830_v14 }
 0x118   : > { %v889_v22 = vld [vmem:[%s464_s24] sm:$0xf] (%p1363_p6)  ;;  %v891_v23 = vld [vmem:[%s464_s24 + $0x4] sm:$0xf] (%p1363_p6) }
 0x119   : > { %890 = vst [vmem:[%s872_s26] sm:$0xf] (%p1363_p6), %v889_v22 }
 0x11a   : > { %v831_v16 = vpop.f32.mrf.mxu2  ;;  %892 = vst [vmem:[%s872_s26 + $0x8] sm:$0xf] (%p1363_p6), %v891_v23 }
 0x11b   : > { %v832_v17 = vadd.f32 %v831_v16, %v813_v15  ;;  %v850_v18 = vpop.f32.mrf.mxu3 }
 0x11d   : > { %v851_v20 = vadd.f32 %v850_v18, %v832_v17  ;;  %867 = sbr.rel (!%p1363_p6) target bundleno = 299 (0x12b), region = 73 }
 0x11f   : > { %v1230_v21 = vpack.c.bf16 %v851_v20, %v849_v19 }
 0x121   : > { %1232 = vst [vmem:[%s464_s24 + $0x8] sm:$0xff] %v1230_v21  }
 0x128   : > { %v893_v24 = vld [vmem:[%s464_s24 + $0x8] sm:$0xf]  ;;  %v895_v25 = vld [vmem:[%s464_s24 + $0xc] sm:$0xf] }
 0x129   : > { %894 = vst [vmem:[%s872_s26 + $0x10] sm:$0xf] %v893_v24 }
 0x12a   : > { %896 = vst [vmem:[%s872_s26 + $0x18] sm:$0xf] %v895_v25 }
 0x12b PF: > { %s12_s13 = sadd.s32 1, %s1311_s13   ;;  %s1622_s9 = smov %s1299_s10 }
 0x12c   : > { %p9_p11 = scmp.ge.s32.totalorder %s12_s13, 4   ;;  %s1623_s10 = smov %s1368_s19 }
 0x12d   : > { %s1624_s11 = smov %s1307_s12  ;;  %s1625_s12 = smov %s1627_s14 }
 0x12e   :  { %11 = sbr.rel (!%p9_p11) target bundleno = 3 (0x3), region = 148 }

// kernel: _forward_impl.320
= control target key start
LH: loop header
LB: loop body
LE: loop exit
PB: predicated region body
PF: predicated region fallthrough
CT: control target
= control target key end

     0   :  { %s497_s12 = smov 0   ;;  %s567_s0 = inlined_call_operand.vmem [shape: bf16[8,1024], index: 0, kind: input, shape index: {}]   ;;  %s568_s1 = inlined_call_operand.vmem [shape: f32[1,1024], index: 1, kind: input, shape index: {}]   ;;  %s569_s2 = inlined_call_operand.vmem [shape: f32[1,1024], index: 2, kind: input, shape index: {}]   ;;  %s570_s3 = inlined_call_operand.vmem [shape: bf16[8,1024], index: 3, kind: output, shape index: {}]  }
   0x1 LB: > { %s440_s13 = sadd.s32 4294967295, %s475_s12   ;;  %p444_p0 = scmp.ge.s32.totalorder %s475_s12, 1  ;;  %s475_s12 = sphi %s497_s12, %s13_s12  }
   0x2   : > { %p158_p1 = scmp.lt.s32.totalorder %s475_s12, 3 }
   0x4   : > { %p159_p2 = pnand %p444_p0, %p158_p1 }
   0x5   : > { %s445_s14 = sshll.u32 (!%p159_p2), %s440_s13, 2 }
   0x6   : > { %162 = sbr.rel (%p159_p2) target bundleno = 83 (0x53), region = 32  ;;  %p191_p3 = scmp.lt.s32.totalorder (!%p159_p2), %s445_s14, 7 }
   0xb   : > { %s578_s14 = smov (!%p191_p3, %s445_s14), 7 }
   0xc   : > { %s446_s15 = sshll.u32 %s578_s14, 2  ;;  %s199_s21 = scalar_lea.vmem %s568_s1, %s578_s14 }
   0xd   : > { %s194_s18 = scalar_lea.vmem %s567_s0, %s446_s15  ;;  %s204_s24 = scalar_lea.vmem %s569_s2, %s578_s14 }
   0xe   : > { %v212_v0 = vld [vmem:[%s194_s18] sm:$0xff]  ;;  %v213_v1 = vld [vmem:[%s194_s18 + $0x8] sm:$0xff]  ;;  %s210_s27 = scalar_lea.vmem %s570_s3, %s446_s15 }
   0xf   : > { %v214_v2 = vunpack.c.l.bf16 %v212_v0  ;;  %v215_v3 = vunpack.c.h.bf16 %v212_v0  ;;  %v216_v4 = vunpack.c.l.bf16 %v213_v1  ;;  %v217_v5 = vunpack.c.h.bf16 %v213_v1 }
  0x11   : > { %v218_v6 = vrot.slane %v214_v2, 4  ;;  %v224_v7 = vrot.slane %v215_v3, 4  ;;  %v230_v8 = vrot.slane %v216_v4, 4  ;;  %v236_v9 = vrot.slane %v217_v5, 4 }
  0x13   : > { %v219_v10 = vadd.f32 %v218_v6, %v214_v2  ;;  %v225_v11 = vadd.f32 %v224_v7, %v215_v3  ;;  %v231_v12 = vadd.f32 %v230_v8, %v216_v4  ;;  %v237_v13 = vadd.f32 %v236_v9, %v217_v5 }
  0x15   : > { %v220_v14 = vrot.slane %v219_v10, 2  ;;  %v226_v15 = vrot.slane %v225_v11, 2  ;;  %v232_v16 = vrot.slane %v231_v12, 2  ;;  %v238_v17 = vrot.slane %v237_v13, 2 }
  0x17   : > { %v221_v18 = vadd.f32 %v220_v14, %v219_v10  ;;  %v227_v19 = vadd.f32 %v226_v15, %v225_v11  ;;  %v233_v20 = vadd.f32 %v232_v16, %v231_v12  ;;  %v239_v21 = vadd.f32 %v238_v17, %v237_v13 }
  0x19   : > { %v222_v22 = vrot.slane %v221_v18, 1  ;;  %v228_v23 = vrot.slane %v227_v19, 1  ;;  %v234_v24 = vrot.slane %v233_v20, 1  ;;  %v240_v25 = vrot.slane %v239_v21, 1 }
  0x1b   : > { %v223_v26 = vadd.f32 %v222_v22, %v221_v18  ;;  %v229_v27 = vadd.f32 %v228_v23, %v227_v19  ;;  %v235_v28 = vadd.f32 %v234_v24, %v233_v20  ;;  %v241_v29 = vadd.f32 %v240_v25, %v239_v21 }
  0x1d   : > { %v242_v30 = vmul.f32 0.125, %v223_v26  ;;  %v243_v31 = vmul.f32 0.125, %v229_v27  ;;  %v244_v32 = vmul.f32 0.125, %v235_v28  ;;  %v245_v33 = vmul.f32 0.125, %v241_v29  ;;  %v330_v26 = vld [vmem:[%s199_s21] sm:$0xf] }
  0x1f   : > { %v513_v34 = vsub.f32 %v214_v2, %v242_v30  ;;  %v515_v35 = vsub.f32 %v215_v3, %v243_v31  ;;  %v517_v36 = vsub.f32 %v216_v4, %v244_v32  ;;  %v519_v37 = vsub.f32 %v217_v5, %v245_v33  ;;  %v344_v33 = vld [vmem:[%s204_s24] sm:$0xf] }
  0x21   : > { %v250_v38 = vmul.f32 %v513_v34, %v513_v34  ;;  %v251_v39 = vmul.f32 %v515_v35, %v515_v35  ;;  %v252_v40 = vmul.f32 %v517_v36, %v517_v36  ;;  %v253_v41 = vmul.f32 %v519_v37, %v519_v37 }
  0x23   : > { %v254_v42 = vrot.slane %v250_v38, 4  ;;  %v260_v43 = vrot.slane %v251_v39, 4  ;;  %v266_v44 = vrot.slane %v252_v40, 4  ;;  %v272_v45 = vrot.slane %v253_v41, 4 }
  0x25   : > { %v255_v46 = vadd.f32 %v254_v42, %v250_v38  ;;  %v261_v47 = vadd.f32 %v260_v43, %v251_v39  ;;  %v267_v48 = vadd.f32 %v266_v44, %v252_v40  ;;  %v273_v49 = vadd.f32 %v272_v45, %v253_v41 }
  0x26   : > { %v332_v41 = vperm.slane %v330_v26, 0  ;;  %v333_v44 = vperm.slane %v330_v26, 1  ;;  %v334_v45 = vperm.slane %v330_v26, 2 }
  0x27   : > { %v256_v50 = vrot.slane %v255_v46, 2  ;;  %v262_v51 = vrot.slane %v261_v47, 2  ;;  %v268_v52 = vrot.slane %v267_v48, 2  ;;  %v274_v53 = vrot.slane %v273_v49, 2 }
  0x29   : > { %v257_v54 = vadd.f32 %v256_v50, %v255_v46  ;;  %v263_v55 = vadd.f32 %v262_v51, %v261_v47  ;;  %v269_v56 = vadd.f32 %v268_v52, %v267_v48  ;;  %v275_v57 = vadd.f32 %v274_v53, %v273_v49 }
  0x2a   : > { %v346_v49 = vperm.slane %v344_v33, 0  ;;  %v335_v52 = vperm.slane %v330_v26, 3  ;;  %v347_v53 = vperm.slane %v344_v33, 1 }
  0x2b   : > { %v258_v58 = vrot.slane %v257_v54, 1  ;;  %v264_v59 = vrot.slane %v263_v55, 1  ;;  %v270_v60 = vrot.slane %v269_v56, 1  ;;  %v276_v61 = vrot.slane %v275_v57, 1 }
  0x2d   : > { %v259_v62 = vadd.f32 %v258_v58, %v257_v54  ;;  %v265_v63 = vadd.f32 %v264_v59, %v263_v55  ;;  %v271_v0 = vadd.f32 %v270_v60, %v269_v56  ;;  %v277_v1 = vadd.f32 %v276_v61, %v275_v57 }
  0x2e   : > { %v348_v57 = vperm.slane %v344_v33, 2  ;;  %v349_v60 = vperm.slane %v344_v33, 3 }
  0x2f   : > { %v278_v2 = vmul.f32 0.125, %v259_v62  ;;  %v279_v3 = vmul.f32 0.125, %v265_v63  ;;  %v280_v4 = vmul.f32 0.125, %v271_v0  ;;  %v281_v5 = vmul.f32 0.125, %v277_v1 }
  0x31   : > { %v282_v6 = vadd.f32 1e-05, %v278_v2  ;;  %v283_v7 = vadd.f32 1e-05, %v279_v3  ;;  %v284_v8 = vadd.f32 1e-05, %v280_v4 }
  0x32   : > { %v285_v9 = vadd.f32 1e-05, %v281_v5 }
  0x33   : > { %461 = vrsqrt.f32 %v282_v6  ;;  %vm292_vm0 = vweird.f32 %v282_v6  ;;  %vm302_vm2 = vweird.f32 %v283_v7  ;;  %vm312_vm4 = vweird.f32 %v284_v8 }
  0x34   : > { %463 = vrsqrt.f32 %v283_v7  ;;  %vm322_vm7 = vweird.f32 %v285_v9 }
  0x35   : > { %465 = vrsqrt.f32 %v284_v8 }
  0x36   : > { %467 = vrsqrt.f32 %v285_v9 }
  0x39   : > { %v462_v10 = vpop.eup %461 }
  0x3a   : > { %v464_v11 = vpop.eup %463  ;;  %v287_v12 = vmul.f32 %v462_v10, %v282_v6  ;;  %vm293_vm1 = vweird.f32 %v462_v10 }
  0x3b   : > { %v466_v13 = vpop.eup %465  ;;  %v297_v14 = vmul.f32 %v464_v11, %v283_v7  ;;  %vm303_vm3 = vweird.f32 %v464_v11  ;;  %vm537_vm6 = vmor %vm292_vm0, %vm293_vm1 }
  0x3c   : > { %v468_v15 = vpop.eup %467  ;;  %v288_v16 = vmul.f32 %v462_v10, %v287_v12  ;;  %v307_v17 = vmul.f32 %v466_v13, %v284_v8  ;;  %vm313_vm5 = vweird.f32 %v466_v13  ;;  %vm541_vm9 = vmor %vm302_vm2, %vm303_vm3 }
  0x3d   : > { %v298_v18 = vmul.f32 %v464_v11, %v297_v14  ;;  %v317_v19 = vmul.f32 %v468_v15, %v285_v9  ;;  %vm323_vm8 = vweird.f32 %v468_v15  ;;  %vm545_vm10 = vmor %vm312_vm4, %vm313_vm5 }
  0x3e   : > { %v289_v20 = vmul.f32 0.5, %v288_v16  ;;  %v308_v21 = vmul.f32 %v466_v13, %v307_v17  ;;  %vm324_vm11 = vmor %vm322_vm7, %vm323_vm8 }
  0x3f   : > { %v299_v22 = vmul.f32 0.5, %v298_v18  ;;  %v318_v23 = vmul.f32 %v468_v15, %v317_v19 }
  0x40   : > { %v290_v24 = vsub.f32 1.5, %v289_v20  ;;  %v309_v25 = vmul.f32 0.5, %v308_v21 }
  0x41   : > { %v300_v28 = vsub.f32 1.5, %v299_v22  ;;  %v319_v29 = vmul.f32 0.5, %v318_v23 }
  0x42   : > { %v291_v30 = vmul.f32 %v462_v10, %v290_v24  ;;  %v310_v32 = vsub.f32 1.5, %v309_v25 }
  0x43   : > { %v301_v38 = vmul.f32 %v464_v11, %v300_v28  ;;  %v320_v40 = vsub.f32 1.5, %v319_v29 }
  0x44   : > { %v295_v42 = vsel %vm537_vm6, %v462_v10, %v291_v30  ;;  %v311_v43 = vmul.f32 %v466_v13, %v310_v32 }
  0x45   : > { %v305_v46 = vsel %vm541_vm9, %v464_v11, %v301_v38  ;;  %v321_v47 = vmul.f32 %v468_v15, %v320_v40  ;;  %v326_v48 = vmul.f32 %v295_v42, %v513_v34 }
  0x46   : > { %v315_v50 = vsel %vm545_vm10, %v466_v13, %v311_v43  ;;  %v327_v51 = vmul.f32 %v305_v46, %v515_v35 }
  0x47   : > { %v325_v54 = vsel %vm324_vm11, %v468_v15, %v321_v47  ;;  %v328_v55 = vmul.f32 %v315_v50, %v517_v36  ;;  %v340_v56 = vmul.f32 %v332_v41, %v326_v48 }
  0x48   : > { %v329_v58 = vmul.f32 %v325_v54, %v519_v37  ;;  %v341_v59 = vmul.f32 %v333_v44, %v327_v51 }
  0x49   : > { %v342_v61 = vmul.f32 %v334_v45, %v328_v55  ;;  %v354_v34 = vadd.f32 %v346_v49, %v340_v56 }
  0x4a   : > { %v343_v62 = vmul.f32 %v335_v52, %v329_v58  ;;  %v355_v63 = vadd.f32 %v347_v53, %v341_v59 }
  0x4b   : > { %v356_v0 = vadd.f32 %v348_v57, %v342_v61  ;;  %v358_v1 = vmax.f32 %v354_v34, 0.0 }
  0x4c   : > { %v357_v2 = vadd.f32 %v349_v60, %v343_v62  ;;  %v359_v35 = vmax.f32 %v355_v63, 0.0 }
  0x4d   : > { %v360_v36 = vmax.f32 %v356_v0, 0.0 }
  0x4e   : > { %v361_v3 = vmax.f32 %v357_v2, 0.0  ;;  %v362_v4 = vpack.c.bf16 %v359_v35, %v358_v1 }
  0x50   : > { %v363_v5 = vpack.c.bf16 %v361_v3, %v360_v36  ;;  %364 = vst [vmem:[%s210_s27] sm:$0xff] %v362_v4 }
  0x52   : > { %365 = vst [vmem:[%s210_s27 + $0x8] sm:$0xff] %v363_v5 }
  0x53 PF: > { %s13_s12 = sadd.s32 1, %s475_s12  }
  0x54   : > { %p10_p4 = scmp.ge.s32.totalorder %s13_s12, 4  }
  0x56   :  { %12 = sbr.rel (!%p10_p4) target bundleno = 1 (0x1), region = 68 }

// kernel: _forward_impl.322
= control target key start
LH: loop header
LB: loop body
LE: loop exit
PB: predicated region body
PF: predicated region fallthrough
CT: control target
= control target key end

     0   :  { %s97_s0 = inlined_call_operand.vmem [shape: bf16[8,128], index: 0, kind: input, shape index: {}]   ;;  %s98_s1 = inlined_call_operand.vmem [shape: f32[1,128], index: 1, kind: input, shape index: {}]   ;;  %s99_s2 = inlined_call_operand.vmem [shape: f32[1,128], index: 2, kind: input, shape index: {}]   ;;  %s100_s3 = inlined_call_operand.vmem [shape: bf16[8,128], index: 3, kind: output, shape index: {}]  }
   0x1   :  { %v14_v0 = vld [vmem:[%s97_s0] sm:$0xf] }
   0x2   :  { %v15_v1 = vunpack.c.l.bf16 %v14_v0  ;;  %v61_v25 = vld [vmem:[%s98_s1] ss:$0 sm:$0xff] }
   0x3   :  { %v62_v28 = vld [vmem:[%s99_s2] ss:$0 sm:$0xff] }
   0x4   :  { %v16_v2 = vrot.slane %v15_v1, 4 }
   0x6   :  { %v17_v3 = vadd.f32 %v16_v2, %v15_v1 }
   0x8   :  { %v18_v4 = vrot.slane %v17_v3, 2 }
   0xa   :  { %v19_v5 = vadd.f32 %v18_v4, %v17_v3 }
   0xc   :  { %v20_v6 = vrot.slane %v19_v5, 1 }
   0xe   :  { %v21_v7 = vadd.f32 %v20_v6, %v19_v5 }
  0x10   :  { %v22_v8 = vmul.f32 0.125, %v21_v7 }
  0x12   :  { %v23_v9 = vsub.f32 %v15_v1, %v22_v8 }
  0x14   :  { %v24_v10 = vmul.f32 %v23_v9, %v23_v9 }
  0x16   :  { %v25_v11 = vrot.slane %v24_v10, 4 }
  0x18   :  { %v26_v12 = vadd.f32 %v25_v11, %v24_v10 }
  0x1a   :  { %v27_v13 = vrot.slane %v26_v12, 2 }
  0x1c   :  { %v28_v14 = vadd.f32 %v27_v13, %v26_v12 }
  0x1e   :  { %v29_v15 = vrot.slane %v28_v14, 1 }
  0x20   :  { %v30_v16 = vadd.f32 %v29_v15, %v28_v14 }
  0x22   :  { %v31_v17 = vmul.f32 0.125, %v30_v16 }
  0x24   :  { %v32_v18 = vadd.f32 1e-05, %v31_v17 }
  0x26   :  { %63 = vrsqrt.f32 %v32_v18  ;;  %vm39_vm0 = vweird.f32 %v32_v18 }
  0x2c   :  { %v64_v19 = vpop.eup %63 }
  0x2d   :  { %v34_v20 = vmul.f32 %v64_v19, %v32_v18  ;;  %vm40_vm1 = vweird.f32 %v64_v19 }
  0x2e   :  { %vm41_vm2 = vmor %vm39_vm0, %vm40_vm1 }
  0x2f   :  { %v35_v21 = vmul.f32 %v64_v19, %v34_v20 }
  0x31   :  { %v36_v22 = vmul.f32 0.5, %v35_v21 }
  0x33   :  { %v37_v23 = vsub.f32 1.5, %v36_v22 }
  0x35   :  { %v38_v24 = vmul.f32 %v64_v19, %v37_v23 }
  0x37   :  { %v42_v26 = vsel %vm41_vm2, %v64_v19, %v38_v24 }
  0x38   :  { %v43_v27 = vmul.f32 %v42_v26, %v23_v9 }
  0x3a   :  { %v48_v29 = vmul.f32 %v61_v25, %v43_v27 }
  0x3c   :  { %v53_v30 = vadd.f32 %v62_v28, %v48_v29 }
  0x3e   :  { %v54_v31 = vmax.f32 %v53_v30, 0.0 }
  0x40   :  { %v55_v32 = vpack.c.bf16 %v54_v31, %v54_v31 }
  0x42   :  { %56 = vst [vmem:[%s100_s3] sm:$0xf] %v55_v32 }

// kernel: _forward_impl.321
= control target key start
LH: loop header
LB: loop body
LE: loop exit
PB: predicated region body
PF: predicated region fallthrough
CT: control target
= control target key end

     0   :  { %s1314_s1 = inlined_call_operand.vmem [shape: bf16[1024,128], index: 1, kind: input, shape index: {}]   ;;  %s1315_s0 = inlined_call_operand.vmem [shape: bf16[16,1024], index: 0, kind: input, shape index: {}]   ;;  %s1316_s2 = inlined_call_operand.vmem [shape: bf16[16,128], index: 2, kind: output, shape index: {}]  }
   0x1   :  { %v994_v0 = vld [vmem:[%s1314_s1 + $0x38] sm:$0xff]  ;;  %v993_v4 = vld [vmem:[%s1314_s1 + $0x30] sm:$0xff]  ;;  %v992_v8 = vld [vmem:[%s1314_s1 + $0x28] sm:$0xff] }
   0x2   :  { %v1002_v1 = vld [vmem:[%s1314_s1 + $0x78] sm:$0xff]  ;;  %571 = vmatpush.bf16.msra.mxu0 %v994_v0  ;;  %v1001_v5 = vld [vmem:[%s1314_s1 + $0x70] sm:$0xff]  ;;  %v1000_v9 = vld [vmem:[%s1314_s1 + $0x68] sm:$0xff] }
   0x3   :  { %v1010_v2 = vld [vmem:[%s1314_s1 + $0xb8] sm:$0xff]  ;;  %585 = vmatpush.bf16.msra.mxu1 %v1002_v1  ;;  %v1009_v6 = vld [vmem:[%s1314_s1 + $0xb0] sm:$0xff]  ;;  %v1008_v10 = vld [vmem:[%s1314_s1 + $0xa8] sm:$0xff] }
   0x4   :  { %v1018_v3 = vld [vmem:[%s1314_s1 + $0xf8] sm:$0xff]  ;;  %599 = vmatpush.bf16.msra.mxu2 %v1010_v2  ;;  %v1017_v7 = vld [vmem:[%s1314_s1 + $0xf0] sm:$0xff]  ;;  %v1016_v11 = vld [vmem:[%s1314_s1 + $0xe8] sm:$0xff] }
   0x5   :  { %613 = vmatpush.bf16.msra.mxu3 %v1018_v3  ;;  %v991_v12 = vld [vmem:[%s1314_s1 + $0x20] sm:$0xff]  ;;  %v990_v16 = vld [vmem:[%s1314_s1 + $0x18] sm:$0xff]  ;;  %v989_v20 = vld [vmem:[%s1314_s1 + $0x10] sm:$0xff] }
   0x6   :  { %572 = vmatpush.bf16.msra.mxu0 %v993_v4  ;;  %v999_v13 = vld [vmem:[%s1314_s1 + $0x60] sm:$0xff]  ;;  %v998_v17 = vld [vmem:[%s1314_s1 + $0x58] sm:$0xff]  ;;  %v997_v21 = vld [vmem:[%s1314_s1 + $0x50] sm:$0xff] }
   0x7   :  { %586 = vmatpush.bf16.msra.mxu1 %v1001_v5  ;;  %v1007_v14 = vld [vmem:[%s1314_s1 + $0xa0] sm:$0xff]  ;;  %v1006_v18 = vld [vmem:[%s1314_s1 + $0x98] sm:$0xff]  ;;  %v1005_v22 = vld [vmem:[%s1314_s1 + $0x90] sm:$0xff] }
   0x8   :  { %600 = vmatpush.bf16.msra.mxu2 %v1009_v6  ;;  %v1015_v15 = vld [vmem:[%s1314_s1 + $0xe0] sm:$0xff]  ;;  %v1014_v19 = vld [vmem:[%s1314_s1 + $0xd8] sm:$0xff]  ;;  %v1013_v23 = vld [vmem:[%s1314_s1 + $0xd0] sm:$0xff] }
   0x9   :  { %614 = vmatpush.bf16.msra.mxu3 %v1017_v7  ;;  %v988_v24 = vld [vmem:[%s1314_s1 + $0x8] sm:$0xff]  ;;  %v987_v28 = vld [vmem:[%s1314_s1] sm:$0xff]  ;;  %v1026_v32 = vld [vmem:[%s1314_s1 + $0x138] sm:$0xff] }
   0xa   :  { %573 = vmatpush.bf16.msra.mxu0 %v992_v8  ;;  %v996_v25 = vld [vmem:[%s1314_s1 + $0x48] sm:$0xff]  ;;  %v995_v29 = vld [vmem:[%s1314_s1 + $0x40] sm:$0xff]  ;;  %v1034_v33 = vld [vmem:[%s1314_s1 + $0x178] sm:$0xff] }
   0xb   :  { %587 = vmatpush.bf16.msra.mxu1 %v1000_v9  ;;  %v1004_v26 = vld [vmem:[%s1314_s1 + $0x88] sm:$0xff]  ;;  %v1003_v30 = vld [vmem:[%s1314_s1 + $0x80] sm:$0xff]  ;;  %v1042_v42 = vld [vmem:[%s1314_s1 + $0x1b8] sm:$0xff] }
   0xc   :  { %601 = vmatpush.bf16.msra.mxu2 %v1008_v10  ;;  %v1012_v27 = vld [vmem:[%s1314_s1 + $0xc8] sm:$0xff]  ;;  %v1011_v31 = vld [vmem:[%s1314_s1 + $0xc0] sm:$0xff]  ;;  %v1050_v43 = vld [vmem:[%s1314_s1 + $0x1f8] sm:$0xff] }
   0xd   :  { %615 = vmatpush.bf16.msra.mxu3 %v1016_v11  ;;  %v701_v34 = vld [vmem:[%s1315_s0 + $0x8] sm:$0xf]  ;;  %v980_v36 = vld [vmem:[%s1315_s0 + $0xc] sm:$0xf]  ;;  %v693_v38 = vld [vmem:[%s1315_s0] sm:$0xf] }
   0xe   :  { %574 = vmatpush.bf16.msra.mxu0 %v991_v12  ;;  %v984_v35 = vld [vmem:[%s1315_s0 + $0x24] sm:$0xf0]  ;;  %v703_v37 = vld [vmem:[%s1315_s0 + $0x28] sm:$0xf0]  ;;  %v983_v39 = vld [vmem:[%s1315_s0 + $0x1c] sm:$0xf0] }
   0xf   :  { %588 = vmatpush.bf16.msra.mxu1 %v999_v13  ;;  %v979_v40 = vld [vmem:[%s1315_s0 + $0x4] sm:$0xf]  ;;  %v702_v44 = vor.u32 %v984_v35, %v701_v34  ;;  %v706_v45 = vor.u32 %v980_v36, %v703_v37  ;;  %v694_v46 = vor.u32 %v983_v39, %v693_v38  ;;  %v1025_v48 = vld [vmem:[%s1314_s1 + $0x130] sm:$0xff]  ;;  %v1024_v52 = vld [vmem:[%s1314_s1 + $0x128] sm:$0xff] }
  0x10   :  { %602 = vmatpush.bf16.msra.mxu2 %v1007_v14  ;;  %v695_v41 = vld [vmem:[%s1315_s0 + $0x20] sm:$0xf0]  ;;  %v1033_v49 = vld [vmem:[%s1314_s1 + $0x170] sm:$0xff]  ;;  %v1032_v53 = vld [vmem:[%s1314_s1 + $0x168] sm:$0xff] }
  0x11   :  { %616 = vmatpush.bf16.msra.mxu3 %v1015_v15  ;;  %v698_v47 = vor.u32 %v979_v40, %v695_v41  ;;  %v1041_v50 = vld [vmem:[%s1314_s1 + $0x1b0] sm:$0xff]  ;;  %v1040_v54 = vld [vmem:[%s1314_s1 + $0x1a8] sm:$0xff]  ;;  %v1023_v56 = vld [vmem:[%s1314_s1 + $0x120] sm:$0xff] }
  0x12   :  { %575 = vmatpush.bf16.msra.mxu0 %v990_v16  ;;  %v1049_v51 = vld [vmem:[%s1314_s1 + $0x1f0] sm:$0xff]  ;;  %v1048_v55 = vld [vmem:[%s1314_s1 + $0x1e8] sm:$0xff]  ;;  %v1031_v57 = vld [vmem:[%s1314_s1 + $0x160] sm:$0xff] }
  0x13   :  { %589 = vmatpush.bf16.msra.mxu1 %v998_v17  ;;  %v1039_v58 = vld [vmem:[%s1314_s1 + $0x1a0] sm:$0xff]  ;;  %v1022_v60 = vld [vmem:[%s1314_s1 + $0x118] sm:$0xff]  ;;  %v1021_v0 = vld [vmem:[%s1314_s1 + $0x110] sm:$0xff] }
  0x14   :  { %603 = vmatpush.bf16.msra.mxu2 %v1006_v18  ;;  %v1047_v59 = vld [vmem:[%s1314_s1 + $0x1e0] sm:$0xff]  ;;  %v1030_v61 = vld [vmem:[%s1314_s1 + $0x158] sm:$0xff]  ;;  %v1029_v1 = vld [vmem:[%s1314_s1 + $0x150] sm:$0xff] }
  0x15   :  { %617 = vmatpush.bf16.msra.mxu3 %v1014_v19  ;;  %v1038_v62 = vld [vmem:[%s1314_s1 + $0x198] sm:$0xff]  ;;  %v1037_v2 = vld [vmem:[%s1314_s1 + $0x190] sm:$0xff]  ;;  %v1020_v4 = vld [vmem:[%s1314_s1 + $0x108] sm:$0xff] }
  0x16   :  { %576 = vmatpush.bf16.msra.mxu0 %v989_v20  ;;  %v1046_v63 = vld [vmem:[%s1314_s1 + $0x1d8] sm:$0xff]  ;;  %v1045_v3 = vld [vmem:[%s1314_s1 + $0x1d0] sm:$0xff]  ;;  %v1028_v5 = vld [vmem:[%s1314_s1 + $0x148] sm:$0xff] }
  0x17   :  { %590 = vmatpush.bf16.msra.mxu1 %v997_v21  ;;  %v1036_v6 = vld [vmem:[%s1314_s1 + $0x188] sm:$0xff]  ;;  %v1019_v8 = vld [vmem:[%s1314_s1 + $0x100] sm:$0xff]  ;;  %v709_v12 = vld [vmem:[%s1315_s0 + $0x10] sm:$0xf] }
  0x18   :  { %604 = vmatpush.bf16.msra.mxu2 %v1005_v22  ;;  %v1044_v7 = vld [vmem:[%s1314_s1 + $0x1c8] sm:$0xff]  ;;  %v1027_v9 = vld [vmem:[%s1314_s1 + $0x140] sm:$0xff]  ;;  %v985_v13 = vld [vmem:[%s1315_s0 + $0x2c] sm:$0xf0] }
  0x19   :  { %618 = vmatpush.bf16.msra.mxu3 %v1013_v23  ;;  %v1035_v10 = vld [vmem:[%s1314_s1 + $0x180] sm:$0xff]  ;;  %v981_v14 = vld [vmem:[%s1315_s0 + $0x14] sm:$0xf]  ;;  %v717_v16 = vld [vmem:[%s1315_s0 + $0x18] sm:$0xf]  ;;  %v710_v20 = vor.u32 %v985_v13, %v709_v12 }
  0x1a   :  { %577 = vmatpush.bf16.msra.mxu0 %v988_v24  ;;  %v1043_v11 = vld [vmem:[%s1314_s1 + $0x1c0] sm:$0xff]  ;;  %v711_v15 = vld [vmem:[%s1315_s0 + $0x30] sm:$0xf0]  ;;  %v986_v17 = vld [vmem:[%s1315_s0 + $0x34] sm:$0xf0] }
  0x1b   :  { %591 = vmatpush.bf16.msra.mxu1 %v996_v25  ;;  %v982_v18 = vld [vmem:[%s1315_s0 + $0x1c] sm:$0xf]  ;;  %v714_v21 = vor.u32 %v981_v14, %v711_v15  ;;  %v718_v22 = vor.u32 %v986_v17, %v717_v16 }
  0x1c   :  { %605 = vmatpush.bf16.msra.mxu2 %v1004_v26  ;;  %v719_v19 = vld [vmem:[%s1315_s0 + $0x38] sm:$0xf0] }
  0x1d   :  { %619 = vmatpush.bf16.msra.mxu3 %v1012_v27  ;;  %v722_v23 = vor.u32 %v982_v18, %v719_v19 }
  0x1e   :  { %578 = vmatpush.bf16.msra.mxu0 %v987_v28 }
  0x1f   :  { %592 = vmatpush.bf16.msra.mxu1 %v995_v29 }
  0x20   :  { %606 = vmatpush.bf16.msra.mxu2 %v1003_v30 }
  0x21   :  { %620 = vmatpush.bf16.msra.mxu3 %v1011_v31  ;;  %579 = vmatmul.bf16.vlgmr.msra.gmra.mxu0 %v694_v46 }
  0x22   :  { %627 = vmatpush.bf16.msrb.mxu0 %v1026_v32  ;;  %593 = vmatmul.bf16.vlgmr.msra.gmra.mxu1 %v698_v47 }
  0x23   :  { %641 = vmatpush.bf16.msrb.mxu1 %v1034_v33  ;;  %607 = vmatmul.bf16.vlgmr.msra.gmra.mxu2 %v702_v44 }
  0x24   :  { %655 = vmatpush.bf16.msrb.mxu2 %v1042_v42  ;;  %621 = vmatmul.bf16.vlgmr.msra.gmra.mxu3 %v706_v45 }
  0x25   :  { %669 = vmatpush.bf16.msrb.mxu3 %v1050_v43 }
  0x26   :  { %628 = vmatpush.bf16.msrb.mxu0 %v1025_v48 }
  0x27   :  { %642 = vmatpush.bf16.msrb.mxu1 %v1033_v49 }
  0x28   :  { %656 = vmatpush.bf16.msrb.mxu2 %v1041_v50 }
  0x29   :  { %670 = vmatpush.bf16.msrb.mxu3 %v1049_v51 }
  0x2a   :  { %629 = vmatpush.bf16.msrb.mxu0 %v1024_v52 }
  0x2b   :  { %643 = vmatpush.bf16.msrb.mxu1 %v1032_v53 }
  0x2c   :  { %657 = vmatpush.bf16.msrb.mxu2 %v1040_v54 }
  0x2d   :  { %671 = vmatpush.bf16.msrb.mxu3 %v1048_v55 }
  0x2e   :  { %630 = vmatpush.bf16.msrb.mxu0 %v1023_v56 }
  0x2f   :  { %644 = vmatpush.bf16.msrb.mxu1 %v1031_v57 }
  0x30   :  { %658 = vmatpush.bf16.msrb.mxu2 %v1039_v58 }
  0x31   :  { %672 = vmatpush.bf16.msrb.mxu3 %v1047_v59 }
  0x32   :  { %631 = vmatpush.bf16.msrb.mxu0 %v1022_v60 }
  0x33   :  { %645 = vmatpush.bf16.msrb.mxu1 %v1030_v61 }
  0x34   :  { %659 = vmatpush.bf16.msrb.mxu2 %v1038_v62 }
  0x35   :  { %673 = vmatpush.bf16.msrb.mxu3 %v1046_v63 }
  0x36   :  { %632 = vmatpush.bf16.msrb.mxu0 %v1021_v0 }
  0x37   :  { %646 = vmatpush.bf16.msrb.mxu1 %v1029_v1 }
  0x38   :  { %660 = vmatpush.bf16.msrb.mxu2 %v1037_v2 }
  0x39   :  { %674 = vmatpush.bf16.msrb.mxu3 %v1045_v3 }
  0x3a   :  { %633 = vmatpush.bf16.msrb.mxu0 %v1020_v4 }
  0x3b   :  { %647 = vmatpush.bf16.msrb.mxu1 %v1028_v5 }
  0x3c   :  { %661 = vmatpush.bf16.msrb.mxu2 %v1036_v6 }
  0x3d   :  { %675 = vmatpush.bf16.msrb.mxu3 %v1044_v7 }
  0x3e   :  { %634 = vmatpush.bf16.msrb.mxu0 %v1019_v8 }
  0x3f   :  { %648 = vmatpush.bf16.msrb.mxu1 %v1027_v9 }
  0x40   :  { %662 = vmatpush.bf16.msrb.mxu2 %v1035_v10 }
  0x41   :  { %676 = vmatpush.bf16.msrb.mxu3 %v1043_v11  ;;  %635 = vmatmul.bf16.vlgmr.msrb.gmra.mxu0 %v710_v20 }
  0x42   :  { %649 = vmatmul.bf16.vlgmr.msrb.gmra.mxu1 %v714_v21 }
  0x43   :  { %663 = vmatmul.bf16.vlgmr.msrb.gmra.mxu2 %v718_v22 }
  0x44   :  { %677 = vmatmul.bf16.vlgmr.msrb.gmra.mxu3 %v722_v23 }
  0x9e   :  { %v580_v24 = vpop.f32.mrf.mxu0 }
  0x9f   :  { %v594_v25 = vpop.f32.mrf.mxu1 }
  0xa0   :  { %v595_v30 = vadd.f32 %v594_v25, %v580_v24 }
  0xa6   :  { %v608_v26 = vpop.f32.mrf.mxu2  ;;  %v582_v28 = vpop.f32.mrf.mxu0 }
  0xa7   :  { %v622_v27 = vpop.f32.mrf.mxu3  ;;  %v596_v29 = vpop.f32.mrf.mxu1  ;;  %v609_v35 = vadd.f32 %v608_v26, %v595_v30 }
  0xa8   :  { %v597_v33 = vadd.f32 %v596_v29, %v582_v28 }
  0xa9   :  { %v623_v38 = vadd.f32 %v622_v27, %v609_v35 }
  0xae   :  { %v610_v31 = vpop.f32.mrf.mxu2 }
  0xaf   :  { %v624_v32 = vpop.f32.mrf.mxu3  ;;  %v611_v37 = vadd.f32 %v610_v31, %v597_v33 }
  0xb1   :  { %v625_v41 = vadd.f32 %v624_v32, %v611_v37 }
  0xbe   :  { %v636_v34 = vpop.f32.mrf.mxu0 }
  0xbf   :  { %v650_v36 = vpop.f32.mrf.mxu1  ;;  %v637_v42 = vadd.f32 %v636_v34, %v623_v38 }
  0xc1   :  { %v651_v45 = vadd.f32 %v650_v36, %v637_v42 }
  0xc6   :  { %v664_v39 = vpop.f32.mrf.mxu2  ;;  %v638_v43 = vpop.f32.mrf.mxu0 }
  0xc7   :  { %v678_v40 = vpop.f32.mrf.mxu3  ;;  %v639_v44 = vadd.f32 %v638_v43, %v625_v41  ;;  %v652_v46 = vpop.f32.mrf.mxu1  ;;  %v665_v47 = vadd.f32 %v664_v39, %v651_v45 }
  0xc9   :  { %v653_v48 = vadd.f32 %v652_v46, %v639_v44  ;;  %v679_v52 = vadd.f32 %v678_v40, %v665_v47 }
  0xce   :  { %v666_v49 = vpop.f32.mrf.mxu2 }
  0xcf   :  { %v667_v50 = vadd.f32 %v666_v49, %v653_v48  ;;  %v680_v51 = vpop.f32.mrf.mxu3 }
  0xd1   :  { %v681_v53 = vadd.f32 %v680_v51, %v667_v50 }
  0xd3   :  { %v1054_v54 = vpack.c.bf16 %v681_v53, %v679_v52 }
  0xd5   :  { %1055 = vst [vmem:[%s1316_s2] sm:$0xff] %v1054_v54  }

// kernel: _forward_impl.323
= control target key start
LH: loop header
LB: loop body
LE: loop exit
PB: predicated region body
PF: predicated region fallthrough
CT: control target
= control target key end

     0   :  { %vm771_vm0 = vcmask 257024   ;;  %s1474_s1 = inlined_call_operand.vmem [shape: bf16[1152,32], index: 1, kind: input, shape index: {}]   ;;  %s1475_s0 = inlined_call_operand.vmem [shape: bf16[16,1152], index: 0, kind: input, shape index: {}]   ;;  %s1476_s2 = inlined_call_operand.vmem [shape: bf16[16,32], index: 2, kind: output, shape index: {}]  }
   0x1   :  { %v1118_v0 = vld [vmem:[%s1474_s1 + $0x38] sm:$0xff]  ;;  %v1117_v4 = vld [vmem:[%s1474_s1 + $0x30] sm:$0xff]  ;;  %v1116_v8 = vld [vmem:[%s1474_s1 + $0x28] sm:$0xff] }
   0x2   :  { %v1134_v1 = vld [vmem:[%s1474_s1 + $0xb8] sm:$0xff]  ;;  %643 = vmatpush.bf16.msra.mxu0 %v1118_v0  ;;  %v1133_v5 = vld [vmem:[%s1474_s1 + $0xb0] sm:$0xff]  ;;  %v1132_v9 = vld [vmem:[%s1474_s1 + $0xa8] sm:$0xff] }
   0x3   :  { %v1126_v2 = vld [vmem:[%s1474_s1 + $0x78] sm:$0xff]  ;;  %671 = vmatpush.bf16.msra.mxu2 %v1134_v1  ;;  %v1125_v6 = vld [vmem:[%s1474_s1 + $0x70] sm:$0xff]  ;;  %v1124_v10 = vld [vmem:[%s1474_s1 + $0x68] sm:$0xff] }
   0x4   :  { %v1142_v3 = vld [vmem:[%s1474_s1 + $0xf8] sm:$0xff]  ;;  %657 = vmatpush.bf16.msra.mxu1 %v1126_v2  ;;  %v1141_v7 = vld [vmem:[%s1474_s1 + $0xf0] sm:$0xff]  ;;  %v1140_v11 = vld [vmem:[%s1474_s1 + $0xe8] sm:$0xff] }
   0x5   :  { %685 = vmatpush.bf16.msra.mxu3 %v1142_v3  ;;  %v1115_v12 = vld [vmem:[%s1474_s1 + $0x20] sm:$0xff]  ;;  %v1114_v16 = vld [vmem:[%s1474_s1 + $0x18] sm:$0xff]  ;;  %v1113_v20 = vld [vmem:[%s1474_s1 + $0x10] sm:$0xff] }
   0x6   :  { %644 = vmatpush.bf16.msra.mxu0 %v1117_v4  ;;  %v1131_v13 = vld [vmem:[%s1474_s1 + $0xa0] sm:$0xff]  ;;  %v1130_v17 = vld [vmem:[%s1474_s1 + $0x98] sm:$0xff]  ;;  %v1129_v21 = vld [vmem:[%s1474_s1 + $0x90] sm:$0xff] }
   0x7   :  { %672 = vmatpush.bf16.msra.mxu2 %v1133_v5  ;;  %v1123_v14 = vld [vmem:[%s1474_s1 + $0x60] sm:$0xff]  ;;  %v1122_v18 = vld [vmem:[%s1474_s1 + $0x58] sm:$0xff]  ;;  %v1121_v22 = vld [vmem:[%s1474_s1 + $0x50] sm:$0xff] }
   0x8   :  { %658 = vmatpush.bf16.msra.mxu1 %v1125_v6  ;;  %v1139_v15 = vld [vmem:[%s1474_s1 + $0xe0] sm:$0xff]  ;;  %v1138_v19 = vld [vmem:[%s1474_s1 + $0xd8] sm:$0xff]  ;;  %v1137_v23 = vld [vmem:[%s1474_s1 + $0xd0] sm:$0xff] }
   0x9   :  { %686 = vmatpush.bf16.msra.mxu3 %v1141_v7  ;;  %v1112_v24 = vld [vmem:[%s1474_s1 + $0x8] sm:$0xff]  ;;  %v1111_v28 = vld [vmem:[%s1474_s1] sm:$0xff]  ;;  %v1150_v30 = vld [vmem:[%s1474_s1 + $0x138] sm:$0xff] }
   0xa   :  { %645 = vmatpush.bf16.msra.mxu0 %v1116_v8  ;;  %v1128_v25 = vld [vmem:[%s1474_s1 + $0x88] sm:$0xff]  ;;  %v1127_v29 = vld [vmem:[%s1474_s1 + $0x80] sm:$0xff]  ;;  %v1166_v31 = vld [vmem:[%s1474_s1 + $0x1b8] sm:$0xff] }
   0xb   :  { %673 = vmatpush.bf16.msra.mxu2 %v1132_v9  ;;  %v1120_v26 = vld [vmem:[%s1474_s1 + $0x48] sm:$0xff]  ;;  %v1119_v32 = vld [vmem:[%s1474_s1 + $0x40] sm:$0xff]  ;;  %v1158_v38 = vld [vmem:[%s1474_s1 + $0x178] sm:$0xff] }
   0xc   :  { %659 = vmatpush.bf16.msra.mxu1 %v1124_v10  ;;  %v1136_v27 = vld [vmem:[%s1474_s1 + $0xc8] sm:$0xff]  ;;  %v1135_v33 = vld [vmem:[%s1474_s1 + $0xc0] sm:$0xff]  ;;  %v1174_v39 = vld [vmem:[%s1474_s1 + $0x1f8] sm:$0xff] }
   0xd   :  { %687 = vmatpush.bf16.msra.mxu3 %v1140_v11  ;;  %v780_v34 = vld [vmem:[%s1475_s0] sm:$0xf]  ;;  %v1106_v35 = vld [vmem:[%s1475_s0 + $0x20] sm:$0xf0]  ;;  %v788_v36 = vld [vmem:[%s1475_s0 + $0x8] sm:$0xf] }
   0xe   :  { %646 = vmatpush.bf16.msra.mxu0 %v1115_v12  ;;  %v1107_v37 = vld [vmem:[%s1475_s0 + $0x28] sm:$0xf0]  ;;  %v1102_v40 = vld [vmem:[%s1475_s0 + $0x4] sm:$0xf]  ;;  %v782_v41 = vld [vmem:[%s1475_s0 + $0x24] sm:$0xf0]  ;;  %v781_v44 = vor.u32 %v1106_v35, %v780_v34 }
   0xf   :  { %674 = vmatpush.bf16.msra.mxu2 %v1131_v13  ;;  %v1103_v42 = vld [vmem:[%s1475_s0 + $0xc] sm:$0xf]  ;;  %v790_v43 = vld [vmem:[%s1475_s0 + $0x2c] sm:$0xf0]  ;;  %v789_v45 = vor.u32 %v1107_v37, %v788_v36  ;;  %v785_v48 = vor.u32 %v1102_v40, %v782_v41  ;;  %v1147_v56 = vld [vmem:[%s1474_s1 + $0x120] sm:$0xff] }
  0x10   :  { %660 = vmatpush.bf16.msra.mxu1 %v1123_v14  ;;  %v1149_v46 = vld [vmem:[%s1474_s1 + $0x130] sm:$0xff]  ;;  %v793_v49 = vor.u32 %v1103_v42, %v790_v43  ;;  %v1148_v52 = vld [vmem:[%s1474_s1 + $0x128] sm:$0xff]  ;;  %v1163_v57 = vld [vmem:[%s1474_s1 + $0x1a0] sm:$0xff] }
  0x11   :  { %688 = vmatpush.bf16.msra.mxu3 %v1139_v15  ;;  %v1165_v47 = vld [vmem:[%s1474_s1 + $0x1b0] sm:$0xff]  ;;  %v1164_v53 = vld [vmem:[%s1474_s1 + $0x1a8] sm:$0xff]  ;;  %v1155_v58 = vld [vmem:[%s1474_s1 + $0x160] sm:$0xff] }
  0x12   :  { %647 = vmatpush.bf16.msra.mxu0 %v1114_v16  ;;  %v1157_v50 = vld [vmem:[%s1474_s1 + $0x170] sm:$0xff]  ;;  %v1156_v54 = vld [vmem:[%s1474_s1 + $0x168] sm:$0xff]  ;;  %v1171_v59 = vld [vmem:[%s1474_s1 + $0x1e0] sm:$0xff] }
  0x13   :  { %675 = vmatpush.bf16.msra.mxu2 %v1130_v17  ;;  %v1173_v51 = vld [vmem:[%s1474_s1 + $0x1f0] sm:$0xff]  ;;  %v1172_v55 = vld [vmem:[%s1474_s1 + $0x1e8] sm:$0xff]  ;;  %v1146_v60 = vld [vmem:[%s1474_s1 + $0x118] sm:$0xff] }
  0x14   :  { %661 = vmatpush.bf16.msra.mxu1 %v1122_v18  ;;  %v1162_v61 = vld [vmem:[%s1474_s1 + $0x198] sm:$0xff]  ;;  %v1145_v0 = vld [vmem:[%s1474_s1 + $0x110] sm:$0xff]  ;;  %v1144_v4 = vld [vmem:[%s1474_s1 + $0x108] sm:$0xff] }
  0x15   :  { %689 = vmatpush.bf16.msra.mxu3 %v1138_v19  ;;  %v1154_v62 = vld [vmem:[%s1474_s1 + $0x158] sm:$0xff]  ;;  %v1161_v1 = vld [vmem:[%s1474_s1 + $0x190] sm:$0xff]  ;;  %v1160_v5 = vld [vmem:[%s1474_s1 + $0x188] sm:$0xff] }
  0x16   :  { %648 = vmatpush.bf16.msra.mxu0 %v1113_v20  ;;  %v1170_v63 = vld [vmem:[%s1474_s1 + $0x1d8] sm:$0xff]  ;;  %v1153_v2 = vld [vmem:[%s1474_s1 + $0x150] sm:$0xff]  ;;  %v1152_v6 = vld [vmem:[%s1474_s1 + $0x148] sm:$0xff] }
  0x17   :  { %676 = vmatpush.bf16.msra.mxu2 %v1129_v21  ;;  %v1169_v3 = vld [vmem:[%s1474_s1 + $0x1d0] sm:$0xff]  ;;  %v1168_v7 = vld [vmem:[%s1474_s1 + $0x1c8] sm:$0xff]  ;;  %v1143_v8 = vld [vmem:[%s1474_s1 + $0x100] sm:$0xff] }
  0x18   :  { %662 = vmatpush.bf16.msra.mxu1 %v1121_v22  ;;  %v1159_v9 = vld [vmem:[%s1474_s1 + $0x180] sm:$0xff]  ;;  %v1182_v10 = vld [vmem:[%s1474_s1 + $0x238] sm:$0xff]  ;;  %v796_v11 = vld [vmem:[%s1475_s0 + $0x10] sm:$0xf] }
  0x19   :  { %690 = vmatpush.bf16.msra.mxu3 %v1137_v23  ;;  %v1108_v12 = vld [vmem:[%s1475_s0 + $0x30] sm:$0xf0]  ;;  %v804_v13 = vld [vmem:[%s1475_s0 + $0x18] sm:$0xf]  ;;  %v1109_v14 = vld [vmem:[%s1475_s0 + $0x38] sm:$0xf0] }
  0x1a   :  { %649 = vmatpush.bf16.msra.mxu0 %v1112_v24  ;;  %v1151_v15 = vld [vmem:[%s1474_s1 + $0x140] sm:$0xff]  ;;  %v1104_v17 = vld [vmem:[%s1475_s0 + $0x14] sm:$0xf]  ;;  %v798_v18 = vld [vmem:[%s1475_s0 + $0x34] sm:$0xf0]  ;;  %v797_v21 = vor.u32 %v1108_v12, %v796_v11  ;;  %v805_v22 = vor.u32 %v1109_v14, %v804_v13 }
  0x1b   :  { %677 = vmatpush.bf16.msra.mxu2 %v1128_v25  ;;  %v1167_v16 = vld [vmem:[%s1474_s1 + $0x1c0] sm:$0xff]  ;;  %v1105_v19 = vld [vmem:[%s1475_s0 + $0x1c] sm:$0xf]  ;;  %v801_v23 = vor.u32 %v1104_v17, %v798_v18  ;;  %v1181_v25 = vld [vmem:[%s1474_s1 + $0x230] sm:$0xff] }
  0x1c   :  { %663 = vmatpush.bf16.msra.mxu1 %v1120_v26  ;;  %v806_v20 = vld [vmem:[%s1475_s0 + $0x3c] sm:$0xf0]  ;;  %v1180_v26 = vld [vmem:[%s1474_s1 + $0x228] sm:$0xff] }
  0x1d   :  { %691 = vmatpush.bf16.msra.mxu3 %v1136_v27  ;;  %v809_v24 = vor.u32 %v1105_v19, %v806_v20  ;;  %v1179_v27 = vld [vmem:[%s1474_s1 + $0x220] sm:$0xff] }
  0x1e   :  { %650 = vmatpush.bf16.msra.mxu0 %v1111_v28  ;;  %v1178_v28 = vld [vmem:[%s1474_s1 + $0x218] sm:$0xff] }
  0x1f   :  { %678 = vmatpush.bf16.msra.mxu2 %v1127_v29  ;;  %v1177_v29 = vld [vmem:[%s1474_s1 + $0x210] sm:$0xff] }
  0x20   :  { %664 = vmatpush.bf16.msra.mxu1 %v1119_v32  ;;  %v812_v32 = vld [vmem:[%s1475_s0 + $0x20] sm:$0xf] }
  0x21   :  { %692 = vmatpush.bf16.msra.mxu3 %v1135_v33  ;;  %651 = vmatmul.bf16.vlgmr.msra.gmra.mxu0 %v781_v44  ;;  %v1110_v33 = vld [vmem:[%s1475_s0 + $0x40] sm:$0xf0] }
  0x22   :  { %699 = vmatpush.bf16.msrb.mxu0 %v1150_v30  ;;  %679 = vmatmul.bf16.vlgmr.msra.gmra.mxu2 %v789_v45  ;;  %v1176_v30 = vld [vmem:[%s1474_s1 + $0x208] sm:$0xff]  ;;  %v813_v34 = vor.u32 %v1110_v33, %v812_v32 }
  0x23   :  { %727 = vmatpush.bf16.msrb.mxu2 %v1166_v31  ;;  %665 = vmatmul.bf16.vlgmr.msra.gmra.mxu1 %v785_v48  ;;  %v1175_v31 = vld [vmem:[%s1474_s1 + $0x200] sm:$0xff] }
  0x24   :  { %713 = vmatpush.bf16.msrb.mxu1 %v1158_v38  ;;  %693 = vmatmul.bf16.vlgmr.msra.gmra.mxu3 %v793_v49 }
  0x25   :  { %741 = vmatpush.bf16.msrb.mxu3 %v1174_v39 }
  0x26   :  { %700 = vmatpush.bf16.msrb.mxu0 %v1149_v46 }
  0x27   :  { %728 = vmatpush.bf16.msrb.mxu2 %v1165_v47 }
  0x28   :  { %714 = vmatpush.bf16.msrb.mxu1 %v1157_v50 }
  0x29   :  { %742 = vmatpush.bf16.msrb.mxu3 %v1173_v51 }
  0x2a   :  { %701 = vmatpush.bf16.msrb.mxu0 %v1148_v52 }
  0x2b   :  { %729 = vmatpush.bf16.msrb.mxu2 %v1164_v53 }
  0x2c   :  { %715 = vmatpush.bf16.msrb.mxu1 %v1156_v54 }
  0x2d   :  { %743 = vmatpush.bf16.msrb.mxu3 %v1172_v55 }
  0x2e   :  { %702 = vmatpush.bf16.msrb.mxu0 %v1147_v56 }
  0x2f   :  { %730 = vmatpush.bf16.msrb.mxu2 %v1163_v57 }
  0x30   :  { %716 = vmatpush.bf16.msrb.mxu1 %v1155_v58 }
  0x31   :  { %744 = vmatpush.bf16.msrb.mxu3 %v1171_v59 }
  0x32   :  { %703 = vmatpush.bf16.msrb.mxu0 %v1146_v60 }
  0x33   :  { %731 = vmatpush.bf16.msrb.mxu2 %v1162_v61 }
  0x34   :  { %717 = vmatpush.bf16.msrb.mxu1 %v1154_v62 }
  0x35   :  { %745 = vmatpush.bf16.msrb.mxu3 %v1170_v63 }
  0x36   :  { %704 = vmatpush.bf16.msrb.mxu0 %v1145_v0 }
  0x37   :  { %732 = vmatpush.bf16.msrb.mxu2 %v1161_v1 }
  0x38   :  { %718 = vmatpush.bf16.msrb.mxu1 %v1153_v2 }
  0x39   :  { %746 = vmatpush.bf16.msrb.mxu3 %v1169_v3 }
  0x3a   :  { %705 = vmatpush.bf16.msrb.mxu0 %v1144_v4 }
  0x3b   :  { %733 = vmatpush.bf16.msrb.mxu2 %v1160_v5 }
  0x3c   :  { %719 = vmatpush.bf16.msrb.mxu1 %v1152_v6 }
  0x3d   :  { %747 = vmatpush.bf16.msrb.mxu3 %v1168_v7 }
  0x3e   :  { %706 = vmatpush.bf16.msrb.mxu0 %v1143_v8 }
  0x3f   :  { %734 = vmatpush.bf16.msrb.mxu2 %v1159_v9 }
  0x40   :  { %720 = vmatpush.bf16.msrb.mxu1 %v1151_v15 }
  0x41   :  { %748 = vmatpush.bf16.msrb.mxu3 %v1167_v16  ;;  %707 = vmatmul.bf16.vlgmr.msrb.gmra.mxu0 %v797_v21 }
  0x42   :  { %755 = vmatpush.bf16.msra.mxu0 %v1182_v10  ;;  %735 = vmatmul.bf16.vlgmr.msrb.gmra.mxu2 %v805_v22 }
  0x43   :  { %721 = vmatmul.bf16.vlgmr.msrb.gmra.mxu1 %v801_v23 }
  0x44   :  { %749 = vmatmul.bf16.vlgmr.msrb.gmra.mxu3 %v809_v24 }
  0x46   :  { %756 = vmatpush.bf16.msra.mxu0 %v1181_v25 }
  0x4a   :  { %757 = vmatpush.bf16.msra.mxu0 %v1180_v26 }
  0x4e   :  { %758 = vmatpush.bf16.msra.mxu0 %v1179_v27 }
  0x52   :  { %759 = vmatpush.bf16.msra.mxu0 %v1178_v28 }
  0x56   :  { %760 = vmatpush.bf16.msra.mxu0 %v1177_v29 }
  0x5a   :  { %761 = vmatpush.bf16.msra.mxu0 %v1176_v30 }
  0x5e   :  { %762 = vmatpush.bf16.msra.mxu0 %v1175_v31 }
  0x61   :  { %763 = vmatmul.bf16.vlgmr.msra.gmra.mxu0 %v813_v34 }
  0x9e   :  { %v652_v35 = vpop.f32.mrf.mxu0 }
  0xa0   :  { %v666_v36 = vpop.f32.mrf.mxu1 }
  0xa1   :  { %v667_v40 = vadd.f32 %v666_v36, %v652_v35 }
  0xa5   :  { %v680_v37 = vpop.f32.mrf.mxu2 }
  0xa6   :  { %v654_v38 = vpop.f32.mrf.mxu0  ;;  %v681_v42 = vadd.f32 %v680_v37, %v667_v40 }
  0xa7   :  { %v694_v39 = vpop.f32.mrf.mxu3 }
  0xa8   :  { %v668_v41 = vpop.f32.mrf.mxu1  ;;  %v695_v45 = vadd.f32 %v694_v39, %v681_v42 }
  0xa9   :  { %v669_v47 = vadd.f32 %v668_v41, %v654_v38 }
  0xad   :  { %v682_v43 = vpop.f32.mrf.mxu2 }
  0xae   :  { %v683_v51 = vadd.f32 %v682_v43, %v669_v47 }
  0xaf   :  { %v696_v46 = vpop.f32.mrf.mxu3 }
  0xb0   :  { %v697_v55 = vadd.f32 %v696_v46, %v683_v51 }
  0xbe   :  { %v708_v44 = vpop.f32.mrf.mxu0 }
  0xbf   :  { %v709_v48 = vadd.f32 %v708_v44, %v695_v45 }
  0xc0   :  { %v722_v49 = vpop.f32.mrf.mxu1 }
  0xc1   :  { %v723_v52 = vadd.f32 %v722_v49, %v709_v48 }
  0xc5   :  { %v736_v50 = vpop.f32.mrf.mxu2 }
  0xc6   :  { %v710_v53 = vpop.f32.mrf.mxu0  ;;  %v737_v56 = vadd.f32 %v736_v50, %v723_v52 }
  0xc7   :  { %v750_v54 = vpop.f32.mrf.mxu3  ;;  %v711_v57 = vadd.f32 %v710_v53, %v697_v55 }
  0xc8   :  { %v724_v58 = vpop.f32.mrf.mxu1  ;;  %v751_v59 = vadd.f32 %v750_v54, %v737_v56 }
  0xc9   :  { %v725_v62 = vadd.f32 %v724_v58, %v711_v57 }
  0xcd   :  { %v738_v60 = vpop.f32.mrf.mxu2 }
  0xce   :  { %v739_v0 = vadd.f32 %v738_v60, %v725_v62 }
  0xcf   :  { %v752_v2 = vpop.f32.mrf.mxu3 }
  0xd0   :  { %v753_v3 = vadd.f32 %v752_v2, %v739_v0 }
  0xde   :  { %v764_v61 = vpop.f32.mrf.mxu0 }
  0xdf   :  { %v765_v63 = vadd.f32 %v764_v61, %v751_v59 }
  0xe1   :  { %v769_v1 = vpack.c.bf16 %v765_v63, %v765_v63 }
  0xe3   :  { %772 = vst.msk [vmem:[%s1476_s2] sm:$0xf] %vm771_vm0, %v769_v1 }
  0xe6   :  { %v766_v4 = vpop.f32.mrf.mxu0 }
  0xe7   :  { %v767_v5 = vadd.f32 %v766_v4, %v753_v3 }
  0xe9   :  { %v770_v6 = vpack.c.bf16 %v767_v5, %v767_v5 }
  0xeb   :  { %773 = vst.msk [vmem:[%s1476_s2 + $0x4] sm:$0xf] %vm771_vm0, %v770_v6 }

// kernel: _forward_impl.420
= control target key start
LH: loop header
LB: loop body
LE: loop exit
PB: predicated region body
PF: predicated region fallthrough
CT: control target
= control target key end

     0   :  { %vm16_vm0 = vcmask 1041408   ;;  %s100_s0 = inlined_call_operand.vmem [shape: bf16[2,128], index: 0, kind: input, shape index: {}]   ;;  %s101_s1 = inlined_call_operand.vmem [shape: f32[1,128], index: 1, kind: input, shape index: {}]   ;;  %s102_s2 = inlined_call_operand.vmem [shape: f32[1,128], index: 2, kind: input, shape index: {}]   ;;  %s103_s3 = inlined_call_operand.vmem [shape: bf16[2,128], index: 3, kind: output, shape index: {}]  }
   0x1   :  { %v14_v0 = vld [vmem:[%s100_s0] sm:$0x1] }
   0x2   :  { %v15_v1 = vunpack.c.l.bf16 %v14_v0  ;;  %v64_v27 = vld [vmem:[%s101_s1] ss:$0 sm:$0xff] }
   0x3   :  { %v65_v30 = vld [vmem:[%s102_s2] ss:$0 sm:$0xff] }
   0x4   :  { %v17_v2 = vsel %vm16_vm0, %v15_v1, 0.0 }
   0x5   :  { %v18_v3 = vrot.slane %v17_v2, 4 }
   0x7   :  { %v19_v4 = vadd.f32 %v18_v3, %v17_v2 }
   0x9   :  { %v20_v5 = vrot.slane %v19_v4, 2 }
   0xb   :  { %v21_v6 = vadd.f32 %v20_v5, %v19_v4 }
   0xd   :  { %v22_v7 = vrot.slane %v21_v6, 1 }
   0xf   :  { %v23_v8 = vadd.f32 %v22_v7, %v21_v6 }
  0x11   :  { %v24_v9 = vmul.f32 0.5, %v23_v8 }
  0x13   :  { %v25_v10 = vsub.f32 %v15_v1, %v24_v9 }
  0x15   :  { %v26_v11 = vmul.f32 %v25_v10, %v25_v10 }
  0x17   :  { %v27_v12 = vsel %vm16_vm0, %v26_v11, 0.0 }
  0x18   :  { %v28_v13 = vrot.slane %v27_v12, 4 }
  0x1a   :  { %v29_v14 = vadd.f32 %v28_v13, %v27_v12 }
  0x1c   :  { %v30_v15 = vrot.slane %v29_v14, 2 }
  0x1e   :  { %v31_v16 = vadd.f32 %v30_v15, %v29_v14 }
  0x20   :  { %v32_v17 = vrot.slane %v31_v16, 1 }
  0x22   :  { %v33_v18 = vadd.f32 %v32_v17, %v31_v16 }
  0x24   :  { %v34_v19 = vmul.f32 0.5, %v33_v18 }
  0x26   :  { %v35_v20 = vadd.f32 1e-05, %v34_v19 }
  0x28   :  { %66 = vrsqrt.f32 %v35_v20  ;;  %vm42_vm1 = vweird.f32 %v35_v20 }
  0x2e   :  { %v67_v21 = vpop.eup %66 }
  0x2f   :  { %v37_v22 = vmul.f32 %v67_v21, %v35_v20  ;;  %vm43_vm2 = vweird.f32 %v67_v21 }
  0x30   :  { %vm44_vm3 = vmor %vm42_vm1, %vm43_vm2 }
  0x31   :  { %v38_v23 = vmul.f32 %v67_v21, %v37_v22 }
  0x33   :  { %v39_v24 = vmul.f32 0.5, %v38_v23 }
  0x35   :  { %v40_v25 = vsub.f32 1.5, %v39_v24 }
  0x37   :  { %v41_v26 = vmul.f32 %v67_v21, %v40_v25 }
  0x39   :  { %v45_v28 = vsel %vm44_vm3, %v67_v21, %v41_v26 }
  0x3a   :  { %v46_v29 = vmul.f32 %v45_v28, %v25_v10 }
  0x3c   :  { %v51_v31 = vmul.f32 %v64_v27, %v46_v29 }
  0x3e   :  { %v56_v32 = vadd.f32 %v65_v30, %v51_v31 }
  0x40   :  { %v57_v33 = vmax.f32 %v56_v32, 0.0 }
  0x42   :  { %v58_v34 = vpack.c.bf16 %v57_v33, %v57_v33 }
  0x44   :  { %59 = vst [vmem:[%s103_s3] sm:$0x1] %v58_v34 }

// kernel: _forward_impl.418
= control target key start
LH: loop header
LB: loop body
LE: loop exit
PB: predicated region body
PF: predicated region fallthrough
CT: control target
= control target key end

     0   :  { %s542_s12 = smov 0   ;;  %s610_s0 = inlined_call_operand.vmem [shape: bf16[2,1024], index: 0, kind: input, shape index: {}]   ;;  %s611_s1 = inlined_call_operand.vmem [shape: f32[1,1024], index: 1, kind: input, shape index: {}]   ;;  %s612_s2 = inlined_call_operand.vmem [shape: f32[1,1024], index: 2, kind: input, shape index: {}]   ;;  %s613_s3 = inlined_call_operand.vmem [shape: bf16[2,1024], index: 3, kind: output, shape index: {}]  }
   0x1 LB: > { %s487_s13 = sadd.s32 4294967295, %s520_s12   ;;  %p491_p0 = scmp.ge.s32.totalorder %s520_s12, 1  ;;  %s520_s12 = sphi %s542_s12, %s13_s12  }
   0x2   : > { %p157_p1 = scmp.lt.s32.totalorder %s520_s12, 3 }
   0x4   : > { %p158_p2 = pnand %p491_p0, %p157_p1 }
   0x5   : > { %s492_s14 = sshll.u32 (!%p158_p2), %s487_s13, 2 }
   0x6   : > { %161 = sbr.rel (%p158_p2) target bundleno = 123 (0x7b), region = 32  ;;  %p188_p3 = scmp.lt.s32.totalorder (!%p158_p2), %s492_s14, 7 }
   0xb   : > { %s617_s14 = smov (!%p188_p3, %s492_s14), 7  ;;  %vm219_vm0 = vcmask 1041408   ;;  %vm260_vm1 = vcmask 1045508   ;;  %vm262_vm2 = vcmask 1043456   ;;  %vm411_vm15 = vcmask 1040384  }
   0xc   : > { %s190_s17 = scalar_lea.vmem %s610_s0, %s617_s14  ;;  %s195_s20 = scalar_lea.vmem %s611_s1, %s617_s14 }
   0xd   : > { %v207_v0 = vld [vmem:[%s190_s17] sm:$0xf]  ;;  %s200_s23 = scalar_lea.vmem %s612_s2, %s617_s14  ;;  %s205_s26 = scalar_lea.vmem %s613_s3, %s617_s14 }
   0xe   : > { %v208_v1 = vunpack.c.l.bf16 %v207_v0 }
  0x10   : > { %210 = vst [vmem:[#allocation1] ss:$4 sm:$0xff] %v208_v1 }
  0x17   : > { %v211_v2 = vld.sshfl [vmem:[#allocation1] sm:$0xff pattern:$0x73625140]  ;;  %v212_v3 = vld.sshfl [vmem:[#allocation1 + $0x8] sm:$0xff pattern:$0x73625140] }
  0x18   : > { %v213_v4 = vld.sshfl [vmem:[#allocation1 + $0x10] sm:$0xff pattern:$0x73625140]  ;;  %v214_v5 = vld.sshfl [vmem:[#allocation1 + $0x18] sm:$0xff pattern:$0x73625140] }
  0x19   : > { %v220_v6 = vsel %vm219_vm0, %v211_v2, 0.0  ;;  %v227_v7 = vsel %vm219_vm0, %v212_v3, 0.0  ;;  %v234_v8 = vsel %vm219_vm0, %v213_v4, 0.0  ;;  %v241_v9 = vsel %vm219_vm0, %v214_v5, 0.0 }
  0x1a   : > { %v221_v10 = vrot.slane %v220_v6, 4  ;;  %v228_v11 = vrot.slane %v227_v7, 4  ;;  %v235_v12 = vrot.slane %v234_v8, 4  ;;  %v242_v13 = vrot.slane %v241_v9, 4 }
  0x1c   : > { %v222_v14 = vadd.f32 %v221_v10, %v220_v6  ;;  %v229_v15 = vadd.f32 %v228_v11, %v227_v7  ;;  %v236_v16 = vadd.f32 %v235_v12, %v234_v8  ;;  %v243_v17 = vadd.f32 %v242_v13, %v241_v9 }
  0x1e   : > { %v223_v18 = vrot.slane %v222_v14, 2  ;;  %v230_v19 = vrot.slane %v229_v15, 2  ;;  %v237_v20 = vrot.slane %v236_v16, 2  ;;  %v244_v21 = vrot.slane %v243_v17, 2 }
  0x20   : > { %v224_v22 = vadd.f32 %v223_v18, %v222_v14  ;;  %v231_v23 = vadd.f32 %v230_v19, %v229_v15  ;;  %v238_v24 = vadd.f32 %v237_v20, %v236_v16  ;;  %v245_v25 = vadd.f32 %v244_v21, %v243_v17 }
  0x22   : > { %v225_v26 = vrot.slane %v224_v22, 1  ;;  %v232_v27 = vrot.slane %v231_v23, 1  ;;  %v239_v28 = vrot.slane %v238_v24, 1  ;;  %v246_v29 = vrot.slane %v245_v25, 1 }
  0x24   : > { %v226_v30 = vadd.f32 %v225_v26, %v224_v22  ;;  %v233_v31 = vadd.f32 %v232_v27, %v231_v23  ;;  %v240_v32 = vadd.f32 %v239_v28, %v238_v24  ;;  %v247_v33 = vadd.f32 %v246_v29, %v245_v25  ;;  %v365_v24 = vld [vmem:[%s195_s20] sm:$0xf] }
  0x25   : > { %v367_v29 = vperm.slane %v365_v24, 0 }
  0x26   : > { %v249_v34 = vmul.f32 0.5, %v233_v31  ;;  %v250_v35 = vmul.f32 0.5, %v240_v32  ;;  %v251_v36 = vmul.f32 0.5, %v247_v33  ;;  %v248_v37 = vmul.f32 0.5, %v226_v30  ;;  %v379_v30 = vld [vmem:[%s200_s23] sm:$0xf] }
  0x27   : > { %v368_v33 = vperm.slane %v365_v24, 1 }
  0x28   : > { %v256_v38 = vrot.slane %v249_v34, 6  ;;  %v257_v39 = vrot.slane %v250_v35, 4  ;;  %v258_v40 = vrot.slane %v251_v36, 2  ;;  %v369_v34 = vperm.slane %v365_v24, 2 }
  0x2a   : > { %v259_v41 = vsel %vm219_vm0, %v248_v37, %v256_v38  ;;  %v261_v42 = vsel %vm260_vm1, %v257_v39, %v258_v40  ;;  %v370_v37 = vperm.slane %v365_v24, 3  ;;  %v381_v38 = vperm.slane %v379_v30, 0 }
  0x2b   : > { %v263_v43 = vsel %vm262_vm2, %v259_v41, %v261_v42  ;;  %v382_v41 = vperm.slane %v379_v30, 1  ;;  %v383_v42 = vperm.slane %v379_v30, 2 }
  0x2c   : > { %v563_v44 = vsub.f32 %v208_v1, %v263_v43 }
  0x2e   : > { %v266_v45 = vmul.f32 %v563_v44, %v563_v44 }
  0x30   : > { %268 = vst [vmem:[#allocation1] ss:$4 sm:$0xff] %v266_v45 }
  0x37   : > { %v269_v46 = vld.sshfl [vmem:[#allocation1] sm:$0xff pattern:$0x73625140]  ;;  %v270_v47 = vld.sshfl [vmem:[#allocation1 + $0x8] sm:$0xff pattern:$0x73625140] }
  0x38   : > { %v271_v48 = vld.sshfl [vmem:[#allocation1 + $0x10] sm:$0xff pattern:$0x73625140]  ;;  %v272_v49 = vld.sshfl [vmem:[#allocation1 + $0x18] sm:$0xff pattern:$0x73625140] }
  0x39   : > { %v277_v50 = vsel %vm219_vm0, %v269_v46, 0.0  ;;  %v284_v51 = vsel %vm219_vm0, %v270_v47, 0.0  ;;  %v291_v52 = vsel %vm219_vm0, %v271_v48, 0.0  ;;  %v298_v53 = vsel %vm219_vm0, %v272_v49, 0.0 }
  0x3a   : > { %v278_v54 = vrot.slane %v277_v50, 4  ;;  %v285_v55 = vrot.slane %v284_v51, 4  ;;  %v292_v56 = vrot.slane %v291_v52, 4  ;;  %v299_v57 = vrot.slane %v298_v53, 4 }
  0x3b   : > { %v384_v46 = vperm.slane %v379_v30, 3  ;;  %v371_v49 = vrot.slane %v368_v33, 6 }
  0x3c   : > { %v279_v58 = vadd.f32 %v278_v54, %v277_v50  ;;  %v286_v59 = vadd.f32 %v285_v55, %v284_v51  ;;  %v293_v60 = vadd.f32 %v292_v56, %v291_v52  ;;  %v300_v61 = vadd.f32 %v299_v57, %v298_v53 }
  0x3d   : > { %v372_v57 = vrot.slane %v369_v34, 4 }
  0x3e   : > { %v280_v62 = vrot.slane %v279_v58, 2  ;;  %v287_v63 = vrot.slane %v286_v59, 2  ;;  %v294_v0 = vrot.slane %v293_v60, 2  ;;  %v301_v1 = vrot.slane %v300_v61, 2 }
  0x40   : > { %v281_v2 = vadd.f32 %v280_v62, %v279_v58  ;;  %v288_v3 = vadd.f32 %v287_v63, %v286_v59  ;;  %v295_v4 = vadd.f32 %v294_v0, %v293_v60  ;;  %v302_v5 = vadd.f32 %v301_v1, %v300_v61 }
  0x41   : > { %v373_v58 = vrot.slane %v370_v37, 2  ;;  %v385_v60 = vrot.slane %v382_v41, 6  ;;  %v386_v63 = vrot.slane %v383_v42, 4  ;;  %v387_v0 = vrot.slane %v384_v46, 2 }
  0x42   : > { %v282_v6 = vrot.slane %v281_v2, 1  ;;  %v289_v7 = vrot.slane %v288_v3, 1  ;;  %v296_v8 = vrot.slane %v295_v4, 1  ;;  %v303_v9 = vrot.slane %v302_v5, 1 }
  0x44   : > { %v283_v10 = vadd.f32 %v282_v6, %v281_v2  ;;  %v290_v11 = vadd.f32 %v289_v7, %v288_v3  ;;  %v297_v12 = vadd.f32 %v296_v8, %v295_v4  ;;  %v304_v13 = vadd.f32 %v303_v9, %v302_v5 }
  0x45   : > { %v374_v6 = vsel %vm219_vm0, %v367_v29, %v371_v49  ;;  %v375_v7 = vsel %vm260_vm1, %v372_v57, %v373_v58 }
  0x46   : > { %v305_v14 = vmul.f32 0.5, %v283_v10  ;;  %v306_v15 = vmul.f32 0.5, %v290_v11  ;;  %v307_v16 = vmul.f32 0.5, %v297_v12  ;;  %v308_v17 = vmul.f32 0.5, %v304_v13 }
  0x47   : > { %v388_v10 = vsel %vm219_vm0, %v381_v38, %v385_v60  ;;  %v389_v11 = vsel %vm260_vm1, %v386_v63, %v387_v0  ;;  %v376_v13 = vsel %vm262_vm2, %v374_v6, %v375_v7 }
  0x48   : > { %v309_v18 = vadd.f32 1e-05, %v305_v14  ;;  %v310_v19 = vadd.f32 1e-05, %v306_v15  ;;  %v311_v20 = vadd.f32 1e-05, %v307_v16  ;;  %v390_v16 = vsel %vm262_vm2, %v388_v10, %v389_v11 }
  0x49   : > { %v312_v21 = vadd.f32 1e-05, %v308_v17 }
  0x4a   : > { %506 = vrsqrt.f32 %v309_v18  ;;  %vm319_vm5 = vweird.f32 %v309_v18  ;;  %vm329_vm6 = vweird.f32 %v310_v19  ;;  %vm339_vm11 = vweird.f32 %v311_v20 }
  0x4b   : > { %508 = vrsqrt.f32 %v310_v19  ;;  %vm349_vm13 = vweird.f32 %v312_v21 }
  0x4c   : > { %510 = vrsqrt.f32 %v311_v20 }
  0x4d   : > { %512 = vrsqrt.f32 %v312_v21 }
  0x50   : > { %v575_v22 = vpop.eup %506 }
  0x51   : > { %v509_v23 = vpop.eup %508  ;;  %v314_v25 = vmul.f32 %v575_v22, %v309_v18  ;;  %vm320_vm3 = vweird.f32 %v575_v22 }
  0x52   : > { %v511_v26 = vpop.eup %510  ;;  %v324_v27 = vmul.f32 %v509_v23, %v310_v19  ;;  %vm330_vm4 = vweird.f32 %v509_v23  ;;  %vm585_vm8 = vmor %vm319_vm5, %vm320_vm3 }
  0x53   : > { %v513_v28 = vpop.eup %512  ;;  %v315_v31 = vmul.f32 %v575_v22, %v314_v25  ;;  %v334_v32 = vmul.f32 %v511_v26, %v311_v20  ;;  %vm340_vm7 = vweird.f32 %v511_v26  ;;  %vm331_vm10 = vmor %vm329_vm6, %vm330_vm4 }
  0x54   : > { %v325_v35 = vmul.f32 %v509_v23, %v324_v27  ;;  %v344_v36 = vmul.f32 %v513_v28, %v312_v21  ;;  %vm350_vm9 = vweird.f32 %v513_v28  ;;  %vm341_vm12 = vmor %vm339_vm11, %vm340_vm7 }
  0x55   : > { %v316_v39 = vmul.f32 0.5, %v315_v31  ;;  %v335_v40 = vmul.f32 %v511_v26, %v334_v32  ;;  %vm351_vm14 = vmor %vm349_vm13, %vm350_vm9 }
  0x56   : > { %v326_v43 = vmul.f32 0.5, %v325_v35  ;;  %v345_v45 = vmul.f32 %v513_v28, %v344_v36 }
  0x57   : > { %v317_v47 = vsub.f32 1.5, %v316_v39  ;;  %v336_v48 = vmul.f32 0.5, %v335_v40 }
  0x58   : > { %v327_v50 = vsub.f32 1.5, %v326_v43  ;;  %v346_v51 = vmul.f32 0.5, %v345_v45 }
  0x59   : > { %v337_v52 = vsub.f32 1.5, %v336_v48  ;;  %v318_v53 = vmul.f32 %v575_v22, %v317_v47 }
  0x5a   : > { %v328_v55 = vmul.f32 %v509_v23, %v327_v50  ;;  %v347_v56 = vsub.f32 1.5, %v346_v51 }
  0x5b   : > { %v338_v59 = vmul.f32 %v511_v26, %v337_v52  ;;  %v322_v3 = vsel %vm585_vm8, %v575_v22, %v318_v53 }
  0x5c   : > { %v332_v61 = vsel %vm331_vm10, %v509_v23, %v328_v55  ;;  %v348_v62 = vmul.f32 %v513_v28, %v347_v56 }
  0x5d   : > { %v342_v1 = vsel %vm341_vm12, %v511_v26, %v338_v59  ;;  %v357_v2 = vrot.slane %v332_v61, 6 }
  0x5e   : > { %v352_v4 = vsel %vm351_vm14, %v513_v28, %v348_v62  ;;  %v358_v5 = vrot.slane %v342_v1, 4 }
  0x5f   : > { %v359_v8 = vrot.slane %v352_v4, 2  ;;  %v360_v9 = vsel %vm219_vm0, %v322_v3, %v357_v2 }
  0x61   : > { %v361_v12 = vsel %vm260_vm1, %v358_v5, %v359_v8  ;;  %vm415_vm1 = vcmask 1042434  }
  0x62   : > { %v362_v14 = vsel %vm262_vm2, %v360_v9, %v361_v12 }
  0x63   : > { %v364_v15 = vmul.f32 %v362_v14, %v563_v44 }
  0x65   : > { %v378_v17 = vmul.f32 %v376_v13, %v364_v15 }
  0x67   : > { %v392_v18 = vadd.f32 %v390_v16, %v378_v17 }
  0x69   : > { %v393_v19 = vmax.f32 %v392_v18, 0.0 }
  0x6b   : > { %395 = vst [vmem:[#allocation1] ss:$4 sm:$0xff] %v393_v19 }
  0x72   : > { %v396_v20 = vld.sshfl [vmem:[#allocation1] sm:$0xff pattern:$0x73625140]  ;;  %v397_v21 = vld.sshfl [vmem:[#allocation1 + $0x8] sm:$0xff pattern:$0x73625140] }
  0x73   : > { %v398_v22 = vld.sshfl [vmem:[#allocation1 + $0x10] sm:$0xff pattern:$0x73625140]  ;;  %v399_v23 = vld.sshfl [vmem:[#allocation1 + $0x18] sm:$0xff pattern:$0x73625140]  ;;  %v404_v24 = vpack.c.bf16 %v397_v21, %v396_v20 }
  0x74   : > { %v405_v25 = vpack.c.bf16 %v399_v23, %v398_v22 }
  0x75   : > { %v408_v26 = vrot.slane %v404_v24, 3 }
  0x76   : > { %v409_v27 = vrot.slane %v405_v25, 6  ;;  %v410_v28 = vrot.slane %v405_v25, 1 }
  0x77   : > { %v414_v44 = vsel %vm411_vm15, %v404_v24, %v408_v26 }
  0x78   : > { %v418_v29 = vsel %vm415_vm1, %v409_v27, %v410_v28 }
  0x79   : > { %v419_v30 = vsel %vm219_vm0, %v414_v44, %v418_v29 }
  0x7a   : > { %421 = vst [vmem:[%s205_s26] sm:$0xf] %v419_v30 }
  0x7b PF: > { %s13_s12 = sadd.s32 1, %s520_s12  }
  0x7c   : > { %p10_p4 = scmp.ge.s32.totalorder %s13_s12, 4  }
  0x7e   :  { %12 = sbr.rel (!%p10_p4) target bundleno = 1 (0x1), region = 68 }

// kernel: _forward_impl.417
= control target key start
LH: loop header
LB: loop body
LE: loop exit
PB: predicated region body
PF: predicated region fallthrough
CT: control target
= control target key end

     0   :  { %s2694_s9 = smov 0   ;;  %s2696_s10 = smov 0   ;;  %s3368_s0 = inlined_call_operand.vmem [shape: bf16[16,1024], index: 0, kind: input, shape index: {}]   ;;  %s3369_s1 = inlined_call_operand.vmem [shape: bf16[1024,512], index: 1, kind: input, shape index: {}]   ;;  %s3370_s2 = inlined_call_operand.vmem [shape: bf16[16,512], index: 2, kind: output, shape index: {}]  }
   0x1   :  { %s2698_s11 = smov 0   ;;  %s2700_s12 = smov 0  }
   0x2   :  { %s2702_s13 = smov 0  }
   0x3 LB: > { %s21_s14 = sadd.s32 1, %s2673_s12  ;;  %s1901_s15 = sadd.s32 4294967295, %s2677_s13   ;;  %s2677_s13 = sphi %s2702_s13, %s12_s13   ;;  %s2673_s12 = sphi %s2700_s12, %s3375_s12   ;;  %s2669_s11 = sphi %s2698_s11, %s3374_s11   ;;  %s2665_s10 = sphi %s2696_s10, %s3373_s10   ;;  %s2661_s9 = sphi %s2694_s9, %s3372_s9  }
   0x4   : > { %p22_p0 = scmp.ge.s32.totalorder %s21_s14, 2  ;;  %p64_p1 = scmp.ne.s32.totalorder %s2665_s10, %s2661_s9 }
   0x5   : > { %p65_p2 = scmp.eq.s32.totalorder %s2677_s13, 0  ;;  %p96_p4 = scmp.eq.s32.totalorder %s1901_s15, 1 }
   0x6   : > { %s3377_s14 = smov (%p22_p0, %s21_s14), 0  ;;  %s57_s17 = sadd.s32 1, %s2665_s10 }
   0x7   : > { %p66_p3 = por %p65_p2, %p64_p1  ;;  %s54_s16 = ssub.s32 %s2673_s12, %s3377_s14 }
   0x8   : > { %p55_p5 = scmp.eq.s32.totalorder %s54_s16, 0  ;;  %p2729_p6 = por %p96_p4, %p64_p1 }
   0x9   : > { %p1905_p7 = scmp.ge.s32.totalorder %s2677_s13, 2 }
   0xa   : > { %s2734_s19 = scalar_select %p55_p5, %s2665_s10, %s57_s17  }
   0xb   : > { %128 = sbr.rel (%p1905_p7) target bundleno = 148 (0x94), region = 20 }
  0x10   : > { %131 = sbr.rel (!%p66_p3) target bundleno = 148 (0x94), region = 24  ;;  %s133_s20 = sand.u32 (%p66_p3), 1, %s2665_s10  }
  0x11   : > { %s2461_s21 = sshll.u32 (%p66_p3), %s2673_s12, 3  ;;  %s1906_s22 = sshll.u32 (%p66_p3), %s133_s20, 10 }
  0x12   : > { %s2742_s25 = scalar_lea.vmem (%p66_p3), %s3369_s1, %s2461_s21  ;;  %s2747_s26 = scalar_lea.vmem (%p66_p3), [#allocation2], %s1906_s22 }
  0x13   : > { %v421_v0 = vld [vmem:[%s2742_s25] sm:$0xff] (%p66_p3)  ;;  %v423_v1 = vld [vmem:[%s2742_s25 + $0x10] sm:$0xff] (%p66_p3) }
  0x14   : > { %v425_v2 = vld [vmem:[%s2742_s25 + $0x20] sm:$0xff] (%p66_p3)  ;;  %422 = vst [vmem:[%s2747_s26] sm:$0xff] (%p66_p3), %v421_v0  ;;  %v427_v3 = vld [vmem:[%s2742_s25 + $0x30] sm:$0xff] (%p66_p3) }
  0x15   : > { %424 = vst [vmem:[%s2747_s26 + $0x8] sm:$0xff] %v423_v1  ;;  %v429_v4 = vld [vmem:[%s2742_s25 + $0x40] sm:$0xff]  ;;  %v431_v5 = vld [vmem:[%s2742_s25 + $0x50] sm:$0xff] }
  0x16   : > { %426 = vst [vmem:[%s2747_s26 + $0x10] sm:$0xff] %v425_v2  ;;  %v433_v6 = vld [vmem:[%s2742_s25 + $0x60] sm:$0xff]  ;;  %v435_v7 = vld [vmem:[%s2742_s25 + $0x70] sm:$0xff] }
  0x17   : > { %428 = vst [vmem:[%s2747_s26 + $0x18] sm:$0xff] %v427_v3  ;;  %v437_v8 = vld [vmem:[%s2742_s25 + $0x80] sm:$0xff]  ;;  %v439_v9 = vld [vmem:[%s2742_s25 + $0x90] sm:$0xff] }
  0x18   : > { %430 = vst [vmem:[%s2747_s26 + $0x20] sm:$0xff] %v429_v4  ;;  %v441_v10 = vld [vmem:[%s2742_s25 + $0xa0] sm:$0xff]  ;;  %v443_v11 = vld [vmem:[%s2742_s25 + $0xb0] sm:$0xff] }
  0x19   : > { %432 = vst [vmem:[%s2747_s26 + $0x28] sm:$0xff] %v431_v5  ;;  %v445_v12 = vld [vmem:[%s2742_s25 + $0xc0] sm:$0xff]  ;;  %v447_v13 = vld [vmem:[%s2742_s25 + $0xd0] sm:$0xff] }
  0x1a   : > { %434 = vst [vmem:[%s2747_s26 + $0x30] sm:$0xff] %v433_v6  ;;  %v449_v14 = vld [vmem:[%s2742_s25 + $0xe0] sm:$0xff]  ;;  %v451_v15 = vld [vmem:[%s2742_s25 + $0xf0] sm:$0xff] }
  0x1b   : > { %436 = vst [vmem:[%s2747_s26 + $0x38] sm:$0xff] %v435_v7  ;;  %v453_v16 = vld [vmem:[%s2742_s25 + $0x100] sm:$0xff]  ;;  %v455_v17 = vld [vmem:[%s2742_s25 + $0x110] sm:$0xff] }
  0x1c   : > { %438 = vst [vmem:[%s2747_s26 + $0x40] sm:$0xff] %v437_v8  ;;  %v457_v18 = vld [vmem:[%s2742_s25 + $0x120] sm:$0xff]  ;;  %v459_v19 = vld [vmem:[%s2742_s25 + $0x130] sm:$0xff] }
  0x1d   : > { %440 = vst [vmem:[%s2747_s26 + $0x48] sm:$0xff] %v439_v9  ;;  %v461_v20 = vld [vmem:[%s2742_s25 + $0x140] sm:$0xff]  ;;  %v463_v21 = vld [vmem:[%s2742_s25 + $0x150] sm:$0xff] }
  0x1e   : > { %442 = vst [vmem:[%s2747_s26 + $0x50] sm:$0xff] %v441_v10  ;;  %v465_v22 = vld [vmem:[%s2742_s25 + $0x160] sm:$0xff]  ;;  %v467_v23 = vld [vmem:[%s2742_s25 + $0x170] sm:$0xff] }
  0x1f   : > { %444 = vst [vmem:[%s2747_s26 + $0x58] sm:$0xff] %v443_v11  ;;  %v469_v24 = vld [vmem:[%s2742_s25 + $0x180] sm:$0xff]  ;;  %v471_v25 = vld [vmem:[%s2742_s25 + $0x190] sm:$0xff] }
  0x20   : > { %446 = vst [vmem:[%s2747_s26 + $0x60] sm:$0xff] %v445_v12  ;;  %v473_v26 = vld [vmem:[%s2742_s25 + $0x1a0] sm:$0xff]  ;;  %v475_v27 = vld [vmem:[%s2742_s25 + $0x1b0] sm:$0xff] }
  0x21   : > { %448 = vst [vmem:[%s2747_s26 + $0x68] sm:$0xff] %v447_v13  ;;  %v477_v28 = vld [vmem:[%s2742_s25 + $0x1c0] sm:$0xff]  ;;  %v479_v29 = vld [vmem:[%s2742_s25 + $0x1d0] sm:$0xff] }
  0x22   : > { %450 = vst [vmem:[%s2747_s26 + $0x70] sm:$0xff] %v449_v14  ;;  %v481_v30 = vld [vmem:[%s2742_s25 + $0x1e0] sm:$0xff]  ;;  %v483_v31 = vld [vmem:[%s2742_s25 + $0x1f0] sm:$0xff] }
  0x23   : > { %452 = vst [vmem:[%s2747_s26 + $0x78] sm:$0xff] %v451_v15  ;;  %v485_v32 = vld [vmem:[%s2742_s25 + $0x200] sm:$0xff]  ;;  %v487_v33 = vld [vmem:[%s2742_s25 + $0x210] sm:$0xff] }
  0x24   : > { %454 = vst [vmem:[%s2747_s26 + $0x80] sm:$0xff] %v453_v16  ;;  %v489_v34 = vld [vmem:[%s2742_s25 + $0x220] sm:$0xff]  ;;  %v491_v35 = vld [vmem:[%s2742_s25 + $0x230] sm:$0xff] }
  0x25   : > { %456 = vst [vmem:[%s2747_s26 + $0x88] sm:$0xff] %v455_v17  ;;  %v493_v36 = vld [vmem:[%s2742_s25 + $0x240] sm:$0xff]  ;;  %v495_v37 = vld [vmem:[%s2742_s25 + $0x250] sm:$0xff] }
  0x26   : > { %458 = vst [vmem:[%s2747_s26 + $0x90] sm:$0xff] %v457_v18  ;;  %v497_v38 = vld [vmem:[%s2742_s25 + $0x260] sm:$0xff]  ;;  %v499_v39 = vld [vmem:[%s2742_s25 + $0x270] sm:$0xff] }
  0x27   : > { %460 = vst [vmem:[%s2747_s26 + $0x98] sm:$0xff] %v459_v19  ;;  %v501_v40 = vld [vmem:[%s2742_s25 + $0x280] sm:$0xff]  ;;  %v503_v41 = vld [vmem:[%s2742_s25 + $0x290] sm:$0xff] }
  0x28   : > { %462 = vst [vmem:[%s2747_s26 + $0xa0] sm:$0xff] %v461_v20  ;;  %v505_v42 = vld [vmem:[%s2742_s25 + $0x2a0] sm:$0xff]  ;;  %v507_v43 = vld [vmem:[%s2742_s25 + $0x2b0] sm:$0xff] }
  0x29   : > { %464 = vst [vmem:[%s2747_s26 + $0xa8] sm:$0xff] %v463_v21  ;;  %v509_v44 = vld [vmem:[%s2742_s25 + $0x2c0] sm:$0xff]  ;;  %v511_v45 = vld [vmem:[%s2742_s25 + $0x2d0] sm:$0xff] }
  0x2a   : > { %466 = vst [vmem:[%s2747_s26 + $0xb0] sm:$0xff] %v465_v22  ;;  %v513_v46 = vld [vmem:[%s2742_s25 + $0x2e0] sm:$0xff]  ;;  %v515_v47 = vld [vmem:[%s2742_s25 + $0x2f0] sm:$0xff] }
  0x2b   : > { %468 = vst [vmem:[%s2747_s26 + $0xb8] sm:$0xff] %v467_v23  ;;  %v517_v48 = vld [vmem:[%s2742_s25 + $0x300] sm:$0xff]  ;;  %v519_v49 = vld [vmem:[%s2742_s25 + $0x310] sm:$0xff] }
  0x2c   : > { %470 = vst [vmem:[%s2747_s26 + $0xc0] sm:$0xff] %v469_v24  ;;  %v521_v50 = vld [vmem:[%s2742_s25 + $0x320] sm:$0xff]  ;;  %v523_v51 = vld [vmem:[%s2742_s25 + $0x330] sm:$0xff] }
  0x2d   : > { %472 = vst [vmem:[%s2747_s26 + $0xc8] sm:$0xff] %v471_v25  ;;  %v525_v52 = vld [vmem:[%s2742_s25 + $0x340] sm:$0xff]  ;;  %v527_v53 = vld [vmem:[%s2742_s25 + $0x350] sm:$0xff] }
  0x2e   : > { %474 = vst [vmem:[%s2747_s26 + $0xd0] sm:$0xff] %v473_v26  ;;  %v529_v54 = vld [vmem:[%s2742_s25 + $0x360] sm:$0xff]  ;;  %v531_v55 = vld [vmem:[%s2742_s25 + $0x370] sm:$0xff] }
  0x2f   : > { %476 = vst [vmem:[%s2747_s26 + $0xd8] sm:$0xff] %v475_v27  ;;  %v533_v56 = vld [vmem:[%s2742_s25 + $0x380] sm:$0xff]  ;;  %v535_v57 = vld [vmem:[%s2742_s25 + $0x390] sm:$0xff] }
  0x30   : > { %478 = vst [vmem:[%s2747_s26 + $0xe0] sm:$0xff] %v477_v28  ;;  %v537_v58 = vld [vmem:[%s2742_s25 + $0x3a0] sm:$0xff]  ;;  %v539_v59 = vld [vmem:[%s2742_s25 + $0x3b0] sm:$0xff] }
  0x31   : > { %480 = vst [vmem:[%s2747_s26 + $0xe8] sm:$0xff] %v479_v29  ;;  %v541_v60 = vld [vmem:[%s2742_s25 + $0x3c0] sm:$0xff]  ;;  %v543_v61 = vld [vmem:[%s2742_s25 + $0x3d0] sm:$0xff] }
  0x32   : > { %482 = vst [vmem:[%s2747_s26 + $0xf0] sm:$0xff] %v481_v30  ;;  %v545_v62 = vld [vmem:[%s2742_s25 + $0x3e0] sm:$0xff]  ;;  %v547_v63 = vld [vmem:[%s2742_s25 + $0x3f0] sm:$0xff] }
  0x33   : > { %484 = vst [vmem:[%s2747_s26 + $0xf8] sm:$0xff] %v483_v31  ;;  %v549_v0 = vld [vmem:[%s2742_s25 + $0x400] sm:$0xff]  ;;  %v551_v1 = vld [vmem:[%s2742_s25 + $0x410] sm:$0xff] }
  0x34   : > { %486 = vst [vmem:[%s2747_s26 + $0x100] sm:$0xff] %v485_v32  ;;  %v553_v2 = vld [vmem:[%s2742_s25 + $0x420] sm:$0xff]  ;;  %v555_v3 = vld [vmem:[%s2742_s25 + $0x430] sm:$0xff] }
  0x35   : > { %488 = vst [vmem:[%s2747_s26 + $0x108] sm:$0xff] %v487_v33  ;;  %v557_v4 = vld [vmem:[%s2742_s25 + $0x440] sm:$0xff]  ;;  %v559_v5 = vld [vmem:[%s2742_s25 + $0x450] sm:$0xff] }
  0x36   : > { %490 = vst [vmem:[%s2747_s26 + $0x110] sm:$0xff] %v489_v34  ;;  %v561_v6 = vld [vmem:[%s2742_s25 + $0x460] sm:$0xff]  ;;  %v563_v7 = vld [vmem:[%s2742_s25 + $0x470] sm:$0xff] }
  0x37   : > { %492 = vst [vmem:[%s2747_s26 + $0x118] sm:$0xff] %v491_v35  ;;  %v565_v8 = vld [vmem:[%s2742_s25 + $0x480] sm:$0xff]  ;;  %v567_v9 = vld [vmem:[%s2742_s25 + $0x490] sm:$0xff] }
  0x38   : > { %494 = vst [vmem:[%s2747_s26 + $0x120] sm:$0xff] %v493_v36  ;;  %v569_v10 = vld [vmem:[%s2742_s25 + $0x4a0] sm:$0xff]  ;;  %v571_v11 = vld [vmem:[%s2742_s25 + $0x4b0] sm:$0xff] }
  0x39   : > { %496 = vst [vmem:[%s2747_s26 + $0x128] sm:$0xff] %v495_v37  ;;  %v573_v12 = vld [vmem:[%s2742_s25 + $0x4c0] sm:$0xff]  ;;  %v575_v13 = vld [vmem:[%s2742_s25 + $0x4d0] sm:$0xff] }
  0x3a   : > { %498 = vst [vmem:[%s2747_s26 + $0x130] sm:$0xff] %v497_v38  ;;  %v577_v14 = vld [vmem:[%s2742_s25 + $0x4e0] sm:$0xff]  ;;  %v579_v15 = vld [vmem:[%s2742_s25 + $0x4f0] sm:$0xff] }
  0x3b   : > { %500 = vst [vmem:[%s2747_s26 + $0x138] sm:$0xff] %v499_v39  ;;  %v581_v16 = vld [vmem:[%s2742_s25 + $0x500] sm:$0xff]  ;;  %v583_v17 = vld [vmem:[%s2742_s25 + $0x510] sm:$0xff] }
  0x3c   : > { %502 = vst [vmem:[%s2747_s26 + $0x140] sm:$0xff] %v501_v40  ;;  %v585_v18 = vld [vmem:[%s2742_s25 + $0x520] sm:$0xff]  ;;  %v587_v19 = vld [vmem:[%s2742_s25 + $0x530] sm:$0xff] }
  0x3d   : > { %504 = vst [vmem:[%s2747_s26 + $0x148] sm:$0xff] %v503_v41  ;;  %v589_v20 = vld [vmem:[%s2742_s25 + $0x540] sm:$0xff]  ;;  %v591_v21 = vld [vmem:[%s2742_s25 + $0x550] sm:$0xff] }
  0x3e   : > { %506 = vst [vmem:[%s2747_s26 + $0x150] sm:$0xff] %v505_v42  ;;  %v593_v22 = vld [vmem:[%s2742_s25 + $0x560] sm:$0xff]  ;;  %v595_v23 = vld [vmem:[%s2742_s25 + $0x570] sm:$0xff] }
  0x3f   : > { %508 = vst [vmem:[%s2747_s26 + $0x158] sm:$0xff] %v507_v43  ;;  %v597_v24 = vld [vmem:[%s2742_s25 + $0x580] sm:$0xff]  ;;  %v599_v25 = vld [vmem:[%s2742_s25 + $0x590] sm:$0xff] }
  0x40   : > { %510 = vst [vmem:[%s2747_s26 + $0x160] sm:$0xff] %v509_v44  ;;  %v601_v26 = vld [vmem:[%s2742_s25 + $0x5a0] sm:$0xff]  ;;  %v603_v27 = vld [vmem:[%s2742_s25 + $0x5b0] sm:$0xff] }
  0x41   : > { %512 = vst [vmem:[%s2747_s26 + $0x168] sm:$0xff] %v511_v45  ;;  %v605_v28 = vld [vmem:[%s2742_s25 + $0x5c0] sm:$0xff]  ;;  %v607_v29 = vld [vmem:[%s2742_s25 + $0x5d0] sm:$0xff] }
  0x42   : > { %514 = vst [vmem:[%s2747_s26 + $0x170] sm:$0xff] %v513_v46  ;;  %v609_v30 = vld [vmem:[%s2742_s25 + $0x5e0] sm:$0xff]  ;;  %v611_v31 = vld [vmem:[%s2742_s25 + $0x5f0] sm:$0xff] }
  0x43   : > { %516 = vst [vmem:[%s2747_s26 + $0x178] sm:$0xff] %v515_v47  ;;  %v613_v32 = vld [vmem:[%s2742_s25 + $0x600] sm:$0xff]  ;;  %v615_v33 = vld [vmem:[%s2742_s25 + $0x610] sm:$0xff] }
  0x44   : > { %518 = vst [vmem:[%s2747_s26 + $0x180] sm:$0xff] %v517_v48  ;;  %v617_v34 = vld [vmem:[%s2742_s25 + $0x620] sm:$0xff]  ;;  %v619_v35 = vld [vmem:[%s2742_s25 + $0x630] sm:$0xff] }
  0x45   : > { %520 = vst [vmem:[%s2747_s26 + $0x188] sm:$0xff] %v519_v49  ;;  %v621_v36 = vld [vmem:[%s2742_s25 + $0x640] sm:$0xff]  ;;  %v623_v37 = vld [vmem:[%s2742_s25 + $0x650] sm:$0xff] }
  0x46   : > { %522 = vst [vmem:[%s2747_s26 + $0x190] sm:$0xff] %v521_v50  ;;  %v625_v38 = vld [vmem:[%s2742_s25 + $0x660] sm:$0xff]  ;;  %v627_v39 = vld [vmem:[%s2742_s25 + $0x670] sm:$0xff] }
  0x47   : > { %524 = vst [vmem:[%s2747_s26 + $0x198] sm:$0xff] %v523_v51  ;;  %v629_v40 = vld [vmem:[%s2742_s25 + $0x680] sm:$0xff]  ;;  %v631_v41 = vld [vmem:[%s2742_s25 + $0x690] sm:$0xff] }
  0x48   : > { %526 = vst [vmem:[%s2747_s26 + $0x1a0] sm:$0xff] %v525_v52  ;;  %v633_v42 = vld [vmem:[%s2742_s25 + $0x6a0] sm:$0xff]  ;;  %v635_v43 = vld [vmem:[%s2742_s25 + $0x6b0] sm:$0xff] }
  0x49   : > { %528 = vst [vmem:[%s2747_s26 + $0x1a8] sm:$0xff] %v527_v53  ;;  %v637_v44 = vld [vmem:[%s2742_s25 + $0x6c0] sm:$0xff]  ;;  %v639_v45 = vld [vmem:[%s2742_s25 + $0x6d0] sm:$0xff] }
  0x4a   : > { %530 = vst [vmem:[%s2747_s26 + $0x1b0] sm:$0xff] %v529_v54  ;;  %v641_v46 = vld [vmem:[%s2742_s25 + $0x6e0] sm:$0xff]  ;;  %v643_v47 = vld [vmem:[%s2742_s25 + $0x6f0] sm:$0xff] }
  0x4b   : > { %532 = vst [vmem:[%s2747_s26 + $0x1b8] sm:$0xff] %v531_v55  ;;  %v645_v48 = vld [vmem:[%s2742_s25 + $0x700] sm:$0xff]  ;;  %v647_v49 = vld [vmem:[%s2742_s25 + $0x710] sm:$0xff] }
  0x4c   : > { %534 = vst [vmem:[%s2747_s26 + $0x1c0] sm:$0xff] %v533_v56  ;;  %v649_v50 = vld [vmem:[%s2742_s25 + $0x720] sm:$0xff]  ;;  %v651_v51 = vld [vmem:[%s2742_s25 + $0x730] sm:$0xff] }
  0x4d   : > { %536 = vst [vmem:[%s2747_s26 + $0x1c8] sm:$0xff] %v535_v57  ;;  %v653_v52 = vld [vmem:[%s2742_s25 + $0x740] sm:$0xff]  ;;  %v655_v53 = vld [vmem:[%s2742_s25 + $0x750] sm:$0xff] }
  0x4e   : > { %538 = vst [vmem:[%s2747_s26 + $0x1d0] sm:$0xff] %v537_v58  ;;  %v657_v54 = vld [vmem:[%s2742_s25 + $0x760] sm:$0xff]  ;;  %v659_v55 = vld [vmem:[%s2742_s25 + $0x770] sm:$0xff] }
  0x4f   : > { %540 = vst [vmem:[%s2747_s26 + $0x1d8] sm:$0xff] %v539_v59  ;;  %v661_v56 = vld [vmem:[%s2742_s25 + $0x780] sm:$0xff]  ;;  %v663_v57 = vld [vmem:[%s2742_s25 + $0x790] sm:$0xff] }
  0x50   : > { %542 = vst [vmem:[%s2747_s26 + $0x1e0] sm:$0xff] %v541_v60  ;;  %v665_v58 = vld [vmem:[%s2742_s25 + $0x7a0] sm:$0xff]  ;;  %v667_v59 = vld [vmem:[%s2742_s25 + $0x7b0] sm:$0xff] }
  0x51   : > { %544 = vst [vmem:[%s2747_s26 + $0x1e8] sm:$0xff] %v543_v61  ;;  %v669_v60 = vld [vmem:[%s2742_s25 + $0x7c0] sm:$0xff]  ;;  %v671_v61 = vld [vmem:[%s2742_s25 + $0x7d0] sm:$0xff] }
  0x52   : > { %546 = vst [vmem:[%s2747_s26 + $0x1f0] sm:$0xff] %v545_v62  ;;  %v673_v62 = vld [vmem:[%s2742_s25 + $0x7e0] sm:$0xff] }
  0x53   : > { %548 = vst [vmem:[%s2747_s26 + $0x1f8] sm:$0xff] %v547_v63  ;;  %v675_v63 = vld [vmem:[%s2742_s25 + $0x7f0] sm:$0xff] }
  0x54   : > { %550 = vst [vmem:[%s2747_s26 + $0x200] sm:$0xff] %v549_v0 }
  0x55   : > { %552 = vst [vmem:[%s2747_s26 + $0x208] sm:$0xff] %v551_v1 }
  0x56   : > { %554 = vst [vmem:[%s2747_s26 + $0x210] sm:$0xff] %v553_v2 }
  0x57   : > { %556 = vst [vmem:[%s2747_s26 + $0x218] sm:$0xff] %v555_v3 }
  0x58   : > { %558 = vst [vmem:[%s2747_s26 + $0x220] sm:$0xff] %v557_v4 }
  0x59   : > { %560 = vst [vmem:[%s2747_s26 + $0x228] sm:$0xff] %v559_v5 }
  0x5a   : > { %562 = vst [vmem:[%s2747_s26 + $0x230] sm:$0xff] %v561_v6 }
  0x5b   : > { %564 = vst [vmem:[%s2747_s26 + $0x238] sm:$0xff] %v563_v7 }
  0x5c   : > { %566 = vst [vmem:[%s2747_s26 + $0x240] sm:$0xff] %v565_v8 }
  0x5d   : > { %568 = vst [vmem:[%s2747_s26 + $0x248] sm:$0xff] %v567_v9 }
  0x5e   : > { %570 = vst [vmem:[%s2747_s26 + $0x250] sm:$0xff] %v569_v10 }
  0x5f   : > { %572 = vst [vmem:[%s2747_s26 + $0x258] sm:$0xff] %v571_v11 }
  0x60   : > { %574 = vst [vmem:[%s2747_s26 + $0x260] sm:$0xff] %v573_v12 }
  0x61   : > { %576 = vst [vmem:[%s2747_s26 + $0x268] sm:$0xff] %v575_v13 }
  0x62   : > { %578 = vst [vmem:[%s2747_s26 + $0x270] sm:$0xff] %v577_v14 }
  0x63   : > { %580 = vst [vmem:[%s2747_s26 + $0x278] sm:$0xff] %v579_v15 }
  0x64   : > { %582 = vst [vmem:[%s2747_s26 + $0x280] sm:$0xff] %v581_v16 }
  0x65   : > { %584 = vst [vmem:[%s2747_s26 + $0x288] sm:$0xff] %v583_v17 }
  0x66   : > { %586 = vst [vmem:[%s2747_s26 + $0x290] sm:$0xff] %v585_v18 }
  0x67   : > { %588 = vst [vmem:[%s2747_s26 + $0x298] sm:$0xff] %v587_v19 }
  0x68   : > { %590 = vst [vmem:[%s2747_s26 + $0x2a0] sm:$0xff] %v589_v20 }
  0x69   : > { %592 = vst [vmem:[%s2747_s26 + $0x2a8] sm:$0xff] %v591_v21 }
  0x6a   : > { %594 = vst [vmem:[%s2747_s26 + $0x2b0] sm:$0xff] %v593_v22 }
  0x6b   : > { %596 = vst [vmem:[%s2747_s26 + $0x2b8] sm:$0xff] %v595_v23 }
  0x6c   : > { %598 = vst [vmem:[%s2747_s26 + $0x2c0] sm:$0xff] %v597_v24 }
  0x6d   : > { %600 = vst [vmem:[%s2747_s26 + $0x2c8] sm:$0xff] %v599_v25 }
  0x6e   : > { %602 = vst [vmem:[%s2747_s26 + $0x2d0] sm:$0xff] %v601_v26 }
  0x6f   : > { %604 = vst [vmem:[%s2747_s26 + $0x2d8] sm:$0xff] %v603_v27 }
  0x70   : > { %606 = vst [vmem:[%s2747_s26 + $0x2e0] sm:$0xff] %v605_v28 }
  0x71   : > { %608 = vst [vmem:[%s2747_s26 + $0x2e8] sm:$0xff] %v607_v29 }
  0x72   : > { %610 = vst [vmem:[%s2747_s26 + $0x2f0] sm:$0xff] %v609_v30 }
  0x73   : > { %612 = vst [vmem:[%s2747_s26 + $0x2f8] sm:$0xff] %v611_v31 }
  0x74   : > { %614 = vst [vmem:[%s2747_s26 + $0x300] sm:$0xff] %v613_v32 }
  0x75   : > { %616 = vst [vmem:[%s2747_s26 + $0x308] sm:$0xff] %v615_v33 }
  0x76   : > { %618 = vst [vmem:[%s2747_s26 + $0x310] sm:$0xff] %v617_v34 }
  0x77   : > { %620 = vst [vmem:[%s2747_s26 + $0x318] sm:$0xff] %v619_v35 }
  0x78   : > { %622 = vst [vmem:[%s2747_s26 + $0x320] sm:$0xff] %v621_v36 }
  0x79   : > { %624 = vst [vmem:[%s2747_s26 + $0x328] sm:$0xff] %v623_v37 }
  0x7a   : > { %626 = vst [vmem:[%s2747_s26 + $0x330] sm:$0xff] %v625_v38 }
  0x7b   : > { %628 = vst [vmem:[%s2747_s26 + $0x338] sm:$0xff] %v627_v39 }
  0x7c   : > { %630 = vst [vmem:[%s2747_s26 + $0x340] sm:$0xff] %v629_v40 }
  0x7d   : > { %632 = vst [vmem:[%s2747_s26 + $0x348] sm:$0xff] %v631_v41 }
  0x7e   : > { %634 = vst [vmem:[%s2747_s26 + $0x350] sm:$0xff] %v633_v42 }
  0x7f   : > { %636 = vst [vmem:[%s2747_s26 + $0x358] sm:$0xff] %v635_v43 }
  0x80   : > { %638 = vst [vmem:[%s2747_s26 + $0x360] sm:$0xff] %v637_v44 }
  0x81   : > { %640 = vst [vmem:[%s2747_s26 + $0x368] sm:$0xff] %v639_v45 }
  0x82   : > { %642 = vst [vmem:[%s2747_s26 + $0x370] sm:$0xff] %v641_v46 }
  0x83   : > { %644 = vst [vmem:[%s2747_s26 + $0x378] sm:$0xff] %v643_v47 }
  0x84   : > { %646 = vst [vmem:[%s2747_s26 + $0x380] sm:$0xff] %v645_v48 }
  0x85   : > { %648 = vst [vmem:[%s2747_s26 + $0x388] sm:$0xff] %v647_v49 }
  0x86   : > { %650 = vst [vmem:[%s2747_s26 + $0x390] sm:$0xff] %v649_v50 }
  0x87   : > { %652 = vst [vmem:[%s2747_s26 + $0x398] sm:$0xff] %v651_v51 }
  0x88   : > { %654 = vst [vmem:[%s2747_s26 + $0x3a0] sm:$0xff] %v653_v52 }
  0x89   : > { %656 = vst [vmem:[%s2747_s26 + $0x3a8] sm:$0xff] %v655_v53 }
  0x8a   : > { %658 = vst [vmem:[%s2747_s26 + $0x3b0] sm:$0xff] %v657_v54 }
  0x8b   : > { %660 = vst [vmem:[%s2747_s26 + $0x3b8] sm:$0xff] %v659_v55 }
  0x8c   : > { %662 = vst [vmem:[%s2747_s26 + $0x3c0] sm:$0xff] %v661_v56 }
  0x8d   : > { %664 = vst [vmem:[%s2747_s26 + $0x3c8] sm:$0xff] %v663_v57 }
  0x8e   : > { %666 = vst [vmem:[%s2747_s26 + $0x3d0] sm:$0xff] %v665_v58 }
  0x8f   : > { %668 = vst [vmem:[%s2747_s26 + $0x3d8] sm:$0xff] %v667_v59 }
  0x90   : > { %670 = vst [vmem:[%s2747_s26 + $0x3e0] sm:$0xff] %v669_v60 }
  0x91   : > { %672 = vst [vmem:[%s2747_s26 + $0x3e8] sm:$0xff] %v671_v61 }
  0x92   : > { %674 = vst [vmem:[%s2747_s26 + $0x3f0] sm:$0xff] %v673_v62 }
  0x93   : > { %676 = vst [vmem:[%s2747_s26 + $0x3f8] sm:$0xff] %v675_v63 }
  0x94 PF: > { %p1909_p8 = scmp.ge.s32.totalorder %s2677_s13, 1  ;;  %p681_p9 = scmp.lt.s32.totalorder %s2677_s13, 3 }
  0x96   : > { %p682_p10 = pnand %p1909_p8, %p681_p9 }
  0x97   : > { %s688_s27 = sand.u32 (!%p682_p10), 1, %s2661_s9  }
  0x98   : > { %685 = sbr.rel (%p682_p10) target bundleno = 444 (0x1bc), region = 62  ;;  %s1910_s28 = sshll.u32 (!%p682_p10), %s688_s27, 10 }
  0x99   : > { %s3007_s29 = scalar_lea.vmem (!%p682_p10), [#allocation2], %s1910_s28 }
  0x9d   : > { %v2002_v0 = vld [vmem:[%s3007_s29 + $0x70] sm:$0xf]  ;;  %v2485_v1 = vld [vmem:[%s3007_s29 + $0x74] sm:$0xf0]  ;;  %v1994_v11 = vld [vmem:[%s3007_s29 + $0x60] sm:$0xf] }
  0x9e   : > { %v2066_v2 = vld [vmem:[%s3007_s29 + $0xf0] sm:$0xf]  ;;  %v2003_v3 = vor.u32 %v2485_v1, %v2002_v0  ;;  %v2501_v4 = vld [vmem:[%s3007_s29 + $0xf4] sm:$0xf0]  ;;  %v2483_v13 = vld [vmem:[%s3007_s29 + $0x64] sm:$0xf0] }
  0x9f   : > { %v2130_v5 = vld [vmem:[%s3007_s29 + $0x170] sm:$0xf]  ;;  %v2517_v6 = vld [vmem:[%s3007_s29 + $0x174] sm:$0xf0]  ;;  %v2067_v7 = vor.u32 %v2501_v4, %v2066_v2  ;;  %v2058_v14 = vld [vmem:[%s3007_s29 + $0xe0] sm:$0xf]  ;;  %v1995_v16 = vor.u32 %v2483_v13, %v1994_v11 }
  0xa0   : > { %v2131_v8 = vor.u32 %v2517_v6, %v2130_v5  ;;  %v2194_v9 = vld [vmem:[%s3007_s29 + $0x1f0] sm:$0xf]  ;;  %v2533_v10 = vld [vmem:[%s3007_s29 + $0x1f4] sm:$0xf0]  ;;  %1540 = vmatpush.bf16.msra.mxu0 %v2003_v3  ;;  %v2499_v15 = vld [vmem:[%s3007_s29 + $0xe4] sm:$0xf0] }
  0xa1   : > { %v2195_v12 = vor.u32 %v2533_v10, %v2194_v9  ;;  %1554 = vmatpush.bf16.msra.mxu1 %v2067_v7  ;;  %v2059_v17 = vor.u32 %v2499_v15, %v2058_v14  ;;  %v2122_v18 = vld [vmem:[%s3007_s29 + $0x160] sm:$0xf]  ;;  %v2515_v19 = vld [vmem:[%s3007_s29 + $0x164] sm:$0xf0]  ;;  %v1986_v23 = vld [vmem:[%s3007_s29 + $0x50] sm:$0xf] }
  0xa2   : > { %1568 = vmatpush.bf16.msra.mxu2 %v2131_v8  ;;  %v2186_v20 = vld [vmem:[%s3007_s29 + $0x1e0] sm:$0xf]  ;;  %v2123_v21 = vor.u32 %v2515_v19, %v2122_v18  ;;  %v2531_v22 = vld [vmem:[%s3007_s29 + $0x1e4] sm:$0xf0]  ;;  %v2481_v24 = vld [vmem:[%s3007_s29 + $0x54] sm:$0xf0] }
  0xa3   : > { %1582 = vmatpush.bf16.msra.mxu3 %v2195_v12  ;;  %v2187_v25 = vor.u32 %v2531_v22, %v2186_v20  ;;  %v2050_v26 = vld [vmem:[%s3007_s29 + $0xd0] sm:$0xf]  ;;  %v2497_v27 = vld [vmem:[%s3007_s29 + $0xd4] sm:$0xf0]  ;;  %v1987_v29 = vor.u32 %v2481_v24, %v1986_v23  ;;  %v1978_v35 = vld [vmem:[%s3007_s29 + $0x40] sm:$0xf] }
  0xa4   : > { %v2114_v28 = vld [vmem:[%s3007_s29 + $0x150] sm:$0xf]  ;;  %1541 = vmatpush.bf16.msra.mxu0 %v1995_v16  ;;  %v2513_v30 = vld [vmem:[%s3007_s29 + $0x154] sm:$0xf0]  ;;  %v2051_v33 = vor.u32 %v2497_v27, %v2050_v26  ;;  %v2479_v36 = vld [vmem:[%s3007_s29 + $0x44] sm:$0xf0] }
  0xa5   : > { %v2178_v31 = vld [vmem:[%s3007_s29 + $0x1d0] sm:$0xf]  ;;  %v2529_v32 = vld [vmem:[%s3007_s29 + $0x1d4] sm:$0xf0]  ;;  %1555 = vmatpush.bf16.msra.mxu1 %v2059_v17  ;;  %v2115_v34 = vor.u32 %v2513_v30, %v2114_v28  ;;  %v2042_v37 = vld [vmem:[%s3007_s29 + $0xc0] sm:$0xf]  ;;  %v1979_v44 = vor.u32 %v2479_v36, %v1978_v35 }
  0xa6   : > { %1569 = vmatpush.bf16.msra.mxu2 %v2123_v21  ;;  %v2179_v38 = vor.u32 %v2529_v32, %v2178_v31  ;;  %v2495_v39 = vld [vmem:[%s3007_s29 + $0xc4] sm:$0xf0]  ;;  %v2106_v40 = vld [vmem:[%s3007_s29 + $0x140] sm:$0xf]  ;;  %v1970_v47 = vld [vmem:[%s3007_s29 + $0x30] sm:$0xf] }
  0xa7   : > { %1583 = vmatpush.bf16.msra.mxu3 %v2187_v25  ;;  %v2511_v41 = vld [vmem:[%s3007_s29 + $0x144] sm:$0xf0]  ;;  %v2170_v42 = vld [vmem:[%s3007_s29 + $0x1c0] sm:$0xf]  ;;  %v2043_v45 = vor.u32 %v2495_v39, %v2042_v37  ;;  %v2477_v48 = vld [vmem:[%s3007_s29 + $0x34] sm:$0xf0] }
  0xa8   : > { %v2527_v43 = vld [vmem:[%s3007_s29 + $0x1c4] sm:$0xf0]  ;;  %1542 = vmatpush.bf16.msra.mxu0 %v1987_v29  ;;  %v2107_v46 = vor.u32 %v2511_v41, %v2106_v40  ;;  %v2034_v49 = vld [vmem:[%s3007_s29 + $0xb0] sm:$0xf]  ;;  %v2493_v51 = vld [vmem:[%s3007_s29 + $0xb4] sm:$0xf0]  ;;  %v1971_v56 = vor.u32 %v2477_v48, %v1970_v47 }
  0xa9   : > { %1556 = vmatpush.bf16.msra.mxu1 %v2051_v33  ;;  %v2171_v50 = vor.u32 %v2527_v43, %v2170_v42  ;;  %v2098_v52 = vld [vmem:[%s3007_s29 + $0x130] sm:$0xf]  ;;  %v2509_v53 = vld [vmem:[%s3007_s29 + $0x134] sm:$0xf0]  ;;  %v2035_v57 = vor.u32 %v2493_v51, %v2034_v49  ;;  %v1962_v59 = vld [vmem:[%s3007_s29 + $0x20] sm:$0xf] }
  0xaa   : > { %1570 = vmatpush.bf16.msra.mxu2 %v2115_v34  ;;  %v2162_v54 = vld [vmem:[%s3007_s29 + $0x1b0] sm:$0xf]  ;;  %v2525_v55 = vld [vmem:[%s3007_s29 + $0x1b4] sm:$0xf0]  ;;  %v2099_v58 = vor.u32 %v2509_v53, %v2098_v52  ;;  %v2475_v60 = vld [vmem:[%s3007_s29 + $0x24] sm:$0xf0] }
  0xab   : > { %1584 = vmatpush.bf16.msra.mxu3 %v2179_v38  ;;  %v2026_v61 = vld [vmem:[%s3007_s29 + $0xa0] sm:$0xf]  ;;  %v2163_v62 = vor.u32 %v2525_v55, %v2162_v54  ;;  %v2491_v63 = vld [vmem:[%s3007_s29 + $0xa4] sm:$0xf0]  ;;  %v1963_v4 = vor.u32 %v2475_v60, %v1962_v59  ;;  %v1954_v7 = vld [vmem:[%s3007_s29 + $0x10] sm:$0xf] }
  0xac   : > { %1543 = vmatpush.bf16.msra.mxu0 %v1979_v44  ;;  %v2090_v0 = vld [vmem:[%s3007_s29 + $0x120] sm:$0xf]  ;;  %v2507_v1 = vld [vmem:[%s3007_s29 + $0x124] sm:$0xf0]  ;;  %v2027_v5 = vor.u32 %v2491_v63, %v2026_v61  ;;  %v2473_v8 = vld [vmem:[%s3007_s29 + $0x14] sm:$0xf0] }
  0xad   : > { %1557 = vmatpush.bf16.msra.mxu1 %v2043_v45  ;;  %v2154_v2 = vld [vmem:[%s3007_s29 + $0x1a0] sm:$0xf]  ;;  %v2523_v3 = vld [vmem:[%s3007_s29 + $0x1a4] sm:$0xf0]  ;;  %v2091_v6 = vor.u32 %v2507_v1, %v2090_v0  ;;  %v2018_v9 = vld [vmem:[%s3007_s29 + $0x90] sm:$0xf]  ;;  %v1955_v16 = vor.u32 %v2473_v8, %v1954_v7 }
  0xae   : > { %1571 = vmatpush.bf16.msra.mxu2 %v2107_v46  ;;  %v2155_v10 = vor.u32 %v2523_v3, %v2154_v2  ;;  %v2489_v11 = vld [vmem:[%s3007_s29 + $0x94] sm:$0xf0]  ;;  %v2082_v12 = vld [vmem:[%s3007_s29 + $0x110] sm:$0xf]  ;;  %v1946_v17 = vld [vmem:[%s3007_s29] sm:$0xf] }
  0xaf   : > { %1585 = vmatpush.bf16.msra.mxu3 %v2171_v50  ;;  %v2505_v13 = vld [vmem:[%s3007_s29 + $0x114] sm:$0xf0]  ;;  %v2146_v14 = vld [vmem:[%s3007_s29 + $0x190] sm:$0xf]  ;;  %v2471_v18 = vld [vmem:[%s3007_s29 + $0x4] sm:$0xf0]  ;;  %v2019_v19 = vor.u32 %v2489_v11, %v2018_v9 }
  0xb0   : > { %1544 = vmatpush.bf16.msra.mxu0 %v1971_v56  ;;  %v2521_v15 = vld [vmem:[%s3007_s29 + $0x194] sm:$0xf0]  ;;  %v2083_v20 = vor.u32 %v2505_v13, %v2082_v12  ;;  %v2010_v21 = vld [vmem:[%s3007_s29 + $0x80] sm:$0xf]  ;;  %v2487_v22 = vld [vmem:[%s3007_s29 + $0x84] sm:$0xf0]  ;;  %v1947_v31 = vor.u32 %v2471_v18, %v1946_v17 }
  0xb1   : > { %1558 = vmatpush.bf16.msra.mxu1 %v2035_v57  ;;  %v2074_v23 = vld [vmem:[%s3007_s29 + $0x100] sm:$0xf]  ;;  %v2147_v24 = vor.u32 %v2521_v15, %v2146_v14  ;;  %v2503_v25 = vld [vmem:[%s3007_s29 + $0x104] sm:$0xf0]  ;;  %v2258_v28 = vld [vmem:[%s3007_s29 + $0x270] sm:$0xf]  ;;  %v2011_v35 = vor.u32 %v2487_v22, %v2010_v21 }
  0xb2   : > { %1572 = vmatpush.bf16.msra.mxu2 %v2099_v58  ;;  %v2138_v26 = vld [vmem:[%s3007_s29 + $0x180] sm:$0xf]  ;;  %v2519_v27 = vld [vmem:[%s3007_s29 + $0x184] sm:$0xf0]  ;;  %v2549_v29 = vld [vmem:[%s3007_s29 + $0x274] sm:$0xf0]  ;;  %v2075_v36 = vor.u32 %v2503_v25, %v2074_v23 }
  0xb3   : > { %1586 = vmatpush.bf16.msra.mxu3 %v2163_v62  ;;  %v2322_v30 = vld [vmem:[%s3007_s29 + $0x2f0] sm:$0xf]  ;;  %v2565_v32 = vld [vmem:[%s3007_s29 + $0x2f4] sm:$0xf0]  ;;  %v2139_v39 = vor.u32 %v2519_v27, %v2138_v26  ;;  %v2259_v40 = vor.u32 %v2549_v29, %v2258_v28  ;;  %v2250_v41 = vld [vmem:[%s3007_s29 + $0x260] sm:$0xf] }
  0xb4   : > { %1545 = vmatpush.bf16.msra.mxu0 %v1963_v4  ;;  %v2386_v33 = vld [vmem:[%s3007_s29 + $0x370] sm:$0xf]  ;;  %v2581_v34 = vld [vmem:[%s3007_s29 + $0x374] sm:$0xf0]  ;;  %v2547_v42 = vld [vmem:[%s3007_s29 + $0x264] sm:$0xf0]  ;;  %v2323_v43 = vor.u32 %v2565_v32, %v2322_v30 }
  0xb5   : > { %1559 = vmatpush.bf16.msra.mxu1 %v2027_v5  ;;  %v2450_v37 = vld [vmem:[%s3007_s29 + $0x3f0] sm:$0xf]  ;;  %v2597_v38 = vld [vmem:[%s3007_s29 + $0x3f4] sm:$0xf0]  ;;  %v2387_v44 = vor.u32 %v2581_v34, %v2386_v33  ;;  %v2314_v45 = vld [vmem:[%s3007_s29 + $0x2e0] sm:$0xf]  ;;  %v2251_v55 = vor.u32 %v2547_v42, %v2250_v41 }
  0xb6   : > { %1573 = vmatpush.bf16.msra.mxu2 %v2091_v6  ;;  %v2563_v46 = vld [vmem:[%s3007_s29 + $0x2e4] sm:$0xf0]  ;;  %v2378_v47 = vld [vmem:[%s3007_s29 + $0x360] sm:$0xf]  ;;  %v2451_v48 = vor.u32 %v2597_v38, %v2450_v37  ;;  %v2242_v56 = vld [vmem:[%s3007_s29 + $0x250] sm:$0xf] }
  0xb7   : > { %1587 = vmatpush.bf16.msra.mxu3 %v2155_v10  ;;  %v2579_v49 = vld [vmem:[%s3007_s29 + $0x364] sm:$0xf0]  ;;  %v2442_v50 = vld [vmem:[%s3007_s29 + $0x3e0] sm:$0xf]  ;;  %v2545_v57 = vld [vmem:[%s3007_s29 + $0x254] sm:$0xf0]  ;;  %v2315_v60 = vor.u32 %v2563_v46, %v2314_v45 }
  0xb8   : > { %1546 = vmatpush.bf16.msra.mxu0 %v1955_v16  ;;  %v2595_v51 = vld [vmem:[%s3007_s29 + $0x3e4] sm:$0xf0]  ;;  %v1914_v52 = vld [vmem:[%s3368_s0] sm:$0xf]  ;;  %v2379_v61 = vor.u32 %v2579_v49, %v2378_v47  ;;  %v2306_v62 = vld [vmem:[%s3007_s29 + $0x2d0] sm:$0xf]  ;;  %v2243_v9 = vor.u32 %v2545_v57, %v2242_v56 }
  0xb9   : > { %1560 = vmatpush.bf16.msra.mxu1 %v2019_v19  ;;  %v2466_v53 = vld [vmem:[%s3368_s0 + $0x1c] sm:$0xf0]  ;;  %v1922_v54 = vld [vmem:[%s3368_s0 + $0x8] sm:$0xf]  ;;  %v2561_v63 = vld [vmem:[%s3007_s29 + $0x2d4] sm:$0xf0]  ;;  %v2443_v2 = vor.u32 %v2595_v51, %v2442_v50 }
  0xba   : > { %1574 = vmatpush.bf16.msra.mxu2 %v2083_v20  ;;  %v3100_v58 = vor.u32 %v2466_v53, %v1914_v52  ;;  %v2467_v59 = vld [vmem:[%s3368_s0 + $0x24] sm:$0xf0]  ;;  %v2370_v0 = vld [vmem:[%s3007_s29 + $0x350] sm:$0xf]  ;;  %v2577_v3 = vld [vmem:[%s3007_s29 + $0x354] sm:$0xf0]  ;;  %v2307_v12 = vor.u32 %v2561_v63, %v2306_v62 }
  0xbb   : > { %1588 = vmatpush.bf16.msra.mxu3 %v2147_v24  ;;  %v3108_v1 = vor.u32 %v2467_v59, %v1922_v54  ;;  %v2434_v4 = vld [vmem:[%s3007_s29 + $0x3d0] sm:$0xf]  ;;  %v2593_v5 = vld [vmem:[%s3007_s29 + $0x3d4] sm:$0xf0]  ;;  %v2462_v6 = vld [vmem:[%s3368_s0 + $0x4] sm:$0xf]  ;;  %v2371_v13 = vor.u32 %v2577_v3, %v2370_v0 }
  0xbc   : > { %1547 = vmatpush.bf16.msra.mxu0 %v1947_v31  ;;  %v1916_v7 = vld [vmem:[%s3368_s0 + $0x20] sm:$0xf0]  ;;  %v2463_v8 = vld [vmem:[%s3368_s0 + $0xc] sm:$0xf]  ;;  %v2234_v14 = vld [vmem:[%s3007_s29 + $0x240] sm:$0xf]  ;;  %v2435_v18 = vor.u32 %v2593_v5, %v2434_v4 }
  0xbd   : > { %1561 = vmatpush.bf16.msra.mxu1 %v2011_v35  ;;  %v3124_v10 = vor.u32 %v2462_v6, %v1916_v7  ;;  %v1924_v11 = vld [vmem:[%s3368_s0 + $0x28] sm:$0xf0]  ;;  %v2543_v15 = vld [vmem:[%s3007_s29 + $0x244] sm:$0xf0]  ;;  %v2298_v16 = vld [vmem:[%s3007_s29 + $0x2c0] sm:$0xf] }
  0xbe   : > { %1575 = vmatpush.bf16.msra.mxu2 %v2075_v36  ;;  %v3132_v17 = vor.u32 %v2463_v8, %v1924_v11  ;;  %v2559_v19 = vld [vmem:[%s3007_s29 + $0x2c4] sm:$0xf0]  ;;  %v2362_v20 = vld [vmem:[%s3007_s29 + $0x340] sm:$0xf]  ;;  %v2235_v24 = vor.u32 %v2543_v15, %v2234_v14  ;;  %v2226_v27 = vld [vmem:[%s3007_s29 + $0x230] sm:$0xf] }
  0xbf   : > { %1589 = vmatpush.bf16.msra.mxu3 %v2139_v39  ;;  %1548 = vmatmul.bf16.vlgmr.msra.gmra.mxu0 %v3100_v58  ;;  %v2575_v21 = vld [vmem:[%s3007_s29 + $0x344] sm:$0xf0]  ;;  %v2426_v22 = vld [vmem:[%s3007_s29 + $0x3c0] sm:$0xf]  ;;  %v2299_v25 = vor.u32 %v2559_v19, %v2298_v16  ;;  %v2541_v28 = vld [vmem:[%s3007_s29 + $0x234] sm:$0xf0] }
  0xc0   : > { %1596 = vmatpush.bf16.msrb.mxu0 %v2259_v40  ;;  %1562 = vmatmul.bf16.vlgmr.msra.gmra.mxu1 %v3124_v10  ;;  %v2591_v23 = vld [vmem:[%s3007_s29 + $0x3c4] sm:$0xf0]  ;;  %v2363_v26 = vor.u32 %v2575_v21, %v2362_v20  ;;  %v2290_v29 = vld [vmem:[%s3007_s29 + $0x2b0] sm:$0xf]  ;;  %v2557_v31 = vld [vmem:[%s3007_s29 + $0x2b4] sm:$0xf0]  ;;  %v2227_v36 = vor.u32 %v2541_v28, %v2226_v27 }
  0xc1   : > { %1610 = vmatpush.bf16.msrb.mxu1 %v2323_v43  ;;  %1576 = vmatmul.bf16.vlgmr.msra.gmra.mxu2 %v3108_v1  ;;  %v2427_v30 = vor.u32 %v2591_v23, %v2426_v22  ;;  %v2354_v32 = vld [vmem:[%s3007_s29 + $0x330] sm:$0xf]  ;;  %v2573_v33 = vld [vmem:[%s3007_s29 + $0x334] sm:$0xf0]  ;;  %v2291_v37 = vor.u32 %v2557_v31, %v2290_v29  ;;  %v2218_v39 = vld [vmem:[%s3007_s29 + $0x220] sm:$0xf] }
  0xc2   : > { %1624 = vmatpush.bf16.msrb.mxu2 %v2387_v44  ;;  %1590 = vmatmul.bf16.vlgmr.msra.gmra.mxu3 %v3132_v17  ;;  %v2418_v34 = vld [vmem:[%s3007_s29 + $0x3b0] sm:$0xf]  ;;  %v2589_v35 = vld [vmem:[%s3007_s29 + $0x3b4] sm:$0xf0]  ;;  %v2355_v38 = vor.u32 %v2573_v33, %v2354_v32  ;;  %v2539_v40 = vld [vmem:[%s3007_s29 + $0x224] sm:$0xf0] }
  0xc3   : > { %1638 = vmatpush.bf16.msrb.mxu3 %v2451_v48  ;;  %v2282_v41 = vld [vmem:[%s3007_s29 + $0x2a0] sm:$0xf]  ;;  %v2419_v42 = vor.u32 %v2589_v35, %v2418_v34  ;;  %v2555_v43 = vld [vmem:[%s3007_s29 + $0x2a4] sm:$0xf0]  ;;  %v2219_v48 = vor.u32 %v2539_v40, %v2218_v39  ;;  %v2210_v49 = vld [vmem:[%s3007_s29 + $0x210] sm:$0xf] }
  0xc4   : > { %1597 = vmatpush.bf16.msrb.mxu0 %v2251_v55  ;;  %v2346_v44 = vld [vmem:[%s3007_s29 + $0x320] sm:$0xf]  ;;  %v2571_v45 = vld [vmem:[%s3007_s29 + $0x324] sm:$0xf0]  ;;  %v2283_v50 = vor.u32 %v2555_v43, %v2282_v41  ;;  %v2537_v52 = vld [vmem:[%s3007_s29 + $0x214] sm:$0xf0] }
  0xc5   : > { %1611 = vmatpush.bf16.msrb.mxu1 %v2315_v60  ;;  %v2410_v46 = vld [vmem:[%s3007_s29 + $0x3a0] sm:$0xf]  ;;  %v2587_v47 = vld [vmem:[%s3007_s29 + $0x3a4] sm:$0xf0]  ;;  %v2347_v51 = vor.u32 %v2571_v45, %v2346_v44  ;;  %v2274_v53 = vld [vmem:[%s3007_s29 + $0x290] sm:$0xf]  ;;  %v2211_v63 = vor.u32 %v2537_v52, %v2210_v49 }
  0xc6   : > { %1625 = vmatpush.bf16.msrb.mxu2 %v2379_v61  ;;  %v2553_v54 = vld [vmem:[%s3007_s29 + $0x294] sm:$0xf0]  ;;  %v2411_v55 = vor.u32 %v2587_v47, %v2410_v46  ;;  %v2338_v56 = vld [vmem:[%s3007_s29 + $0x310] sm:$0xf]  ;;  %v2202_v61 = vld [vmem:[%s3007_s29 + $0x200] sm:$0xf] }
  0xc7   : > { %1639 = vmatpush.bf16.msrb.mxu3 %v2443_v2  ;;  %v2569_v57 = vld [vmem:[%s3007_s29 + $0x314] sm:$0xf0]  ;;  %v2402_v59 = vld [vmem:[%s3007_s29 + $0x390] sm:$0xf]  ;;  %v2535_v62 = vld [vmem:[%s3007_s29 + $0x204] sm:$0xf0]  ;;  %v2275_v5 = vor.u32 %v2553_v54, %v2274_v53 }
  0xc8   : > { %1598 = vmatpush.bf16.msrb.mxu0 %v2243_v9  ;;  %v2585_v60 = vld [vmem:[%s3007_s29 + $0x394] sm:$0xf0]  ;;  %v2266_v0 = vld [vmem:[%s3007_s29 + $0x280] sm:$0xf]  ;;  %v2551_v2 = vld [vmem:[%s3007_s29 + $0x284] sm:$0xf0]  ;;  %v2339_v6 = vor.u32 %v2569_v57, %v2338_v56  ;;  %v2203_v19 = vor.u32 %v2535_v62, %v2202_v61 }
  0xc9   : > { %1612 = vmatpush.bf16.msrb.mxu1 %v2307_v12  ;;  %v2330_v3 = vld [vmem:[%s3007_s29 + $0x300] sm:$0xf]  ;;  %v2567_v4 = vld [vmem:[%s3007_s29 + $0x304] sm:$0xf0]  ;;  %v2484_v9 = vld [vmem:[%s3007_s29 + $0x74] sm:$0xf]  ;;  %v2403_v11 = vor.u32 %v2585_v60, %v2402_v59  ;;  %v2267_v23 = vor.u32 %v2551_v2, %v2266_v0 }
  0xca   : > { %1626 = vmatpush.bf16.msrb.mxu2 %v2371_v13  ;;  %v2394_v7 = vld [vmem:[%s3007_s29 + $0x380] sm:$0xf]  ;;  %v2583_v8 = vld [vmem:[%s3007_s29 + $0x384] sm:$0xf0]  ;;  %v2004_v12 = vld [vmem:[%s3007_s29 + $0x78] sm:$0xf0] }
  0xcb   : > { %1640 = vmatpush.bf16.msrb.mxu3 %v2435_v18  ;;  %v2500_v13 = vld [vmem:[%s3007_s29 + $0xf4] sm:$0xf]  ;;  %v2068_v14 = vld [vmem:[%s3007_s29 + $0xf8] sm:$0xf0]  ;;  %v1930_v21 = vld [vmem:[%s3368_s0 + $0x10] sm:$0xf]  ;;  %v2395_v28 = vor.u32 %v2583_v8, %v2394_v7  ;;  %v2007_v29 = vor.u32 %v2484_v9, %v2004_v12 }
  0xcc   : > { %1599 = vmatpush.bf16.msrb.mxu0 %v2235_v24  ;;  %v2516_v15 = vld [vmem:[%s3007_s29 + $0x174] sm:$0xf]  ;;  %v2132_v16 = vld [vmem:[%s3007_s29 + $0x178] sm:$0xf0]  ;;  %v2468_v22 = vld [vmem:[%s3368_s0 + $0x2c] sm:$0xf0]  ;;  %v2331_v24 = vor.u32 %v2567_v4, %v2330_v3  ;;  %v2071_v33 = vor.u32 %v2500_v13, %v2068_v14 }
  0xcd   : > { %1613 = vmatpush.bf16.msrb.mxu1 %v2299_v25  ;;  %v2532_v18 = vld [vmem:[%s3007_s29 + $0x1f4] sm:$0xf]  ;;  %v2196_v20 = vld [vmem:[%s3007_s29 + $0x1f8] sm:$0xf0]  ;;  %v1938_v25 = vld [vmem:[%s3368_s0 + $0x18] sm:$0xf]  ;;  %v2135_v34 = vor.u32 %v2516_v15, %v2132_v16  ;;  %v3208_v39 = vor.u32 %v2468_v22, %v1930_v21 }
  0xce   : > { %1627 = vmatpush.bf16.msrb.mxu2 %v2363_v26  ;;  %v2469_v26 = vld [vmem:[%s3368_s0 + $0x34] sm:$0xf0]  ;;  %v2464_v27 = vld [vmem:[%s3368_s0 + $0x14] sm:$0xf]  ;;  %v2465_v31 = vld [vmem:[%s3368_s0 + $0x1c] sm:$0xf] }
  0xcf   : > { %1641 = vmatpush.bf16.msrb.mxu3 %v2427_v30  ;;  %v1932_v30 = vld [vmem:[%s3368_s0 + $0x30] sm:$0xf0]  ;;  %v1940_v32 = vld [vmem:[%s3368_s0 + $0x38] sm:$0xf0]  ;;  %v2482_v35 = vld [vmem:[%s3007_s29 + $0x64] sm:$0xf]  ;;  %v3213_v43 = vor.u32 %v2469_v26, %v1938_v25 }
  0xd0   : > { %1600 = vmatpush.bf16.msrb.mxu0 %v2227_v36  ;;  %v1996_v36 = vld [vmem:[%s3007_s29 + $0x68] sm:$0xf0]  ;;  %v2514_v41 = vld [vmem:[%s3007_s29 + $0x164] sm:$0xf]  ;;  %v3215_v44 = vor.u32 %v2464_v27, %v1932_v30  ;;  %v3219_v47 = vor.u32 %v2465_v31, %v1940_v32  ;;  %v1988_v52 = vld [vmem:[%s3007_s29 + $0x58] sm:$0xf0] }
  0xd1   : > { %1614 = vmatpush.bf16.msrb.mxu1 %v2291_v37  ;;  %v2498_v37 = vld [vmem:[%s3007_s29 + $0xe4] sm:$0xf]  ;;  %v2060_v40 = vld [vmem:[%s3007_s29 + $0xe8] sm:$0xf0]  ;;  %v2496_v53 = vld [vmem:[%s3007_s29 + $0xd4] sm:$0xf] }
  0xd2   : > { %1628 = vmatpush.bf16.msrb.mxu2 %v2355_v38  ;;  %v2199_v38 = vor.u32 %v2532_v18, %v2196_v20  ;;  %v2530_v45 = vld [vmem:[%s3007_s29 + $0x1e4] sm:$0xf]  ;;  %v2188_v46 = vld [vmem:[%s3007_s29 + $0x1e8] sm:$0xf0]  ;;  %v2063_v49 = vor.u32 %v2498_v37, %v2060_v40  ;;  %v2512_v56 = vld [vmem:[%s3007_s29 + $0x154] sm:$0xf] }
  0xd3   : > { %1642 = vmatpush.bf16.msrb.mxu3 %v2419_v42  ;;  %v2124_v42 = vld [vmem:[%s3007_s29 + $0x168] sm:$0xf0]  ;;  %v2191_v54 = vor.u32 %v2530_v45, %v2188_v46  ;;  %v2116_v57 = vld [vmem:[%s3007_s29 + $0x158] sm:$0xf0]  ;;  %v2528_v59 = vld [vmem:[%s3007_s29 + $0x1d4] sm:$0xf] }
  0xd4   : > { %1601 = vmatpush.bf16.msrb.mxu0 %v2219_v48  ;;  %v1999_v48 = vor.u32 %v2482_v35, %v1996_v36  ;;  %v2180_v60 = vld [vmem:[%s3007_s29 + $0x1d8] sm:$0xf0]  ;;  %v2478_v0 = vld [vmem:[%s3007_s29 + $0x44] sm:$0xf]  ;;  %v1980_v2 = vld [vmem:[%s3007_s29 + $0x48] sm:$0xf0] }
  0xd5   : > { %1615 = vmatpush.bf16.msrb.mxu1 %v2283_v50  ;;  %v2127_v50 = vor.u32 %v2514_v41, %v2124_v42  ;;  %v2494_v3 = vld [vmem:[%s3007_s29 + $0xc4] sm:$0xf]  ;;  %v2183_v4 = vor.u32 %v2528_v59, %v2180_v60  ;;  %v2108_v7 = vld [vmem:[%s3007_s29 + $0x148] sm:$0xf0]  ;;  %v2476_v14 = vld [vmem:[%s3007_s29 + $0x34] sm:$0xf] }
  0xd6   : > { %1629 = vmatpush.bf16.msrb.mxu2 %v2347_v51  ;;  %v2480_v51 = vld [vmem:[%s3007_s29 + $0x54] sm:$0xf]  ;;  %v2526_v8 = vld [vmem:[%s3007_s29 + $0x1c4] sm:$0xf]  ;;  %v2172_v9 = vld [vmem:[%s3007_s29 + $0x1c8] sm:$0xf0] }
  0xd7   : > { %1643 = vmatpush.bf16.msrb.mxu3 %v2411_v55  ;;  %v2052_v55 = vld [vmem:[%s3007_s29 + $0xd8] sm:$0xf0]  ;;  %v1991_v61 = vor.u32 %v2480_v51, %v1988_v52  ;;  %v2492_v16 = vld [vmem:[%s3007_s29 + $0xb4] sm:$0xf]  ;;  %v2175_v18 = vor.u32 %v2526_v8, %v2172_v9  ;;  %v2474_v27 = vld [vmem:[%s3007_s29 + $0x24] sm:$0xf] }
  0xd8   : > { %1602 = vmatpush.bf16.msrb.mxu0 %v2211_v63  ;;  %v2055_v62 = vor.u32 %v2496_v53, %v2052_v55  ;;  %v2119_v63 = vor.u32 %v2512_v56, %v2116_v57  ;;  %v1972_v15 = vld [vmem:[%s3007_s29 + $0x38] sm:$0xf0]  ;;  %v2508_v20 = vld [vmem:[%s3007_s29 + $0x134] sm:$0xf]  ;;  %v2028_v31 = vld [vmem:[%s3007_s29 + $0xa8] sm:$0xf0] }
  0xd9   : > { %1616 = vmatpush.bf16.msrb.mxu1 %v2275_v5  ;;  %v2044_v5 = vld [vmem:[%s3007_s29 + $0xc8] sm:$0xf0]  ;;  %v2100_v21 = vld [vmem:[%s3007_s29 + $0x138] sm:$0xf0]  ;;  %v2524_v22 = vld [vmem:[%s3007_s29 + $0x1b4] sm:$0xf] }
  0xda   : > { %1630 = vmatpush.bf16.msrb.mxu2 %v2339_v6  ;;  %v2510_v6 = vld [vmem:[%s3007_s29 + $0x144] sm:$0xf]  ;;  %v2047_v12 = vor.u32 %v2494_v3, %v2044_v5  ;;  %v2103_v26 = vor.u32 %v2508_v20, %v2100_v21  ;;  %v2156_v35 = vld [vmem:[%s3007_s29 + $0x1a8] sm:$0xf0]  ;;  %v2472_v40 = vld [vmem:[%s3007_s29 + $0x14] sm:$0xf] }
  0xdb   : > { %1644 = vmatpush.bf16.msrb.mxu3 %v2403_v11  ;;  %v1983_v11 = vor.u32 %v2478_v0, %v1980_v2  ;;  %v2111_v13 = vor.u32 %v2510_v6, %v2108_v7  ;;  %v2506_v32 = vld [vmem:[%s3007_s29 + $0x124] sm:$0xf]  ;;  %v1956_v41 = vld [vmem:[%s3007_s29 + $0x18] sm:$0xf0]  ;;  %v2488_v42 = vld [vmem:[%s3007_s29 + $0x94] sm:$0xf] }
  0xdc   : > { %1603 = vmatpush.bf16.msrb.mxu0 %v2203_v19  ;;  %v2036_v19 = vld [vmem:[%s3007_s29 + $0xb8] sm:$0xf0]  ;;  %v1959_v52 = vor.u32 %v2472_v40, %v1956_v41  ;;  %v2470_v53 = vld [vmem:[%s3007_s29 + $0x4] sm:$0xf]  ;;  %v2012_v59 = vld [vmem:[%s3007_s29 + $0x88] sm:$0xf0] }
  0xdd   : > { %1617 = vmatpush.bf16.msrb.mxu1 %v2267_v23  ;;  %v2164_v23 = vld [vmem:[%s3007_s29 + $0x1b8] sm:$0xf0]  ;;  %v2039_v25 = vor.u32 %v2492_v16, %v2036_v19  ;;  %v2486_v57 = vld [vmem:[%s3007_s29 + $0x84] sm:$0xf]  ;;  %v2140_v0 = vld [vmem:[%s3007_s29 + $0x188] sm:$0xf0] }
  0xde   : > { %1631 = vmatpush.bf16.msrb.mxu2 %v2331_v24  ;;  %v1975_v24 = vor.u32 %v2476_v14, %v1972_v15  ;;  %v2167_v30 = vor.u32 %v2524_v22, %v2164_v23  ;;  %v2020_v46 = vld [vmem:[%s3007_s29 + $0x98] sm:$0xf0]  ;;  %v2502_v60 = vld [vmem:[%s3007_s29 + $0x104] sm:$0xf]  ;;  %v2548_v2 = vld [vmem:[%s3007_s29 + $0x274] sm:$0xf]  ;;  %v2015_v9 = vor.u32 %v2486_v57, %v2012_v59 }
  0xdf   : > { %1645 = vmatpush.bf16.msrb.mxu3 %v2395_v28  ;;  %1604 = vmatmul.bf16.vlgmr.msrb.gmra.mxu0 %v3208_v39  ;;  %v1964_v28 = vld [vmem:[%s3007_s29 + $0x28] sm:$0xf0]  ;;  %v2148_v51 = vld [vmem:[%s3007_s29 + $0x198] sm:$0xf0]  ;;  %v2023_v55 = vor.u32 %v2488_v42, %v2020_v46  ;;  %v2580_v7 = vld [vmem:[%s3007_s29 + $0x374] sm:$0xf] }
  0xe0   : > { %1652 = vmatpush.bf16.msra.mxu0 %v2007_v29  ;;  %1618 = vmatmul.bf16.vlgmr.msrb.gmra.mxu1 %v3215_v44  ;;  %v2490_v29 = vld [vmem:[%s3007_s29 + $0xa4] sm:$0xf]  ;;  %v1967_v36 = vor.u32 %v2474_v27, %v1964_v28  ;;  %v2260_v3 = vld [vmem:[%s3007_s29 + $0x278] sm:$0xf0]  ;;  %v2252_v20 = vld [vmem:[%s3007_s29 + $0x268] sm:$0xf0] }
  0xe1   : > { %1666 = vmatpush.bf16.msra.mxu1 %v2071_v33  ;;  %1632 = vmatmul.bf16.vlgmr.msrb.gmra.mxu2 %v3213_v43  ;;  %v2092_v33 = vld [vmem:[%s3007_s29 + $0x128] sm:$0xf0]  ;;  %v2031_v37 = vor.u32 %v2490_v29, %v2028_v31  ;;  %v2324_v6 = vld [vmem:[%s3007_s29 + $0x2f8] sm:$0xf0]  ;;  %v2263_v15 = vor.u32 %v2548_v2, %v2260_v3  ;;  %v2546_v19 = vld [vmem:[%s3007_s29 + $0x264] sm:$0xf] }
  0xe2   : > { %1680 = vmatpush.bf16.msra.mxu2 %v2135_v34  ;;  %1646 = vmatmul.bf16.vlgmr.msrb.gmra.mxu3 %v3219_v47  ;;  %v2522_v34 = vld [vmem:[%s3007_s29 + $0x1a4] sm:$0xf]  ;;  %v2388_v8 = vld [vmem:[%s3007_s29 + $0x378] sm:$0xf0]  ;;  %v2316_v23 = vld [vmem:[%s3007_s29 + $0x2e8] sm:$0xf0]  ;;  %v2255_v28 = vor.u32 %v2546_v19, %v2252_v20 }
  0xe3   : > { %1694 = vmatpush.bf16.msra.mxu3 %v2199_v38  ;;  %v2095_v38 = vor.u32 %v2506_v32, %v2092_v33  ;;  %v2159_v45 = vor.u32 %v2522_v34, %v2156_v35  ;;  %v2562_v21 = vld [vmem:[%s3007_s29 + $0x2e4] sm:$0xf]  ;;  %v2444_v27 = vld [vmem:[%s3007_s29 + $0x3e8] sm:$0xf0]  ;;  %v2544_v31 = vld [vmem:[%s3007_s29 + $0x254] sm:$0xf] }
  0xe4   : > { %1653 = vmatpush.bf16.msra.mxu0 %v1999_v48  ;;  %v2504_v48 = vld [vmem:[%s3007_s29 + $0x114] sm:$0xf]  ;;  %v2319_v29 = vor.u32 %v2562_v21, %v2316_v23  ;;  %v2244_v32 = vld [vmem:[%s3007_s29 + $0x258] sm:$0xf0]  ;;  %v2558_v46 = vld [vmem:[%s3007_s29 + $0x2c4] sm:$0xf] }
  0xe5   : > { %1667 = vmatpush.bf16.msra.mxu1 %v2063_v49  ;;  %v2084_v49 = vld [vmem:[%s3007_s29 + $0x118] sm:$0xf0]  ;;  %v2560_v33 = vld [vmem:[%s3007_s29 + $0x2d4] sm:$0xf]  ;;  %v2247_v41 = vor.u32 %v2544_v31, %v2244_v32  ;;  %v2534_v31 = vld [vmem:[%s3007_s29 + $0x204] sm:$0xf] }
  0xe6   : > { %1681 = vmatpush.bf16.msra.mxu2 %v2127_v50  ;;  %v2520_v50 = vld [vmem:[%s3007_s29 + $0x194] sm:$0xf]  ;;  %v2087_v56 = vor.u32 %v2504_v48, %v2084_v49  ;;  %v2308_v35 = vld [vmem:[%s3007_s29 + $0x2d8] sm:$0xf0]  ;;  %v2300_v49 = vld [vmem:[%s3007_s29 + $0x2c8] sm:$0xf0] }
  0xe7   : > { %1695 = vmatpush.bf16.msra.mxu3 %v2191_v54  ;;  %v1948_v54 = vld [vmem:[%s3007_s29 + $0x8] sm:$0xf0]  ;;  %v2436_v40 = vld [vmem:[%s3007_s29 + $0x3d8] sm:$0xf0]  ;;  %v2556_v57 = vld [vmem:[%s3007_s29 + $0x2b4] sm:$0xf] }
  0xe8   : > { %1654 = vmatpush.bf16.msra.mxu0 %v1991_v61  ;;  %v2151_v61 = vor.u32 %v2520_v50, %v2148_v51  ;;  %v1951_v5 = vor.u32 %v2470_v53, %v1948_v54  ;;  %v2364_v50 = vld [vmem:[%s3007_s29 + $0x348] sm:$0xf0]  ;;  %v2590_v51 = vld [vmem:[%s3007_s29 + $0x3c4] sm:$0xf]  ;;  %v2303_v53 = vor.u32 %v2558_v46, %v2300_v49  ;;  %v2536_v19 = vld [vmem:[%s3007_s29 + $0x214] sm:$0xf] }
  0xe9   : > { %1668 = vmatpush.bf16.msra.mxu1 %v2055_v62  ;;  %v2076_v62 = vld [vmem:[%s3007_s29 + $0x108] sm:$0xf0]  ;;  %v2212_v20 = vld [vmem:[%s3007_s29 + $0x218] sm:$0xf0]  ;;  %v2552_v21 = vld [vmem:[%s3007_s29 + $0x294] sm:$0xf] }
  0xea   : > { %1682 = vmatpush.bf16.msra.mxu2 %v2119_v63  ;;  %v2518_v63 = vld [vmem:[%s3007_s29 + $0x184] sm:$0xf]  ;;  %v2276_v23 = vld [vmem:[%s3007_s29 + $0x298] sm:$0xf0]  ;;  %v2204_v32 = vld [vmem:[%s3007_s29 + $0x208] sm:$0xf0] }
  0xeb   : > { %1696 = vmatpush.bf16.msra.mxu3 %v2183_v4  ;;  %v2564_v4 = vld [vmem:[%s3007_s29 + $0x2f4] sm:$0xf]  ;;  %v2143_v14 = vor.u32 %v2518_v63, %v2140_v0  ;;  %v2420_v0 = vld [vmem:[%s3007_s29 + $0x3b8] sm:$0xf0]  ;;  %s2598_s9 = sshll.u32 (%p2729_p6), %s2669_s11, 3 }
  0xec   : > { %1655 = vmatpush.bf16.msra.mxu0 %v1983_v11  ;;  %v2079_v11 = vor.u32 %v2502_v60, %v2076_v62  ;;  %v2327_v16 = vor.u32 %v2564_v4, %v2324_v6  ;;  %v2292_v60 = vld [vmem:[%s3007_s29 + $0x2b8] sm:$0xf0]  ;;  %v2588_v63 = vld [vmem:[%s3007_s29 + $0x3b4] sm:$0xf]  ;;  %v2220_v6 = vld [vmem:[%s3007_s29 + $0x228] sm:$0xf0]  ;;  %s1780_s26 = scalar_lea.vmem (%p2729_p6), %s3370_s2, %s2598_s9 }
  0xed   : > { %1669 = vmatpush.bf16.msra.mxu1 %v2047_v12  ;;  %v2596_v12 = vld [vmem:[%s3007_s29 + $0x3f4] sm:$0xf]  ;;  %v2356_v62 = vld [vmem:[%s3007_s29 + $0x338] sm:$0xf0]  ;;  %v2295_v3 = vor.u32 %v2556_v57, %v2292_v60 }
  0xee   : > { %1683 = vmatpush.bf16.msra.mxu2 %v2111_v13  ;;  %v2452_v13 = vld [vmem:[%s3007_s29 + $0x3f8] sm:$0xf0] }
  0xef   : > { %1697 = vmatpush.bf16.msra.mxu3 %v2175_v18  ;;  %v2391_v18 = vor.u32 %v2580_v7, %v2388_v8  ;;  %v2455_v22 = vor.u32 %v2596_v12, %v2452_v13  ;;  %v2554_v7 = vld [vmem:[%s3007_s29 + $0x2a4] sm:$0xf]  ;;  %v2423_v8 = vor.u32 %v2588_v63, %v2420_v0  ;;  %v2348_v12 = vld [vmem:[%s3007_s29 + $0x328] sm:$0xf0] }
  0xf0   : > { %1656 = vmatpush.bf16.msra.mxu0 %v1975_v24  ;;  %v2578_v24 = vld [vmem:[%s3007_s29 + $0x364] sm:$0xf] }
  0xf1   : > { %1670 = vmatpush.bf16.msra.mxu1 %v2039_v25  ;;  %v2380_v25 = vld [vmem:[%s3007_s29 + $0x368] sm:$0xf0]  ;;  %v2586_v13 = vld [vmem:[%s3007_s29 + $0x3a4] sm:$0xf] }
  0xf2   : > { %1684 = vmatpush.bf16.msra.mxu2 %v2103_v26  ;;  %v2594_v26 = vld [vmem:[%s3007_s29 + $0x3e4] sm:$0xf] }
  0xf3   : > { %1698 = vmatpush.bf16.msra.mxu3 %v2167_v30  ;;  %v2383_v30 = vor.u32 %v2578_v24, %v2380_v25  ;;  %v2447_v34 = vor.u32 %v2594_v26, %v2444_v27  ;;  %v2568_v24 = vld [vmem:[%s3007_s29 + $0x314] sm:$0xf]  ;;  %v2340_v25 = vld [vmem:[%s3007_s29 + $0x318] sm:$0xf0] }
  0xf4   : > { %1657 = vmatpush.bf16.msra.mxu0 %v1967_v36  ;;  %v2576_v36 = vld [vmem:[%s3007_s29 + $0x354] sm:$0xf]  ;;  %v2404_v27 = vld [vmem:[%s3007_s29 + $0x398] sm:$0xf0] }
  0xf5   : > { %1671 = vmatpush.bf16.msra.mxu1 %v2031_v37  ;;  %v2372_v37 = vld [vmem:[%s3007_s29 + $0x358] sm:$0xf0]  ;;  %v2584_v26 = vld [vmem:[%s3007_s29 + $0x394] sm:$0xf] }
  0xf6   : > { %1685 = vmatpush.bf16.msra.mxu2 %v2095_v38  ;;  %v2592_v38 = vld [vmem:[%s3007_s29 + $0x3d4] sm:$0xf]  ;;  %v2375_v42 = vor.u32 %v2576_v36, %v2372_v37  ;;  %v2566_v36 = vld [vmem:[%s3007_s29 + $0x304] sm:$0xf]  ;;  %v2332_v37 = vld [vmem:[%s3007_s29 + $0x308] sm:$0xf0] }
  0xf7   : > { %1699 = vmatpush.bf16.msra.mxu3 %v2159_v45  ;;  %v2542_v45 = vld [vmem:[%s3007_s29 + $0x244] sm:$0xf]  ;;  %v2439_v48 = vor.u32 %v2592_v38, %v2436_v40  ;;  %v2396_v40 = vld [vmem:[%s3007_s29 + $0x388] sm:$0xf0] }
  0xf8   : > { %1658 = vmatpush.bf16.msra.mxu0 %v1959_v52  ;;  %v2582_v38 = vld [vmem:[%s3007_s29 + $0x384] sm:$0xf] }
  0xf9   : > { %1672 = vmatpush.bf16.msra.mxu1 %v2023_v55  ;;  %v2540_v55 = vld [vmem:[%s3007_s29 + $0x234] sm:$0xf] }
  0xfa   : > { %1686 = vmatpush.bf16.msra.mxu2 %v2087_v56  ;;  %v2228_v56 = vld [vmem:[%s3007_s29 + $0x238] sm:$0xf0] }
  0xfb   : > { %1700 = vmatpush.bf16.msra.mxu3 %v2151_v61  ;;  %v2572_v61 = vld [vmem:[%s3007_s29 + $0x334] sm:$0xf]  ;;  %v2231_v2 = vor.u32 %v2540_v55, %v2228_v56 }
  0xfc   : > { %1659 = vmatpush.bf16.msra.mxu0 %v1951_v5  ;;  %v2359_v4 = vor.u32 %v2572_v61, %v2356_v62  ;;  %v2538_v5 = vld [vmem:[%s3007_s29 + $0x224] sm:$0xf] }
  0xfd   : > { %1673 = vmatpush.bf16.msra.mxu1 %v2015_v9  ;;  %v2284_v9 = vld [vmem:[%s3007_s29 + $0x2a8] sm:$0xf0] }
  0xfe   : > { %1687 = vmatpush.bf16.msra.mxu2 %v2079_v11  ;;  %v2570_v11 = vld [vmem:[%s3007_s29 + $0x324] sm:$0xf] }
  0xff   : > { %1701 = vmatpush.bf16.msra.mxu3 %v2143_v14  ;;  %1660 = vmatmul.bf16.vlgmr.msra.gmra.mxu0 %v3100_v58  ;;  %v2574_v58 = vld [vmem:[%s3007_s29 + $0x344] sm:$0xf]  ;;  %v2412_v14 = vld [vmem:[%s3007_s29 + $0x3a8] sm:$0xf0] }
 0x100   : > { %1708 = vmatpush.bf16.msrb.mxu0 %v2263_v15  ;;  %1674 = vmatmul.bf16.vlgmr.msra.gmra.mxu1 %v3124_v10  ;;  %v2428_v10 = vld [vmem:[%s3007_s29 + $0x3c8] sm:$0xf0]  ;;  %v2367_v54 = vor.u32 %v2574_v58, %v2364_v50  ;;  %v2223_v15 = vor.u32 %v2538_v5, %v2220_v6 }
 0x101   : > { %1722 = vmatpush.bf16.msrb.mxu1 %v2327_v16  ;;  %1688 = vmatmul.bf16.vlgmr.msra.gmra.mxu2 %v3108_v1  ;;  %v2311_v1 = vor.u32 %v2560_v33, %v2308_v35  ;;  %v2431_v59 = vor.u32 %v2590_v51, %v2428_v10  ;;  %v2287_v16 = vor.u32 %v2554_v7, %v2284_v9  ;;  %v2550_v33 = vld [vmem:[%s3007_s29 + $0x284] sm:$0xf]  ;;  %v2268_v35 = vld [vmem:[%s3007_s29 + $0x288] sm:$0xf0] }
 0x102   : > { %1736 = vmatpush.bf16.msrb.mxu2 %v2391_v18  ;;  %1702 = vmatmul.bf16.vlgmr.msra.gmra.mxu3 %v3132_v17  ;;  %v2236_v17 = vld [vmem:[%s3007_s29 + $0x248] sm:$0xf0]  ;;  %v2351_v18 = vor.u32 %v2570_v11, %v2348_v12  ;;  %s1911_s29 = sshll.u32 %s688_s27, 4 }
 0x103   : > { %1750 = vmatpush.bf16.msrb.mxu3 %v2455_v22  ;;  %v2239_v52 = vor.u32 %v2542_v45, %v2236_v17  ;;  %v2415_v22 = vor.u32 %v2586_v13, %v2412_v14  ;;  %v2399_v45 = vor.u32 %v2582_v38, %v2396_v40  ;;  %s713_s24 = scalar_lea.vmem [#allocation3], %s1911_s29 }
 0x104   : > { %1709 = vmatpush.bf16.msrb.mxu0 %v2255_v28  ;;  %v2215_v28 = vor.u32 %v2536_v19, %v2212_v20 }
 0x105   : > { %1723 = vmatpush.bf16.msrb.mxu1 %v2319_v29  ;;  %v2279_v29 = vor.u32 %v2552_v21, %v2276_v23 }
 0x106   : > { %1737 = vmatpush.bf16.msrb.mxu2 %v2383_v30  ;;  %v2343_v30 = vor.u32 %v2568_v24, %v2340_v25 }
 0x107   : > { %1751 = vmatpush.bf16.msrb.mxu3 %v2447_v34  ;;  %v2407_v34 = vor.u32 %v2584_v26, %v2404_v27 }
 0x108   : > { %1710 = vmatpush.bf16.msrb.mxu0 %v2247_v41  ;;  %v2207_v41 = vor.u32 %v2534_v31, %v2204_v32 }
 0x109   : > { %1724 = vmatpush.bf16.msrb.mxu1 %v2311_v1  ;;  %v2271_v1 = vor.u32 %v2550_v33, %v2268_v35 }
 0x10a   : > { %1738 = vmatpush.bf16.msrb.mxu2 %v2375_v42  ;;  %v2335_v42 = vor.u32 %v2566_v36, %v2332_v37 }
 0x10b   : > { %1752 = vmatpush.bf16.msrb.mxu3 %v2439_v48 }
 0x10c   : > { %1711 = vmatpush.bf16.msrb.mxu0 %v2239_v52 }
 0x10d   : > { %1725 = vmatpush.bf16.msrb.mxu1 %v2303_v53 }
 0x10e   : > { %1739 = vmatpush.bf16.msrb.mxu2 %v2367_v54 }
 0x10f   : > { %1753 = vmatpush.bf16.msrb.mxu3 %v2431_v59 }
 0x110   : > { %1712 = vmatpush.bf16.msrb.mxu0 %v2231_v2 }
 0x111   : > { %1726 = vmatpush.bf16.msrb.mxu1 %v2295_v3 }
 0x112   : > { %1740 = vmatpush.bf16.msrb.mxu2 %v2359_v4 }
 0x113   : > { %1754 = vmatpush.bf16.msrb.mxu3 %v2423_v8 }
 0x114   : > { %1713 = vmatpush.bf16.msrb.mxu0 %v2223_v15 }
 0x115   : > { %1727 = vmatpush.bf16.msrb.mxu1 %v2287_v16 }
 0x116   : > { %1741 = vmatpush.bf16.msrb.mxu2 %v2351_v18 }
 0x117   : > { %1755 = vmatpush.bf16.msrb.mxu3 %v2415_v22 }
 0x118   : > { %1714 = vmatpush.bf16.msrb.mxu0 %v2215_v28 }
 0x119   : > { %1728 = vmatpush.bf16.msrb.mxu1 %v2279_v29 }
 0x11a   : > { %1742 = vmatpush.bf16.msrb.mxu2 %v2343_v30 }
 0x11b   : > { %1756 = vmatpush.bf16.msrb.mxu3 %v2407_v34 }
 0x11c   : > { %1715 = vmatpush.bf16.msrb.mxu0 %v2207_v41 }
 0x11d   : > { %1729 = vmatpush.bf16.msrb.mxu1 %v2271_v1 }
 0x11e   : > { %1743 = vmatpush.bf16.msrb.mxu2 %v2335_v42 }
 0x11f   : > { %1757 = vmatpush.bf16.msrb.mxu3 %v2399_v45  ;;  %1716 = vmatmul.bf16.vlgmr.msrb.gmra.mxu0 %v3208_v39 }
 0x120   : > { %1730 = vmatmul.bf16.vlgmr.msrb.gmra.mxu1 %v3215_v44 }
 0x121   : > { %1744 = vmatmul.bf16.vlgmr.msrb.gmra.mxu2 %v3213_v43 }
 0x122   : > { %1758 = vmatmul.bf16.vlgmr.msrb.gmra.mxu3 %v3219_v47 }
 0x13c   : > { %v1549_v17 = vpop.f32.mrf.mxu0 }
 0x13d   : > { %v1563_v46 = vpop.f32.mrf.mxu1 }
 0x13e   : > { %v1564_v60 = vadd.f32 %v1563_v46, %v1549_v17 }
 0x144   : > { %v1577_v48 = vpop.f32.mrf.mxu2  ;;  %v1551_v58 = vpop.f32.mrf.mxu0 }
 0x145   : > { %v1591_v49 = vpop.f32.mrf.mxu3  ;;  %v1565_v50 = vpop.f32.mrf.mxu1  ;;  %v1578_v61 = vadd.f32 %v1577_v48, %v1564_v60 }
 0x146   : > { %v1566_v5 = vadd.f32 %v1565_v50, %v1551_v58 }
 0x147   : > { %v1592_v2 = vadd.f32 %v1591_v49, %v1578_v61 }
 0x14c   : > { %v1579_v51 = vpop.f32.mrf.mxu2 }
 0x14d   : > { %v1593_v10 = vpop.f32.mrf.mxu3  ;;  %v1580_v13 = vadd.f32 %v1579_v51, %v1566_v5 }
 0x14f   : > { %v1594_v19 = vadd.f32 %v1593_v10, %v1580_v13 }
 0x15c   : > { %v1605_v52 = vpop.f32.mrf.mxu0 }
 0x15d   : > { %v1619_v53 = vpop.f32.mrf.mxu1  ;;  %v1606_v6 = vadd.f32 %v1605_v52, %v1592_v2 }
 0x15f   : > { %v1620_v14 = vadd.f32 %v1619_v53, %v1606_v6 }
 0x164   : > { %v1633_v54 = vpop.f32.mrf.mxu2  ;;  %v1607_v56 = vpop.f32.mrf.mxu0 }
 0x165   : > { %v1647_v55 = vpop.f32.mrf.mxu3  ;;  %v1621_v39 = vpop.f32.mrf.mxu1  ;;  %v1634_v20 = vadd.f32 %v1633_v54, %v1620_v14  ;;  %v1608_v23 = vadd.f32 %v1607_v56, %v1594_v19 }
 0x167   : > { %v1648_v28 = vadd.f32 %v1647_v55, %v1634_v20  ;;  %v1622_v31 = vadd.f32 %v1621_v39, %v1608_v23 }
 0x16c   : > { %v1635_v57 = vpop.f32.mrf.mxu2 }
 0x16d   : > { %v1649_v44 = vpop.f32.mrf.mxu3  ;;  %v1636_v34 = vadd.f32 %v1635_v57, %v1622_v31 }
 0x16f   : > { %v1650_v40 = vadd.f32 %v1649_v44, %v1636_v34 }
 0x17c   : > { %v1661_v59 = vpop.f32.mrf.mxu0 }
 0x17d   : > { %v1675_v43 = vpop.f32.mrf.mxu1 }
 0x17e   : > { %v1676_v63 = vadd.f32 %v1675_v43, %v1661_v59 }
 0x184   : > { %v1689_v47 = vpop.f32.mrf.mxu2  ;;  %v1663_v0 = vpop.f32.mrf.mxu0 }
 0x185   : > { %v1703_v62 = vpop.f32.mrf.mxu3  ;;  %v1677_v3 = vpop.f32.mrf.mxu1  ;;  %v1690_v4 = vadd.f32 %v1689_v47, %v1676_v63 }
 0x186   : > { %v1678_v9 = vadd.f32 %v1677_v3, %v1663_v0 }
 0x187   : > { %v1704_v8 = vadd.f32 %v1703_v62, %v1690_v4 }
 0x18c   : > { %v1691_v7 = vpop.f32.mrf.mxu2 }
 0x18d   : > { %v1705_v11 = vpop.f32.mrf.mxu3  ;;  %v1692_v18 = vadd.f32 %v1691_v7, %v1678_v9 }
 0x18f   : > { %v1706_v24 = vadd.f32 %v1705_v11, %v1692_v18 }
 0x19c   : > { %v1717_v12 = vpop.f32.mrf.mxu0 }
 0x19d   : > { %v1718_v15 = vadd.f32 %v1717_v12, %v1704_v8  ;;  %v1731_v16 = vpop.f32.mrf.mxu1 }
 0x19f   : > { %v1732_v21 = vadd.f32 %v1731_v16, %v1718_v15 }
 0x1a4   : > { %v1745_v22 = vpop.f32.mrf.mxu2  ;;  %v1719_v27 = vpop.f32.mrf.mxu0 }
 0x1a5   : > { %v1746_v25 = vadd.f32 %v1745_v22, %v1732_v21  ;;  %v1759_v26 = vpop.f32.mrf.mxu3  ;;  %v1720_v30 = vadd.f32 %v1719_v27, %v1706_v24  ;;  %v1733_v33 = vpop.f32.mrf.mxu1 }
 0x1a7   : > { %v1760_v29 = vadd.f32 %v1759_v26, %v1746_v25  ;;  %v1734_v35 = vadd.f32 %v1733_v33, %v1720_v30 }
 0x1a9   : > { %v1764_v32 = vpack.c.bf16 %v1760_v29, %v1648_v28 }
 0x1ab   : > { %1766 = vst [vmem:[%s713_s24] sm:$0xff] %v1764_v32 }
 0x1ac   : > { %v1747_v36 = vpop.f32.mrf.mxu2 }
 0x1ad   : > { %v1748_v37 = vadd.f32 %v1747_v36, %v1734_v35  ;;  %v1761_v38 = vpop.f32.mrf.mxu3 }
 0x1af   : > { %v1762_v41 = vadd.f32 %v1761_v38, %v1748_v37  ;;  %1774 = sbr.rel (!%p2729_p6) target bundleno = 444 (0x1bc), region = 70 }
 0x1b1   : > { %v1765_v1 = vpack.c.bf16 %v1762_v41, %v1650_v40 }
 0x1b2   : > { %v1811_v42 = vld [vmem:[%s713_s24] sm:$0xff] (%p2729_p6) }
 0x1b3   : > { %1767 = vst [vmem:[%s713_s24 + $0x8] sm:$0xff] %v1765_v1 }
 0x1b4   : > { %1812 = vst [vmem:[%s1780_s26] sm:$0xff] %v1811_v42 }
 0x1ba   : > { %v1813_v45 = vld [vmem:[%s713_s24 + $0x8] sm:$0xff] }
 0x1bb   : > { %1814 = vst [vmem:[%s1780_s26 + $0x10] sm:$0xff] %v1813_v45 }
 0x1bc PF: > { %s12_s13 = sadd.s32 1, %s2677_s13   ;;  %s3372_s9 = smov %s2665_s10 }
 0x1bd   : > { %p9_p11 = scmp.ge.s32.totalorder %s12_s13, 4   ;;  %s3373_s10 = smov %s2734_s19 }
 0x1be   : > { %s3374_s11 = smov %s2673_s12  ;;  %s3375_s12 = smov %s3377_s14 }
 0x1bf   :  { %11 = sbr.rel (!%p9_p11) target bundleno = 3 (0x3), region = 142 }

// kernel: _forward_impl.482
= control target key start
LH: loop header
LB: loop body
LE: loop exit
PB: predicated region body
PF: predicated region fallthrough
CT: control target
= control target key end

     0   :  { %s523_s12 = smov 0   ;;  %s589_s0 = inlined_call_operand.vmem [shape: bf16[2,1024], index: 0, kind: input, shape index: {}]   ;;  %s590_s1 = inlined_call_operand.vmem [shape: f32[1,1024], index: 1, kind: input, shape index: {}]   ;;  %s591_s2 = inlined_call_operand.vmem [shape: f32[1,1024], index: 2, kind: input, shape index: {}]   ;;  %s592_s3 = inlined_call_operand.vmem [shape: f32[2,1024], index: 3, kind: output, shape index: {}]  }
   0x1 LB: > { %s467_s13 = sadd.s32 4294967295, %s501_s12   ;;  %p471_p0 = scmp.ge.s32.totalorder %s501_s12, 1  ;;  %s501_s12 = sphi %s523_s12, %s13_s12  }
   0x2   : > { %p157_p1 = scmp.lt.s32.totalorder %s501_s12, 3 }
   0x4   : > { %p158_p2 = pnand %p471_p0, %p157_p1 }
   0x5   : > { %s472_s14 = sshll.u32 (!%p158_p2), %s467_s13, 2 }
   0x6   : > { %161 = sbr.rel (%p158_p2) target bundleno = 106 (0x6a), region = 32  ;;  %p189_p3 = scmp.lt.s32.totalorder (!%p158_p2), %s472_s14, 7 }
   0xb   : > { %s596_s14 = smov (!%p189_p3, %s472_s14), 7  ;;  %vm221_vm0 = vcmask 1041408   ;;  %vm262_vm1 = vcmask 1045508   ;;  %vm264_vm2 = vcmask 1043456  }
   0xc   : > { %s191_s17 = scalar_lea.vmem %s589_s0, %s596_s14  ;;  %s196_s20 = scalar_lea.vmem %s590_s1, %s596_s14 }
   0xd   : > { %v209_v0 = vld [vmem:[%s191_s17] sm:$0xf]  ;;  %s201_s23 = scalar_lea.vmem %s591_s2, %s596_s14  ;;  %s476_s24 = sshll.u32 %s596_s14, 1 }
   0xe   : > { %v210_v1 = vunpack.c.l.bf16 %v209_v0  ;;  %s207_s27 = scalar_lea.vmem %s592_s3, %s476_s24 }
  0x10   : > { %212 = vst [vmem:[#allocation1] ss:$4 sm:$0xff] %v210_v1 }
  0x17   : > { %v213_v2 = vld.sshfl [vmem:[#allocation1] sm:$0xff pattern:$0x73625140]  ;;  %v214_v3 = vld.sshfl [vmem:[#allocation1 + $0x8] sm:$0xff pattern:$0x73625140] }
  0x18   : > { %v215_v4 = vld.sshfl [vmem:[#allocation1 + $0x10] sm:$0xff pattern:$0x73625140]  ;;  %v216_v5 = vld.sshfl [vmem:[#allocation1 + $0x18] sm:$0xff pattern:$0x73625140] }
  0x19   : > { %v222_v6 = vsel %vm221_vm0, %v213_v2, 0.0  ;;  %v229_v7 = vsel %vm221_vm0, %v214_v3, 0.0  ;;  %v236_v8 = vsel %vm221_vm0, %v215_v4, 0.0  ;;  %v243_v9 = vsel %vm221_vm0, %v216_v5, 0.0 }
  0x1a   : > { %v223_v10 = vrot.slane %v222_v6, 4  ;;  %v230_v11 = vrot.slane %v229_v7, 4  ;;  %v237_v12 = vrot.slane %v236_v8, 4  ;;  %v244_v13 = vrot.slane %v243_v9, 4 }
  0x1c   : > { %v224_v14 = vadd.f32 %v223_v10, %v222_v6  ;;  %v231_v15 = vadd.f32 %v230_v11, %v229_v7  ;;  %v238_v16 = vadd.f32 %v237_v12, %v236_v8  ;;  %v245_v17 = vadd.f32 %v244_v13, %v243_v9 }
  0x1e   : > { %v225_v18 = vrot.slane %v224_v14, 2  ;;  %v232_v19 = vrot.slane %v231_v15, 2  ;;  %v239_v20 = vrot.slane %v238_v16, 2  ;;  %v246_v21 = vrot.slane %v245_v17, 2 }
  0x20   : > { %v226_v22 = vadd.f32 %v225_v18, %v224_v14  ;;  %v233_v23 = vadd.f32 %v232_v19, %v231_v15  ;;  %v240_v24 = vadd.f32 %v239_v20, %v238_v16  ;;  %v247_v25 = vadd.f32 %v246_v21, %v245_v17 }
  0x22   : > { %v227_v26 = vrot.slane %v226_v22, 1  ;;  %v234_v27 = vrot.slane %v233_v23, 1  ;;  %v241_v28 = vrot.slane %v240_v24, 1  ;;  %v248_v29 = vrot.slane %v247_v25, 1 }
  0x24   : > { %v228_v30 = vadd.f32 %v227_v26, %v226_v22  ;;  %v235_v31 = vadd.f32 %v234_v27, %v233_v23  ;;  %v242_v32 = vadd.f32 %v241_v28, %v240_v24  ;;  %v249_v33 = vadd.f32 %v248_v29, %v247_v25  ;;  %v556_v22 = vld [vmem:[%s196_s20] sm:$0xf] }
  0x25   : > { %v370_v26 = vperm.slane %v556_v22, 1  ;;  %v371_v29 = vperm.slane %v556_v22, 2 }
  0x26   : > { %v251_v34 = vmul.f32 0.5, %v235_v31  ;;  %v252_v35 = vmul.f32 0.5, %v242_v32  ;;  %v253_v36 = vmul.f32 0.5, %v249_v33  ;;  %v250_v37 = vmul.f32 0.5, %v228_v30  ;;  %v381_v33 = vld [vmem:[%s201_s23] sm:$0xf] }
  0x28   : > { %v258_v38 = vrot.slane %v251_v34, 6  ;;  %v259_v39 = vrot.slane %v252_v35, 4  ;;  %v260_v40 = vrot.slane %v253_v36, 2  ;;  %v372_v36 = vperm.slane %v556_v22, 3 }
  0x2a   : > { %v261_v41 = vsel %vm221_vm0, %v250_v37, %v258_v38  ;;  %v263_v42 = vsel %vm262_vm1, %v259_v39, %v260_v40  ;;  %v369_v39 = vperm.slane %v556_v22, 0  ;;  %v373_v40 = vrot.slane %v370_v26, 6 }
  0x2b   : > { %v265_v43 = vsel %vm264_vm2, %v261_v41, %v263_v42 }
  0x2c   : > { %v544_v44 = vsub.f32 %v210_v1, %v265_v43  ;;  %v374_v43 = vrot.slane %v371_v29, 4 }
  0x2e   : > { %v268_v45 = vmul.f32 %v544_v44, %v544_v44 }
  0x30   : > { %270 = vst [vmem:[#allocation1] ss:$4 sm:$0xff] %v268_v45  ;;  %v384_v45 = vperm.slane %v381_v33, 1 }
  0x37   : > { %v271_v46 = vld.sshfl [vmem:[#allocation1] sm:$0xff pattern:$0x73625140]  ;;  %v272_v47 = vld.sshfl [vmem:[#allocation1 + $0x8] sm:$0xff pattern:$0x73625140] }
  0x38   : > { %v273_v48 = vld.sshfl [vmem:[#allocation1 + $0x10] sm:$0xff pattern:$0x73625140]  ;;  %v274_v49 = vld.sshfl [vmem:[#allocation1 + $0x18] sm:$0xff pattern:$0x73625140] }
  0x39   : > { %v279_v50 = vsel %vm221_vm0, %v271_v46, 0.0  ;;  %v286_v51 = vsel %vm221_vm0, %v272_v47, 0.0  ;;  %v293_v52 = vsel %vm221_vm0, %v273_v48, 0.0  ;;  %v300_v53 = vsel %vm221_vm0, %v274_v49, 0.0 }
  0x3a   : > { %v280_v54 = vrot.slane %v279_v50, 4  ;;  %v287_v55 = vrot.slane %v286_v51, 4  ;;  %v294_v56 = vrot.slane %v293_v52, 4  ;;  %v301_v57 = vrot.slane %v300_v53, 4 }
  0x3b   : > { %v385_v48 = vperm.slane %v381_v33, 2 }
  0x3c   : > { %v281_v58 = vadd.f32 %v280_v54, %v279_v50  ;;  %v288_v59 = vadd.f32 %v287_v55, %v286_v51  ;;  %v295_v60 = vadd.f32 %v294_v56, %v293_v52  ;;  %v302_v61 = vadd.f32 %v301_v57, %v300_v53 }
  0x3d   : > { %v386_v51 = vperm.slane %v381_v33, 3 }
  0x3e   : > { %v282_v62 = vrot.slane %v281_v58, 2  ;;  %v289_v63 = vrot.slane %v288_v59, 2  ;;  %v296_v0 = vrot.slane %v295_v60, 2  ;;  %v303_v1 = vrot.slane %v302_v61, 2 }
  0x40   : > { %v283_v2 = vadd.f32 %v282_v62, %v281_v58  ;;  %v290_v3 = vadd.f32 %v289_v63, %v288_v59  ;;  %v297_v4 = vadd.f32 %v296_v0, %v295_v60  ;;  %v304_v5 = vadd.f32 %v303_v1, %v302_v61 }
  0x41   : > { %v375_v58 = vrot.slane %v372_v36, 2  ;;  %v383_v59 = vperm.slane %v381_v33, 0  ;;  %v387_v62 = vrot.slane %v384_v45, 6  ;;  %v388_v1 = vrot.slane %v385_v48, 4 }
  0x42   : > { %v284_v6 = vrot.slane %v283_v2, 1  ;;  %v291_v7 = vrot.slane %v290_v3, 1  ;;  %v298_v8 = vrot.slane %v297_v4, 1  ;;  %v305_v9 = vrot.slane %v304_v5, 1 }
  0x44   : > { %v285_v10 = vadd.f32 %v284_v6, %v283_v2  ;;  %v292_v11 = vadd.f32 %v291_v7, %v290_v3  ;;  %v299_v12 = vadd.f32 %v298_v8, %v297_v4  ;;  %v306_v13 = vadd.f32 %v305_v9, %v304_v5 }
  0x45   : > { %v389_v2 = vrot.slane %v386_v51, 2  ;;  %v376_v8 = vsel %vm221_vm0, %v369_v39, %v373_v40  ;;  %v377_v9 = vsel %vm262_vm1, %v374_v43, %v375_v58 }
  0x46   : > { %v307_v14 = vmul.f32 0.5, %v285_v10  ;;  %v308_v15 = vmul.f32 0.5, %v292_v11  ;;  %v309_v16 = vmul.f32 0.5, %v299_v12  ;;  %v310_v17 = vmul.f32 0.5, %v306_v13 }
  0x47   : > { %v390_v11 = vsel %vm221_vm0, %v383_v59, %v387_v62  ;;  %v391_v12 = vsel %vm262_vm1, %v388_v1, %v389_v2 }
  0x48   : > { %v311_v18 = vadd.f32 1e-05, %v307_v14  ;;  %v312_v19 = vadd.f32 1e-05, %v308_v15  ;;  %v313_v20 = vadd.f32 1e-05, %v309_v16  ;;  %v378_v14 = vsel %vm264_vm2, %v376_v8, %v377_v9 }
  0x49   : > { %v314_v21 = vadd.f32 1e-05, %v310_v17  ;;  %v392_v16 = vsel %vm264_vm2, %v390_v11, %v391_v12 }
  0x4a   : > { %487 = vrsqrt.f32 %v311_v18  ;;  %vm321_vm5 = vweird.f32 %v311_v18  ;;  %vm331_vm6 = vweird.f32 %v312_v19  ;;  %vm341_vm11 = vweird.f32 %v313_v20 }
  0x4b   : > { %489 = vrsqrt.f32 %v312_v19  ;;  %vm351_vm13 = vweird.f32 %v314_v21 }
  0x4c   : > { %491 = vrsqrt.f32 %v313_v20 }
  0x4d   : > { %493 = vrsqrt.f32 %v314_v21 }
  0x50   : > { %v488_v23 = vpop.eup %487 }
  0x51   : > { %v490_v24 = vpop.eup %489  ;;  %v316_v25 = vmul.f32 %v488_v23, %v311_v18  ;;  %vm322_vm3 = vweird.f32 %v488_v23 }
  0x52   : > { %v492_v27 = vpop.eup %491  ;;  %v326_v28 = vmul.f32 %v490_v24, %v312_v19  ;;  %vm332_vm4 = vweird.f32 %v490_v24  ;;  %vm566_vm8 = vmor %vm321_vm5, %vm322_vm3 }
  0x53   : > { %v494_v30 = vpop.eup %493  ;;  %v317_v31 = vmul.f32 %v488_v23, %v316_v25  ;;  %v336_v32 = vmul.f32 %v492_v27, %v313_v20  ;;  %vm342_vm7 = vweird.f32 %v492_v27  ;;  %vm333_vm10 = vmor %vm331_vm6, %vm332_vm4 }
  0x54   : > { %v327_v34 = vmul.f32 %v490_v24, %v326_v28  ;;  %v346_v35 = vmul.f32 %v494_v30, %v314_v21  ;;  %vm352_vm9 = vweird.f32 %v494_v30  ;;  %vm343_vm12 = vmor %vm341_vm11, %vm342_vm7 }
  0x55   : > { %v318_v37 = vmul.f32 0.5, %v317_v31  ;;  %v337_v38 = vmul.f32 %v492_v27, %v336_v32  ;;  %vm353_vm14 = vmor %vm351_vm13, %vm352_vm9 }
  0x56   : > { %v328_v41 = vmul.f32 0.5, %v327_v34  ;;  %v347_v42 = vmul.f32 %v494_v30, %v346_v35 }
  0x57   : > { %v319_v46 = vsub.f32 1.5, %v318_v37  ;;  %v338_v47 = vmul.f32 0.5, %v337_v38 }
  0x58   : > { %v329_v49 = vsub.f32 1.5, %v328_v41  ;;  %v348_v50 = vmul.f32 0.5, %v347_v42 }
  0x59   : > { %v339_v52 = vsub.f32 1.5, %v338_v47  ;;  %v320_v53 = vmul.f32 %v488_v23, %v319_v46 }
  0x5a   : > { %v330_v55 = vmul.f32 %v490_v24, %v329_v49  ;;  %v349_v56 = vsub.f32 1.5, %v348_v50 }
  0x5b   : > { %v340_v57 = vmul.f32 %v492_v27, %v339_v52  ;;  %v324_v3 = vsel %vm566_vm8, %v488_v23, %v320_v53 }
  0x5c   : > { %v334_v60 = vsel %vm333_vm10, %v490_v24, %v330_v55  ;;  %v350_v61 = vmul.f32 %v494_v30, %v349_v56 }
  0x5d   : > { %v344_v63 = vsel %vm343_vm12, %v492_v27, %v340_v57  ;;  %v359_v0 = vrot.slane %v334_v60, 6 }
  0x5e   : > { %v354_v4 = vsel %vm353_vm14, %v494_v30, %v350_v61  ;;  %v360_v5 = vrot.slane %v344_v63, 4 }
  0x5f   : > { %v361_v6 = vrot.slane %v354_v4, 2  ;;  %v362_v7 = vsel %vm221_vm0, %v324_v3, %v359_v0 }
  0x61   : > { %v363_v10 = vsel %vm262_vm1, %v360_v5, %v361_v6 }
  0x62   : > { %v364_v13 = vsel %vm264_vm2, %v362_v7, %v363_v10 }
  0x63   : > { %v366_v15 = vmul.f32 %v364_v13, %v544_v44 }
  0x65   : > { %v380_v17 = vmul.f32 %v378_v14, %v366_v15 }
  0x67   : > { %v394_v18 = vadd.f32 %v392_v16, %v380_v17 }
  0x69   : > { %395 = vst [vmem:[%s207_s27] sm:$0xff] %v394_v18 }
  0x6a PF: > { %s13_s12 = sadd.s32 1, %s501_s12  }
  0x6b   : > { %p10_p4 = scmp.ge.s32.totalorder %s13_s12, 4  }
  0x6d   :  { %12 = sbr.rel (!%p10_p4) target bundleno = 1 (0x1), region = 68 }

// kernel: _forward_impl.483
= control target key start
LH: loop header
LB: loop body
LE: loop exit
PB: predicated region body
PF: predicated region fallthrough
CT: control target
= control target key end

     0   :  { %s826_s0 = inlined_call_operand.vmem [shape: f32[2,1,1024], index: 0, kind: input, shape index: {}]   ;;  %s827_s1 = inlined_call_operand.vmem [shape: f32[1024,10], index: 1, kind: input, shape index: {}]   ;;  %s828_s2 = inlined_call_operand.vmem [shape: f32[1,10], index: 2, kind: input, shape index: {}]   ;;  %s829_s3 = inlined_call_operand.hbm [shape: f32[2,10], index: 3, kind: output, shape index: {}]  }
   0x1   :  { %v66_v0 = vld [vmem:[%s827_s1 + $0x178] sm:$0xff]  ;;  %v65_v2 = vld [vmem:[%s827_s1 + $0x170] sm:$0xff]  ;;  %v64_v6 = vld [vmem:[%s827_s1 + $0x168] sm:$0xff] }
   0x2   :  { %v34_v1 = vld [vmem:[%s827_s1 + $0x78] sm:$0xff]  ;;  %212 = vmatpush.msra.mxu2 %v66_v0  ;;  %v33_v4 = vld [vmem:[%s827_s1 + $0x70] sm:$0xff]  ;;  %v32_v8 = vld [vmem:[%s827_s1 + $0x68] sm:$0xff] }
   0x3   :  { %172 = vmatpush.msra.mxu0 %v34_v1  ;;  %v82_v3 = vld [vmem:[%s827_s1 + $0x1f8] sm:$0xff]  ;;  %v81_v7 = vld [vmem:[%s827_s1 + $0x1f0] sm:$0xff]  ;;  %v80_v10 = vld [vmem:[%s827_s1 + $0x1e8] sm:$0xff] }
   0x4   :  { %v50_v5 = vld [vmem:[%s827_s1 + $0xf8] sm:$0xff]  ;;  %232 = vmatpush.msra.mxu3 %v82_v3  ;;  %213 = vmatpush.msra.mxu2 %v65_v2  ;;  %v49_v9 = vld [vmem:[%s827_s1 + $0xf0] sm:$0xff]  ;;  %v63_v11 = vld [vmem:[%s827_s1 + $0x160] sm:$0xff] }
   0x5   :  { %192 = vmatpush.msra.mxu1 %v50_v5  ;;  %173 = vmatpush.msra.mxu0 %v33_v4  ;;  %v31_v12 = vld [vmem:[%s827_s1 + $0x60] sm:$0xff]  ;;  %v48_v13 = vld [vmem:[%s827_s1 + $0xe8] sm:$0xff]  ;;  %v62_v16 = vld [vmem:[%s827_s1 + $0x158] sm:$0xff] }
   0x6   :  { %233 = vmatpush.msra.mxu3 %v81_v7  ;;  %214 = vmatpush.msra.mxu2 %v64_v6  ;;  %v79_v14 = vld [vmem:[%s827_s1 + $0x1e0] sm:$0xff]  ;;  %v30_v17 = vld [vmem:[%s827_s1 + $0x58] sm:$0xff]  ;;  %v61_v20 = vld [vmem:[%s827_s1 + $0x150] sm:$0xff] }
   0x7   :  { %193 = vmatpush.msra.mxu1 %v49_v9  ;;  %174 = vmatpush.msra.mxu0 %v32_v8  ;;  %v47_v15 = vld [vmem:[%s827_s1 + $0xe0] sm:$0xff]  ;;  %v78_v18 = vld [vmem:[%s827_s1 + $0x1d8] sm:$0xff]  ;;  %v29_v21 = vld [vmem:[%s827_s1 + $0x50] sm:$0xff] }
   0x8   :  { %234 = vmatpush.msra.mxu3 %v80_v10  ;;  %215 = vmatpush.msra.mxu2 %v63_v11  ;;  %v46_v19 = vld [vmem:[%s827_s1 + $0xd8] sm:$0xff]  ;;  %v77_v22 = vld [vmem:[%s827_s1 + $0x1d0] sm:$0xff]  ;;  %v60_v24 = vld [vmem:[%s827_s1 + $0x148] sm:$0xff] }
   0x9   :  { %194 = vmatpush.msra.mxu1 %v48_v13  ;;  %175 = vmatpush.msra.mxu0 %v31_v12  ;;  %v45_v23 = vld [vmem:[%s827_s1 + $0xd0] sm:$0xff]  ;;  %v28_v25 = vld [vmem:[%s827_s1 + $0x48] sm:$0xff]  ;;  %v59_v28 = vld [vmem:[%s827_s1 + $0x140] sm:$0xff] }
   0xa   :  { %235 = vmatpush.msra.mxu3 %v79_v14  ;;  %216 = vmatpush.msra.mxu2 %v62_v16  ;;  %v76_v26 = vld [vmem:[%s827_s1 + $0x1c8] sm:$0xff]  ;;  %v27_v29 = vld [vmem:[%s827_s1 + $0x40] sm:$0xff]  ;;  %v58_v32 = vld [vmem:[%s827_s1 + $0x138] sm:$0xff] }
   0xb   :  { %195 = vmatpush.msra.mxu1 %v47_v15  ;;  %176 = vmatpush.msra.mxu0 %v30_v17  ;;  %v44_v27 = vld [vmem:[%s827_s1 + $0xc8] sm:$0xff]  ;;  %v75_v30 = vld [vmem:[%s827_s1 + $0x1c0] sm:$0xff]  ;;  %v26_v33 = vld [vmem:[%s827_s1 + $0x38] sm:$0xff] }
   0xc   :  { %236 = vmatpush.msra.mxu3 %v78_v18  ;;  %217 = vmatpush.msra.mxu2 %v61_v20  ;;  %v43_v31 = vld [vmem:[%s827_s1 + $0xc0] sm:$0xff]  ;;  %v74_v34 = vld [vmem:[%s827_s1 + $0x1b8] sm:$0xff]  ;;  %v57_v36 = vld [vmem:[%s827_s1 + $0x130] sm:$0xff] }
   0xd   :  { %196 = vmatpush.msra.mxu1 %v46_v19  ;;  %177 = vmatpush.msra.mxu0 %v29_v21  ;;  %v42_v35 = vld [vmem:[%s827_s1 + $0xb8] sm:$0xff]  ;;  %v25_v37 = vld [vmem:[%s827_s1 + $0x30] sm:$0xff]  ;;  %v56_v40 = vld [vmem:[%s827_s1 + $0x128] sm:$0xff] }
   0xe   :  { %237 = vmatpush.msra.mxu3 %v77_v22  ;;  %218 = vmatpush.msra.mxu2 %v60_v24  ;;  %v73_v38 = vld [vmem:[%s827_s1 + $0x1b0] sm:$0xff]  ;;  %v24_v41 = vld [vmem:[%s827_s1 + $0x28] sm:$0xff]  ;;  %v55_v44 = vld [vmem:[%s827_s1 + $0x120] sm:$0xff] }
   0xf   :  { %197 = vmatpush.msra.mxu1 %v45_v23  ;;  %178 = vmatpush.msra.mxu0 %v28_v25  ;;  %v41_v39 = vld [vmem:[%s827_s1 + $0xb0] sm:$0xff]  ;;  %v72_v42 = vld [vmem:[%s827_s1 + $0x1a8] sm:$0xff]  ;;  %v23_v45 = vld [vmem:[%s827_s1 + $0x20] sm:$0xff] }
  0x10   :  { %238 = vmatpush.msra.mxu3 %v76_v26  ;;  %219 = vmatpush.msra.mxu2 %v59_v28  ;;  %v40_v43 = vld [vmem:[%s827_s1 + $0xa8] sm:$0xff]  ;;  %v71_v46 = vld [vmem:[%s827_s1 + $0x1a0] sm:$0xff]  ;;  %v54_v48 = vld [vmem:[%s827_s1 + $0x118] sm:$0xff] }
  0x11   :  { %198 = vmatpush.msra.mxu1 %v44_v27  ;;  %179 = vmatpush.msra.mxu0 %v27_v29  ;;  %v39_v47 = vld [vmem:[%s827_s1 + $0xa0] sm:$0xff]  ;;  %v22_v49 = vld [vmem:[%s827_s1 + $0x18] sm:$0xff]  ;;  %v53_v52 = vld [vmem:[%s827_s1 + $0x110] sm:$0xff] }
  0x12   :  { %239 = vmatpush.msra.mxu3 %v75_v30  ;;  %220 = vmatpush.msra.mxu2 %v58_v32  ;;  %v70_v50 = vld [vmem:[%s827_s1 + $0x198] sm:$0xff]  ;;  %v21_v53 = vld [vmem:[%s827_s1 + $0x10] sm:$0xff]  ;;  %v52_v56 = vld [vmem:[%s827_s1 + $0x108] sm:$0xff] }
  0x13   :  { %199 = vmatpush.msra.mxu1 %v43_v31  ;;  %180 = vmatpush.msra.mxu0 %v26_v33  ;;  %v38_v51 = vld [vmem:[%s827_s1 + $0x98] sm:$0xff]  ;;  %v69_v54 = vld [vmem:[%s827_s1 + $0x190] sm:$0xff]  ;;  %v20_v57 = vld [vmem:[%s827_s1 + $0x8] sm:$0xff] }
  0x14   :  { %240 = vmatpush.msra.mxu3 %v74_v34  ;;  %221 = vmatpush.msra.mxu2 %v57_v36  ;;  %v37_v55 = vld [vmem:[%s827_s1 + $0x90] sm:$0xff]  ;;  %v68_v58 = vld [vmem:[%s827_s1 + $0x188] sm:$0xff]  ;;  %v51_v60 = vld [vmem:[%s827_s1 + $0x100] sm:$0xff] }
  0x15   :  { %200 = vmatpush.msra.mxu1 %v42_v35  ;;  %181 = vmatpush.msra.mxu0 %v25_v37  ;;  %v36_v59 = vld [vmem:[%s827_s1 + $0x88] sm:$0xff]  ;;  %v19_v61 = vld [vmem:[%s827_s1] sm:$0xff]  ;;  %v130_v62 = vld [vmem:[%s827_s1 + $0x378] sm:$0xff] }
  0x16   :  { %241 = vmatpush.msra.mxu3 %v73_v38  ;;  %222 = vmatpush.msra.mxu2 %v56_v40  ;;  %v67_v63 = vld [vmem:[%s827_s1 + $0x180] sm:$0xff]  ;;  %v98_v0 = vld [vmem:[%s827_s1 + $0x278] sm:$0xff]  ;;  %v129_v2 = vld [vmem:[%s827_s1 + $0x370] sm:$0xff] }
  0x17   :  { %201 = vmatpush.msra.mxu1 %v41_v39  ;;  %182 = vmatpush.msra.mxu0 %v24_v41  ;;  %v146_v1 = vld [vmem:[%s827_s1 + $0x3f8] sm:$0xff]  ;;  %v35_v3 = vld [vmem:[%s827_s1 + $0x80] sm:$0xff]  ;;  %v97_v4 = vld [vmem:[%s827_s1 + $0x270] sm:$0xff] }
  0x18   :  { %242 = vmatpush.msra.mxu3 %v72_v42  ;;  %223 = vmatpush.msra.mxu2 %v55_v44  ;;  %v114_v5 = vld [vmem:[%s827_s1 + $0x2f8] sm:$0xff]  ;;  %v128_v6 = vld [vmem:[%s827_s1 + $0x368] sm:$0xff]  ;;  %v145_v7 = vld [vmem:[%s827_s1 + $0x3f0] sm:$0xff] }
  0x19   :  { %202 = vmatpush.msra.mxu1 %v40_v43  ;;  %183 = vmatpush.msra.mxu0 %v23_v45  ;;  %v96_v8 = vld [vmem:[%s827_s1 + $0x268] sm:$0xff]  ;;  %v113_v9 = vld [vmem:[%s827_s1 + $0x2f0] sm:$0xff]  ;;  %v127_v10 = vld [vmem:[%s827_s1 + $0x360] sm:$0xff] }
  0x1a   :  { %243 = vmatpush.msra.mxu3 %v71_v46  ;;  %224 = vmatpush.msra.mxu2 %v54_v48  ;;  %v144_v11 = vld [vmem:[%s827_s1 + $0x3e8] sm:$0xff]  ;;  %v95_v12 = vld [vmem:[%s827_s1 + $0x260] sm:$0xff]  ;;  %v126_v16 = vld [vmem:[%s827_s1 + $0x358] sm:$0xff] }
  0x1b   :  { %203 = vmatpush.msra.mxu1 %v39_v47  ;;  %184 = vmatpush.msra.mxu0 %v22_v49  ;;  %v112_v13 = vld [vmem:[%s827_s1 + $0x2e8] sm:$0xff]  ;;  %v15_v14 = vld [vmem:[%s826_s0] sm:$0xff]  ;;  %v94_v18 = vld [vmem:[%s827_s1 + $0x258] sm:$0xff] }
  0x1c   :  { %244 = vmatpush.msra.mxu3 %v70_v50  ;;  %225 = vmatpush.msra.mxu2 %v53_v52  ;;  %v16_v15 = vld [vmem:[%s826_s0 + $0x8] sm:$0xff]  ;;  %v143_v17 = vld [vmem:[%s827_s1 + $0x3e0] sm:$0xff]  ;;  %153 = vst [vmem:[#allocation1] ss:$9 sm:$0xff] %v15_v14  ;;  %v125_v20 = vld [vmem:[%s827_s1 + $0x350] sm:$0xff] }
  0x1d   :  { %204 = vmatpush.msra.mxu1 %v38_v51  ;;  %185 = vmatpush.msra.mxu0 %v21_v53  ;;  %v111_v19 = vld [vmem:[%s827_s1 + $0x2e0] sm:$0xff]  ;;  %155 = vst [vmem:[#allocation1 + $0x1] ss:$9 sm:$0xff] %v16_v15  ;;  %v142_v21 = vld [vmem:[%s827_s1 + $0x3d8] sm:$0xff]  ;;  %v93_v22 = vld [vmem:[%s827_s1 + $0x250] sm:$0xff] }
  0x1e   :  { %245 = vmatpush.msra.mxu3 %v69_v54  ;;  %226 = vmatpush.msra.mxu2 %v52_v56  ;;  %v110_v23 = vld [vmem:[%s827_s1 + $0x2d8] sm:$0xff]  ;;  %v124_v24 = vld [vmem:[%s827_s1 + $0x348] sm:$0xff]  ;;  %v141_v25 = vld [vmem:[%s827_s1 + $0x3d0] sm:$0xff] }
  0x1f   :  { %205 = vmatpush.msra.mxu1 %v37_v55  ;;  %186 = vmatpush.msra.mxu0 %v20_v57  ;;  %v92_v26 = vld [vmem:[%s827_s1 + $0x248] sm:$0xff]  ;;  %v109_v27 = vld [vmem:[%s827_s1 + $0x2d0] sm:$0xff]  ;;  %v123_v28 = vld [vmem:[%s827_s1 + $0x340] sm:$0xff] }
  0x20   :  { %246 = vmatpush.msra.mxu3 %v68_v58  ;;  %227 = vmatpush.msra.mxu2 %v51_v60  ;;  %v140_v29 = vld [vmem:[%s827_s1 + $0x3c8] sm:$0xff]  ;;  %v91_v30 = vld [vmem:[%s827_s1 + $0x240] sm:$0xff] }
  0x21   :  { %206 = vmatpush.msra.mxu1 %v36_v59  ;;  %187 = vmatpush.msra.mxu0 %v19_v61  ;;  %v108_v31 = vld [vmem:[%s827_s1 + $0x2c8] sm:$0xff] }
  0x22   :  { %292 = vmatpush.msrb.mxu2 %v130_v62  ;;  %247 = vmatpush.msra.mxu3 %v67_v63 }
  0x23   :  { %252 = vmatpush.msrb.mxu0 %v98_v0  ;;  %207 = vmatpush.msra.mxu1 %v35_v3 }
  0x24   :  { %312 = vmatpush.msrb.mxu3 %v146_v1  ;;  %293 = vmatpush.msrb.mxu2 %v129_v2 }
  0x25   :  { %253 = vmatpush.msrb.mxu0 %v97_v4  ;;  %272 = vmatpush.msrb.mxu1 %v114_v5 }
  0x26   :  { %294 = vmatpush.msrb.mxu2 %v128_v6  ;;  %313 = vmatpush.msrb.mxu3 %v145_v7 }
  0x27   :  { %254 = vmatpush.msrb.mxu0 %v96_v8  ;;  %273 = vmatpush.msrb.mxu1 %v113_v9 }
  0x28   :  { %295 = vmatpush.msrb.mxu2 %v127_v10  ;;  %314 = vmatpush.msrb.mxu3 %v144_v11 }
  0x29   :  { %255 = vmatpush.msrb.mxu0 %v95_v12  ;;  %274 = vmatpush.msrb.mxu1 %v112_v13 }
  0x2a   :  { %296 = vmatpush.msrb.mxu2 %v126_v16  ;;  %315 = vmatpush.msrb.mxu3 %v143_v17 }
  0x2b   :  { %256 = vmatpush.msrb.mxu0 %v94_v18  ;;  %275 = vmatpush.msrb.mxu1 %v111_v19 }
  0x2c   :  { %297 = vmatpush.msrb.mxu2 %v125_v20  ;;  %316 = vmatpush.msrb.mxu3 %v142_v21 }
  0x2d   :  { %257 = vmatpush.msrb.mxu0 %v93_v22  ;;  %276 = vmatpush.msrb.mxu1 %v110_v23 }
  0x2e   :  { %298 = vmatpush.msrb.mxu2 %v124_v24  ;;  %317 = vmatpush.msrb.mxu3 %v141_v25 }
  0x2f   :  { %8 = vsyncpa [#allocation3], 0  ;;  %258 = vmatpush.msrb.mxu0 %v92_v26  ;;  %277 = vmatpush.msrb.mxu1 %v109_v27  ;;  %v122_v32 = vld [vmem:[%s827_s1 + $0x338] sm:$0xff]  ;;  %v139_v33 = vld [vmem:[%s827_s1 + $0x3c0] sm:$0xff]  ;;  %vm332_vm0 = vcmask 74752   ;;  %s365_s29 = sshll.u32 %s829_s3, 4  ;;  %s366_s29 = int_to_ptr.hbm [resolvable:$true] %s365_s29 }
  0x30   :  { %299 = vmatpush.msrb.mxu2 %v123_v28  ;;  %318 = vmatpush.msrb.mxu3 %v140_v29  ;;  %v90_v34 = vld [vmem:[%s827_s1 + $0x238] sm:$0xff]  ;;  %v107_v35 = vld [vmem:[%s827_s1 + $0x2c0] sm:$0xff]  ;;  %v121_v36 = vld [vmem:[%s827_s1 + $0x330] sm:$0xff] }
  0x31   :  { %259 = vmatpush.msrb.mxu0 %v91_v30  ;;  %278 = vmatpush.msrb.mxu1 %v108_v31  ;;  %v138_v37 = vld [vmem:[%s827_s1 + $0x3b8] sm:$0xff]  ;;  %v89_v38 = vld [vmem:[%s827_s1 + $0x230] sm:$0xff]  ;;  %v120_v40 = vld [vmem:[%s827_s1 + $0x328] sm:$0xff] }
  0x32   :  { %300 = vmatpush.msrb.mxu2 %v122_v32  ;;  %319 = vmatpush.msrb.mxu3 %v139_v33  ;;  %v106_v39 = vld [vmem:[%s827_s1 + $0x2b8] sm:$0xff]  ;;  %v137_v41 = vld [vmem:[%s827_s1 + $0x3b0] sm:$0xff]  ;;  %v88_v42 = vld [vmem:[%s827_s1 + $0x228] sm:$0xff] }
  0x33   :  { %260 = vmatpush.msrb.mxu0 %v90_v34  ;;  %279 = vmatpush.msrb.mxu1 %v107_v35  ;;  %v105_v43 = vld [vmem:[%s827_s1 + $0x2b0] sm:$0xff]  ;;  %v119_v44 = vld [vmem:[%s827_s1 + $0x320] sm:$0xff]  ;;  %v136_v45 = vld [vmem:[%s827_s1 + $0x3a8] sm:$0xff] }
  0x34   :  { %301 = vmatpush.msrb.mxu2 %v121_v36  ;;  %320 = vmatpush.msrb.mxu3 %v138_v37  ;;  %v158_v46 = vld [vmem:[#allocation1 + $0x12] sm:$0xff]  ;;  %v87_v47 = vld [vmem:[%s827_s1 + $0x220] sm:$0xff]  ;;  %v104_v48 = vld [vmem:[%s827_s1 + $0x2a8] sm:$0xff] }
  0x35   :  { %261 = vmatpush.msrb.mxu0 %v89_v38  ;;  %280 = vmatpush.msrb.mxu1 %v106_v39  ;;  %v118_v49 = vld [vmem:[%s827_s1 + $0x318] sm:$0xff]  ;;  %v135_v50 = vld [vmem:[%s827_s1 + $0x3a0] sm:$0xff]  ;;  %v117_v55 = vld [vmem:[%s827_s1 + $0x310] sm:$0xff] }
  0x36   :  { %302 = vmatpush.msrb.mxu2 %v120_v40  ;;  %321 = vmatpush.msrb.mxu3 %v137_v41  ;;  %v156_v51 = vld [vmem:[#allocation1] sm:$0xff]  ;;  %v86_v53 = vld [vmem:[%s827_s1 + $0x218] sm:$0xff]  ;;  %v157_v57 = vld [vmem:[#allocation1 + $0x9] sm:$0xff] }
  0x37   :  { %262 = vmatpush.msrb.mxu0 %v88_v42  ;;  %281 = vmatpush.msrb.mxu1 %v105_v43  ;;  %v159_v52 = vld [vmem:[#allocation1 + $0x1b] sm:$0xff]  ;;  %v85_v58 = vld [vmem:[%s827_s1 + $0x210] sm:$0xff]  ;;  %v116_v60 = vld [vmem:[%s827_s1 + $0x308] sm:$0xff] }
  0x38   :  { %303 = vmatpush.msrb.mxu2 %v119_v44  ;;  %322 = vmatpush.msrb.mxu3 %v136_v45  ;;  %v103_v54 = vld [vmem:[%s827_s1 + $0x2a0] sm:$0xff]  ;;  %v134_v56 = vld [vmem:[%s827_s1 + $0x398] sm:$0xff]  ;;  %v133_v61 = vld [vmem:[%s827_s1 + $0x390] sm:$0xff] }
  0x39   :  { %228 = vmatmul.f32.vlgmr.msra.gmra.mxu2 %v158_v46  ;;  %263 = vmatpush.msrb.mxu0 %v87_v47  ;;  %v102_v59 = vld [vmem:[%s827_s1 + $0x298] sm:$0xff]  ;;  %v84_v62 = vld [vmem:[%s827_s1 + $0x208] sm:$0xff]  ;;  %v101_v63 = vld [vmem:[%s827_s1 + $0x290] sm:$0xff] }
  0x3a   :  { %282 = vmatpush.msrb.mxu1 %v104_v48  ;;  %304 = vmatpush.msrb.mxu2 %v118_v49  ;;  %v115_v0 = vld [vmem:[%s827_s1 + $0x300] sm:$0xff]  ;;  %v132_v1 = vld [vmem:[%s827_s1 + $0x388] sm:$0xff]  ;;  %v162_v2 = vld [vmem:[#allocation1 + $0x36] sm:$0xff] }
  0x3b   :  { %323 = vmatpush.msrb.mxu3 %v135_v50  ;;  %188 = vmatmul.f32.vlgmr.msra.gmra.mxu0 %v156_v51  ;;  %v83_v3 = vld [vmem:[%s827_s1 + $0x200] sm:$0xff]  ;;  %v100_v4 = vld [vmem:[%s827_s1 + $0x288] sm:$0xff] }
  0x3c   :  { %248 = vmatmul.f32.vlgmr.msra.gmra.mxu3 %v159_v52  ;;  %264 = vmatpush.msrb.mxu0 %v86_v53  ;;  %v131_v5 = vld [vmem:[%s827_s1 + $0x380] sm:$0xff]  ;;  %v161_v9 = vld [vmem:[#allocation1 + $0x2d] sm:$0xff] }
  0x3d   :  { %283 = vmatpush.msrb.mxu1 %v103_v54  ;;  %305 = vmatpush.msrb.mxu2 %v117_v55  ;;  %v160_v6 = vld [vmem:[#allocation1 + $0x24] sm:$0xff]  ;;  %v375_v10 = vld [vmem:[%s828_s2] ss:$0 sm:$0xff] }
  0x3e   :  { %324 = vmatpush.msrb.mxu3 %v134_v56  ;;  %208 = vmatmul.f32.vlgmr.msra.gmra.mxu1 %v157_v57  ;;  %v163_v7 = vld [vmem:[#allocation1 + $0x3f] sm:$0xff] }
  0x3f   :  { %265 = vmatpush.msrb.mxu0 %v85_v58  ;;  %284 = vmatpush.msrb.mxu1 %v102_v59  ;;  %v99_v8 = vld [vmem:[%s827_s1 + $0x280] sm:$0xff]  ;;  %s406_s1 = smov [#allocation2]  }
  0x40   :  { %306 = vmatpush.msrb.mxu2 %v116_v60  ;;  %325 = vmatpush.msrb.mxu3 %v133_v61  ;;  %s363_s2 = sshll.u32 %s406_s1, 4  ;;  %s364_s2 = int_to_ptr.vmem [resolvable:$true] %s363_s2 }
  0x41   :  { %266 = vmatpush.msrb.mxu0 %v84_v62  ;;  %285 = vmatpush.msrb.mxu1 %v101_v63 }
  0x42   :  { %307 = vmatpush.msrb.mxu2 %v115_v0  ;;  %326 = vmatpush.msrb.mxu3 %v132_v1 }
  0x43   :  { %308 = vmatmul.f32.vlgmr.msrb.gmra.mxu2 %v162_v2  ;;  %267 = vmatpush.msrb.mxu0 %v83_v3 }
  0x44   :  { %286 = vmatpush.msrb.mxu1 %v100_v4  ;;  %327 = vmatpush.msrb.mxu3 %v131_v5 }
  0x45   :  { %268 = vmatmul.f32.vlgmr.msrb.gmra.mxu0 %v160_v6  ;;  %328 = vmatmul.f32.vlgmr.msrb.gmra.mxu3 %v163_v7 }
  0x46   :  { %287 = vmatpush.msrb.mxu1 %v99_v8 }
  0x47   :  { %288 = vmatmul.f32.vlgmr.msrb.gmra.mxu1 %v161_v9 }
  0xb8   :  { %v189_v11 = vpop.f32.mrf.mxu0 }
  0xb9   :  { %v190_v12 = vadd.f32 %v375_v10, %v189_v11 }
  0xbb   :  { %v209_v13 = vpop.f32.mrf.mxu1 }
  0xbc   :  { %v210_v14 = vadd.f32 %v209_v13, %v190_v12  ;;  %v229_v15 = vpop.f32.mrf.mxu2 }
  0xbe   :  { %v230_v16 = vadd.f32 %v229_v15, %v210_v14 }
  0xbf   :  { %v249_v17 = vpop.f32.mrf.mxu3 }
  0xc0   :  { %v250_v18 = vadd.f32 %v249_v17, %v230_v16 }
  0xc2   :  { %v269_v19 = vpop.f32.mrf.mxu0 }
  0xc3   :  { %v270_v20 = vadd.f32 %v269_v19, %v250_v18 }
  0xc4   :  { %v289_v21 = vpop.f32.mrf.mxu1 }
  0xc5   :  { %v290_v22 = vadd.f32 %v289_v21, %v270_v20 }
  0xc6   :  { %v309_v23 = vpop.f32.mrf.mxu2 }
  0xc7   :  { %v310_v24 = vadd.f32 %v309_v23, %v290_v22 }
  0xc8   :  { %v329_v25 = vpop.f32.mrf.mxu3 }
  0xc9   :  { %v330_v26 = vadd.f32 %v329_v25, %v310_v24 }
  0xcb   :  { %v333_v27 = vsel %vm332_vm0, %v330_v26, -inf }
  0xcc   :  { %334 = vmax.xlane.f32.xlu0 %v333_v27 }
 0x13f   :  { %v335_v28 = vpop.xlane.xlu0 %334 }
 0x140   :  { %v336_v29 = vsub.f32 %v330_v26, %v335_v28 }
 0x142   :  { %v337_v30 = vmul.f32 1.442695, %v336_v29 }
 0x144   :  { %376 = vpow2.f32 %v337_v30 }
 0x14a   :  { %v377_v31 = vpop.eup %376 }
 0x14b   :  { %v339_v32 = vsel %vm332_vm0, %v377_v31, 0.0 }
 0x14c   :  { %340 = vadd.xlane.f32.xlu0 %v339_v32 }
 0x1bf   :  { %v341_v33 = vpop.xlane.xlu0 %340 }
 0x1c0   :  { %378 = vrcp.f32 %v341_v33  ;;  %v353_v37 = vand.u32 2147483648, %v341_v33  ;;  %v351_v39 = vand.u32 2147483647, %v341_v33  ;;  %vm347_vm2 = vweird.f32 %v341_v33 }
 0x1c2   :  { %v354_v41 = vor.u32 1.1754944e-38, %v353_v37  ;;  %vm352_vm4 = vcmp.eq.f32.partialorder %v351_v39, 8.507059e+37 }
 0x1c6   :  { %v379_v34 = vpop.eup %378 }
 0x1c7   :  { %v343_v35 = vmul.f32 %v379_v34, %v341_v33  ;;  %vm348_vm1 = vweird.f32 %v379_v34 }
 0x1c8   :  { %vm349_vm3 = vmor %vm347_vm2, %vm348_vm1 }
 0x1c9   :  { %v344_v36 = vsub.f32 1.0, %v343_v35 }
 0x1cb   :  { %v345_v38 = vmul.f32 %v379_v34, %v344_v36 }
 0x1cd   :  { %v346_v40 = vadd.f32 %v379_v34, %v345_v38 }
 0x1cf   :  { %v350_v42 = vsel %vm349_vm3, %v379_v34, %v346_v40 }
 0x1d0   :  { %v355_v43 = vsel %vm352_vm4, %v354_v41, %v350_v42 }
 0x1d1   :  { %v356_v44 = vmul.f32 %v377_v31, %v355_v43 }
 0x1d3   :  { %357 = vst.msk [vmem:[#allocation2] sm:$0x3] %vm332_vm0, %v356_v44 }
 0x1d4   :  { %368 = dma.vmem_to_hbm [thread:$0]  %s364_s2, 32, %s366_s29, [#allocation3]  }
 0x1d5   :  { %404 = dma.done.wait [#allocation3], 32  }
 0x1d6   :  { %405 = vsyncadd [#allocation3], 4294967264 }
 0x1d7   :  { %373 = vsyncpa [#allocation3], 1 }

</bundles_post_ra>
